<compile_context>
chip_gen: v6e
topology: v6e:2x2x1
jax: 0.10.0
libtpu: 0.0.40
codegen_flags: <defaults>
</compile_context>

<pallas_src>
import functools

import jax
import jax.numpy as jnp
from jax.experimental import pallas as pl
from jax.experimental.pallas import tpu as pltpu


def _dirconv_kernel(w_ref, b_ref, x_ref, o_ref, *, cin, cout, kw_size, out_w):
    """One grid step: all channels for one tile of TR rows.

    w_ref : SMEM (Cout*Cin*KW,)            flattened [co, ci, kw] weights
    b_ref : SMEM (Cout,)
    x_ref : VMEM (Cin, out_w + KW - 1, TR) width-padded, rows on lanes
    o_ref : VMEM (Cout, out_w, TR)
    """
    tr = o_ref.shape[-1]

    # Prologue: bias scalars (scalar-slot work overlaps the first vector loads).
    bvals = [b_ref[co] for co in range(cout)]

    # co outermost -> exactly one live (out_w, TR) f32 accumulator at a time.
    for co in range(cout):
        # Burst-read this channel's Cin*KW weights before its tap loop so the
        # scalar loads overlap vector work (keeps sreg pressure at ~36 values).
        wvals = [w_ref[(co * cin + ci) * kw_size + kw]
                 for ci in range(cin) for kw in range(kw_size)]

        acc = jnp.full((out_w, tr), bvals[co], dtype=jnp.float32)
        for ci in range(cin):
            for kw in range(kw_size):
                # Sublane-offset window load straight from the input ref
                # (lane-dense: all 128 lanes carry independent rows).
                win = x_ref[ci, kw:kw + out_w, :]
                acc = acc + wvals[ci * kw_size + kw] * win
        o_ref[co] = acc.astype(o_ref.dtype)


def directional_conv(x_nchw, weight, bias, *, row_tile=512,
                     vmem_budget_bytes=24 * 1024 * 1024):
    """Forward pass of DirectionalConv.

    x_nchw : (N, Cin, H, W)       float32
    weight : (Cout, Cin, 1, KW)   float32   (PyTorch Conv2d layout)
    bias   : (Cout,)              float32
    returns: (N, Cout, H, W)      float32
    """
    n, cin, h, w = x_nchw.shape
    cout, cin_w, kh, kw = weight.shape
    assert kh == 1 and cin_w == cin
    pad = (kw - 1) // 2

    # Output width rounded up to the sublane granule (8); input width adds the
    # +-pad halo on top of that.
    w8 = -(-w // 8) * 8
    wp = w8 + 2 * pad

    # Fold batch and height into one "rows" axis -> the lane dim of the kernel.
    r = n * h

    # Row tile: multiple of 128 lanes, clamped so double-buffered in+out blocks
    # stay within a VMEM budget that is also safe on v7x (64 MiB VMEM).
    assert row_tile % 128 == 0
    bytes_per_row = 2 * 4 * (cin * wp + cout * w8)        # double-buffered f32
    tr_cap = max(128, (vmem_budget_bytes // bytes_per_row) // 128 * 128)
    tr = min(row_tile, tr_cap)
    if r <= tr:
        tr = max(128, -(-r // 128) * 128)
    r_pad = -(-r // tr) * tr
    grid = (r_pad // tr,)

    # Layout plumbing (fuses into one XLA copy): NCHW -> (Cin, W, N*H), then
    # pad W (halo + sublane round-up) and pad rows up to the tile multiple.
    x_t = jnp.transpose(x_nchw, (1, 3, 0, 2)).reshape(cin, w, r)
    x_t = jnp.pad(x_t, ((0, 0), (pad, pad + (w8 - w)), (0, r_pad - r)))

    # Flatten weights/bias for SMEM scalar reads inside the kernel.
    w_flat = weight[:, :, 0, :].reshape(cout * cin * kw).astype(jnp.float32)
    b_flat = bias.reshape(cout).astype(jnp.float32)

    kernel = functools.partial(_dirconv_kernel, cin=cin, cout=cout,
                               kw_size=kw, out_w=w8)

    out_t = pl.pallas_call(
        kernel,
        out_shape=jax.ShapeDtypeStruct((cout, w8, r_pad), x_nchw.dtype),
        grid=grid,
        in_specs=[
            pl.BlockSpec(memory_space=pltpu.MemorySpace.SMEM),   # weights
            pl.BlockSpec(memory_space=pltpu.MemorySpace.SMEM),   # bias
            pl.BlockSpec((cin, wp, tr), lambda i: (0, 0, i)),    # input tile
        ],
        out_specs=pl.BlockSpec((cout, w8, tr), lambda i: (0, 0, i)),
        compiler_params=pltpu.CompilerParams(
            dimension_semantics=("parallel",),
            vmem_limit_bytes=32 * 1024 * 1024,
        ),
    )(w_flat, b_flat, x_t)

    # Undo the layout plumbing: (Cout, W, N*H) -> (N, Cout, H, W).
    out = out_t[:, :w, :r].reshape(cout, w, n, h)
    return jnp.transpose(out, (2, 0, 3, 1))


def init_params(key, in_channels, out_channels, kernel_size=(1, 9)):
    """Deterministic xavier_uniform weight + zero bias (matches nn.init)."""
    kh, kw = kernel_size
    fan_in = in_channels * kh * kw
    fan_out = out_channels * kh * kw
    bound = (6.0 / (fan_in + fan_out)) ** 0.5
    weight = jax.random.uniform(
        key, (out_channels, in_channels, kh, kw),
        minval=-bound, maxval=bound, dtype=jnp.float32)
    bias = jnp.zeros((out_channels,), dtype=jnp.float32)
    return weight, bias


if __name__ == "__main__":
    key = jax.random.PRNGKey(0)
    k_x, k_w = jax.random.split(key)

    # Small shapes consistent with the module's forward (NCHW input).
    N, CIN, H, W = 2, 4, 16, 16
    COUT = 8

    x = jax.random.normal(k_x, (N, CIN, H, W), dtype=jnp.float32)
    weight, bias = init_params(k_w, CIN, COUT, kernel_size=(1, 9))

    out = directional_conv(x, weight, bias)
    out = jax.block_until_ready(out)

    # Reference check against XLA's conv (NCHW, same padding semantics).
    ref = jax.lax.conv_general_dilated(
        x, weight, window_strides=(1, 1), padding=((0, 0), (4, 4)),
        dimension_numbers=("NCHW", "OIHW", "NCHW"))
    ref = ref + bias.reshape(1, COUT, 1, 1)

    assert out.shape == (N, COUT, H, W)
    assert jnp.allclose(out, ref, atol=1e-5, rtol=1e-5)
    print("KERNEL_OK")
</pallas_src>

<mosaic_0001>
module attributes {stable_mosaic.version = 11 : i64} {
  func.func @_dirconv_kernel(%arg0: i32, %arg1: memref<288xf32, #tpu.memory_space<smem>>, %arg2: memref<8xf32, #tpu.memory_space<smem>>, %arg3: memref<4x24x128xf32, #tpu.memory_space<vmem>>, %arg4: memref<8x16x128xf32, #tpu.memory_space<vmem>>) attributes {dimension_semantics = [#tpu.dimension_semantics<parallel>], iteration_bounds = array<i64: 1>, scalar_prefetch = 0 : i64, scratch_operands = 0 : i64, tpu.core_type = #tpu.core_type<tc>, window_params = [{transform_indices = @transform_0, window_bounds = array<i64: 288>}, {transform_indices = @transform_1, window_bounds = array<i64: 8>}, {transform_indices = @transform_2, window_bounds = array<i64: 4, 24, 128>}, {transform_indices = @transform_3, window_bounds = array<i64: 8, 16, 128>}]} {
    %c0 = arith.constant 0 : index
    %0 = memref.load %arg2[%c0] : memref<8xf32, #tpu.memory_space<smem>>
    %c1 = arith.constant 1 : index
    %1 = memref.load %arg2[%c1] : memref<8xf32, #tpu.memory_space<smem>>
    %c2 = arith.constant 2 : index
    %2 = memref.load %arg2[%c2] : memref<8xf32, #tpu.memory_space<smem>>
    %c3 = arith.constant 3 : index
    %3 = memref.load %arg2[%c3] : memref<8xf32, #tpu.memory_space<smem>>
    %c4 = arith.constant 4 : index
    %4 = memref.load %arg2[%c4] : memref<8xf32, #tpu.memory_space<smem>>
    %c5 = arith.constant 5 : index
    %5 = memref.load %arg2[%c5] : memref<8xf32, #tpu.memory_space<smem>>
    %c6 = arith.constant 6 : index
    %6 = memref.load %arg2[%c6] : memref<8xf32, #tpu.memory_space<smem>>
    %c7 = arith.constant 7 : index
    %7 = memref.load %arg2[%c7] : memref<8xf32, #tpu.memory_space<smem>>
    %c0_0 = arith.constant 0 : index
    %8 = memref.load %arg1[%c0_0] : memref<288xf32, #tpu.memory_space<smem>>
    %c1_1 = arith.constant 1 : index
    %9 = memref.load %arg1[%c1_1] : memref<288xf32, #tpu.memory_space<smem>>
    %c2_2 = arith.constant 2 : index
    %10 = memref.load %arg1[%c2_2] : memref<288xf32, #tpu.memory_space<smem>>
    %c3_3 = arith.constant 3 : index
    %11 = memref.load %arg1[%c3_3] : memref<288xf32, #tpu.memory_space<smem>>
    %c4_4 = arith.constant 4 : index
    %12 = memref.load %arg1[%c4_4] : memref<288xf32, #tpu.memory_space<smem>>
    %c5_5 = arith.constant 5 : index
    %13 = memref.load %arg1[%c5_5] : memref<288xf32, #tpu.memory_space<smem>>
    %c6_6 = arith.constant 6 : index
    %14 = memref.load %arg1[%c6_6] : memref<288xf32, #tpu.memory_space<smem>>
    %c7_7 = arith.constant 7 : index
    %15 = memref.load %arg1[%c7_7] : memref<288xf32, #tpu.memory_space<smem>>
    %c8 = arith.constant 8 : index
    %16 = memref.load %arg1[%c8] : memref<288xf32, #tpu.memory_space<smem>>
    %c9 = arith.constant 9 : index
    %17 = memref.load %arg1[%c9] : memref<288xf32, #tpu.memory_space<smem>>
    %c10 = arith.constant 10 : index
    %18 = memref.load %arg1[%c10] : memref<288xf32, #tpu.memory_space<smem>>
    %c11 = arith.constant 11 : index
    %19 = memref.load %arg1[%c11] : memref<288xf32, #tpu.memory_space<smem>>
    %c12 = arith.constant 12 : index
    %20 = memref.load %arg1[%c12] : memref<288xf32, #tpu.memory_space<smem>>
    %c13 = arith.constant 13 : index
    %21 = memref.load %arg1[%c13] : memref<288xf32, #tpu.memory_space<smem>>
    %c14 = arith.constant 14 : index
    %22 = memref.load %arg1[%c14] : memref<288xf32, #tpu.memory_space<smem>>
    %c15 = arith.constant 15 : index
    %23 = memref.load %arg1[%c15] : memref<288xf32, #tpu.memory_space<smem>>
    %c16 = arith.constant 16 : index
    %24 = memref.load %arg1[%c16] : memref<288xf32, #tpu.memory_space<smem>>
    %c17 = arith.constant 17 : index
    %25 = memref.load %arg1[%c17] : memref<288xf32, #tpu.memory_space<smem>>
    %c18 = arith.constant 18 : index
    %26 = memref.load %arg1[%c18] : memref<288xf32, #tpu.memory_space<smem>>
    %c19 = arith.constant 19 : index
    %27 = memref.load %arg1[%c19] : memref<288xf32, #tpu.memory_space<smem>>
    %c20 = arith.constant 20 : index
    %28 = memref.load %arg1[%c20] : memref<288xf32, #tpu.memory_space<smem>>
    %c21 = arith.constant 21 : index
    %29 = memref.load %arg1[%c21] : memref<288xf32, #tpu.memory_space<smem>>
    %c22 = arith.constant 22 : index
    %30 = memref.load %arg1[%c22] : memref<288xf32, #tpu.memory_space<smem>>
    %c23 = arith.constant 23 : index
    %31 = memref.load %arg1[%c23] : memref<288xf32, #tpu.memory_space<smem>>
    %c24 = arith.constant 24 : index
    %32 = memref.load %arg1[%c24] : memref<288xf32, #tpu.memory_space<smem>>
    %c25 = arith.constant 25 : index
    %33 = memref.load %arg1[%c25] : memref<288xf32, #tpu.memory_space<smem>>
    %c26 = arith.constant 26 : index
    %34 = memref.load %arg1[%c26] : memref<288xf32, #tpu.memory_space<smem>>
    %c27 = arith.constant 27 : index
    %35 = memref.load %arg1[%c27] : memref<288xf32, #tpu.memory_space<smem>>
    %c28 = arith.constant 28 : index
    %36 = memref.load %arg1[%c28] : memref<288xf32, #tpu.memory_space<smem>>
    %c29 = arith.constant 29 : index
    %37 = memref.load %arg1[%c29] : memref<288xf32, #tpu.memory_space<smem>>
    %c30 = arith.constant 30 : index
    %38 = memref.load %arg1[%c30] : memref<288xf32, #tpu.memory_space<smem>>
    %c31 = arith.constant 31 : index
    %39 = memref.load %arg1[%c31] : memref<288xf32, #tpu.memory_space<smem>>
    %c32 = arith.constant 32 : index
    %40 = memref.load %arg1[%c32] : memref<288xf32, #tpu.memory_space<smem>>
    %c33 = arith.constant 33 : index
    %41 = memref.load %arg1[%c33] : memref<288xf32, #tpu.memory_space<smem>>
    %c34 = arith.constant 34 : index
    %42 = memref.load %arg1[%c34] : memref<288xf32, #tpu.memory_space<smem>>
    %c35 = arith.constant 35 : index
    %43 = memref.load %arg1[%c35] : memref<288xf32, #tpu.memory_space<smem>>
    %44 = vector.broadcast %0 : f32 to vector<16x128xf32>
    %c0_8 = arith.constant 0 : index
    %c0_9 = arith.constant 0 : index
    %c0_10 = arith.constant 0 : index
    %45 = vector.load %arg3[%c0_8, %c0_9, %c0_10] : memref<4x24x128xf32, #tpu.memory_space<vmem>>, vector<1x16x128xf32>
    %46 = vector.shape_cast %45 : vector<1x16x128xf32> to vector<16x128xf32>
    %47 = vector.broadcast %8 : f32 to vector<16x128xf32>
    %48 = arith.mulf %47, %46 : vector<16x128xf32>
    %49 = arith.addf %44, %48 : vector<16x128xf32>
    %c0_11 = arith.constant 0 : index
    %c1_12 = arith.constant 1 : index
    %c0_13 = arith.constant 0 : index
    %50 = vector.load %arg3[%c0_11, %c1_12, %c0_13] : memref<4x24x128xf32, #tpu.memory_space<vmem>>, vector<1x16x128xf32>
    %51 = vector.shape_cast %50 : vector<1x16x128xf32> to vector<16x128xf32>
    %52 = vector.broadcast %9 : f32 to vector<16x128xf32>
    %53 = arith.mulf %52, %51 : vector<16x128xf32>
    %54 = arith.addf %49, %53 : vector<16x128xf32>
    %c0_14 = arith.constant 0 : index
    %c2_15 = arith.constant 2 : index
    %c0_16 = arith.constant 0 : index
    %55 = vector.load %arg3[%c0_14, %c2_15, %c0_16] : memref<4x24x128xf32, #tpu.memory_space<vmem>>, vector<1x16x128xf32>
    %56 = vector.shape_cast %55 : vector<1x16x128xf32> to vector<16x128xf32>
    %57 = vector.broadcast %10 : f32 to vector<16x128xf32>
    %58 = arith.mulf %57, %56 : vector<16x128xf32>
    %59 = arith.addf %54, %58 : vector<16x128xf32>
    %c0_17 = arith.constant 0 : index
    %c3_18 = arith.constant 3 : index
    %c0_19 = arith.constant 0 : index
    %60 = vector.load %arg3[%c0_17, %c3_18, %c0_19] : memref<4x24x128xf32, #tpu.memory_space<vmem>>, vector<1x16x128xf32>
    %61 = vector.shape_cast %60 : vector<1x16x128xf32> to vector<16x128xf32>
    %62 = vector.broadcast %11 : f32 to vector<16x128xf32>
    %63 = arith.mulf %62, %61 : vector<16x128xf32>
    %64 = arith.addf %59, %63 : vector<16x128xf32>
    %c0_20 = arith.constant 0 : index
    %c4_21 = arith.constant 4 : index
    %c0_22 = arith.constant 0 : index
    %65 = vector.load %arg3[%c0_20, %c4_21, %c0_22] : memref<4x24x128xf32, #tpu.memory_space<vmem>>, vector<1x16x128xf32>
    %66 = vector.shape_cast %65 : vector<1x16x128xf32> to vector<16x128xf32>
    %67 = vector.broadcast %12 : f32 to vector<16x128xf32>
    %68 = arith.mulf %67, %66 : vector<16x128xf32>
    %69 = arith.addf %64, %68 : vector<16x128xf32>
    %c0_23 = arith.constant 0 : index
    %c5_24 = arith.constant 5 : index
    %c0_25 = arith.constant 0 : index
    %70 = vector.load %arg3[%c0_23, %c5_24, %c0_25] : memref<4x24x128xf32, #tpu.memory_space<vmem>>, vector<1x16x128xf32>
    %71 = vector.shape_cast %70 : vector<1x16x128xf32> to vector<16x128xf32>
    %72 = vector.broadcast %13 : f32 to vector<16x128xf32>
    %73 = arith.mulf %72, %71 : vector<16x128xf32>
    %74 = arith.addf %69, %73 : vector<16x128xf32>
    %c0_26 = arith.constant 0 : index
    %c6_27 = arith.constant 6 : index
    %c0_28 = arith.constant 0 : index
    %75 = vector.load %arg3[%c0_26, %c6_27, %c0_28] : memref<4x24x128xf32, #tpu.memory_space<vmem>>, vector<1x16x128xf32>
    %76 = vector.shape_cast %75 : vector<1x16x128xf32> to vector<16x128xf32>
    %77 = vector.broadcast %14 : f32 to vector<16x128xf32>
    %78 = arith.mulf %77, %76 : vector<16x128xf32>
    %79 = arith.addf %74, %78 : vector<16x128xf32>
    %c0_29 = arith.constant 0 : index
    %c7_30 = arith.constant 7 : index
    %c0_31 = arith.constant 0 : index
    %80 = vector.load %arg3[%c0_29, %c7_30, %c0_31] : memref<4x24x128xf32, #tpu.memory_space<vmem>>, vector<1x16x128xf32>
    %81 = vector.shape_cast %80 : vector<1x16x128xf32> to vector<16x128xf32>
    %82 = vector.broadcast %15 : f32 to vector<16x128xf32>
    %83 = arith.mulf %82, %81 : vector<16x128xf32>
    %84 = arith.addf %79, %83 : vector<16x128xf32>
    %c0_32 = arith.constant 0 : index
    %c8_33 = arith.constant 8 : index
    %c0_34 = arith.constant 0 : index
    %85 = vector.load %arg3[%c0_32, %c8_33, %c0_34] : memref<4x24x128xf32, #tpu.memory_space<vmem>>, vector<1x16x128xf32>
    %86 = vector.shape_cast %85 : vector<1x16x128xf32> to vector<16x128xf32>
    %87 = vector.broadcast %16 : f32 to vector<16x128xf32>
    %88 = arith.mulf %87, %86 : vector<16x128xf32>
    %89 = arith.addf %84, %88 : vector<16x128xf32>
    %c1_35 = arith.constant 1 : index
    %c0_36 = arith.constant 0 : index
    %c0_37 = arith.constant 0 : index
    %90 = vector.load %arg3[%c1_35, %c0_36, %c0_37] : memref<4x24x128xf32, #tpu.memory_space<vmem>>, vector<1x16x128xf32>
    %91 = vector.shape_cast %90 : vector<1x16x128xf32> to vector<16x128xf32>
    %92 = vector.broadcast %17 : f32 to vector<16x128xf32>
    %93 = arith.mulf %92, %91 : vector<16x128xf32>
    %94 = arith.addf %89, %93 : vector<16x128xf32>
    %c1_38 = arith.constant 1 : index
    %c1_39 = arith.constant 1 : index
    %c0_40 = arith.constant 0 : index
    %95 = vector.load %arg3[%c1_38, %c1_39, %c0_40] : memref<4x24x128xf32, #tpu.memory_space<vmem>>, vector<1x16x128xf32>
    %96 = vector.shape_cast %95 : vector<1x16x128xf32> to vector<16x128xf32>
    %97 = vector.broadcast %18 : f32 to vector<16x128xf32>
    %98 = arith.mulf %97, %96 : vector<16x128xf32>
    %99 = arith.addf %94, %98 : vector<16x128xf32>
    %c1_41 = arith.constant 1 : index
    %c2_42 = arith.constant 2 : index
    %c0_43 = arith.constant 0 : index
    %100 = vector.load %arg3[%c1_41, %c2_42, %c0_43] : memref<4x24x128xf32, #tpu.memory_space<vmem>>, vector<1x16x128xf32>
    %101 = vector.shape_cast %100 : vector<1x16x128xf32> to vector<16x128xf32>
    %102 = vector.broadcast %19 : f32 to vector<16x128xf32>
    %103 = arith.mulf %102, %101 : vector<16x128xf32>
    %104 = arith.addf %99, %103 : vector<16x128xf32>
    %c1_44 = arith.constant 1 : index
    %c3_45 = arith.constant 3 : index
    %c0_46 = arith.constant 0 : index
    %105 = vector.load %arg3[%c1_44, %c3_45, %c0_46] : memref<4x24x128xf32, #tpu.memory_space<vmem>>, vector<1x16x128xf32>
    %106 = vector.shape_cast %105 : vector<1x16x128xf32> to vector<16x128xf32>
    %107 = vector.broadcast %20 : f32 to vector<16x128xf32>
    %108 = arith.mulf %107, %106 : vector<16x128xf32>
    %109 = arith.addf %104, %108 : vector<16x128xf32>
    %c1_47 = arith.constant 1 : index
    %c4_48 = arith.constant 4 : index
    %c0_49 = arith.constant 0 : index
    %110 = vector.load %arg3[%c1_47, %c4_48, %c0_49] : memref<4x24x128xf32, #tpu.memory_space<vmem>>, vector<1x16x128xf32>
    %111 = vector.shape_cast %110 : vector<1x16x128xf32> to vector<16x128xf32>
    %112 = vector.broadcast %21 : f32 to vector<16x128xf32>
    %113 = arith.mulf %112, %111 : vector<16x128xf32>
    %114 = arith.addf %109, %113 : vector<16x128xf32>
    %c1_50 = arith.constant 1 : index
    %c5_51 = arith.constant 5 : index
    %c0_52 = arith.constant 0 : index
    %115 = vector.load %arg3[%c1_50, %c5_51, %c0_52] : memref<4x24x128xf32, #tpu.memory_space<vmem>>, vector<1x16x128xf32>
    %116 = vector.shape_cast %115 : vector<1x16x128xf32> to vector<16x128xf32>
    %117 = vector.broadcast %22 : f32 to vector<16x128xf32>
    %118 = arith.mulf %117, %116 : vector<16x128xf32>
    %119 = arith.addf %114, %118 : vector<16x128xf32>
    %c1_53 = arith.constant 1 : index
    %c6_54 = arith.constant 6 : index
    %c0_55 = arith.constant 0 : index
    %120 = vector.load %arg3[%c1_53, %c6_54, %c0_55] : memref<4x24x128xf32, #tpu.memory_space<vmem>>, vector<1x16x128xf32>
    %121 = vector.shape_cast %120 : vector<1x16x128xf32> to vector<16x128xf32>
    %122 = vector.broadcast %23 : f32 to vector<16x128xf32>
    %123 = arith.mulf %122, %121 : vector<16x128xf32>
    %124 = arith.addf %119, %123 : vector<16x128xf32>
    %c1_56 = arith.constant 1 : index
    %c7_57 = arith.constant 7 : index
    %c0_58 = arith.constant 0 : index
    %125 = vector.load %arg3[%c1_56, %c7_57, %c0_58] : memref<4x24x128xf32, #tpu.memory_space<vmem>>, vector<1x16x128xf32>
    %126 = vector.shape_cast %125 : vector<1x16x128xf32> to vector<16x128xf32>
    %127 = vector.broadcast %24 : f32 to vector<16x128xf32>
    %128 = arith.mulf %127, %126 : vector<16x128xf32>
    %129 = arith.addf %124, %128 : vector<16x128xf32>
    %c1_59 = arith.constant 1 : index
    %c8_60 = arith.constant 8 : index
    %c0_61 = arith.constant 0 : index
    %130 = vector.load %arg3[%c1_59, %c8_60, %c0_61] : memref<4x24x128xf32, #tpu.memory_space<vmem>>, vector<1x16x128xf32>
    %131 = vector.shape_cast %130 : vector<1x16x128xf32> to vector<16x128xf32>
    %132 = vector.broadcast %25 : f32 to vector<16x128xf32>
    %133 = arith.mulf %132, %131 : vector<16x128xf32>
    %134 = arith.addf %129, %133 : vector<16x128xf32>
    %c2_62 = arith.constant 2 : index
    %c0_63 = arith.constant 0 : index
    %c0_64 = arith.constant 0 : index
    %135 = vector.load %arg3[%c2_62, %c0_63, %c0_64] : memref<4x24x128xf32, #tpu.memory_space<vmem>>, vector<1x16x128xf32>
    %136 = vector.shape_cast %135 : vector<1x16x128xf32> to vector<16x128xf32>
    %137 = vector.broadcast %26 : f32 to vector<16x128xf32>
    %138 = arith.mulf %137, %136 : vector<16x128xf32>
    %139 = arith.addf %134, %138 : vector<16x128xf32>
    %c2_65 = arith.constant 2 : index
    %c1_66 = arith.constant 1 : index
    %c0_67 = arith.constant 0 : index
    %140 = vector.load %arg3[%c2_65, %c1_66, %c0_67] : memref<4x24x128xf32, #tpu.memory_space<vmem>>, vector<1x16x128xf32>
    %141 = vector.shape_cast %140 : vector<1x16x128xf32> to vector<16x128xf32>
    %142 = vector.broadcast %27 : f32 to vector<16x128xf32>
    %143 = arith.mulf %142, %141 : vector<16x128xf32>
    %144 = arith.addf %139, %143 : vector<16x128xf32>
    %c2_68 = arith.constant 2 : index
    %c2_69 = arith.constant 2 : index
    %c0_70 = arith.constant 0 : index
    %145 = vector.load %arg3[%c2_68, %c2_69, %c0_70] : memref<4x24x128xf32, #tpu.memory_space<vmem>>, vector<1x16x128xf32>
    %146 = vector.shape_cast %145 : vector<1x16x128xf32> to vector<16x128xf32>
    %147 = vector.broadcast %28 : f32 to vector<16x128xf32>
    %148 = arith.mulf %147, %146 : vector<16x128xf32>
    %149 = arith.addf %144, %148 : vector<16x128xf32>
    %c2_71 = arith.constant 2 : index
    %c3_72 = arith.constant 3 : index
    %c0_73 = arith.constant 0 : index
    %150 = vector.load %arg3[%c2_71, %c3_72, %c0_73] : memref<4x24x128xf32, #tpu.memory_space<vmem>>, vector<1x16x128xf32>
    %151 = vector.shape_cast %150 : vector<1x16x128xf32> to vector<16x128xf32>
    %152 = vector.broadcast %29 : f32 to vector<16x128xf32>
    %153 = arith.mulf %152, %151 : vector<16x128xf32>
    %154 = arith.addf %149, %153 : vector<16x128xf32>
    %c2_74 = arith.constant 2 : index
    %c4_75 = arith.constant 4 : index
    %c0_76 = arith.constant 0 : index
    %155 = vector.load %arg3[%c2_74, %c4_75, %c0_76] : memref<4x24x128xf32, #tpu.memory_space<vmem>>, vector<1x16x128xf32>
    %156 = vector.shape_cast %155 : vector<1x16x128xf32> to vector<16x128xf32>
    %157 = vector.broadcast %30 : f32 to vector<16x128xf32>
    %158 = arith.mulf %157, %156 : vector<16x128xf32>
    %159 = arith.addf %154, %158 : vector<16x128xf32>
    %c2_77 = arith.constant 2 : index
    %c5_78 = arith.constant 5 : index
    %c0_79 = arith.constant 0 : index
    %160 = vector.load %arg3[%c2_77, %c5_78, %c0_79] : memref<4x24x128xf32, #tpu.memory_space<vmem>>, vector<1x16x128xf32>
    %161 = vector.shape_cast %160 : vector<1x16x128xf32> to vector<16x128xf32>
    %162 = vector.broadcast %31 : f32 to vector<16x128xf32>
    %163 = arith.mulf %162, %161 : vector<16x128xf32>
    %164 = arith.addf %159, %163 : vector<16x128xf32>
    %c2_80 = arith.constant 2 : index
    %c6_81 = arith.constant 6 : index
    %c0_82 = arith.constant 0 : index
    %165 = vector.load %arg3[%c2_80, %c6_81, %c0_82] : memref<4x24x128xf32, #tpu.memory_space<vmem>>, vector<1x16x128xf32>
    %166 = vector.shape_cast %165 : vector<1x16x128xf32> to vector<16x128xf32>
    %167 = vector.broadcast %32 : f32 to vector<16x128xf32>
    %168 = arith.mulf %167, %166 : vector<16x128xf32>
    %169 = arith.addf %164, %168 : vector<16x128xf32>
    %c2_83 = arith.constant 2 : index
    %c7_84 = arith.constant 7 : index
    %c0_85 = arith.constant 0 : index
    %170 = vector.load %arg3[%c2_83, %c7_84, %c0_85] : memref<4x24x128xf32, #tpu.memory_space<vmem>>, vector<1x16x128xf32>
    %171 = vector.shape_cast %170 : vector<1x16x128xf32> to vector<16x128xf32>
    %172 = vector.broadcast %33 : f32 to vector<16x128xf32>
    %173 = arith.mulf %172, %171 : vector<16x128xf32>
    %174 = arith.addf %169, %173 : vector<16x128xf32>
    %c2_86 = arith.constant 2 : index
    %c8_87 = arith.constant 8 : index
    %c0_88 = arith.constant 0 : index
    %175 = vector.load %arg3[%c2_86, %c8_87, %c0_88] : memref<4x24x128xf32, #tpu.memory_space<vmem>>, vector<1x16x128xf32>
    %176 = vector.shape_cast %175 : vector<1x16x128xf32> to vector<16x128xf32>
    %177 = vector.broadcast %34 : f32 to vector<16x128xf32>
    %178 = arith.mulf %177, %176 : vector<16x128xf32>
    %179 = arith.addf %174, %178 : vector<16x128xf32>
    %c3_89 = arith.constant 3 : index
    %c0_90 = arith.constant 0 : index
    %c0_91 = arith.constant 0 : index
    %180 = vector.load %arg3[%c3_89, %c0_90, %c0_91] : memref<4x24x128xf32, #tpu.memory_space<vmem>>, vector<1x16x128xf32>
    %181 = vector.shape_cast %180 : vector<1x16x128xf32> to vector<16x128xf32>
    %182 = vector.broadcast %35 : f32 to vector<16x128xf32>
    %183 = arith.mulf %182, %181 : vector<16x128xf32>
    %184 = arith.addf %179, %183 : vector<16x128xf32>
    %c3_92 = arith.constant 3 : index
    %c1_93 = arith.constant 1 : index
    %c0_94 = arith.constant 0 : index
    %185 = vector.load %arg3[%c3_92, %c1_93, %c0_94] : memref<4x24x128xf32, #tpu.memory_space<vmem>>, vector<1x16x128xf32>
    %186 = vector.shape_cast %185 : vector<1x16x128xf32> to vector<16x128xf32>
    %187 = vector.broadcast %36 : f32 to vector<16x128xf32>
    %188 = arith.mulf %187, %186 : vector<16x128xf32>
    %189 = arith.addf %184, %188 : vector<16x128xf32>
    %c3_95 = arith.constant 3 : index
    %c2_96 = arith.constant 2 : index
    %c0_97 = arith.constant 0 : index
    %190 = vector.load %arg3[%c3_95, %c2_96, %c0_97] : memref<4x24x128xf32, #tpu.memory_space<vmem>>, vector<1x16x128xf32>
    %191 = vector.shape_cast %190 : vector<1x16x128xf32> to vector<16x128xf32>
    %192 = vector.broadcast %37 : f32 to vector<16x128xf32>
    %193 = arith.mulf %192, %191 : vector<16x128xf32>
    %194 = arith.addf %189, %193 : vector<16x128xf32>
    %c3_98 = arith.constant 3 : index
    %c3_99 = arith.constant 3 : index
    %c0_100 = arith.constant 0 : index
    %195 = vector.load %arg3[%c3_98, %c3_99, %c0_100] : memref<4x24x128xf32, #tpu.memory_space<vmem>>, vector<1x16x128xf32>
    %196 = vector.shape_cast %195 : vector<1x16x128xf32> to vector<16x128xf32>
    %197 = vector.broadcast %38 : f32 to vector<16x128xf32>
    %198 = arith.mulf %197, %196 : vector<16x128xf32>
    %199 = arith.addf %194, %198 : vector<16x128xf32>
    %c3_101 = arith.constant 3 : index
    %c4_102 = arith.constant 4 : index
    %c0_103 = arith.constant 0 : index
    %200 = vector.load %arg3[%c3_101, %c4_102, %c0_103] : memref<4x24x128xf32, #tpu.memory_space<vmem>>, vector<1x16x128xf32>
    %201 = vector.shape_cast %200 : vector<1x16x128xf32> to vector<16x128xf32>
    %202 = vector.broadcast %39 : f32 to vector<16x128xf32>
    %203 = arith.mulf %202, %201 : vector<16x128xf32>
    %204 = arith.addf %199, %203 : vector<16x128xf32>
    %c3_104 = arith.constant 3 : index
    %c5_105 = arith.constant 5 : index
    %c0_106 = arith.constant 0 : index
    %205 = vector.load %arg3[%c3_104, %c5_105, %c0_106] : memref<4x24x128xf32, #tpu.memory_space<vmem>>, vector<1x16x128xf32>
    %206 = vector.shape_cast %205 : vector<1x16x128xf32> to vector<16x128xf32>
    %207 = vector.broadcast %40 : f32 to vector<16x128xf32>
    %208 = arith.mulf %207, %206 : vector<16x128xf32>
    %209 = arith.addf %204, %208 : vector<16x128xf32>
    %c3_107 = arith.constant 3 : index
    %c6_108 = arith.constant 6 : index
    %c0_109 = arith.constant 0 : index
    %210 = vector.load %arg3[%c3_107, %c6_108, %c0_109] : memref<4x24x128xf32, #tpu.memory_space<vmem>>, vector<1x16x128xf32>
    %211 = vector.shape_cast %210 : vector<1x16x128xf32> to vector<16x128xf32>
    %212 = vector.broadcast %41 : f32 to vector<16x128xf32>
    %213 = arith.mulf %212, %211 : vector<16x128xf32>
    %214 = arith.addf %209, %213 : vector<16x128xf32>
    %c3_110 = arith.constant 3 : index
    %c7_111 = arith.constant 7 : index
    %c0_112 = arith.constant 0 : index
    %215 = vector.load %arg3[%c3_110, %c7_111, %c0_112] : memref<4x24x128xf32, #tpu.memory_space<vmem>>, vector<1x16x128xf32>
    %216 = vector.shape_cast %215 : vector<1x16x128xf32> to vector<16x128xf32>
    %217 = vector.broadcast %42 : f32 to vector<16x128xf32>
    %218 = arith.mulf %217, %216 : vector<16x128xf32>
    %219 = arith.addf %214, %218 : vector<16x128xf32>
    %c3_113 = arith.constant 3 : index
    %c8_114 = arith.constant 8 : index
    %c0_115 = arith.constant 0 : index
    %220 = vector.load %arg3[%c3_113, %c8_114, %c0_115] : memref<4x24x128xf32, #tpu.memory_space<vmem>>, vector<1x16x128xf32>
    %221 = vector.shape_cast %220 : vector<1x16x128xf32> to vector<16x128xf32>
    %222 = vector.broadcast %43 : f32 to vector<16x128xf32>
    %223 = arith.mulf %222, %221 : vector<16x128xf32>
    %224 = arith.addf %219, %223 : vector<16x128xf32>
    %c0_116 = arith.constant 0 : index
    %c0_117 = arith.constant 0 : index
    %c0_118 = arith.constant 0 : index
    %225 = vector.load %arg4[%c0_116, %c0_117, %c0_118] : memref<8x16x128xf32, #tpu.memory_space<vmem>>, vector<1x16x128xf32>
    %226 = vector.shape_cast %225 : vector<1x16x128xf32> to vector<16x128xf32>
    %227 = vector.shape_cast %224 : vector<16x128xf32> to vector<1x16x128xf32>
    tpu.vector_store %arg4[%c0_116, %c0_117, %c0_118], %227 {strides = array<i32>} : memref<8x16x128xf32, #tpu.memory_space<vmem>>, vector<1x16x128xf32>,
    %c36 = arith.constant 36 : index
    %228 = memref.load %arg1[%c36] : memref<288xf32, #tpu.memory_space<smem>>
    %c37 = arith.constant 37 : index
    %229 = memref.load %arg1[%c37] : memref<288xf32, #tpu.memory_space<smem>>
    %c38 = arith.constant 38 : index
    %230 = memref.load %arg1[%c38] : memref<288xf32, #tpu.memory_space<smem>>
    %c39 = arith.constant 39 : index
    %231 = memref.load %arg1[%c39] : memref<288xf32, #tpu.memory_space<smem>>
    %c40 = arith.constant 40 : index
    %232 = memref.load %arg1[%c40] : memref<288xf32, #tpu.memory_space<smem>>
    %c41 = arith.constant 41 : index
    %233 = memref.load %arg1[%c41] : memref<288xf32, #tpu.memory_space<smem>>
    %c42 = arith.constant 42 : index
    %234 = memref.load %arg1[%c42] : memref<288xf32, #tpu.memory_space<smem>>
    %c43 = arith.constant 43 : index
    %235 = memref.load %arg1[%c43] : memref<288xf32, #tpu.memory_space<smem>>
    %c44 = arith.constant 44 : index
    %236 = memref.load %arg1[%c44] : memref<288xf32, #tpu.memory_space<smem>>
    %c45 = arith.constant 45 : index
    %237 = memref.load %arg1[%c45] : memref<288xf32, #tpu.memory_space<smem>>
    %c46 = arith.constant 46 : index
    %238 = memref.load %arg1[%c46] : memref<288xf32, #tpu.memory_space<smem>>
    %c47 = arith.constant 47 : index
    %239 = memref.load %arg1[%c47] : memref<288xf32, #tpu.memory_space<smem>>
    %c48 = arith.constant 48 : index
    %240 = memref.load %arg1[%c48] : memref<288xf32, #tpu.memory_space<smem>>
    %c49 = arith.constant 49 : index
    %241 = memref.load %arg1[%c49] : memref<288xf32, #tpu.memory_space<smem>>
    %c50 = arith.constant 50 : index
    %242 = memref.load %arg1[%c50] : memref<288xf32, #tpu.memory_space<smem>>
    %c51 = arith.constant 51 : index
    %243 = memref.load %arg1[%c51] : memref<288xf32, #tpu.memory_space<smem>>
    %c52 = arith.constant 52 : index
    %244 = memref.load %arg1[%c52] : memref<288xf32, #tpu.memory_space<smem>>
    %c53 = arith.constant 53 : index
    %245 = memref.load %arg1[%c53] : memref<288xf32, #tpu.memory_space<smem>>
    %c54 = arith.constant 54 : index
    %246 = memref.load %arg1[%c54] : memref<288xf32, #tpu.memory_space<smem>>
    %c55 = arith.constant 55 : index
    %247 = memref.load %arg1[%c55] : memref<288xf32, #tpu.memory_space<smem>>
    %c56 = arith.constant 56 : index
    %248 = memref.load %arg1[%c56] : memref<288xf32, #tpu.memory_space<smem>>
    %c57 = arith.constant 57 : index
    %249 = memref.load %arg1[%c57] : memref<288xf32, #tpu.memory_space<smem>>
    %c58 = arith.constant 58 : index
    %250 = memref.load %arg1[%c58] : memref<288xf32, #tpu.memory_space<smem>>
    %c59 = arith.constant 59 : index
    %251 = memref.load %arg1[%c59] : memref<288xf32, #tpu.memory_space<smem>>
    %c60 = arith.constant 60 : index
    %252 = memref.load %arg1[%c60] : memref<288xf32, #tpu.memory_space<smem>>
    %c61 = arith.constant 61 : index
    %253 = memref.load %arg1[%c61] : memref<288xf32, #tpu.memory_space<smem>>
    %c62 = arith.constant 62 : index
    %254 = memref.load %arg1[%c62] : memref<288xf32, #tpu.memory_space<smem>>
    %c63 = arith.constant 63 : index
    %255 = memref.load %arg1[%c63] : memref<288xf32, #tpu.memory_space<smem>>
    %c64 = arith.constant 64 : index
    %256 = memref.load %arg1[%c64] : memref<288xf32, #tpu.memory_space<smem>>
    %c65 = arith.constant 65 : index
    %257 = memref.load %arg1[%c65] : memref<288xf32, #tpu.memory_space<smem>>
    %c66 = arith.constant 66 : index
    %258 = memref.load %arg1[%c66] : memref<288xf32, #tpu.memory_space<smem>>
    %c67 = arith.constant 67 : index
    %259 = memref.load %arg1[%c67] : memref<288xf32, #tpu.memory_space<smem>>
    %c68 = arith.constant 68 : index
    %260 = memref.load %arg1[%c68] : memref<288xf32, #tpu.memory_space<smem>>
    %c69 = arith.constant 69 : index
    %261 = memref.load %arg1[%c69] : memref<288xf32, #tpu.memory_space<smem>>
    %c70 = arith.constant 70 : index
    %262 = memref.load %arg1[%c70] : memref<288xf32, #tpu.memory_space<smem>>
    %c71 = arith.constant 71 : index
    %263 = memref.load %arg1[%c71] : memref<288xf32, #tpu.memory_space<smem>>
    %264 = vector.broadcast %1 : f32 to vector<16x128xf32>
    %c0_119 = arith.constant 0 : index
    %c0_120 = arith.constant 0 : index
    %c0_121 = arith.constant 0 : index
    %265 = vector.load %arg3[%c0_119, %c0_120, %c0_121] : memref<4x24x128xf32, #tpu.memory_space<vmem>>, vector<1x16x128xf32>
    %266 = vector.shape_cast %265 : vector<1x16x128xf32> to vector<16x128xf32>
    %267 = vector.broadcast %228 : f32 to vector<16x128xf32>
    %268 = arith.mulf %267, %266 : vector<16x128xf32>
    %269 = arith.addf %264, %268 : vector<16x128xf32>
    %c0_122 = arith.constant 0 : index
    %c1_123 = arith.constant 1 : index
    %c0_124 = arith.constant 0 : index
    %270 = vector.load %arg3[%c0_122, %c1_123, %c0_124] : memref<4x24x128xf32, #tpu.memory_space<vmem>>, vector<1x16x128xf32>
    %271 = vector.shape_cast %270 : vector<1x16x128xf32> to vector<16x128xf32>
    %272 = vector.broadcast %229 : f32 to vector<16x128xf32>
    %273 = arith.mulf %272, %271 : vector<16x128xf32>
    %274 = arith.addf %269, %273 : vector<16x128xf32>
    %c0_125 = arith.constant 0 : index
    %c2_126 = arith.constant 2 : index
    %c0_127 = arith.constant 0 : index
    %275 = vector.load %arg3[%c0_125, %c2_126, %c0_127] : memref<4x24x128xf32, #tpu.memory_space<vmem>>, vector<1x16x128xf32>
    %276 = vector.shape_cast %275 : vector<1x16x128xf32> to vector<16x128xf32>
    %277 = vector.broadcast %230 : f32 to vector<16x128xf32>
    %278 = arith.mulf %277, %276 : vector<16x128xf32>
    %279 = arith.addf %274, %278 : vector<16x128xf32>
    %c0_128 = arith.constant 0 : index
    %c3_129 = arith.constant 3 : index
    %c0_130 = arith.constant 0 : index
    %280 = vector.load %arg3[%c0_128, %c3_129, %c0_130] : memref<4x24x128xf32, #tpu.memory_space<vmem>>, vector<1x16x128xf32>
    %281 = vector.shape_cast %280 : vector<1x16x128xf32> to vector<16x128xf32>
    %282 = vector.broadcast %231 : f32 to vector<16x128xf32>
    %283 = arith.mulf %282, %281 : vector<16x128xf32>
    %284 = arith.addf %279, %283 : vector<16x128xf32>
    %c0_131 = arith.constant 0 : index
    %c4_132 = arith.constant 4 : index
    %c0_133 = arith.constant 0 : index
    %285 = vector.load %arg3[%c0_131, %c4_132, %c0_133] : memref<4x24x128xf32, #tpu.memory_space<vmem>>, vector<1x16x128xf32>
    %286 = vector.shape_cast %285 : vector<1x16x128xf32> to vector<16x128xf32>
    %287 = vector.broadcast %232 : f32 to vector<16x128xf32>
    %288 = arith.mulf %287, %286 : vector<16x128xf32>
    %289 = arith.addf %284, %288 : vector<16x128xf32>
    %c0_134 = arith.constant 0 : index
    %c5_135 = arith.constant 5 : index
    %c0_136 = arith.constant 0 : index
    %290 = vector.load %arg3[%c0_134, %c5_135, %c0_136] : memref<4x24x128xf32, #tpu.memory_space<vmem>>, vector<1x16x128xf32>
    %291 = vector.shape_cast %290 : vector<1x16x128xf32> to vector<16x128xf32>
    %292 = vector.broadcast %233 : f32 to vector<16x128xf32>
    %293 = arith.mulf %292, %291 : vector<16x128xf32>
    %294 = arith.addf %289, %293 : vector<16x128xf32>
    %c0_137 = arith.constant 0 : index
    %c6_138 = arith.constant 6 : index
    %c0_139 = arith.constant 0 : index
    %295 = vector.load %arg3[%c0_137, %c6_138, %c0_139] : memref<4x24x128xf32, #tpu.memory_space<vmem>>, vector<1x16x128xf32>
    %296 = vector.shape_cast %295 : vector<1x16x128xf32> to vector<16x128xf32>
    %297 = vector.broadcast %234 : f32 to vector<16x128xf32>
    %298 = arith.mulf %297, %296 : vector<16x128xf32>
    %299 = arith.addf %294, %298 : vector<16x128xf32>
    %c0_140 = arith.constant 0 : index
    %c7_141 = arith.constant 7 : index
    %c0_142 = arith.constant 0 : index
    %300 = vector.load %arg3[%c0_140, %c7_141, %c0_142] : memref<4x24x128xf32, #tpu.memory_space<vmem>>, vector<1x16x128xf32>
    %301 = vector.shape_cast %300 : vector<1x16x128xf32> to vector<16x128xf32>
    %302 = vector.broadcast %235 : f32 to vector<16x128xf32>
    %303 = arith.mulf %302, %301 : vector<16x128xf32>
    %304 = arith.addf %299, %303 : vector<16x128xf32>
    %c0_143 = arith.constant 0 : index
    %c8_144 = arith.constant 8 : index
    %c0_145 = arith.constant 0 : index
    %305 = vector.load %arg3[%c0_143, %c8_144, %c0_145] : memref<4x24x128xf32, #tpu.memory_space<vmem>>, vector<1x16x128xf32>
    %306 = vector.shape_cast %305 : vector<1x16x128xf32> to vector<16x128xf32>
    %307 = vector.broadcast %236 : f32 to vector<16x128xf32>
    %308 = arith.mulf %307, %306 : vector<16x128xf32>
    %309 = arith.addf %304, %308 : vector<16x128xf32>
    %c1_146 = arith.constant 1 : index
    %c0_147 = arith.constant 0 : index
    %c0_148 = arith.constant 0 : index
    %310 = vector.load %arg3[%c1_146, %c0_147, %c0_148] : memref<4x24x128xf32, #tpu.memory_space<vmem>>, vector<1x16x128xf32>
    %311 = vector.shape_cast %310 : vector<1x16x128xf32> to vector<16x128xf32>
    %312 = vector.broadcast %237 : f32 to vector<16x128xf32>
    %313 = arith.mulf %312, %311 : vector<16x128xf32>
    %314 = arith.addf %309, %313 : vector<16x128xf32>
    %c1_149 = arith.constant 1 : index
    %c1_150 = arith.constant 1 : index
    %c0_151 = arith.constant 0 : index
    %315 = vector.load %arg3[%c1_149, %c1_150, %c0_151] : memref<4x24x128xf32, #tpu.memory_space<vmem>>, vector<1x16x128xf32>
    %316 = vector.shape_cast %315 : vector<1x16x128xf32> to vector<16x128xf32>
    %317 = vector.broadcast %238 : f32 to vector<16x128xf32>
    %318 = arith.mulf %317, %316 : vector<16x128xf32>
    %319 = arith.addf %314, %318 : vector<16x128xf32>
    %c1_152 = arith.constant 1 : index
    %c2_153 = arith.constant 2 : index
    %c0_154 = arith.constant 0 : index
    %320 = vector.load %arg3[%c1_152, %c2_153, %c0_154] : memref<4x24x128xf32, #tpu.memory_space<vmem>>, vector<1x16x128xf32>
    %321 = vector.shape_cast %320 : vector<1x16x128xf32> to vector<16x128xf32>
    %322 = vector.broadcast %239 : f32 to vector<16x128xf32>
    %323 = arith.mulf %322, %321 : vector<16x128xf32>
    %324 = arith.addf %319, %323 : vector<16x128xf32>
    %c1_155 = arith.constant 1 : index
    %c3_156 = arith.constant 3 : index
    %c0_157 = arith.constant 0 : index
    %325 = vector.load %arg3[%c1_155, %c3_156, %c0_157] : memref<4x24x128xf32, #tpu.memory_space<vmem>>, vector<1x16x128xf32>
    %326 = vector.shape_cast %325 : vector<1x16x128xf32> to vector<16x128xf32>
    %327 = vector.broadcast %240 : f32 to vector<16x128xf32>
    %328 = arith.mulf %327, %326 : vector<16x128xf32>
    %329 = arith.addf %324, %328 : vector<16x128xf32>
    %c1_158 = arith.constant 1 : index
    %c4_159 = arith.constant 4 : index
    %c0_160 = arith.constant 0 : index
    %330 = vector.load %arg3[%c1_158, %c4_159, %c0_160] : memref<4x24x128xf32, #tpu.memory_space<vmem>>, vector<1x16x128xf32>
    %331 = vector.shape_cast %330 : vector<1x16x128xf32> to vector<16x128xf32>
    %332 = vector.broadcast %241 : f32 to vector<16x128xf32>
    %333 = arith.mulf %332, %331 : vector<16x128xf32>
    %334 = arith.addf %329, %333 : vector<16x128xf32>
    %c1_161 = arith.constant 1 : index
    %c5_162 = arith.constant 5 : index
    %c0_163 = arith.constant 0 : index
    %335 = vector.load %arg3[%c1_161, %c5_162, %c0_163] : memref<4x24x128xf32, #tpu.memory_space<vmem>>, vector<1x16x128xf32>
    %336 = vector.shape_cast %335 : vector<1x16x128xf32> to vector<16x128xf32>
    %337 = vector.broadcast %242 : f32 to vector<16x128xf32>
    %338 = arith.mulf %337, %336 : vector<16x128xf32>
    %339 = arith.addf %334, %338 : vector<16x128xf32>
    %c1_164 = arith.constant 1 : index
    %c6_165 = arith.constant 6 : index
    %c0_166 = arith.constant 0 : index
    %340 = vector.load %arg3[%c1_164, %c6_165, %c0_166] : memref<4x24x128xf32, #tpu.memory_space<vmem>>, vector<1x16x128xf32>
    %341 = vector.shape_cast %340 : vector<1x16x128xf32> to vector<16x128xf32>
    %342 = vector.broadcast %243 : f32 to vector<16x128xf32>
    %343 = arith.mulf %342, %341 : vector<16x128xf32>
    %344 = arith.addf %339, %343 : vector<16x128xf32>
    %c1_167 = arith.constant 1 : index
    %c7_168 = arith.constant 7 : index
    %c0_169 = arith.constant 0 : index
    %345 = vector.load %arg3[%c1_167, %c7_168, %c0_169] : memref<4x24x128xf32, #tpu.memory_space<vmem>>, vector<1x16x128xf32>
    %346 = vector.shape_cast %345 : vector<1x16x128xf32> to vector<16x128xf32>
    %347 = vector.broadcast %244 : f32 to vector<16x128xf32>
    %348 = arith.mulf %347, %346 : vector<16x128xf32>
    %349 = arith.addf %344, %348 : vector<16x128xf32>
    %c1_170 = arith.constant 1 : index
    %c8_171 = arith.constant 8 : index
    %c0_172 = arith.constant 0 : index
    %350 = vector.load %arg3[%c1_170, %c8_171, %c0_172] : memref<4x24x128xf32, #tpu.memory_space<vmem>>, vector<1x16x128xf32>
    %351 = vector.shape_cast %350 : vector<1x16x128xf32> to vector<16x128xf32>
    %352 = vector.broadcast %245 : f32 to vector<16x128xf32>
    %353 = arith.mulf %352, %351 : vector<16x128xf32>
    %354 = arith.addf %349, %353 : vector<16x128xf32>
    %c2_173 = arith.constant 2 : index
    %c0_174 = arith.constant 0 : index
    %c0_175 = arith.constant 0 : index
    %355 = vector.load %arg3[%c2_173, %c0_174, %c0_175] : memref<4x24x128xf32, #tpu.memory_space<vmem>>, vector<1x16x128xf32>
    %356 = vector.shape_cast %355 : vector<1x16x128xf32> to vector<16x128xf32>
    %357 = vector.broadcast %246 : f32 to vector<16x128xf32>
    %358 = arith.mulf %357, %356 : vector<16x128xf32>
    %359 = arith.addf %354, %358 : vector<16x128xf32>
    %c2_176 = arith.constant 2 : index
    %c1_177 = arith.constant 1 : index
    %c0_178 = arith.constant 0 : index
    %360 = vector.load %arg3[%c2_176, %c1_177, %c0_178] : memref<4x24x128xf32, #tpu.memory_space<vmem>>, vector<1x16x128xf32>
    %361 = vector.shape_cast %360 : vector<1x16x128xf32> to vector<16x128xf32>
    %362 = vector.broadcast %247 : f32 to vector<16x128xf32>
    %363 = arith.mulf %362, %361 : vector<16x128xf32>
    %364 = arith.addf %359, %363 : vector<16x128xf32>
    %c2_179 = arith.constant 2 : index
    %c2_180 = arith.constant 2 : index
    %c0_181 = arith.constant 0 : index
    %365 = vector.load %arg3[%c2_179, %c2_180, %c0_181] : memref<4x24x128xf32, #tpu.memory_space<vmem>>, vector<1x16x128xf32>
    %366 = vector.shape_cast %365 : vector<1x16x128xf32> to vector<16x128xf32>
    %367 = vector.broadcast %248 : f32 to vector<16x128xf32>
    %368 = arith.mulf %367, %366 : vector<16x128xf32>
    %369 = arith.addf %364, %368 : vector<16x128xf32>
    %c2_182 = arith.constant 2 : index
    %c3_183 = arith.constant 3 : index
    %c0_184 = arith.constant 0 : index
    %370 = vector.load %arg3[%c2_182, %c3_183, %c0_184] : memref<4x24x128xf32, #tpu.memory_space<vmem>>, vector<1x16x128xf32>
    %371 = vector.shape_cast %370 : vector<1x16x128xf32> to vector<16x128xf32>
    %372 = vector.broadcast %249 : f32 to vector<16x128xf32>
    %373 = arith.mulf %372, %371 : vector<16x128xf32>
    %374 = arith.addf %369, %373 : vector<16x128xf32>
    %c2_185 = arith.constant 2 : index
    %c4_186 = arith.constant 4 : index
    %c0_187 = arith.constant 0 : index
    %375 = vector.load %arg3[%c2_185, %c4_186, %c0_187] : memref<4x24x128xf32, #tpu.memory_space<vmem>>, vector<1x16x128xf32>
    %376 = vector.shape_cast %375 : vector<1x16x128xf32> to vector<16x128xf32>
    %377 = vector.broadcast %250 : f32 to vector<16x128xf32>
    %378 = arith.mulf %377, %376 : vector<16x128xf32>
    %379 = arith.addf %374, %378 : vector<16x128xf32>
    %c2_188 = arith.constant 2 : index
    %c5_189 = arith.constant 5 : index
    %c0_190 = arith.constant 0 : index
    %380 = vector.load %arg3[%c2_188, %c5_189, %c0_190] : memref<4x24x128xf32, #tpu.memory_space<vmem>>, vector<1x16x128xf32>
    %381 = vector.shape_cast %380 : vector<1x16x128xf32> to vector<16x128xf32>
    %382 = vector.broadcast %251 : f32 to vector<16x128xf32>
    %383 = arith.mulf %382, %381 : vector<16x128xf32>
    %384 = arith.addf %379, %383 : vector<16x128xf32>
    %c2_191 = arith.constant 2 : index
    %c6_192 = arith.constant 6 : index
    %c0_193 = arith.constant 0 : index
    %385 = vector.load %arg3[%c2_191, %c6_192, %c0_193] : memref<4x24x128xf32, #tpu.memory_space<vmem>>, vector<1x16x128xf32>
    %386 = vector.shape_cast %385 : vector<1x16x128xf32> to vector<16x128xf32>
    %387 = vector.broadcast %252 : f32 to vector<16x128xf32>
    %388 = arith.mulf %387, %386 : vector<16x128xf32>
    %389 = arith.addf %384, %388 : vector<16x128xf32>
    %c2_194 = arith.constant 2 : index
    %c7_195 = arith.constant 7 : index
    %c0_196 = arith.constant 0 : index
    %390 = vector.load %arg3[%c2_194, %c7_195, %c0_196] : memref<4x24x128xf32, #tpu.memory_space<vmem>>, vector<1x16x128xf32>
    %391 = vector.shape_cast %390 : vector<1x16x128xf32> to vector<16x128xf32>
    %392 = vector.broadcast %253 : f32 to vector<16x128xf32>
    %393 = arith.mulf %392, %391 : vector<16x128xf32>
    %394 = arith.addf %389, %393 : vector<16x128xf32>
    %c2_197 = arith.constant 2 : index
    %c8_198 = arith.constant 8 : index
    %c0_199 = arith.constant 0 : index
    %395 = vector.load %arg3[%c2_197, %c8_198, %c0_199] : memref<4x24x128xf32, #tpu.memory_space<vmem>>, vector<1x16x128xf32>
    %396 = vector.shape_cast %395 : vector<1x16x128xf32> to vector<16x128xf32>
    %397 = vector.broadcast %254 : f32 to vector<16x128xf32>
    %398 = arith.mulf %397, %396 : vector<16x128xf32>
    %399 = arith.addf %394, %398 : vector<16x128xf32>
    %c3_200 = arith.constant 3 : index
    %c0_201 = arith.constant 0 : index
    %c0_202 = arith.constant 0 : index
    %400 = vector.load %arg3[%c3_200, %c0_201, %c0_202] : memref<4x24x128xf32, #tpu.memory_space<vmem>>, vector<1x16x128xf32>
    %401 = vector.shape_cast %400 : vector<1x16x128xf32> to vector<16x128xf32>
    %402 = vector.broadcast %255 : f32 to vector<16x128xf32>
    %403 = arith.mulf %402, %401 : vector<16x128xf32>
    %404 = arith.addf %399, %403 : vector<16x128xf32>
    %c3_203 = arith.constant 3 : index
    %c1_204 = arith.constant 1 : index
    %c0_205 = arith.constant 0 : index
    %405 = vector.load %arg3[%c3_203, %c1_204, %c0_205] : memref<4x24x128xf32, #tpu.memory_space<vmem>>, vector<1x16x128xf32>
    %406 = vector.shape_cast %405 : vector<1x16x128xf32> to vector<16x128xf32>
    %407 = vector.broadcast %256 : f32 to vector<16x128xf32>
    %408 = arith.mulf %407, %406 : vector<16x128xf32>
    %409 = arith.addf %404, %408 : vector<16x128xf32>
    %c3_206 = arith.constant 3 : index
    %c2_207 = arith.constant 2 : index
    %c0_208 = arith.constant 0 : index
    %410 = vector.load %arg3[%c3_206, %c2_207, %c0_208] : memref<4x24x128xf32, #tpu.memory_space<vmem>>, vector<1x16x128xf32>
    %411 = vector.shape_cast %410 : vector<1x16x128xf32> to vector<16x128xf32>
    %412 = vector.broadcast %257 : f32 to vector<16x128xf32>
    %413 = arith.mulf %412, %411 : vector<16x128xf32>
    %414 = arith.addf %409, %413 : vector<16x128xf32>
    %c3_209 = arith.constant 3 : index
    %c3_210 = arith.constant 3 : index
    %c0_211 = arith.constant 0 : index
    %415 = vector.load %arg3[%c3_209, %c3_210, %c0_211] : memref<4x24x128xf32, #tpu.memory_space<vmem>>, vector<1x16x128xf32>
    %416 = vector.shape_cast %415 : vector<1x16x128xf32> to vector<16x128xf32>
    %417 = vector.broadcast %258 : f32 to vector<16x128xf32>
    %418 = arith.mulf %417, %416 : vector<16x128xf32>
    %419 = arith.addf %414, %418 : vector<16x128xf32>
    %c3_212 = arith.constant 3 : index
    %c4_213 = arith.constant 4 : index
    %c0_214 = arith.constant 0 : index
    %420 = vector.load %arg3[%c3_212, %c4_213, %c0_214] : memref<4x24x128xf32, #tpu.memory_space<vmem>>, vector<1x16x128xf32>
    %421 = vector.shape_cast %420 : vector<1x16x128xf32> to vector<16x128xf32>
    %422 = vector.broadcast %259 : f32 to vector<16x128xf32>
    %423 = arith.mulf %422, %421 : vector<16x128xf32>
    %424 = arith.addf %419, %423 : vector<16x128xf32>
    %c3_215 = arith.constant 3 : index
    %c5_216 = arith.constant 5 : index
    %c0_217 = arith.constant 0 : index
    %425 = vector.load %arg3[%c3_215, %c5_216, %c0_217] : memref<4x24x128xf32, #tpu.memory_space<vmem>>, vector<1x16x128xf32>
    %426 = vector.shape_cast %425 : vector<1x16x128xf32> to vector<16x128xf32>
    %427 = vector.broadcast %260 : f32 to vector<16x128xf32>
    %428 = arith.mulf %427, %426 : vector<16x128xf32>
    %429 = arith.addf %424, %428 : vector<16x128xf32>
    %c3_218 = arith.constant 3 : index
    %c6_219 = arith.constant 6 : index
    %c0_220 = arith.constant 0 : index
    %430 = vector.load %arg3[%c3_218, %c6_219, %c0_220] : memref<4x24x128xf32, #tpu.memory_space<vmem>>, vector<1x16x128xf32>
    %431 = vector.shape_cast %430 : vector<1x16x128xf32> to vector<16x128xf32>
    %432 = vector.broadcast %261 : f32 to vector<16x128xf32>
    %433 = arith.mulf %432, %431 : vector<16x128xf32>
    %434 = arith.addf %429, %433 : vector<16x128xf32>
    %c3_221 = arith.constant 3 : index
    %c7_222 = arith.constant 7 : index
    %c0_223 = arith.constant 0 : index
    %435 = vector.load %arg3[%c3_221, %c7_222, %c0_223] : memref<4x24x128xf32, #tpu.memory_space<vmem>>, vector<1x16x128xf32>
    %436 = vector.shape_cast %435 : vector<1x16x128xf32> to vector<16x128xf32>
    %437 = vector.broadcast %262 : f32 to vector<16x128xf32>
    %438 = arith.mulf %437, %436 : vector<16x128xf32>
    %439 = arith.addf %434, %438 : vector<16x128xf32>
    %c3_224 = arith.constant 3 : index
    %c8_225 = arith.constant 8 : index
    %c0_226 = arith.constant 0 : index
    %440 = vector.load %arg3[%c3_224, %c8_225, %c0_226] : memref<4x24x128xf32, #tpu.memory_space<vmem>>, vector<1x16x128xf32>
    %441 = vector.shape_cast %440 : vector<1x16x128xf32> to vector<16x128xf32>
    %442 = vector.broadcast %263 : f32 to vector<16x128xf32>
    %443 = arith.mulf %442, %441 : vector<16x128xf32>
    %444 = arith.addf %439, %443 : vector<16x128xf32>
    %c1_227 = arith.constant 1 : index
    %c0_228 = arith.constant 0 : index
    %c0_229 = arith.constant 0 : index
    %445 = vector.load %arg4[%c1_227, %c0_228, %c0_229] : memref<8x16x128xf32, #tpu.memory_space<vmem>>, vector<1x16x128xf32>
    %446 = vector.shape_cast %445 : vector<1x16x128xf32> to vector<16x128xf32>
    %447 = vector.shape_cast %444 : vector<16x128xf32> to vector<1x16x128xf32>
    tpu.vector_store %arg4[%c1_227, %c0_228, %c0_229], %447 {strides = array<i32>} : memref<8x16x128xf32, #tpu.memory_space<vmem>>, vector<1x16x128xf32>,
    %c72 = arith.constant 72 : index
    %448 = memref.load %arg1[%c72] : memref<288xf32, #tpu.memory_space<smem>>
    %c73 = arith.constant 73 : index
    %449 = memref.load %arg1[%c73] : memref<288xf32, #tpu.memory_space<smem>>
    %c74 = arith.constant 74 : index
    %450 = memref.load %arg1[%c74] : memref<288xf32, #tpu.memory_space<smem>>
    %c75 = arith.constant 75 : index
    %451 = memref.load %arg1[%c75] : memref<288xf32, #tpu.memory_space<smem>>
    %c76 = arith.constant 76 : index
    %452 = memref.load %arg1[%c76] : memref<288xf32, #tpu.memory_space<smem>>
    %c77 = arith.constant 77 : index
    %453 = memref.load %arg1[%c77] : memref<288xf32, #tpu.memory_space<smem>>
    %c78 = arith.constant 78 : index
    %454 = memref.load %arg1[%c78] : memref<288xf32, #tpu.memory_space<smem>>
    %c79 = arith.constant 79 : index
    %455 = memref.load %arg1[%c79] : memref<288xf32, #tpu.memory_space<smem>>
    %c80 = arith.constant 80 : index
    %456 = memref.load %arg1[%c80] : memref<288xf32, #tpu.memory_space<smem>>
    %c81 = arith.constant 81 : index
    %457 = memref.load %arg1[%c81] : memref<288xf32, #tpu.memory_space<smem>>
    %c82 = arith.constant 82 : index
    %458 = memref.load %arg1[%c82] : memref<288xf32, #tpu.memory_space<smem>>
    %c83 = arith.constant 83 : index
    %459 = memref.load %arg1[%c83] : memref<288xf32, #tpu.memory_space<smem>>
    %c84 = arith.constant 84 : index
    %460 = memref.load %arg1[%c84] : memref<288xf32, #tpu.memory_space<smem>>
    %c85 = arith.constant 85 : index
    %461 = memref.load %arg1[%c85] : memref<288xf32, #tpu.memory_space<smem>>
    %c86 = arith.constant 86 : index
    %462 = memref.load %arg1[%c86] : memref<288xf32, #tpu.memory_space<smem>>
    %c87 = arith.constant 87 : index
    %463 = memref.load %arg1[%c87] : memref<288xf32, #tpu.memory_space<smem>>
    %c88 = arith.constant 88 : index
    %464 = memref.load %arg1[%c88] : memref<288xf32, #tpu.memory_space<smem>>
    %c89 = arith.constant 89 : index
    %465 = memref.load %arg1[%c89] : memref<288xf32, #tpu.memory_space<smem>>
    %c90 = arith.constant 90 : index
    %466 = memref.load %arg1[%c90] : memref<288xf32, #tpu.memory_space<smem>>
    %c91 = arith.constant 91 : index
    %467 = memref.load %arg1[%c91] : memref<288xf32, #tpu.memory_space<smem>>
    %c92 = arith.constant 92 : index
    %468 = memref.load %arg1[%c92] : memref<288xf32, #tpu.memory_space<smem>>
    %c93 = arith.constant 93 : index
    %469 = memref.load %arg1[%c93] : memref<288xf32, #tpu.memory_space<smem>>
    %c94 = arith.constant 94 : index
    %470 = memref.load %arg1[%c94] : memref<288xf32, #tpu.memory_space<smem>>
    %c95 = arith.constant 95 : index
    %471 = memref.load %arg1[%c95] : memref<288xf32, #tpu.memory_space<smem>>
    %c96 = arith.constant 96 : index
    %472 = memref.load %arg1[%c96] : memref<288xf32, #tpu.memory_space<smem>>
    %c97 = arith.constant 97 : index
    %473 = memref.load %arg1[%c97] : memref<288xf32, #tpu.memory_space<smem>>
    %c98 = arith.constant 98 : index
    %474 = memref.load %arg1[%c98] : memref<288xf32, #tpu.memory_space<smem>>
    %c99 = arith.constant 99 : index
    %475 = memref.load %arg1[%c99] : memref<288xf32, #tpu.memory_space<smem>>
    %c100 = arith.constant 100 : index
    %476 = memref.load %arg1[%c100] : memref<288xf32, #tpu.memory_space<smem>>
    %c101 = arith.constant 101 : index
    %477 = memref.load %arg1[%c101] : memref<288xf32, #tpu.memory_space<smem>>
    %c102 = arith.constant 102 : index
    %478 = memref.load %arg1[%c102] : memref<288xf32, #tpu.memory_space<smem>>
    %c103 = arith.constant 103 : index
    %479 = memref.load %arg1[%c103] : memref<288xf32, #tpu.memory_space<smem>>
    %c104 = arith.constant 104 : index
    %480 = memref.load %arg1[%c104] : memref<288xf32, #tpu.memory_space<smem>>
    %c105 = arith.constant 105 : index
    %481 = memref.load %arg1[%c105] : memref<288xf32, #tpu.memory_space<smem>>
    %c106 = arith.constant 106 : index
    %482 = memref.load %arg1[%c106] : memref<288xf32, #tpu.memory_space<smem>>
    %c107 = arith.constant 107 : index
    %483 = memref.load %arg1[%c107] : memref<288xf32, #tpu.memory_space<smem>>
    %484 = vector.broadcast %2 : f32 to vector<16x128xf32>
    %c0_230 = arith.constant 0 : index
    %c0_231 = arith.constant 0 : index
    %c0_232 = arith.constant 0 : index
    %485 = vector.load %arg3[%c0_230, %c0_231, %c0_232] : memref<4x24x128xf32, #tpu.memory_space<vmem>>, vector<1x16x128xf32>
    %486 = vector.shape_cast %485 : vector<1x16x128xf32> to vector<16x128xf32>
    %487 = vector.broadcast %448 : f32 to vector<16x128xf32>
    %488 = arith.mulf %487, %486 : vector<16x128xf32>
    %489 = arith.addf %484, %488 : vector<16x128xf32>
    %c0_233 = arith.constant 0 : index
    %c1_234 = arith.constant 1 : index
    %c0_235 = arith.constant 0 : index
    %490 = vector.load %arg3[%c0_233, %c1_234, %c0_235] : memref<4x24x128xf32, #tpu.memory_space<vmem>>, vector<1x16x128xf32>
    %491 = vector.shape_cast %490 : vector<1x16x128xf32> to vector<16x128xf32>
    %492 = vector.broadcast %449 : f32 to vector<16x128xf32>
    %493 = arith.mulf %492, %491 : vector<16x128xf32>
    %494 = arith.addf %489, %493 : vector<16x128xf32>
    %c0_236 = arith.constant 0 : index
    %c2_237 = arith.constant 2 : index
    %c0_238 = arith.constant 0 : index
    %495 = vector.load %arg3[%c0_236, %c2_237, %c0_238] : memref<4x24x128xf32, #tpu.memory_space<vmem>>, vector<1x16x128xf32>
    %496 = vector.shape_cast %495 : vector<1x16x128xf32> to vector<16x128xf32>
    %497 = vector.broadcast %450 : f32 to vector<16x128xf32>
    %498 = arith.mulf %497, %496 : vector<16x128xf32>
    %499 = arith.addf %494, %498 : vector<16x128xf32>
    %c0_239 = arith.constant 0 : index
    %c3_240 = arith.constant 3 : index
    %c0_241 = arith.constant 0 : index
    %500 = vector.load %arg3[%c0_239, %c3_240, %c0_241] : memref<4x24x128xf32, #tpu.memory_space<vmem>>, vector<1x16x128xf32>
    %501 = vector.shape_cast %500 : vector<1x16x128xf32> to vector<16x128xf32>
    %502 = vector.broadcast %451 : f32 to vector<16x128xf32>
    %503 = arith.mulf %502, %501 : vector<16x128xf32>
    %504 = arith.addf %499, %503 : vector<16x128xf32>
    %c0_242 = arith.constant 0 : index
    %c4_243 = arith.constant 4 : index
    %c0_244 = arith.constant 0 : index
    %505 = vector.load %arg3[%c0_242, %c4_243, %c0_244] : memref<4x24x128xf32, #tpu.memory_space<vmem>>, vector<1x16x128xf32>
    %506 = vector.shape_cast %505 : vector<1x16x128xf32> to vector<16x128xf32>
    %507 = vector.broadcast %452 : f32 to vector<16x128xf32>
    %508 = arith.mulf %507, %506 : vector<16x128xf32>
    %509 = arith.addf %504, %508 : vector<16x128xf32>
    %c0_245 = arith.constant 0 : index
    %c5_246 = arith.constant 5 : index
    %c0_247 = arith.constant 0 : index
    %510 = vector.load %arg3[%c0_245, %c5_246, %c0_247] : memref<4x24x128xf32, #tpu.memory_space<vmem>>, vector<1x16x128xf32>
    %511 = vector.shape_cast %510 : vector<1x16x128xf32> to vector<16x128xf32>
    %512 = vector.broadcast %453 : f32 to vector<16x128xf32>
    %513 = arith.mulf %512, %511 : vector<16x128xf32>
    %514 = arith.addf %509, %513 : vector<16x128xf32>
    %c0_248 = arith.constant 0 : index
    %c6_249 = arith.constant 6 : index
    %c0_250 = arith.constant 0 : index
    %515 = vector.load %arg3[%c0_248, %c6_249, %c0_250] : memref<4x24x128xf32, #tpu.memory_space<vmem>>, vector<1x16x128xf32>
    %516 = vector.shape_cast %515 : vector<1x16x128xf32> to vector<16x128xf32>
    %517 = vector.broadcast %454 : f32 to vector<16x128xf32>
    %518 = arith.mulf %517, %516 : vector<16x128xf32>
    %519 = arith.addf %514, %518 : vector<16x128xf32>
    %c0_251 = arith.constant 0 : index
    %c7_252 = arith.constant 7 : index
    %c0_253 = arith.constant 0 : index
    %520 = vector.load %arg3[%c0_251, %c7_252, %c0_253] : memref<4x24x128xf32, #tpu.memory_space<vmem>>, vector<1x16x128xf32>
    %521 = vector.shape_cast %520 : vector<1x16x128xf32> to vector<16x128xf32>
    %522 = vector.broadcast %455 : f32 to vector<16x128xf32>
    %523 = arith.mulf %522, %521 : vector<16x128xf32>
    %524 = arith.addf %519, %523 : vector<16x128xf32>
    %c0_254 = arith.constant 0 : index
    %c8_255 = arith.constant 8 : index
    %c0_256 = arith.constant 0 : index
    %525 = vector.load %arg3[%c0_254, %c8_255, %c0_256] : memref<4x24x128xf32, #tpu.memory_space<vmem>>, vector<1x16x128xf32>
    %526 = vector.shape_cast %525 : vector<1x16x128xf32> to vector<16x128xf32>
    %527 = vector.broadcast %456 : f32 to vector<16x128xf32>
    %528 = arith.mulf %527, %526 : vector<16x128xf32>
    %529 = arith.addf %524, %528 : vector<16x128xf32>
    %c1_257 = arith.constant 1 : index
    %c0_258 = arith.constant 0 : index
    %c0_259 = arith.constant 0 : index
    %530 = vector.load %arg3[%c1_257, %c0_258, %c0_259] : memref<4x24x128xf32, #tpu.memory_space<vmem>>, vector<1x16x128xf32>
    %531 = vector.shape_cast %530 : vector<1x16x128xf32> to vector<16x128xf32>
    %532 = vector.broadcast %457 : f32 to vector<16x128xf32>
    %533 = arith.mulf %532, %531 : vector<16x128xf32>
    %534 = arith.addf %529, %533 : vector<16x128xf32>
    %c1_260 = arith.constant 1 : index
    %c1_261 = arith.constant 1 : index
    %c0_262 = arith.constant 0 : index
    %535 = vector.load %arg3[%c1_260, %c1_261, %c0_262] : memref<4x24x128xf32, #tpu.memory_space<vmem>>, vector<1x16x128xf32>
    %536 = vector.shape_cast %535 : vector<1x16x128xf32> to vector<16x128xf32>
    %537 = vector.broadcast %458 : f32 to vector<16x128xf32>
    %538 = arith.mulf %537, %536 : vector<16x128xf32>
    %539 = arith.addf %534, %538 : vector<16x128xf32>
    %c1_263 = arith.constant 1 : index
    %c2_264 = arith.constant 2 : index
    %c0_265 = arith.constant 0 : index
    %540 = vector.load %arg3[%c1_263, %c2_264, %c0_265] : memref<4x24x128xf32, #tpu.memory_space<vmem>>, vector<1x16x128xf32>
    %541 = vector.shape_cast %540 : vector<1x16x128xf32> to vector<16x128xf32>
    %542 = vector.broadcast %459 : f32 to vector<16x128xf32>
    %543 = arith.mulf %542, %541 : vector<16x128xf32>
    %544 = arith.addf %539, %543 : vector<16x128xf32>
    %c1_266 = arith.constant 1 : index
    %c3_267 = arith.constant 3 : index
    %c0_268 = arith.constant 0 : index
    %545 = vector.load %arg3[%c1_266, %c3_267, %c0_268] : memref<4x24x128xf32, #tpu.memory_space<vmem>>, vector<1x16x128xf32>
    %546 = vector.shape_cast %545 : vector<1x16x128xf32> to vector<16x128xf32>
    %547 = vector.broadcast %460 : f32 to vector<16x128xf32>
    %548 = arith.mulf %547, %546 : vector<16x128xf32>
    %549 = arith.addf %544, %548 : vector<16x128xf32>
    %c1_269 = arith.constant 1 : index
    %c4_270 = arith.constant 4 : index
    %c0_271 = arith.constant 0 : index
    %550 = vector.load %arg3[%c1_269, %c4_270, %c0_271] : memref<4x24x128xf32, #tpu.memory_space<vmem>>, vector<1x16x128xf32>
    %551 = vector.shape_cast %550 : vector<1x16x128xf32> to vector<16x128xf32>
    %552 = vector.broadcast %461 : f32 to vector<16x128xf32>
    %553 = arith.mulf %552, %551 : vector<16x128xf32>
    %554 = arith.addf %549, %553 : vector<16x128xf32>
    %c1_272 = arith.constant 1 : index
    %c5_273 = arith.constant 5 : index
    %c0_274 = arith.constant 0 : index
    %555 = vector.load %arg3[%c1_272, %c5_273, %c0_274] : memref<4x24x128xf32, #tpu.memory_space<vmem>>, vector<1x16x128xf32>
    %556 = vector.shape_cast %555 : vector<1x16x128xf32> to vector<16x128xf32>
    %557 = vector.broadcast %462 : f32 to vector<16x128xf32>
    %558 = arith.mulf %557, %556 : vector<16x128xf32>
    %559 = arith.addf %554, %558 : vector<16x128xf32>
    %c1_275 = arith.constant 1 : index
    %c6_276 = arith.constant 6 : index
    %c0_277 = arith.constant 0 : index
    %560 = vector.load %arg3[%c1_275, %c6_276, %c0_277] : memref<4x24x128xf32, #tpu.memory_space<vmem>>, vector<1x16x128xf32>
    %561 = vector.shape_cast %560 : vector<1x16x128xf32> to vector<16x128xf32>
    %562 = vector.broadcast %463 : f32 to vector<16x128xf32>
    %563 = arith.mulf %562, %561 : vector<16x128xf32>
    %564 = arith.addf %559, %563 : vector<16x128xf32>
    %c1_278 = arith.constant 1 : index
    %c7_279 = arith.constant 7 : index
    %c0_280 = arith.constant 0 : index
    %565 = vector.load %arg3[%c1_278, %c7_279, %c0_280] : memref<4x24x128xf32, #tpu.memory_space<vmem>>, vector<1x16x128xf32>
    %566 = vector.shape_cast %565 : vector<1x16x128xf32> to vector<16x128xf32>
    %567 = vector.broadcast %464 : f32 to vector<16x128xf32>
    %568 = arith.mulf %567, %566 : vector<16x128xf32>
    %569 = arith.addf %564, %568 : vector<16x128xf32>
    %c1_281 = arith.constant 1 : index
    %c8_282 = arith.constant 8 : index
    %c0_283 = arith.constant 0 : index
    %570 = vector.load %arg3[%c1_281, %c8_282, %c0_283] : memref<4x24x128xf32, #tpu.memory_space<vmem>>, vector<1x16x128xf32>
    %571 = vector.shape_cast %570 : vector<1x16x128xf32> to vector<16x128xf32>
    %572 = vector.broadcast %465 : f32 to vector<16x128xf32>
    %573 = arith.mulf %572, %571 : vector<16x128xf32>
    %574 = arith.addf %569, %573 : vector<16x128xf32>
    %c2_284 = arith.constant 2 : index
    %c0_285 = arith.constant 0 : index
    %c0_286 = arith.constant 0 : index
    %575 = vector.load %arg3[%c2_284, %c0_285, %c0_286] : memref<4x24x128xf32, #tpu.memory_space<vmem>>, vector<1x16x128xf32>
    %576 = vector.shape_cast %575 : vector<1x16x128xf32> to vector<16x128xf32>
    %577 = vector.broadcast %466 : f32 to vector<16x128xf32>
    %578 = arith.mulf %577, %576 : vector<16x128xf32>
    %579 = arith.addf %574, %578 : vector<16x128xf32>
    %c2_287 = arith.constant 2 : index
    %c1_288 = arith.constant 1 : index
    %c0_289 = arith.constant 0 : index
    %580 = vector.load %arg3[%c2_287, %c1_288, %c0_289] : memref<4x24x128xf32, #tpu.memory_space<vmem>>, vector<1x16x128xf32>
    %581 = vector.shape_cast %580 : vector<1x16x128xf32> to vector<16x128xf32>
    %582 = vector.broadcast %467 : f32 to vector<16x128xf32>
    %583 = arith.mulf %582, %581 : vector<16x128xf32>
    %584 = arith.addf %579, %583 : vector<16x128xf32>
    %c2_290 = arith.constant 2 : index
    %c2_291 = arith.constant 2 : index
    %c0_292 = arith.constant 0 : index
    %585 = vector.load %arg3[%c2_290, %c2_291, %c0_292] : memref<4x24x128xf32, #tpu.memory_space<vmem>>, vector<1x16x128xf32>
    %586 = vector.shape_cast %585 : vector<1x16x128xf32> to vector<16x128xf32>
    %587 = vector.broadcast %468 : f32 to vector<16x128xf32>
    %588 = arith.mulf %587, %586 : vector<16x128xf32>
    %589 = arith.addf %584, %588 : vector<16x128xf32>
    %c2_293 = arith.constant 2 : index
    %c3_294 = arith.constant 3 : index
    %c0_295 = arith.constant 0 : index
    %590 = vector.load %arg3[%c2_293, %c3_294, %c0_295] : memref<4x24x128xf32, #tpu.memory_space<vmem>>, vector<1x16x128xf32>
    %591 = vector.shape_cast %590 : vector<1x16x128xf32> to vector<16x128xf32>
    %592 = vector.broadcast %469 : f32 to vector<16x128xf32>
    %593 = arith.mulf %592, %591 : vector<16x128xf32>
    %594 = arith.addf %589, %593 : vector<16x128xf32>
    %c2_296 = arith.constant 2 : index
    %c4_297 = arith.constant 4 : index
    %c0_298 = arith.constant 0 : index
    %595 = vector.load %arg3[%c2_296, %c4_297, %c0_298] : memref<4x24x128xf32, #tpu.memory_space<vmem>>, vector<1x16x128xf32>
    %596 = vector.shape_cast %595 : vector<1x16x128xf32> to vector<16x128xf32>
    %597 = vector.broadcast %470 : f32 to vector<16x128xf32>
    %598 = arith.mulf %597, %596 : vector<16x128xf32>
    %599 = arith.addf %594, %598 : vector<16x128xf32>
    %c2_299 = arith.constant 2 : index
    %c5_300 = arith.constant 5 : index
    %c0_301 = arith.constant 0 : index
    %600 = vector.load %arg3[%c2_299, %c5_300, %c0_301] : memref<4x24x128xf32, #tpu.memory_space<vmem>>, vector<1x16x128xf32>
    %601 = vector.shape_cast %600 : vector<1x16x128xf32> to vector<16x128xf32>
    %602 = vector.broadcast %471 : f32 to vector<16x128xf32>
    %603 = arith.mulf %602, %601 : vector<16x128xf32>
    %604 = arith.addf %599, %603 : vector<16x128xf32>
    %c2_302 = arith.constant 2 : index
    %c6_303 = arith.constant 6 : index
    %c0_304 = arith.constant 0 : index
    %605 = vector.load %arg3[%c2_302, %c6_303, %c0_304] : memref<4x24x128xf32, #tpu.memory_space<vmem>>, vector<1x16x128xf32>
    %606 = vector.shape_cast %605 : vector<1x16x128xf32> to vector<16x128xf32>
    %607 = vector.broadcast %472 : f32 to vector<16x128xf32>
    %608 = arith.mulf %607, %606 : vector<16x128xf32>
    %609 = arith.addf %604, %608 : vector<16x128xf32>
    %c2_305 = arith.constant 2 : index
    %c7_306 = arith.constant 7 : index
    %c0_307 = arith.constant 0 : index
    %610 = vector.load %arg3[%c2_305, %c7_306, %c0_307] : memref<4x24x128xf32, #tpu.memory_space<vmem>>, vector<1x16x128xf32>
    %611 = vector.shape_cast %610 : vector<1x16x128xf32> to vector<16x128xf32>
    %612 = vector.broadcast %473 : f32 to vector<16x128xf32>
    %613 = arith.mulf %612, %611 : vector<16x128xf32>
    %614 = arith.addf %609, %613 : vector<16x128xf32>
    %c2_308 = arith.constant 2 : index
    %c8_309 = arith.constant 8 : index
    %c0_310 = arith.constant 0 : index
    %615 = vector.load %arg3[%c2_308, %c8_309, %c0_310] : memref<4x24x128xf32, #tpu.memory_space<vmem>>, vector<1x16x128xf32>
    %616 = vector.shape_cast %615 : vector<1x16x128xf32> to vector<16x128xf32>
    %617 = vector.broadcast %474 : f32 to vector<16x128xf32>
    %618 = arith.mulf %617, %616 : vector<16x128xf32>
    %619 = arith.addf %614, %618 : vector<16x128xf32>
    %c3_311 = arith.constant 3 : index
    %c0_312 = arith.constant 0 : index
    %c0_313 = arith.constant 0 : index
    %620 = vector.load %arg3[%c3_311, %c0_312, %c0_313] : memref<4x24x128xf32, #tpu.memory_space<vmem>>, vector<1x16x128xf32>
    %621 = vector.shape_cast %620 : vector<1x16x128xf32> to vector<16x128xf32>
    %622 = vector.broadcast %475 : f32 to vector<16x128xf32>
    %623 = arith.mulf %622, %621 : vector<16x128xf32>
    %624 = arith.addf %619, %623 : vector<16x128xf32>
    %c3_314 = arith.constant 3 : index
    %c1_315 = arith.constant 1 : index
    %c0_316 = arith.constant 0 : index
    %625 = vector.load %arg3[%c3_314, %c1_315, %c0_316] : memref<4x24x128xf32, #tpu.memory_space<vmem>>, vector<1x16x128xf32>
    %626 = vector.shape_cast %625 : vector<1x16x128xf32> to vector<16x128xf32>
    %627 = vector.broadcast %476 : f32 to vector<16x128xf32>
    %628 = arith.mulf %627, %626 : vector<16x128xf32>
    %629 = arith.addf %624, %628 : vector<16x128xf32>
    %c3_317 = arith.constant 3 : index
    %c2_318 = arith.constant 2 : index
    %c0_319 = arith.constant 0 : index
    %630 = vector.load %arg3[%c3_317, %c2_318, %c0_319] : memref<4x24x128xf32, #tpu.memory_space<vmem>>, vector<1x16x128xf32>
    %631 = vector.shape_cast %630 : vector<1x16x128xf32> to vector<16x128xf32>
    %632 = vector.broadcast %477 : f32 to vector<16x128xf32>
    %633 = arith.mulf %632, %631 : vector<16x128xf32>
    %634 = arith.addf %629, %633 : vector<16x128xf32>
    %c3_320 = arith.constant 3 : index
    %c3_321 = arith.constant 3 : index
    %c0_322 = arith.constant 0 : index
    %635 = vector.load %arg3[%c3_320, %c3_321, %c0_322] : memref<4x24x128xf32, #tpu.memory_space<vmem>>, vector<1x16x128xf32>
    %636 = vector.shape_cast %635 : vector<1x16x128xf32> to vector<16x128xf32>
    %637 = vector.broadcast %478 : f32 to vector<16x128xf32>
    %638 = arith.mulf %637, %636 : vector<16x128xf32>
    %639 = arith.addf %634, %638 : vector<16x128xf32>
    %c3_323 = arith.constant 3 : index
    %c4_324 = arith.constant 4 : index
    %c0_325 = arith.constant 0 : index
    %640 = vector.load %arg3[%c3_323, %c4_324, %c0_325] : memref<4x24x128xf32, #tpu.memory_space<vmem>>, vector<1x16x128xf32>
    %641 = vector.shape_cast %640 : vector<1x16x128xf32> to vector<16x128xf32>
    %642 = vector.broadcast %479 : f32 to vector<16x128xf32>
    %643 = arith.mulf %642, %641 : vector<16x128xf32>
    %644 = arith.addf %639, %643 : vector<16x128xf32>
    %c3_326 = arith.constant 3 : index
    %c5_327 = arith.constant 5 : index
    %c0_328 = arith.constant 0 : index
    %645 = vector.load %arg3[%c3_326, %c5_327, %c0_328] : memref<4x24x128xf32, #tpu.memory_space<vmem>>, vector<1x16x128xf32>
    %646 = vector.shape_cast %645 : vector<1x16x128xf32> to vector<16x128xf32>
    %647 = vector.broadcast %480 : f32 to vector<16x128xf32>
    %648 = arith.mulf %647, %646 : vector<16x128xf32>
    %649 = arith.addf %644, %648 : vector<16x128xf32>
    %c3_329 = arith.constant 3 : index
    %c6_330 = arith.constant 6 : index
    %c0_331 = arith.constant 0 : index
    %650 = vector.load %arg3[%c3_329, %c6_330, %c0_331] : memref<4x24x128xf32, #tpu.memory_space<vmem>>, vector<1x16x128xf32>
    %651 = vector.shape_cast %650 : vector<1x16x128xf32> to vector<16x128xf32>
    %652 = vector.broadcast %481 : f32 to vector<16x128xf32>
    %653 = arith.mulf %652, %651 : vector<16x128xf32>
    %654 = arith.addf %649, %653 : vector<16x128xf32>
    %c3_332 = arith.constant 3 : index
    %c7_333 = arith.constant 7 : index
    %c0_334 = arith.constant 0 : index
    %655 = vector.load %arg3[%c3_332, %c7_333, %c0_334] : memref<4x24x128xf32, #tpu.memory_space<vmem>>, vector<1x16x128xf32>
    %656 = vector.shape_cast %655 : vector<1x16x128xf32> to vector<16x128xf32>
    %657 = vector.broadcast %482 : f32 to vector<16x128xf32>
    %658 = arith.mulf %657, %656 : vector<16x128xf32>
    %659 = arith.addf %654, %658 : vector<16x128xf32>
    %c3_335 = arith.constant 3 : index
    %c8_336 = arith.constant 8 : index
    %c0_337 = arith.constant 0 : index
    %660 = vector.load %arg3[%c3_335, %c8_336, %c0_337] : memref<4x24x128xf32, #tpu.memory_space<vmem>>, vector<1x16x128xf32>
    %661 = vector.shape_cast %660 : vector<1x16x128xf32> to vector<16x128xf32>
    %662 = vector.broadcast %483 : f32 to vector<16x128xf32>
    %663 = arith.mulf %662, %661 : vector<16x128xf32>
    %664 = arith.addf %659, %663 : vector<16x128xf32>
    %c2_338 = arith.constant 2 : index
    %c0_339 = arith.constant 0 : index
    %c0_340 = arith.constant 0 : index
    %665 = vector.load %arg4[%c2_338, %c0_339, %c0_340] : memref<8x16x128xf32, #tpu.memory_space<vmem>>, vector<1x16x128xf32>
    %666 = vector.shape_cast %665 : vector<1x16x128xf32> to vector<16x128xf32>
    %667 = vector.shape_cast %664 : vector<16x128xf32> to vector<1x16x128xf32>
    tpu.vector_store %arg4[%c2_338, %c0_339, %c0_340], %667 {strides = array<i32>} : memref<8x16x128xf32, #tpu.memory_space<vmem>>, vector<1x16x128xf32>,
    %c108 = arith.constant 108 : index
    %668 = memref.load %arg1[%c108] : memref<288xf32, #tpu.memory_space<smem>>
    %c109 = arith.constant 109 : index
    %669 = memref.load %arg1[%c109] : memref<288xf32, #tpu.memory_space<smem>>
    %c110 = arith.constant 110 : index
    %670 = memref.load %arg1[%c110] : memref<288xf32, #tpu.memory_space<smem>>
    %c111 = arith.constant 111 : index
    %671 = memref.load %arg1[%c111] : memref<288xf32, #tpu.memory_space<smem>>
    %c112 = arith.constant 112 : index
    %672 = memref.load %arg1[%c112] : memref<288xf32, #tpu.memory_space<smem>>
    %c113 = arith.constant 113 : index
    %673 = memref.load %arg1[%c113] : memref<288xf32, #tpu.memory_space<smem>>
    %c114 = arith.constant 114 : index
    %674 = memref.load %arg1[%c114] : memref<288xf32, #tpu.memory_space<smem>>
    %c115 = arith.constant 115 : index
    %675 = memref.load %arg1[%c115] : memref<288xf32, #tpu.memory_space<smem>>
    %c116 = arith.constant 116 : index
    %676 = memref.load %arg1[%c116] : memref<288xf32, #tpu.memory_space<smem>>
    %c117 = arith.constant 117 : index
    %677 = memref.load %arg1[%c117] : memref<288xf32, #tpu.memory_space<smem>>
    %c118 = arith.constant 118 : index
    %678 = memref.load %arg1[%c118] : memref<288xf32, #tpu.memory_space<smem>>
    %c119 = arith.constant 119 : index
    %679 = memref.load %arg1[%c119] : memref<288xf32, #tpu.memory_space<smem>>
    %c120 = arith.constant 120 : index
    %680 = memref.load %arg1[%c120] : memref<288xf32, #tpu.memory_space<smem>>
    %c121 = arith.constant 121 : index
    %681 = memref.load %arg1[%c121] : memref<288xf32, #tpu.memory_space<smem>>
    %c122 = arith.constant 122 : index
    %682 = memref.load %arg1[%c122] : memref<288xf32, #tpu.memory_space<smem>>
    %c123 = arith.constant 123 : index
    %683 = memref.load %arg1[%c123] : memref<288xf32, #tpu.memory_space<smem>>
    %c124 = arith.constant 124 : index
    %684 = memref.load %arg1[%c124] : memref<288xf32, #tpu.memory_space<smem>>
    %c125 = arith.constant 125 : index
    %685 = memref.load %arg1[%c125] : memref<288xf32, #tpu.memory_space<smem>>
    %c126 = arith.constant 126 : index
    %686 = memref.load %arg1[%c126] : memref<288xf32, #tpu.memory_space<smem>>
    %c127 = arith.constant 127 : index
    %687 = memref.load %arg1[%c127] : memref<288xf32, #tpu.memory_space<smem>>
    %c128 = arith.constant 128 : index
    %688 = memref.load %arg1[%c128] : memref<288xf32, #tpu.memory_space<smem>>
    %c129 = arith.constant 129 : index
    %689 = memref.load %arg1[%c129] : memref<288xf32, #tpu.memory_space<smem>>
    %c130 = arith.constant 130 : index
    %690 = memref.load %arg1[%c130] : memref<288xf32, #tpu.memory_space<smem>>
    %c131 = arith.constant 131 : index
    %691 = memref.load %arg1[%c131] : memref<288xf32, #tpu.memory_space<smem>>
    %c132 = arith.constant 132 : index
    %692 = memref.load %arg1[%c132] : memref<288xf32, #tpu.memory_space<smem>>
    %c133 = arith.constant 133 : index
    %693 = memref.load %arg1[%c133] : memref<288xf32, #tpu.memory_space<smem>>
    %c134 = arith.constant 134 : index
    %694 = memref.load %arg1[%c134] : memref<288xf32, #tpu.memory_space<smem>>
    %c135 = arith.constant 135 : index
    %695 = memref.load %arg1[%c135] : memref<288xf32, #tpu.memory_space<smem>>
    %c136 = arith.constant 136 : index
    %696 = memref.load %arg1[%c136] : memref<288xf32, #tpu.memory_space<smem>>
    %c137 = arith.constant 137 : index
    %697 = memref.load %arg1[%c137] : memref<288xf32, #tpu.memory_space<smem>>
    %c138 = arith.constant 138 : index
    %698 = memref.load %arg1[%c138] : memref<288xf32, #tpu.memory_space<smem>>
    %c139 = arith.constant 139 : index
    %699 = memref.load %arg1[%c139] : memref<288xf32, #tpu.memory_space<smem>>
    %c140 = arith.constant 140 : index
    %700 = memref.load %arg1[%c140] : memref<288xf32, #tpu.memory_space<smem>>
    %c141 = arith.constant 141 : index
    %701 = memref.load %arg1[%c141] : memref<288xf32, #tpu.memory_space<smem>>
    %c142 = arith.constant 142 : index
    %702 = memref.load %arg1[%c142] : memref<288xf32, #tpu.memory_space<smem>>
    %c143 = arith.constant 143 : index
    %703 = memref.load %arg1[%c143] : memref<288xf32, #tpu.memory_space<smem>>
    %704 = vector.broadcast %3 : f32 to vector<16x128xf32>
    %c0_341 = arith.constant 0 : index
    %c0_342 = arith.constant 0 : index
    %c0_343 = arith.constant 0 : index
    %705 = vector.load %arg3[%c0_341, %c0_342, %c0_343] : memref<4x24x128xf32, #tpu.memory_space<vmem>>, vector<1x16x128xf32>
    %706 = vector.shape_cast %705 : vector<1x16x128xf32> to vector<16x128xf32>
    %707 = vector.broadcast %668 : f32 to vector<16x128xf32>
    %708 = arith.mulf %707, %706 : vector<16x128xf32>
    %709 = arith.addf %704, %708 : vector<16x128xf32>
    %c0_344 = arith.constant 0 : index
    %c1_345 = arith.constant 1 : index
    %c0_346 = arith.constant 0 : index
    %710 = vector.load %arg3[%c0_344, %c1_345, %c0_346] : memref<4x24x128xf32, #tpu.memory_space<vmem>>, vector<1x16x128xf32>
    %711 = vector.shape_cast %710 : vector<1x16x128xf32> to vector<16x128xf32>
    %712 = vector.broadcast %669 : f32 to vector<16x128xf32>
    %713 = arith.mulf %712, %711 : vector<16x128xf32>
    %714 = arith.addf %709, %713 : vector<16x128xf32>
    %c0_347 = arith.constant 0 : index
    %c2_348 = arith.constant 2 : index
    %c0_349 = arith.constant 0 : index
    %715 = vector.load %arg3[%c0_347, %c2_348, %c0_349] : memref<4x24x128xf32, #tpu.memory_space<vmem>>, vector<1x16x128xf32>
    %716 = vector.shape_cast %715 : vector<1x16x128xf32> to vector<16x128xf32>
    %717 = vector.broadcast %670 : f32 to vector<16x128xf32>
    %718 = arith.mulf %717, %716 : vector<16x128xf32>
    %719 = arith.addf %714, %718 : vector<16x128xf32>
    %c0_350 = arith.constant 0 : index
    %c3_351 = arith.constant 3 : index
    %c0_352 = arith.constant 0 : index
    %720 = vector.load %arg3[%c0_350, %c3_351, %c0_352] : memref<4x24x128xf32, #tpu.memory_space<vmem>>, vector<1x16x128xf32>
    %721 = vector.shape_cast %720 : vector<1x16x128xf32> to vector<16x128xf32>
    %722 = vector.broadcast %671 : f32 to vector<16x128xf32>
    %723 = arith.mulf %722, %721 : vector<16x128xf32>
    %724 = arith.addf %719, %723 : vector<16x128xf32>
    %c0_353 = arith.constant 0 : index
    %c4_354 = arith.constant 4 : index
    %c0_355 = arith.constant 0 : index
    %725 = vector.load %arg3[%c0_353, %c4_354, %c0_355] : memref<4x24x128xf32, #tpu.memory_space<vmem>>, vector<1x16x128xf32>
    %726 = vector.shape_cast %725 : vector<1x16x128xf32> to vector<16x128xf32>
    %727 = vector.broadcast %672 : f32 to vector<16x128xf32>
    %728 = arith.mulf %727, %726 : vector<16x128xf32>
    %729 = arith.addf %724, %728 : vector<16x128xf32>
    %c0_356 = arith.constant 0 : index
    %c5_357 = arith.constant 5 : index
    %c0_358 = arith.constant 0 : index
    %730 = vector.load %arg3[%c0_356, %c5_357, %c0_358] : memref<4x24x128xf32, #tpu.memory_space<vmem>>, vector<1x16x128xf32>
    %731 = vector.shape_cast %730 : vector<1x16x128xf32> to vector<16x128xf32>
    %732 = vector.broadcast %673 : f32 to vector<16x128xf32>
    %733 = arith.mulf %732, %731 : vector<16x128xf32>
    %734 = arith.addf %729, %733 : vector<16x128xf32>
    %c0_359 = arith.constant 0 : index
    %c6_360 = arith.constant 6 : index
    %c0_361 = arith.constant 0 : index
    %735 = vector.load %arg3[%c0_359, %c6_360, %c0_361] : memref<4x24x128xf32, #tpu.memory_space<vmem>>, vector<1x16x128xf32>
    %736 = vector.shape_cast %735 : vector<1x16x128xf32> to vector<16x128xf32>
    %737 = vector.broadcast %674 : f32 to vector<16x128xf32>
    %738 = arith.mulf %737, %736 : vector<16x128xf32>
    %739 = arith.addf %734, %738 : vector<16x128xf32>
    %c0_362 = arith.constant 0 : index
    %c7_363 = arith.constant 7 : index
    %c0_364 = arith.constant 0 : index
    %740 = vector.load %arg3[%c0_362, %c7_363, %c0_364] : memref<4x24x128xf32, #tpu.memory_space<vmem>>, vector<1x16x128xf32>
    %741 = vector.shape_cast %740 : vector<1x16x128xf32> to vector<16x128xf32>
    %742 = vector.broadcast %675 : f32 to vector<16x128xf32>
    %743 = arith.mulf %742, %741 : vector<16x128xf32>
    %744 = arith.addf %739, %743 : vector<16x128xf32>
    %c0_365 = arith.constant 0 : index
    %c8_366 = arith.constant 8 : index
    %c0_367 = arith.constant 0 : index
    %745 = vector.load %arg3[%c0_365, %c8_366, %c0_367] : memref<4x24x128xf32, #tpu.memory_space<vmem>>, vector<1x16x128xf32>
    %746 = vector.shape_cast %745 : vector<1x16x128xf32> to vector<16x128xf32>
    %747 = vector.broadcast %676 : f32 to vector<16x128xf32>
    %748 = arith.mulf %747, %746 : vector<16x128xf32>
    %749 = arith.addf %744, %748 : vector<16x128xf32>
    %c1_368 = arith.constant 1 : index
    %c0_369 = arith.constant 0 : index
    %c0_370 = arith.constant 0 : index
    %750 = vector.load %arg3[%c1_368, %c0_369, %c0_370] : memref<4x24x128xf32, #tpu.memory_space<vmem>>, vector<1x16x128xf32>
    %751 = vector.shape_cast %750 : vector<1x16x128xf32> to vector<16x128xf32>
    %752 = vector.broadcast %677 : f32 to vector<16x128xf32>
    %753 = arith.mulf %752, %751 : vector<16x128xf32>
    %754 = arith.addf %749, %753 : vector<16x128xf32>
    %c1_371 = arith.constant 1 : index
    %c1_372 = arith.constant 1 : index
    %c0_373 = arith.constant 0 : index
    %755 = vector.load %arg3[%c1_371, %c1_372, %c0_373] : memref<4x24x128xf32, #tpu.memory_space<vmem>>, vector<1x16x128xf32>
    %756 = vector.shape_cast %755 : vector<1x16x128xf32> to vector<16x128xf32>
    %757 = vector.broadcast %678 : f32 to vector<16x128xf32>
    %758 = arith.mulf %757, %756 : vector<16x128xf32>
    %759 = arith.addf %754, %758 : vector<16x128xf32>
    %c1_374 = arith.constant 1 : index
    %c2_375 = arith.constant 2 : index
    %c0_376 = arith.constant 0 : index
    %760 = vector.load %arg3[%c1_374, %c2_375, %c0_376] : memref<4x24x128xf32, #tpu.memory_space<vmem>>, vector<1x16x128xf32>
    %761 = vector.shape_cast %760 : vector<1x16x128xf32> to vector<16x128xf32>
    %762 = vector.broadcast %679 : f32 to vector<16x128xf32>
    %763 = arith.mulf %762, %761 : vector<16x128xf32>
    %764 = arith.addf %759, %763 : vector<16x128xf32>
    %c1_377 = arith.constant 1 : index
    %c3_378 = arith.constant 3 : index
    %c0_379 = arith.constant 0 : index
    %765 = vector.load %arg3[%c1_377, %c3_378, %c0_379] : memref<4x24x128xf32, #tpu.memory_space<vmem>>, vector<1x16x128xf32>
    %766 = vector.shape_cast %765 : vector<1x16x128xf32> to vector<16x128xf32>
    %767 = vector.broadcast %680 : f32 to vector<16x128xf32>
    %768 = arith.mulf %767, %766 : vector<16x128xf32>
    %769 = arith.addf %764, %768 : vector<16x128xf32>
    %c1_380 = arith.constant 1 : index
    %c4_381 = arith.constant 4 : index
    %c0_382 = arith.constant 0 : index
    %770 = vector.load %arg3[%c1_380, %c4_381, %c0_382] : memref<4x24x128xf32, #tpu.memory_space<vmem>>, vector<1x16x128xf32>
    %771 = vector.shape_cast %770 : vector<1x16x128xf32> to vector<16x128xf32>
    %772 = vector.broadcast %681 : f32 to vector<16x128xf32>
    %773 = arith.mulf %772, %771 : vector<16x128xf32>
    %774 = arith.addf %769, %773 : vector<16x128xf32>
    %c1_383 = arith.constant 1 : index
    %c5_384 = arith.constant 5 : index
    %c0_385 = arith.constant 0 : index
    %775 = vector.load %arg3[%c1_383, %c5_384, %c0_385] : memref<4x24x128xf32, #tpu.memory_space<vmem>>, vector<1x16x128xf32>
    %776 = vector.shape_cast %775 : vector<1x16x128xf32> to vector<16x128xf32>
    %777 = vector.broadcast %682 : f32 to vector<16x128xf32>
    %778 = arith.mulf %777, %776 : vector<16x128xf32>
    %779 = arith.addf %774, %778 : vector<16x128xf32>
    %c1_386 = arith.constant 1 : index
    %c6_387 = arith.constant 6 : index
    %c0_388 = arith.constant 0 : index
    %780 = vector.load %arg3[%c1_386, %c6_387, %c0_388] : memref<4x24x128xf32, #tpu.memory_space<vmem>>, vector<1x16x128xf32>
    %781 = vector.shape_cast %780 : vector<1x16x128xf32> to vector<16x128xf32>
    %782 = vector.broadcast %683 : f32 to vector<16x128xf32>
    %783 = arith.mulf %782, %781 : vector<16x128xf32>
    %784 = arith.addf %779, %783 : vector<16x128xf32>
    %c1_389 = arith.constant 1 : index
    %c7_390 = arith.constant 7 : index
    %c0_391 = arith.constant 0 : index
    %785 = vector.load %arg3[%c1_389, %c7_390, %c0_391] : memref<4x24x128xf32, #tpu.memory_space<vmem>>, vector<1x16x128xf32>
    %786 = vector.shape_cast %785 : vector<1x16x128xf32> to vector<16x128xf32>
    %787 = vector.broadcast %684 : f32 to vector<16x128xf32>
    %788 = arith.mulf %787, %786 : vector<16x128xf32>
    %789 = arith.addf %784, %788 : vector<16x128xf32>
    %c1_392 = arith.constant 1 : index
    %c8_393 = arith.constant 8 : index
    %c0_394 = arith.constant 0 : index
    %790 = vector.load %arg3[%c1_392, %c8_393, %c0_394] : memref<4x24x128xf32, #tpu.memory_space<vmem>>, vector<1x16x128xf32>
    %791 = vector.shape_cast %790 : vector<1x16x128xf32> to vector<16x128xf32>
    %792 = vector.broadcast %685 : f32 to vector<16x128xf32>
    %793 = arith.mulf %792, %791 : vector<16x128xf32>
    %794 = arith.addf %789, %793 : vector<16x128xf32>
    %c2_395 = arith.constant 2 : index
    %c0_396 = arith.constant 0 : index
    %c0_397 = arith.constant 0 : index
    %795 = vector.load %arg3[%c2_395, %c0_396, %c0_397] : memref<4x24x128xf32, #tpu.memory_space<vmem>>, vector<1x16x128xf32>
    %796 = vector.shape_cast %795 : vector<1x16x128xf32> to vector<16x128xf32>
    %797 = vector.broadcast %686 : f32 to vector<16x128xf32>
    %798 = arith.mulf %797, %796 : vector<16x128xf32>
    %799 = arith.addf %794, %798 : vector<16x128xf32>
    %c2_398 = arith.constant 2 : index
    %c1_399 = arith.constant 1 : index
    %c0_400 = arith.constant 0 : index
    %800 = vector.load %arg3[%c2_398, %c1_399, %c0_400] : memref<4x24x128xf32, #tpu.memory_space<vmem>>, vector<1x16x128xf32>
    %801 = vector.shape_cast %800 : vector<1x16x128xf32> to vector<16x128xf32>
    %802 = vector.broadcast %687 : f32 to vector<16x128xf32>
    %803 = arith.mulf %802, %801 : vector<16x128xf32>
    %804 = arith.addf %799, %803 : vector<16x128xf32>
    %c2_401 = arith.constant 2 : index
    %c2_402 = arith.constant 2 : index
    %c0_403 = arith.constant 0 : index
    %805 = vector.load %arg3[%c2_401, %c2_402, %c0_403] : memref<4x24x128xf32, #tpu.memory_space<vmem>>, vector<1x16x128xf32>
    %806 = vector.shape_cast %805 : vector<1x16x128xf32> to vector<16x128xf32>
    %807 = vector.broadcast %688 : f32 to vector<16x128xf32>
    %808 = arith.mulf %807, %806 : vector<16x128xf32>
    %809 = arith.addf %804, %808 : vector<16x128xf32>
    %c2_404 = arith.constant 2 : index
    %c3_405 = arith.constant 3 : index
    %c0_406 = arith.constant 0 : index
    %810 = vector.load %arg3[%c2_404, %c3_405, %c0_406] : memref<4x24x128xf32, #tpu.memory_space<vmem>>, vector<1x16x128xf32>
    %811 = vector.shape_cast %810 : vector<1x16x128xf32> to vector<16x128xf32>
    %812 = vector.broadcast %689 : f32 to vector<16x128xf32>
    %813 = arith.mulf %812, %811 : vector<16x128xf32>
    %814 = arith.addf %809, %813 : vector<16x128xf32>
    %c2_407 = arith.constant 2 : index
    %c4_408 = arith.constant 4 : index
    %c0_409 = arith.constant 0 : index
    %815 = vector.load %arg3[%c2_407, %c4_408, %c0_409] : memref<4x24x128xf32, #tpu.memory_space<vmem>>, vector<1x16x128xf32>
    %816 = vector.shape_cast %815 : vector<1x16x128xf32> to vector<16x128xf32>
    %817 = vector.broadcast %690 : f32 to vector<16x128xf32>
    %818 = arith.mulf %817, %816 : vector<16x128xf32>
    %819 = arith.addf %814, %818 : vector<16x128xf32>
    %c2_410 = arith.constant 2 : index
    %c5_411 = arith.constant 5 : index
    %c0_412 = arith.constant 0 : index
    %820 = vector.load %arg3[%c2_410, %c5_411, %c0_412] : memref<4x24x128xf32, #tpu.memory_space<vmem>>, vector<1x16x128xf32>
    %821 = vector.shape_cast %820 : vector<1x16x128xf32> to vector<16x128xf32>
    %822 = vector.broadcast %691 : f32 to vector<16x128xf32>
    %823 = arith.mulf %822, %821 : vector<16x128xf32>
    %824 = arith.addf %819, %823 : vector<16x128xf32>
    %c2_413 = arith.constant 2 : index
    %c6_414 = arith.constant 6 : index
    %c0_415 = arith.constant 0 : index
    %825 = vector.load %arg3[%c2_413, %c6_414, %c0_415] : memref<4x24x128xf32, #tpu.memory_space<vmem>>, vector<1x16x128xf32>
    %826 = vector.shape_cast %825 : vector<1x16x128xf32> to vector<16x128xf32>
    %827 = vector.broadcast %692 : f32 to vector<16x128xf32>
    %828 = arith.mulf %827, %826 : vector<16x128xf32>
    %829 = arith.addf %824, %828 : vector<16x128xf32>
    %c2_416 = arith.constant 2 : index
    %c7_417 = arith.constant 7 : index
    %c0_418 = arith.constant 0 : index
    %830 = vector.load %arg3[%c2_416, %c7_417, %c0_418] : memref<4x24x128xf32, #tpu.memory_space<vmem>>, vector<1x16x128xf32>
    %831 = vector.shape_cast %830 : vector<1x16x128xf32> to vector<16x128xf32>
    %832 = vector.broadcast %693 : f32 to vector<16x128xf32>
    %833 = arith.mulf %832, %831 : vector<16x128xf32>
    %834 = arith.addf %829, %833 : vector<16x128xf32>
    %c2_419 = arith.constant 2 : index
    %c8_420 = arith.constant 8 : index
    %c0_421 = arith.constant 0 : index
    %835 = vector.load %arg3[%c2_419, %c8_420, %c0_421] : memref<4x24x128xf32, #tpu.memory_space<vmem>>, vector<1x16x128xf32>
    %836 = vector.shape_cast %835 : vector<1x16x128xf32> to vector<16x128xf32>
    %837 = vector.broadcast %694 : f32 to vector<16x128xf32>
    %838 = arith.mulf %837, %836 : vector<16x128xf32>
    %839 = arith.addf %834, %838 : vector<16x128xf32>
    %c3_422 = arith.constant 3 : index
    %c0_423 = arith.constant 0 : index
    %c0_424 = arith.constant 0 : index
    %840 = vector.load %arg3[%c3_422, %c0_423, %c0_424] : memref<4x24x128xf32, #tpu.memory_space<vmem>>, vector<1x16x128xf32>
    %841 = vector.shape_cast %840 : vector<1x16x128xf32> to vector<16x128xf32>
    %842 = vector.broadcast %695 : f32 to vector<16x128xf32>
    %843 = arith.mulf %842, %841 : vector<16x128xf32>
    %844 = arith.addf %839, %843 : vector<16x128xf32>
    %c3_425 = arith.constant 3 : index
    %c1_426 = arith.constant 1 : index
    %c0_427 = arith.constant 0 : index
    %845 = vector.load %arg3[%c3_425, %c1_426, %c0_427] : memref<4x24x128xf32, #tpu.memory_space<vmem>>, vector<1x16x128xf32>
    %846 = vector.shape_cast %845 : vector<1x16x128xf32> to vector<16x128xf32>
    %847 = vector.broadcast %696 : f32 to vector<16x128xf32>
    %848 = arith.mulf %847, %846 : vector<16x128xf32>
    %849 = arith.addf %844, %848 : vector<16x128xf32>
    %c3_428 = arith.constant 3 : index
    %c2_429 = arith.constant 2 : index
    %c0_430 = arith.constant 0 : index
    %850 = vector.load %arg3[%c3_428, %c2_429, %c0_430] : memref<4x24x128xf32, #tpu.memory_space<vmem>>, vector<1x16x128xf32>
    %851 = vector.shape_cast %850 : vector<1x16x128xf32> to vector<16x128xf32>
    %852 = vector.broadcast %697 : f32 to vector<16x128xf32>
    %853 = arith.mulf %852, %851 : vector<16x128xf32>
    %854 = arith.addf %849, %853 : vector<16x128xf32>
    %c3_431 = arith.constant 3 : index
    %c3_432 = arith.constant 3 : index
    %c0_433 = arith.constant 0 : index
    %855 = vector.load %arg3[%c3_431, %c3_432, %c0_433] : memref<4x24x128xf32, #tpu.memory_space<vmem>>, vector<1x16x128xf32>
    %856 = vector.shape_cast %855 : vector<1x16x128xf32> to vector<16x128xf32>
    %857 = vector.broadcast %698 : f32 to vector<16x128xf32>
    %858 = arith.mulf %857, %856 : vector<16x128xf32>
    %859 = arith.addf %854, %858 : vector<16x128xf32>
    %c3_434 = arith.constant 3 : index
    %c4_435 = arith.constant 4 : index
    %c0_436 = arith.constant 0 : index
    %860 = vector.load %arg3[%c3_434, %c4_435, %c0_436] : memref<4x24x128xf32, #tpu.memory_space<vmem>>, vector<1x16x128xf32>
    %861 = vector.shape_cast %860 : vector<1x16x128xf32> to vector<16x128xf32>
    %862 = vector.broadcast %699 : f32 to vector<16x128xf32>
    %863 = arith.mulf %862, %861 : vector<16x128xf32>
    %864 = arith.addf %859, %863 : vector<16x128xf32>
    %c3_437 = arith.constant 3 : index
    %c5_438 = arith.constant 5 : index
    %c0_439 = arith.constant 0 : index
    %865 = vector.load %arg3[%c3_437, %c5_438, %c0_439] : memref<4x24x128xf32, #tpu.memory_space<vmem>>, vector<1x16x128xf32>
    %866 = vector.shape_cast %865 : vector<1x16x128xf32> to vector<16x128xf32>
    %867 = vector.broadcast %700 : f32 to vector<16x128xf32>
    %868 = arith.mulf %867, %866 : vector<16x128xf32>
    %869 = arith.addf %864, %868 : vector<16x128xf32>
    %c3_440 = arith.constant 3 : index
    %c6_441 = arith.constant 6 : index
    %c0_442 = arith.constant 0 : index
    %870 = vector.load %arg3[%c3_440, %c6_441, %c0_442] : memref<4x24x128xf32, #tpu.memory_space<vmem>>, vector<1x16x128xf32>
    %871 = vector.shape_cast %870 : vector<1x16x128xf32> to vector<16x128xf32>
    %872 = vector.broadcast %701 : f32 to vector<16x128xf32>
    %873 = arith.mulf %872, %871 : vector<16x128xf32>
    %874 = arith.addf %869, %873 : vector<16x128xf32>
    %c3_443 = arith.constant 3 : index
    %c7_444 = arith.constant 7 : index
    %c0_445 = arith.constant 0 : index
    %875 = vector.load %arg3[%c3_443, %c7_444, %c0_445] : memref<4x24x128xf32, #tpu.memory_space<vmem>>, vector<1x16x128xf32>
    %876 = vector.shape_cast %875 : vector<1x16x128xf32> to vector<16x128xf32>
    %877 = vector.broadcast %702 : f32 to vector<16x128xf32>
    %878 = arith.mulf %877, %876 : vector<16x128xf32>
    %879 = arith.addf %874, %878 : vector<16x128xf32>
    %c3_446 = arith.constant 3 : index
    %c8_447 = arith.constant 8 : index
    %c0_448 = arith.constant 0 : index
    %880 = vector.load %arg3[%c3_446, %c8_447, %c0_448] : memref<4x24x128xf32, #tpu.memory_space<vmem>>, vector<1x16x128xf32>
    %881 = vector.shape_cast %880 : vector<1x16x128xf32> to vector<16x128xf32>
    %882 = vector.broadcast %703 : f32 to vector<16x128xf32>
    %883 = arith.mulf %882, %881 : vector<16x128xf32>
    %884 = arith.addf %879, %883 : vector<16x128xf32>
    %c3_449 = arith.constant 3 : index
    %c0_450 = arith.constant 0 : index
    %c0_451 = arith.constant 0 : index
    %885 = vector.load %arg4[%c3_449, %c0_450, %c0_451] : memref<8x16x128xf32, #tpu.memory_space<vmem>>, vector<1x16x128xf32>
    %886 = vector.shape_cast %885 : vector<1x16x128xf32> to vector<16x128xf32>
    %887 = vector.shape_cast %884 : vector<16x128xf32> to vector<1x16x128xf32>
    tpu.vector_store %arg4[%c3_449, %c0_450, %c0_451], %887 {strides = array<i32>} : memref<8x16x128xf32, #tpu.memory_space<vmem>>, vector<1x16x128xf32>,
    %c144 = arith.constant 144 : index
    %888 = memref.load %arg1[%c144] : memref<288xf32, #tpu.memory_space<smem>>
    %c145 = arith.constant 145 : index
    %889 = memref.load %arg1[%c145] : memref<288xf32, #tpu.memory_space<smem>>
    %c146 = arith.constant 146 : index
    %890 = memref.load %arg1[%c146] : memref<288xf32, #tpu.memory_space<smem>>
    %c147 = arith.constant 147 : index
    %891 = memref.load %arg1[%c147] : memref<288xf32, #tpu.memory_space<smem>>
    %c148 = arith.constant 148 : index
    %892 = memref.load %arg1[%c148] : memref<288xf32, #tpu.memory_space<smem>>
    %c149 = arith.constant 149 : index
    %893 = memref.load %arg1[%c149] : memref<288xf32, #tpu.memory_space<smem>>
    %c150 = arith.constant 150 : index
    %894 = memref.load %arg1[%c150] : memref<288xf32, #tpu.memory_space<smem>>
    %c151 = arith.constant 151 : index
    %895 = memref.load %arg1[%c151] : memref<288xf32, #tpu.memory_space<smem>>
    %c152 = arith.constant 152 : index
    %896 = memref.load %arg1[%c152] : memref<288xf32, #tpu.memory_space<smem>>
    %c153 = arith.constant 153 : index
    %897 = memref.load %arg1[%c153] : memref<288xf32, #tpu.memory_space<smem>>
    %c154 = arith.constant 154 : index
    %898 = memref.load %arg1[%c154] : memref<288xf32, #tpu.memory_space<smem>>
    %c155 = arith.constant 155 : index
    %899 = memref.load %arg1[%c155] : memref<288xf32, #tpu.memory_space<smem>>
    %c156 = arith.constant 156 : index
    %900 = memref.load %arg1[%c156] : memref<288xf32, #tpu.memory_space<smem>>
    %c157 = arith.constant 157 : index
    %901 = memref.load %arg1[%c157] : memref<288xf32, #tpu.memory_space<smem>>
    %c158 = arith.constant 158 : index
    %902 = memref.load %arg1[%c158] : memref<288xf32, #tpu.memory_space<smem>>
    %c159 = arith.constant 159 : index
    %903 = memref.load %arg1[%c159] : memref<288xf32, #tpu.memory_space<smem>>
    %c160 = arith.constant 160 : index
    %904 = memref.load %arg1[%c160] : memref<288xf32, #tpu.memory_space<smem>>
    %c161 = arith.constant 161 : index
    %905 = memref.load %arg1[%c161] : memref<288xf32, #tpu.memory_space<smem>>
    %c162 = arith.constant 162 : index
    %906 = memref.load %arg1[%c162] : memref<288xf32, #tpu.memory_space<smem>>
    %c163 = arith.constant 163 : index
    %907 = memref.load %arg1[%c163] : memref<288xf32, #tpu.memory_space<smem>>
    %c164 = arith.constant 164 : index
    %908 = memref.load %arg1[%c164] : memref<288xf32, #tpu.memory_space<smem>>
    %c165 = arith.constant 165 : index
    %909 = memref.load %arg1[%c165] : memref<288xf32, #tpu.memory_space<smem>>
    %c166 = arith.constant 166 : index
    %910 = memref.load %arg1[%c166] : memref<288xf32, #tpu.memory_space<smem>>
    %c167 = arith.constant 167 : index
    %911 = memref.load %arg1[%c167] : memref<288xf32, #tpu.memory_space<smem>>
    %c168 = arith.constant 168 : index
    %912 = memref.load %arg1[%c168] : memref<288xf32, #tpu.memory_space<smem>>
    %c169 = arith.constant 169 : index
    %913 = memref.load %arg1[%c169] : memref<288xf32, #tpu.memory_space<smem>>
    %c170 = arith.constant 170 : index
    %914 = memref.load %arg1[%c170] : memref<288xf32, #tpu.memory_space<smem>>
    %c171 = arith.constant 171 : index
    %915 = memref.load %arg1[%c171] : memref<288xf32, #tpu.memory_space<smem>>
    %c172 = arith.constant 172 : index
    %916 = memref.load %arg1[%c172] : memref<288xf32, #tpu.memory_space<smem>>
    %c173 = arith.constant 173 : index
    %917 = memref.load %arg1[%c173] : memref<288xf32, #tpu.memory_space<smem>>
    %c174 = arith.constant 174 : index
    %918 = memref.load %arg1[%c174] : memref<288xf32, #tpu.memory_space<smem>>
    %c175 = arith.constant 175 : index
    %919 = memref.load %arg1[%c175] : memref<288xf32, #tpu.memory_space<smem>>
    %c176 = arith.constant 176 : index
    %920 = memref.load %arg1[%c176] : memref<288xf32, #tpu.memory_space<smem>>
    %c177 = arith.constant 177 : index
    %921 = memref.load %arg1[%c177] : memref<288xf32, #tpu.memory_space<smem>>
    %c178 = arith.constant 178 : index
    %922 = memref.load %arg1[%c178] : memref<288xf32, #tpu.memory_space<smem>>
    %c179 = arith.constant 179 : index
    %923 = memref.load %arg1[%c179] : memref<288xf32, #tpu.memory_space<smem>>
    %924 = vector.broadcast %4 : f32 to vector<16x128xf32>
    %c0_452 = arith.constant 0 : index
    %c0_453 = arith.constant 0 : index
    %c0_454 = arith.constant 0 : index
    %925 = vector.load %arg3[%c0_452, %c0_453, %c0_454] : memref<4x24x128xf32, #tpu.memory_space<vmem>>, vector<1x16x128xf32>
    %926 = vector.shape_cast %925 : vector<1x16x128xf32> to vector<16x128xf32>
    %927 = vector.broadcast %888 : f32 to vector<16x128xf32>
    %928 = arith.mulf %927, %926 : vector<16x128xf32>
    %929 = arith.addf %924, %928 : vector<16x128xf32>
    %c0_455 = arith.constant 0 : index
    %c1_456 = arith.constant 1 : index
    %c0_457 = arith.constant 0 : index
    %930 = vector.load %arg3[%c0_455, %c1_456, %c0_457] : memref<4x24x128xf32, #tpu.memory_space<vmem>>, vector<1x16x128xf32>
    %931 = vector.shape_cast %930 : vector<1x16x128xf32> to vector<16x128xf32>
    %932 = vector.broadcast %889 : f32 to vector<16x128xf32>
    %933 = arith.mulf %932, %931 : vector<16x128xf32>
    %934 = arith.addf %929, %933 : vector<16x128xf32>
    %c0_458 = arith.constant 0 : index
    %c2_459 = arith.constant 2 : index
    %c0_460 = arith.constant 0 : index
    %935 = vector.load %arg3[%c0_458, %c2_459, %c0_460] : memref<4x24x128xf32, #tpu.memory_space<vmem>>, vector<1x16x128xf32>
    %936 = vector.shape_cast %935 : vector<1x16x128xf32> to vector<16x128xf32>
    %937 = vector.broadcast %890 : f32 to vector<16x128xf32>
    %938 = arith.mulf %937, %936 : vector<16x128xf32>
    %939 = arith.addf %934, %938 : vector<16x128xf32>
    %c0_461 = arith.constant 0 : index
    %c3_462 = arith.constant 3 : index
    %c0_463 = arith.constant 0 : index
    %940 = vector.load %arg3[%c0_461, %c3_462, %c0_463] : memref<4x24x128xf32, #tpu.memory_space<vmem>>, vector<1x16x128xf32>
    %941 = vector.shape_cast %940 : vector<1x16x128xf32> to vector<16x128xf32>
    %942 = vector.broadcast %891 : f32 to vector<16x128xf32>
    %943 = arith.mulf %942, %941 : vector<16x128xf32>
    %944 = arith.addf %939, %943 : vector<16x128xf32>
    %c0_464 = arith.constant 0 : index
    %c4_465 = arith.constant 4 : index
    %c0_466 = arith.constant 0 : index
    %945 = vector.load %arg3[%c0_464, %c4_465, %c0_466] : memref<4x24x128xf32, #tpu.memory_space<vmem>>, vector<1x16x128xf32>
    %946 = vector.shape_cast %945 : vector<1x16x128xf32> to vector<16x128xf32>
    %947 = vector.broadcast %892 : f32 to vector<16x128xf32>
    %948 = arith.mulf %947, %946 : vector<16x128xf32>
    %949 = arith.addf %944, %948 : vector<16x128xf32>
    %c0_467 = arith.constant 0 : index
    %c5_468 = arith.constant 5 : index
    %c0_469 = arith.constant 0 : index
    %950 = vector.load %arg3[%c0_467, %c5_468, %c0_469] : memref<4x24x128xf32, #tpu.memory_space<vmem>>, vector<1x16x128xf32>
    %951 = vector.shape_cast %950 : vector<1x16x128xf32> to vector<16x128xf32>
    %952 = vector.broadcast %893 : f32 to vector<16x128xf32>
    %953 = arith.mulf %952, %951 : vector<16x128xf32>
    %954 = arith.addf %949, %953 : vector<16x128xf32>
    %c0_470 = arith.constant 0 : index
    %c6_471 = arith.constant 6 : index
    %c0_472 = arith.constant 0 : index
    %955 = vector.load %arg3[%c0_470, %c6_471, %c0_472] : memref<4x24x128xf32, #tpu.memory_space<vmem>>, vector<1x16x128xf32>
    %956 = vector.shape_cast %955 : vector<1x16x128xf32> to vector<16x128xf32>
    %957 = vector.broadcast %894 : f32 to vector<16x128xf32>
    %958 = arith.mulf %957, %956 : vector<16x128xf32>
    %959 = arith.addf %954, %958 : vector<16x128xf32>
    %c0_473 = arith.constant 0 : index
    %c7_474 = arith.constant 7 : index
    %c0_475 = arith.constant 0 : index
    %960 = vector.load %arg3[%c0_473, %c7_474, %c0_475] : memref<4x24x128xf32, #tpu.memory_space<vmem>>, vector<1x16x128xf32>
    %961 = vector.shape_cast %960 : vector<1x16x128xf32> to vector<16x128xf32>
    %962 = vector.broadcast %895 : f32 to vector<16x128xf32>
    %963 = arith.mulf %962, %961 : vector<16x128xf32>
    %964 = arith.addf %959, %963 : vector<16x128xf32>
    %c0_476 = arith.constant 0 : index
    %c8_477 = arith.constant 8 : index
    %c0_478 = arith.constant 0 : index
    %965 = vector.load %arg3[%c0_476, %c8_477, %c0_478] : memref<4x24x128xf32, #tpu.memory_space<vmem>>, vector<1x16x128xf32>
    %966 = vector.shape_cast %965 : vector<1x16x128xf32> to vector<16x128xf32>
    %967 = vector.broadcast %896 : f32 to vector<16x128xf32>
    %968 = arith.mulf %967, %966 : vector<16x128xf32>
    %969 = arith.addf %964, %968 : vector<16x128xf32>
    %c1_479 = arith.constant 1 : index
    %c0_480 = arith.constant 0 : index
    %c0_481 = arith.constant 0 : index
    %970 = vector.load %arg3[%c1_479, %c0_480, %c0_481] : memref<4x24x128xf32, #tpu.memory_space<vmem>>, vector<1x16x128xf32>
    %971 = vector.shape_cast %970 : vector<1x16x128xf32> to vector<16x128xf32>
    %972 = vector.broadcast %897 : f32 to vector<16x128xf32>
    %973 = arith.mulf %972, %971 : vector<16x128xf32>
    %974 = arith.addf %969, %973 : vector<16x128xf32>
    %c1_482 = arith.constant 1 : index
    %c1_483 = arith.constant 1 : index
    %c0_484 = arith.constant 0 : index
    %975 = vector.load %arg3[%c1_482, %c1_483, %c0_484] : memref<4x24x128xf32, #tpu.memory_space<vmem>>, vector<1x16x128xf32>
    %976 = vector.shape_cast %975 : vector<1x16x128xf32> to vector<16x128xf32>
    %977 = vector.broadcast %898 : f32 to vector<16x128xf32>
    %978 = arith.mulf %977, %976 : vector<16x128xf32>
    %979 = arith.addf %974, %978 : vector<16x128xf32>
    %c1_485 = arith.constant 1 : index
    %c2_486 = arith.constant 2 : index
    %c0_487 = arith.constant 0 : index
    %980 = vector.load %arg3[%c1_485, %c2_486, %c0_487] : memref<4x24x128xf32, #tpu.memory_space<vmem>>, vector<1x16x128xf32>
    %981 = vector.shape_cast %980 : vector<1x16x128xf32> to vector<16x128xf32>
    %982 = vector.broadcast %899 : f32 to vector<16x128xf32>
    %983 = arith.mulf %982, %981 : vector<16x128xf32>
    %984 = arith.addf %979, %983 : vector<16x128xf32>
    %c1_488 = arith.constant 1 : index
    %c3_489 = arith.constant 3 : index
    %c0_490 = arith.constant 0 : index
    %985 = vector.load %arg3[%c1_488, %c3_489, %c0_490] : memref<4x24x128xf32, #tpu.memory_space<vmem>>, vector<1x16x128xf32>
    %986 = vector.shape_cast %985 : vector<1x16x128xf32> to vector<16x128xf32>
    %987 = vector.broadcast %900 : f32 to vector<16x128xf32>
    %988 = arith.mulf %987, %986 : vector<16x128xf32>
    %989 = arith.addf %984, %988 : vector<16x128xf32>
    %c1_491 = arith.constant 1 : index
    %c4_492 = arith.constant 4 : index
    %c0_493 = arith.constant 0 : index
    %990 = vector.load %arg3[%c1_491, %c4_492, %c0_493] : memref<4x24x128xf32, #tpu.memory_space<vmem>>, vector<1x16x128xf32>
    %991 = vector.shape_cast %990 : vector<1x16x128xf32> to vector<16x128xf32>
    %992 = vector.broadcast %901 : f32 to vector<16x128xf32>
    %993 = arith.mulf %992, %991 : vector<16x128xf32>
    %994 = arith.addf %989, %993 : vector<16x128xf32>
    %c1_494 = arith.constant 1 : index
    %c5_495 = arith.constant 5 : index
    %c0_496 = arith.constant 0 : index
    %995 = vector.load %arg3[%c1_494, %c5_495, %c0_496] : memref<4x24x128xf32, #tpu.memory_space<vmem>>, vector<1x16x128xf32>
    %996 = vector.shape_cast %995 : vector<1x16x128xf32> to vector<16x128xf32>
    %997 = vector.broadcast %902 : f32 to vector<16x128xf32>
    %998 = arith.mulf %997, %996 : vector<16x128xf32>
    %999 = arith.addf %994, %998 : vector<16x128xf32>
    %c1_497 = arith.constant 1 : index
    %c6_498 = arith.constant 6 : index
    %c0_499 = arith.constant 0 : index
    %1000 = vector.load %arg3[%c1_497, %c6_498, %c0_499] : memref<4x24x128xf32, #tpu.memory_space<vmem>>, vector<1x16x128xf32>
    %1001 = vector.shape_cast %1000 : vector<1x16x128xf32> to vector<16x128xf32>
    %1002 = vector.broadcast %903 : f32 to vector<16x128xf32>
    %1003 = arith.mulf %1002, %1001 : vector<16x128xf32>
    %1004 = arith.addf %999, %1003 : vector<16x128xf32>
    %c1_500 = arith.constant 1 : index
    %c7_501 = arith.constant 7 : index
    %c0_502 = arith.constant 0 : index
    %1005 = vector.load %arg3[%c1_500, %c7_501, %c0_502] : memref<4x24x128xf32, #tpu.memory_space<vmem>>, vector<1x16x128xf32>
    %1006 = vector.shape_cast %1005 : vector<1x16x128xf32> to vector<16x128xf32>
    %1007 = vector.broadcast %904 : f32 to vector<16x128xf32>
    %1008 = arith.mulf %1007, %1006 : vector<16x128xf32>
    %1009 = arith.addf %1004, %1008 : vector<16x128xf32>
    %c1_503 = arith.constant 1 : index
    %c8_504 = arith.constant 8 : index
    %c0_505 = arith.constant 0 : index
    %1010 = vector.load %arg3[%c1_503, %c8_504, %c0_505] : memref<4x24x128xf32, #tpu.memory_space<vmem>>, vector<1x16x128xf32>
    %1011 = vector.shape_cast %1010 : vector<1x16x128xf32> to vector<16x128xf32>
    %1012 = vector.broadcast %905 : f32 to vector<16x128xf32>
    %1013 = arith.mulf %1012, %1011 : vector<16x128xf32>
    %1014 = arith.addf %1009, %1013 : vector<16x128xf32>
    %c2_506 = arith.constant 2 : index
    %c0_507 = arith.constant 0 : index
    %c0_508 = arith.constant 0 : index
    %1015 = vector.load %arg3[%c2_506, %c0_507, %c0_508] : memref<4x24x128xf32, #tpu.memory_space<vmem>>, vector<1x16x128xf32>
    %1016 = vector.shape_cast %1015 : vector<1x16x128xf32> to vector<16x128xf32>
    %1017 = vector.broadcast %906 : f32 to vector<16x128xf32>
    %1018 = arith.mulf %1017, %1016 : vector<16x128xf32>
    %1019 = arith.addf %1014, %1018 : vector<16x128xf32>
    %c2_509 = arith.constant 2 : index
    %c1_510 = arith.constant 1 : index
    %c0_511 = arith.constant 0 : index
    %1020 = vector.load %arg3[%c2_509, %c1_510, %c0_511] : memref<4x24x128xf32, #tpu.memory_space<vmem>>, vector<1x16x128xf32>
    %1021 = vector.shape_cast %1020 : vector<1x16x128xf32> to vector<16x128xf32>
    %1022 = vector.broadcast %907 : f32 to vector<16x128xf32>
    %1023 = arith.mulf %1022, %1021 : vector<16x128xf32>
    %1024 = arith.addf %1019, %1023 : vector<16x128xf32>
    %c2_512 = arith.constant 2 : index
    %c2_513 = arith.constant 2 : index
    %c0_514 = arith.constant 0 : index
    %1025 = vector.load %arg3[%c2_512, %c2_513, %c0_514] : memref<4x24x128xf32, #tpu.memory_space<vmem>>, vector<1x16x128xf32>
    %1026 = vector.shape_cast %1025 : vector<1x16x128xf32> to vector<16x128xf32>
    %1027 = vector.broadcast %908 : f32 to vector<16x128xf32>
    %1028 = arith.mulf %1027, %1026 : vector<16x128xf32>
    %1029 = arith.addf %1024, %1028 : vector<16x128xf32>
    %c2_515 = arith.constant 2 : index
    %c3_516 = arith.constant 3 : index
    %c0_517 = arith.constant 0 : index
    %1030 = vector.load %arg3[%c2_515, %c3_516, %c0_517] : memref<4x24x128xf32, #tpu.memory_space<vmem>>, vector<1x16x128xf32>
    %1031 = vector.shape_cast %1030 : vector<1x16x128xf32> to vector<16x128xf32>
    %1032 = vector.broadcast %909 : f32 to vector<16x128xf32>
    %1033 = arith.mulf %1032, %1031 : vector<16x128xf32>
    %1034 = arith.addf %1029, %1033 : vector<16x128xf32>
    %c2_518 = arith.constant 2 : index
    %c4_519 = arith.constant 4 : index
    %c0_520 = arith.constant 0 : index
    %1035 = vector.load %arg3[%c2_518, %c4_519, %c0_520] : memref<4x24x128xf32, #tpu.memory_space<vmem>>, vector<1x16x128xf32>
    %1036 = vector.shape_cast %1035 : vector<1x16x128xf32> to vector<16x128xf32>
    %1037 = vector.broadcast %910 : f32 to vector<16x128xf32>
    %1038 = arith.mulf %1037, %1036 : vector<16x128xf32>
    %1039 = arith.addf %1034, %1038 : vector<16x128xf32>
    %c2_521 = arith.constant 2 : index
    %c5_522 = arith.constant 5 : index
    %c0_523 = arith.constant 0 : index
    %1040 = vector.load %arg3[%c2_521, %c5_522, %c0_523] : memref<4x24x128xf32, #tpu.memory_space<vmem>>, vector<1x16x128xf32>
    %1041 = vector.shape_cast %1040 : vector<1x16x128xf32> to vector<16x128xf32>
    %1042 = vector.broadcast %911 : f32 to vector<16x128xf32>
    %1043 = arith.mulf %1042, %1041 : vector<16x128xf32>
    %1044 = arith.addf %1039, %1043 : vector<16x128xf32>
    %c2_524 = arith.constant 2 : index
    %c6_525 = arith.constant 6 : index
    %c0_526 = arith.constant 0 : index
    %1045 = vector.load %arg3[%c2_524, %c6_525, %c0_526] : memref<4x24x128xf32, #tpu.memory_space<vmem>>, vector<1x16x128xf32>
    %1046 = vector.shape_cast %1045 : vector<1x16x128xf32> to vector<16x128xf32>
    %1047 = vector.broadcast %912 : f32 to vector<16x128xf32>
    %1048 = arith.mulf %1047, %1046 : vector<16x128xf32>
    %1049 = arith.addf %1044, %1048 : vector<16x128xf32>
    %c2_527 = arith.constant 2 : index
    %c7_528 = arith.constant 7 : index
    %c0_529 = arith.constant 0 : index
    %1050 = vector.load %arg3[%c2_527, %c7_528, %c0_529] : memref<4x24x128xf32, #tpu.memory_space<vmem>>, vector<1x16x128xf32>
    %1051 = vector.shape_cast %1050 : vector<1x16x128xf32> to vector<16x128xf32>
    %1052 = vector.broadcast %913 : f32 to vector<16x128xf32>
    %1053 = arith.mulf %1052, %1051 : vector<16x128xf32>
    %1054 = arith.addf %1049, %1053 : vector<16x128xf32>
    %c2_530 = arith.constant 2 : index
    %c8_531 = arith.constant 8 : index
    %c0_532 = arith.constant 0 : index
    %1055 = vector.load %arg3[%c2_530, %c8_531, %c0_532] : memref<4x24x128xf32, #tpu.memory_space<vmem>>, vector<1x16x128xf32>
    %1056 = vector.shape_cast %1055 : vector<1x16x128xf32> to vector<16x128xf32>
    %1057 = vector.broadcast %914 : f32 to vector<16x128xf32>
    %1058 = arith.mulf %1057, %1056 : vector<16x128xf32>
    %1059 = arith.addf %1054, %1058 : vector<16x128xf32>
    %c3_533 = arith.constant 3 : index
    %c0_534 = arith.constant 0 : index
    %c0_535 = arith.constant 0 : index
    %1060 = vector.load %arg3[%c3_533, %c0_534, %c0_535] : memref<4x24x128xf32, #tpu.memory_space<vmem>>, vector<1x16x128xf32>
    %1061 = vector.shape_cast %1060 : vector<1x16x128xf32> to vector<16x128xf32>
    %1062 = vector.broadcast %915 : f32 to vector<16x128xf32>
    %1063 = arith.mulf %1062, %1061 : vector<16x128xf32>
    %1064 = arith.addf %1059, %1063 : vector<16x128xf32>
    %c3_536 = arith.constant 3 : index
    %c1_537 = arith.constant 1 : index
    %c0_538 = arith.constant 0 : index
    %1065 = vector.load %arg3[%c3_536, %c1_537, %c0_538] : memref<4x24x128xf32, #tpu.memory_space<vmem>>, vector<1x16x128xf32>
    %1066 = vector.shape_cast %1065 : vector<1x16x128xf32> to vector<16x128xf32>
    %1067 = vector.broadcast %916 : f32 to vector<16x128xf32>
    %1068 = arith.mulf %1067, %1066 : vector<16x128xf32>
    %1069 = arith.addf %1064, %1068 : vector<16x128xf32>
    %c3_539 = arith.constant 3 : index
    %c2_540 = arith.constant 2 : index
    %c0_541 = arith.constant 0 : index
    %1070 = vector.load %arg3[%c3_539, %c2_540, %c0_541] : memref<4x24x128xf32, #tpu.memory_space<vmem>>, vector<1x16x128xf32>
    %1071 = vector.shape_cast %1070 : vector<1x16x128xf32> to vector<16x128xf32>
    %1072 = vector.broadcast %917 : f32 to vector<16x128xf32>
    %1073 = arith.mulf %1072, %1071 : vector<16x128xf32>
    %1074 = arith.addf %1069, %1073 : vector<16x128xf32>
    %c3_542 = arith.constant 3 : index
    %c3_543 = arith.constant 3 : index
    %c0_544 = arith.constant 0 : index
    %1075 = vector.load %arg3[%c3_542, %c3_543, %c0_544] : memref<4x24x128xf32, #tpu.memory_space<vmem>>, vector<1x16x128xf32>
    %1076 = vector.shape_cast %1075 : vector<1x16x128xf32> to vector<16x128xf32>
    %1077 = vector.broadcast %918 : f32 to vector<16x128xf32>
    %1078 = arith.mulf %1077, %1076 : vector<16x128xf32>
    %1079 = arith.addf %1074, %1078 : vector<16x128xf32>
    %c3_545 = arith.constant 3 : index
    %c4_546 = arith.constant 4 : index
    %c0_547 = arith.constant 0 : index
    %1080 = vector.load %arg3[%c3_545, %c4_546, %c0_547] : memref<4x24x128xf32, #tpu.memory_space<vmem>>, vector<1x16x128xf32>
    %1081 = vector.shape_cast %1080 : vector<1x16x128xf32> to vector<16x128xf32>
    %1082 = vector.broadcast %919 : f32 to vector<16x128xf32>
    %1083 = arith.mulf %1082, %1081 : vector<16x128xf32>
    %1084 = arith.addf %1079, %1083 : vector<16x128xf32>
    %c3_548 = arith.constant 3 : index
    %c5_549 = arith.constant 5 : index
    %c0_550 = arith.constant 0 : index
    %1085 = vector.load %arg3[%c3_548, %c5_549, %c0_550] : memref<4x24x128xf32, #tpu.memory_space<vmem>>, vector<1x16x128xf32>
    %1086 = vector.shape_cast %1085 : vector<1x16x128xf32> to vector<16x128xf32>
    %1087 = vector.broadcast %920 : f32 to vector<16x128xf32>
    %1088 = arith.mulf %1087, %1086 : vector<16x128xf32>
    %1089 = arith.addf %1084, %1088 : vector<16x128xf32>
    %c3_551 = arith.constant 3 : index
    %c6_552 = arith.constant 6 : index
    %c0_553 = arith.constant 0 : index
    %1090 = vector.load %arg3[%c3_551, %c6_552, %c0_553] : memref<4x24x128xf32, #tpu.memory_space<vmem>>, vector<1x16x128xf32>
    %1091 = vector.shape_cast %1090 : vector<1x16x128xf32> to vector<16x128xf32>
    %1092 = vector.broadcast %921 : f32 to vector<16x128xf32>
    %1093 = arith.mulf %1092, %1091 : vector<16x128xf32>
    %1094 = arith.addf %1089, %1093 : vector<16x128xf32>
    %c3_554 = arith.constant 3 : index
    %c7_555 = arith.constant 7 : index
    %c0_556 = arith.constant 0 : index
    %1095 = vector.load %arg3[%c3_554, %c7_555, %c0_556] : memref<4x24x128xf32, #tpu.memory_space<vmem>>, vector<1x16x128xf32>
    %1096 = vector.shape_cast %1095 : vector<1x16x128xf32> to vector<16x128xf32>
    %1097 = vector.broadcast %922 : f32 to vector<16x128xf32>
    %1098 = arith.mulf %1097, %1096 : vector<16x128xf32>
    %1099 = arith.addf %1094, %1098 : vector<16x128xf32>
    %c3_557 = arith.constant 3 : index
    %c8_558 = arith.constant 8 : index
    %c0_559 = arith.constant 0 : index
    %1100 = vector.load %arg3[%c3_557, %c8_558, %c0_559] : memref<4x24x128xf32, #tpu.memory_space<vmem>>, vector<1x16x128xf32>
    %1101 = vector.shape_cast %1100 : vector<1x16x128xf32> to vector<16x128xf32>
    %1102 = vector.broadcast %923 : f32 to vector<16x128xf32>
    %1103 = arith.mulf %1102, %1101 : vector<16x128xf32>
    %1104 = arith.addf %1099, %1103 : vector<16x128xf32>
    %c4_560 = arith.constant 4 : index
    %c0_561 = arith.constant 0 : index
    %c0_562 = arith.constant 0 : index
    %1105 = vector.load %arg4[%c4_560, %c0_561, %c0_562] : memref<8x16x128xf32, #tpu.memory_space<vmem>>, vector<1x16x128xf32>
    %1106 = vector.shape_cast %1105 : vector<1x16x128xf32> to vector<16x128xf32>
    %1107 = vector.shape_cast %1104 : vector<16x128xf32> to vector<1x16x128xf32>
    tpu.vector_store %arg4[%c4_560, %c0_561, %c0_562], %1107 {strides = array<i32>} : memref<8x16x128xf32, #tpu.memory_space<vmem>>, vector<1x16x128xf32>,
    %c180 = arith.constant 180 : index
    %1108 = memref.load %arg1[%c180] : memref<288xf32, #tpu.memory_space<smem>>
    %c181 = arith.constant 181 : index
    %1109 = memref.load %arg1[%c181] : memref<288xf32, #tpu.memory_space<smem>>
    %c182 = arith.constant 182 : index
    %1110 = memref.load %arg1[%c182] : memref<288xf32, #tpu.memory_space<smem>>
    %c183 = arith.constant 183 : index
    %1111 = memref.load %arg1[%c183] : memref<288xf32, #tpu.memory_space<smem>>
    %c184 = arith.constant 184 : index
    %1112 = memref.load %arg1[%c184] : memref<288xf32, #tpu.memory_space<smem>>
    %c185 = arith.constant 185 : index
    %1113 = memref.load %arg1[%c185] : memref<288xf32, #tpu.memory_space<smem>>
    %c186 = arith.constant 186 : index
    %1114 = memref.load %arg1[%c186] : memref<288xf32, #tpu.memory_space<smem>>
    %c187 = arith.constant 187 : index
    %1115 = memref.load %arg1[%c187] : memref<288xf32, #tpu.memory_space<smem>>
    %c188 = arith.constant 188 : index
    %1116 = memref.load %arg1[%c188] : memref<288xf32, #tpu.memory_space<smem>>
    %c189 = arith.constant 189 : index
    %1117 = memref.load %arg1[%c189] : memref<288xf32, #tpu.memory_space<smem>>
    %c190 = arith.constant 190 : index
    %1118 = memref.load %arg1[%c190] : memref<288xf32, #tpu.memory_space<smem>>
    %c191 = arith.constant 191 : index
    %1119 = memref.load %arg1[%c191] : memref<288xf32, #tpu.memory_space<smem>>
    %c192 = arith.constant 192 : index
    %1120 = memref.load %arg1[%c192] : memref<288xf32, #tpu.memory_space<smem>>
    %c193 = arith.constant 193 : index
    %1121 = memref.load %arg1[%c193] : memref<288xf32, #tpu.memory_space<smem>>
    %c194 = arith.constant 194 : index
    %1122 = memref.load %arg1[%c194] : memref<288xf32, #tpu.memory_space<smem>>
    %c195 = arith.constant 195 : index
    %1123 = memref.load %arg1[%c195] : memref<288xf32, #tpu.memory_space<smem>>
    %c196 = arith.constant 196 : index
    %1124 = memref.load %arg1[%c196] : memref<288xf32, #tpu.memory_space<smem>>
    %c197 = arith.constant 197 : index
    %1125 = memref.load %arg1[%c197] : memref<288xf32, #tpu.memory_space<smem>>
    %c198 = arith.constant 198 : index
    %1126 = memref.load %arg1[%c198] : memref<288xf32, #tpu.memory_space<smem>>
    %c199 = arith.constant 199 : index
    %1127 = memref.load %arg1[%c199] : memref<288xf32, #tpu.memory_space<smem>>
    %c200 = arith.constant 200 : index
    %1128 = memref.load %arg1[%c200] : memref<288xf32, #tpu.memory_space<smem>>
    %c201 = arith.constant 201 : index
    %1129 = memref.load %arg1[%c201] : memref<288xf32, #tpu.memory_space<smem>>
    %c202 = arith.constant 202 : index
    %1130 = memref.load %arg1[%c202] : memref<288xf32, #tpu.memory_space<smem>>
    %c203 = arith.constant 203 : index
    %1131 = memref.load %arg1[%c203] : memref<288xf32, #tpu.memory_space<smem>>
    %c204 = arith.constant 204 : index
    %1132 = memref.load %arg1[%c204] : memref<288xf32, #tpu.memory_space<smem>>
    %c205 = arith.constant 205 : index
    %1133 = memref.load %arg1[%c205] : memref<288xf32, #tpu.memory_space<smem>>
    %c206 = arith.constant 206 : index
    %1134 = memref.load %arg1[%c206] : memref<288xf32, #tpu.memory_space<smem>>
    %c207 = arith.constant 207 : index
    %1135 = memref.load %arg1[%c207] : memref<288xf32, #tpu.memory_space<smem>>
    %c208 = arith.constant 208 : index
    %1136 = memref.load %arg1[%c208] : memref<288xf32, #tpu.memory_space<smem>>
    %c209 = arith.constant 209 : index
    %1137 = memref.load %arg1[%c209] : memref<288xf32, #tpu.memory_space<smem>>
    %c210 = arith.constant 210 : index
    %1138 = memref.load %arg1[%c210] : memref<288xf32, #tpu.memory_space<smem>>
    %c211 = arith.constant 211 : index
    %1139 = memref.load %arg1[%c211] : memref<288xf32, #tpu.memory_space<smem>>
    %c212 = arith.constant 212 : index
    %1140 = memref.load %arg1[%c212] : memref<288xf32, #tpu.memory_space<smem>>
    %c213 = arith.constant 213 : index
    %1141 = memref.load %arg1[%c213] : memref<288xf32, #tpu.memory_space<smem>>
    %c214 = arith.constant 214 : index
    %1142 = memref.load %arg1[%c214] : memref<288xf32, #tpu.memory_space<smem>>
    %c215 = arith.constant 215 : index
    %1143 = memref.load %arg1[%c215] : memref<288xf32, #tpu.memory_space<smem>>
    %1144 = vector.broadcast %5 : f32 to vector<16x128xf32>
    %c0_563 = arith.constant 0 : index
    %c0_564 = arith.constant 0 : index
    %c0_565 = arith.constant 0 : index
    %1145 = vector.load %arg3[%c0_563, %c0_564, %c0_565] : memref<4x24x128xf32, #tpu.memory_space<vmem>>, vector<1x16x128xf32>
    %1146 = vector.shape_cast %1145 : vector<1x16x128xf32> to vector<16x128xf32>
    %1147 = vector.broadcast %1108 : f32 to vector<16x128xf32>
    %1148 = arith.mulf %1147, %1146 : vector<16x128xf32>
    %1149 = arith.addf %1144, %1148 : vector<16x128xf32>
    %c0_566 = arith.constant 0 : index
    %c1_567 = arith.constant 1 : index
    %c0_568 = arith.constant 0 : index
    %1150 = vector.load %arg3[%c0_566, %c1_567, %c0_568] : memref<4x24x128xf32, #tpu.memory_space<vmem>>, vector<1x16x128xf32>
    %1151 = vector.shape_cast %1150 : vector<1x16x128xf32> to vector<16x128xf32>
    %1152 = vector.broadcast %1109 : f32 to vector<16x128xf32>
    %1153 = arith.mulf %1152, %1151 : vector<16x128xf32>
    %1154 = arith.addf %1149, %1153 : vector<16x128xf32>
    %c0_569 = arith.constant 0 : index
    %c2_570 = arith.constant 2 : index
    %c0_571 = arith.constant 0 : index
    %1155 = vector.load %arg3[%c0_569, %c2_570, %c0_571] : memref<4x24x128xf32, #tpu.memory_space<vmem>>, vector<1x16x128xf32>
    %1156 = vector.shape_cast %1155 : vector<1x16x128xf32> to vector<16x128xf32>
    %1157 = vector.broadcast %1110 : f32 to vector<16x128xf32>
    %1158 = arith.mulf %1157, %1156 : vector<16x128xf32>
    %1159 = arith.addf %1154, %1158 : vector<16x128xf32>
    %c0_572 = arith.constant 0 : index
    %c3_573 = arith.constant 3 : index
    %c0_574 = arith.constant 0 : index
    %1160 = vector.load %arg3[%c0_572, %c3_573, %c0_574] : memref<4x24x128xf32, #tpu.memory_space<vmem>>, vector<1x16x128xf32>
    %1161 = vector.shape_cast %1160 : vector<1x16x128xf32> to vector<16x128xf32>
    %1162 = vector.broadcast %1111 : f32 to vector<16x128xf32>
    %1163 = arith.mulf %1162, %1161 : vector<16x128xf32>
    %1164 = arith.addf %1159, %1163 : vector<16x128xf32>
    %c0_575 = arith.constant 0 : index
    %c4_576 = arith.constant 4 : index
    %c0_577 = arith.constant 0 : index
    %1165 = vector.load %arg3[%c0_575, %c4_576, %c0_577] : memref<4x24x128xf32, #tpu.memory_space<vmem>>, vector<1x16x128xf32>
    %1166 = vector.shape_cast %1165 : vector<1x16x128xf32> to vector<16x128xf32>
    %1167 = vector.broadcast %1112 : f32 to vector<16x128xf32>
    %1168 = arith.mulf %1167, %1166 : vector<16x128xf32>
    %1169 = arith.addf %1164, %1168 : vector<16x128xf32>
    %c0_578 = arith.constant 0 : index
    %c5_579 = arith.constant 5 : index
    %c0_580 = arith.constant 0 : index
    %1170 = vector.load %arg3[%c0_578, %c5_579, %c0_580] : memref<4x24x128xf32, #tpu.memory_space<vmem>>, vector<1x16x128xf32>
    %1171 = vector.shape_cast %1170 : vector<1x16x128xf32> to vector<16x128xf32>
    %1172 = vector.broadcast %1113 : f32 to vector<16x128xf32>
    %1173 = arith.mulf %1172, %1171 : vector<16x128xf32>
    %1174 = arith.addf %1169, %1173 : vector<16x128xf32>
    %c0_581 = arith.constant 0 : index
    %c6_582 = arith.constant 6 : index
    %c0_583 = arith.constant 0 : index
    %1175 = vector.load %arg3[%c0_581, %c6_582, %c0_583] : memref<4x24x128xf32, #tpu.memory_space<vmem>>, vector<1x16x128xf32>
    %1176 = vector.shape_cast %1175 : vector<1x16x128xf32> to vector<16x128xf32>
    %1177 = vector.broadcast %1114 : f32 to vector<16x128xf32>
    %1178 = arith.mulf %1177, %1176 : vector<16x128xf32>
    %1179 = arith.addf %1174, %1178 : vector<16x128xf32>
    %c0_584 = arith.constant 0 : index
    %c7_585 = arith.constant 7 : index
    %c0_586 = arith.constant 0 : index
    %1180 = vector.load %arg3[%c0_584, %c7_585, %c0_586] : memref<4x24x128xf32, #tpu.memory_space<vmem>>, vector<1x16x128xf32>
    %1181 = vector.shape_cast %1180 : vector<1x16x128xf32> to vector<16x128xf32>
    %1182 = vector.broadcast %1115 : f32 to vector<16x128xf32>
    %1183 = arith.mulf %1182, %1181 : vector<16x128xf32>
    %1184 = arith.addf %1179, %1183 : vector<16x128xf32>
    %c0_587 = arith.constant 0 : index
    %c8_588 = arith.constant 8 : index
    %c0_589 = arith.constant 0 : index
    %1185 = vector.load %arg3[%c0_587, %c8_588, %c0_589] : memref<4x24x128xf32, #tpu.memory_space<vmem>>, vector<1x16x128xf32>
    %1186 = vector.shape_cast %1185 : vector<1x16x128xf32> to vector<16x128xf32>
    %1187 = vector.broadcast %1116 : f32 to vector<16x128xf32>
    %1188 = arith.mulf %1187, %1186 : vector<16x128xf32>
    %1189 = arith.addf %1184, %1188 : vector<16x128xf32>
    %c1_590 = arith.constant 1 : index
    %c0_591 = arith.constant 0 : index
    %c0_592 = arith.constant 0 : index
    %1190 = vector.load %arg3[%c1_590, %c0_591, %c0_592] : memref<4x24x128xf32, #tpu.memory_space<vmem>>, vector<1x16x128xf32>
    %1191 = vector.shape_cast %1190 : vector<1x16x128xf32> to vector<16x128xf32>
    %1192 = vector.broadcast %1117 : f32 to vector<16x128xf32>
    %1193 = arith.mulf %1192, %1191 : vector<16x128xf32>
    %1194 = arith.addf %1189, %1193 : vector<16x128xf32>
    %c1_593 = arith.constant 1 : index
    %c1_594 = arith.constant 1 : index
    %c0_595 = arith.constant 0 : index
    %1195 = vector.load %arg3[%c1_593, %c1_594, %c0_595] : memref<4x24x128xf32, #tpu.memory_space<vmem>>, vector<1x16x128xf32>
    %1196 = vector.shape_cast %1195 : vector<1x16x128xf32> to vector<16x128xf32>
    %1197 = vector.broadcast %1118 : f32 to vector<16x128xf32>
    %1198 = arith.mulf %1197, %1196 : vector<16x128xf32>
    %1199 = arith.addf %1194, %1198 : vector<16x128xf32>
    %c1_596 = arith.constant 1 : index
    %c2_597 = arith.constant 2 : index
    %c0_598 = arith.constant 0 : index
    %1200 = vector.load %arg3[%c1_596, %c2_597, %c0_598] : memref<4x24x128xf32, #tpu.memory_space<vmem>>, vector<1x16x128xf32>
    %1201 = vector.shape_cast %1200 : vector<1x16x128xf32> to vector<16x128xf32>
    %1202 = vector.broadcast %1119 : f32 to vector<16x128xf32>
    %1203 = arith.mulf %1202, %1201 : vector<16x128xf32>
    %1204 = arith.addf %1199, %1203 : vector<16x128xf32>
    %c1_599 = arith.constant 1 : index
    %c3_600 = arith.constant 3 : index
    %c0_601 = arith.constant 0 : index
    %1205 = vector.load %arg3[%c1_599, %c3_600, %c0_601] : memref<4x24x128xf32, #tpu.memory_space<vmem>>, vector<1x16x128xf32>
    %1206 = vector.shape_cast %1205 : vector<1x16x128xf32> to vector<16x128xf32>
    %1207 = vector.broadcast %1120 : f32 to vector<16x128xf32>
    %1208 = arith.mulf %1207, %1206 : vector<16x128xf32>
    %1209 = arith.addf %1204, %1208 : vector<16x128xf32>
    %c1_602 = arith.constant 1 : index
    %c4_603 = arith.constant 4 : index
    %c0_604 = arith.constant 0 : index
    %1210 = vector.load %arg3[%c1_602, %c4_603, %c0_604] : memref<4x24x128xf32, #tpu.memory_space<vmem>>, vector<1x16x128xf32>
    %1211 = vector.shape_cast %1210 : vector<1x16x128xf32> to vector<16x128xf32>
    %1212 = vector.broadcast %1121 : f32 to vector<16x128xf32>
    %1213 = arith.mulf %1212, %1211 : vector<16x128xf32>
    %1214 = arith.addf %1209, %1213 : vector<16x128xf32>
    %c1_605 = arith.constant 1 : index
    %c5_606 = arith.constant 5 : index
    %c0_607 = arith.constant 0 : index
    %1215 = vector.load %arg3[%c1_605, %c5_606, %c0_607] : memref<4x24x128xf32, #tpu.memory_space<vmem>>, vector<1x16x128xf32>
    %1216 = vector.shape_cast %1215 : vector<1x16x128xf32> to vector<16x128xf32>
    %1217 = vector.broadcast %1122 : f32 to vector<16x128xf32>
    %1218 = arith.mulf %1217, %1216 : vector<16x128xf32>
    %1219 = arith.addf %1214, %1218 : vector<16x128xf32>
    %c1_608 = arith.constant 1 : index
    %c6_609 = arith.constant 6 : index
    %c0_610 = arith.constant 0 : index
    %1220 = vector.load %arg3[%c1_608, %c6_609, %c0_610] : memref<4x24x128xf32, #tpu.memory_space<vmem>>, vector<1x16x128xf32>
    %1221 = vector.shape_cast %1220 : vector<1x16x128xf32> to vector<16x128xf32>
    %1222 = vector.broadcast %1123 : f32 to vector<16x128xf32>
    %1223 = arith.mulf %1222, %1221 : vector<16x128xf32>
    %1224 = arith.addf %1219, %1223 : vector<16x128xf32>
    %c1_611 = arith.constant 1 : index
    %c7_612 = arith.constant 7 : index
    %c0_613 = arith.constant 0 : index
    %1225 = vector.load %arg3[%c1_611, %c7_612, %c0_613] : memref<4x24x128xf32, #tpu.memory_space<vmem>>, vector<1x16x128xf32>
    %1226 = vector.shape_cast %1225 : vector<1x16x128xf32> to vector<16x128xf32>
    %1227 = vector.broadcast %1124 : f32 to vector<16x128xf32>
    %1228 = arith.mulf %1227, %1226 : vector<16x128xf32>
    %1229 = arith.addf %1224, %1228 : vector<16x128xf32>
    %c1_614 = arith.constant 1 : index
    %c8_615 = arith.constant 8 : index
    %c0_616 = arith.constant 0 : index
    %1230 = vector.load %arg3[%c1_614, %c8_615, %c0_616] : memref<4x24x128xf32, #tpu.memory_space<vmem>>, vector<1x16x128xf32>
    %1231 = vector.shape_cast %1230 : vector<1x16x128xf32> to vector<16x128xf32>
    %1232 = vector.broadcast %1125 : f32 to vector<16x128xf32>
    %1233 = arith.mulf %1232, %1231 : vector<16x128xf32>
    %1234 = arith.addf %1229, %1233 : vector<16x128xf32>
    %c2_617 = arith.constant 2 : index
    %c0_618 = arith.constant 0 : index
    %c0_619 = arith.constant 0 : index
    %1235 = vector.load %arg3[%c2_617, %c0_618, %c0_619] : memref<4x24x128xf32, #tpu.memory_space<vmem>>, vector<1x16x128xf32>
    %1236 = vector.shape_cast %1235 : vector<1x16x128xf32> to vector<16x128xf32>
    %1237 = vector.broadcast %1126 : f32 to vector<16x128xf32>
    %1238 = arith.mulf %1237, %1236 : vector<16x128xf32>
    %1239 = arith.addf %1234, %1238 : vector<16x128xf32>
    %c2_620 = arith.constant 2 : index
    %c1_621 = arith.constant 1 : index
    %c0_622 = arith.constant 0 : index
    %1240 = vector.load %arg3[%c2_620, %c1_621, %c0_622] : memref<4x24x128xf32, #tpu.memory_space<vmem>>, vector<1x16x128xf32>
    %1241 = vector.shape_cast %1240 : vector<1x16x128xf32> to vector<16x128xf32>
    %1242 = vector.broadcast %1127 : f32 to vector<16x128xf32>
    %1243 = arith.mulf %1242, %1241 : vector<16x128xf32>
    %1244 = arith.addf %1239, %1243 : vector<16x128xf32>
    %c2_623 = arith.constant 2 : index
    %c2_624 = arith.constant 2 : index
    %c0_625 = arith.constant 0 : index
    %1245 = vector.load %arg3[%c2_623, %c2_624, %c0_625] : memref<4x24x128xf32, #tpu.memory_space<vmem>>, vector<1x16x128xf32>
    %1246 = vector.shape_cast %1245 : vector<1x16x128xf32> to vector<16x128xf32>
    %1247 = vector.broadcast %1128 : f32 to vector<16x128xf32>
    %1248 = arith.mulf %1247, %1246 : vector<16x128xf32>
    %1249 = arith.addf %1244, %1248 : vector<16x128xf32>
    %c2_626 = arith.constant 2 : index
    %c3_627 = arith.constant 3 : index
    %c0_628 = arith.constant 0 : index
    %1250 = vector.load %arg3[%c2_626, %c3_627, %c0_628] : memref<4x24x128xf32, #tpu.memory_space<vmem>>, vector<1x16x128xf32>
    %1251 = vector.shape_cast %1250 : vector<1x16x128xf32> to vector<16x128xf32>
    %1252 = vector.broadcast %1129 : f32 to vector<16x128xf32>
    %1253 = arith.mulf %1252, %1251 : vector<16x128xf32>
    %1254 = arith.addf %1249, %1253 : vector<16x128xf32>
    %c2_629 = arith.constant 2 : index
    %c4_630 = arith.constant 4 : index
    %c0_631 = arith.constant 0 : index
    %1255 = vector.load %arg3[%c2_629, %c4_630, %c0_631] : memref<4x24x128xf32, #tpu.memory_space<vmem>>, vector<1x16x128xf32>
    %1256 = vector.shape_cast %1255 : vector<1x16x128xf32> to vector<16x128xf32>
    %1257 = vector.broadcast %1130 : f32 to vector<16x128xf32>
    %1258 = arith.mulf %1257, %1256 : vector<16x128xf32>
    %1259 = arith.addf %1254, %1258 : vector<16x128xf32>
    %c2_632 = arith.constant 2 : index
    %c5_633 = arith.constant 5 : index
    %c0_634 = arith.constant 0 : index
    %1260 = vector.load %arg3[%c2_632, %c5_633, %c0_634] : memref<4x24x128xf32, #tpu.memory_space<vmem>>, vector<1x16x128xf32>
    %1261 = vector.shape_cast %1260 : vector<1x16x128xf32> to vector<16x128xf32>
    %1262 = vector.broadcast %1131 : f32 to vector<16x128xf32>
    %1263 = arith.mulf %1262, %1261 : vector<16x128xf32>
    %1264 = arith.addf %1259, %1263 : vector<16x128xf32>
    %c2_635 = arith.constant 2 : index
    %c6_636 = arith.constant 6 : index
    %c0_637 = arith.constant 0 : index
    %1265 = vector.load %arg3[%c2_635, %c6_636, %c0_637] : memref<4x24x128xf32, #tpu.memory_space<vmem>>, vector<1x16x128xf32>
    %1266 = vector.shape_cast %1265 : vector<1x16x128xf32> to vector<16x128xf32>
    %1267 = vector.broadcast %1132 : f32 to vector<16x128xf32>
    %1268 = arith.mulf %1267, %1266 : vector<16x128xf32>
    %1269 = arith.addf %1264, %1268 : vector<16x128xf32>
    %c2_638 = arith.constant 2 : index
    %c7_639 = arith.constant 7 : index
    %c0_640 = arith.constant 0 : index
    %1270 = vector.load %arg3[%c2_638, %c7_639, %c0_640] : memref<4x24x128xf32, #tpu.memory_space<vmem>>, vector<1x16x128xf32>
    %1271 = vector.shape_cast %1270 : vector<1x16x128xf32> to vector<16x128xf32>
    %1272 = vector.broadcast %1133 : f32 to vector<16x128xf32>
    %1273 = arith.mulf %1272, %1271 : vector<16x128xf32>
    %1274 = arith.addf %1269, %1273 : vector<16x128xf32>
    %c2_641 = arith.constant 2 : index
    %c8_642 = arith.constant 8 : index
    %c0_643 = arith.constant 0 : index
    %1275 = vector.load %arg3[%c2_641, %c8_642, %c0_643] : memref<4x24x128xf32, #tpu.memory_space<vmem>>, vector<1x16x128xf32>
    %1276 = vector.shape_cast %1275 : vector<1x16x128xf32> to vector<16x128xf32>
    %1277 = vector.broadcast %1134 : f32 to vector<16x128xf32>
    %1278 = arith.mulf %1277, %1276 : vector<16x128xf32>
    %1279 = arith.addf %1274, %1278 : vector<16x128xf32>
    %c3_644 = arith.constant 3 : index
    %c0_645 = arith.constant 0 : index
    %c0_646 = arith.constant 0 : index
    %1280 = vector.load %arg3[%c3_644, %c0_645, %c0_646] : memref<4x24x128xf32, #tpu.memory_space<vmem>>, vector<1x16x128xf32>
    %1281 = vector.shape_cast %1280 : vector<1x16x128xf32> to vector<16x128xf32>
    %1282 = vector.broadcast %1135 : f32 to vector<16x128xf32>
    %1283 = arith.mulf %1282, %1281 : vector<16x128xf32>
    %1284 = arith.addf %1279, %1283 : vector<16x128xf32>
    %c3_647 = arith.constant 3 : index
    %c1_648 = arith.constant 1 : index
    %c0_649 = arith.constant 0 : index
    %1285 = vector.load %arg3[%c3_647, %c1_648, %c0_649] : memref<4x24x128xf32, #tpu.memory_space<vmem>>, vector<1x16x128xf32>
    %1286 = vector.shape_cast %1285 : vector<1x16x128xf32> to vector<16x128xf32>
    %1287 = vector.broadcast %1136 : f32 to vector<16x128xf32>
    %1288 = arith.mulf %1287, %1286 : vector<16x128xf32>
    %1289 = arith.addf %1284, %1288 : vector<16x128xf32>
    %c3_650 = arith.constant 3 : index
    %c2_651 = arith.constant 2 : index
    %c0_652 = arith.constant 0 : index
    %1290 = vector.load %arg3[%c3_650, %c2_651, %c0_652] : memref<4x24x128xf32, #tpu.memory_space<vmem>>, vector<1x16x128xf32>
    %1291 = vector.shape_cast %1290 : vector<1x16x128xf32> to vector<16x128xf32>
    %1292 = vector.broadcast %1137 : f32 to vector<16x128xf32>
    %1293 = arith.mulf %1292, %1291 : vector<16x128xf32>
    %1294 = arith.addf %1289, %1293 : vector<16x128xf32>
    %c3_653 = arith.constant 3 : index
    %c3_654 = arith.constant 3 : index
    %c0_655 = arith.constant 0 : index
    %1295 = vector.load %arg3[%c3_653, %c3_654, %c0_655] : memref<4x24x128xf32, #tpu.memory_space<vmem>>, vector<1x16x128xf32>
    %1296 = vector.shape_cast %1295 : vector<1x16x128xf32> to vector<16x128xf32>
    %1297 = vector.broadcast %1138 : f32 to vector<16x128xf32>
    %1298 = arith.mulf %1297, %1296 : vector<16x128xf32>
    %1299 = arith.addf %1294, %1298 : vector<16x128xf32>
    %c3_656 = arith.constant 3 : index
    %c4_657 = arith.constant 4 : index
    %c0_658 = arith.constant 0 : index
    %1300 = vector.load %arg3[%c3_656, %c4_657, %c0_658] : memref<4x24x128xf32, #tpu.memory_space<vmem>>, vector<1x16x128xf32>
    %1301 = vector.shape_cast %1300 : vector<1x16x128xf32> to vector<16x128xf32>
    %1302 = vector.broadcast %1139 : f32 to vector<16x128xf32>
    %1303 = arith.mulf %1302, %1301 : vector<16x128xf32>
    %1304 = arith.addf %1299, %1303 : vector<16x128xf32>
    %c3_659 = arith.constant 3 : index
    %c5_660 = arith.constant 5 : index
    %c0_661 = arith.constant 0 : index
    %1305 = vector.load %arg3[%c3_659, %c5_660, %c0_661] : memref<4x24x128xf32, #tpu.memory_space<vmem>>, vector<1x16x128xf32>
    %1306 = vector.shape_cast %1305 : vector<1x16x128xf32> to vector<16x128xf32>
    %1307 = vector.broadcast %1140 : f32 to vector<16x128xf32>
    %1308 = arith.mulf %1307, %1306 : vector<16x128xf32>
    %1309 = arith.addf %1304, %1308 : vector<16x128xf32>
    %c3_662 = arith.constant 3 : index
    %c6_663 = arith.constant 6 : index
    %c0_664 = arith.constant 0 : index
    %1310 = vector.load %arg3[%c3_662, %c6_663, %c0_664] : memref<4x24x128xf32, #tpu.memory_space<vmem>>, vector<1x16x128xf32>
    %1311 = vector.shape_cast %1310 : vector<1x16x128xf32> to vector<16x128xf32>
    %1312 = vector.broadcast %1141 : f32 to vector<16x128xf32>
    %1313 = arith.mulf %1312, %1311 : vector<16x128xf32>
    %1314 = arith.addf %1309, %1313 : vector<16x128xf32>
    %c3_665 = arith.constant 3 : index
    %c7_666 = arith.constant 7 : index
    %c0_667 = arith.constant 0 : index
    %1315 = vector.load %arg3[%c3_665, %c7_666, %c0_667] : memref<4x24x128xf32, #tpu.memory_space<vmem>>, vector<1x16x128xf32>
    %1316 = vector.shape_cast %1315 : vector<1x16x128xf32> to vector<16x128xf32>
    %1317 = vector.broadcast %1142 : f32 to vector<16x128xf32>
    %1318 = arith.mulf %1317, %1316 : vector<16x128xf32>
    %1319 = arith.addf %1314, %1318 : vector<16x128xf32>
    %c3_668 = arith.constant 3 : index
    %c8_669 = arith.constant 8 : index
    %c0_670 = arith.constant 0 : index
    %1320 = vector.load %arg3[%c3_668, %c8_669, %c0_670] : memref<4x24x128xf32, #tpu.memory_space<vmem>>, vector<1x16x128xf32>
    %1321 = vector.shape_cast %1320 : vector<1x16x128xf32> to vector<16x128xf32>
    %1322 = vector.broadcast %1143 : f32 to vector<16x128xf32>
    %1323 = arith.mulf %1322, %1321 : vector<16x128xf32>
    %1324 = arith.addf %1319, %1323 : vector<16x128xf32>
    %c5_671 = arith.constant 5 : index
    %c0_672 = arith.constant 0 : index
    %c0_673 = arith.constant 0 : index
    %1325 = vector.load %arg4[%c5_671, %c0_672, %c0_673] : memref<8x16x128xf32, #tpu.memory_space<vmem>>, vector<1x16x128xf32>
    %1326 = vector.shape_cast %1325 : vector<1x16x128xf32> to vector<16x128xf32>
    %1327 = vector.shape_cast %1324 : vector<16x128xf32> to vector<1x16x128xf32>
    tpu.vector_store %arg4[%c5_671, %c0_672, %c0_673], %1327 {strides = array<i32>} : memref<8x16x128xf32, #tpu.memory_space<vmem>>, vector<1x16x128xf32>,
    %c216 = arith.constant 216 : index
    %1328 = memref.load %arg1[%c216] : memref<288xf32, #tpu.memory_space<smem>>
    %c217 = arith.constant 217 : index
    %1329 = memref.load %arg1[%c217] : memref<288xf32, #tpu.memory_space<smem>>
    %c218 = arith.constant 218 : index
    %1330 = memref.load %arg1[%c218] : memref<288xf32, #tpu.memory_space<smem>>
    %c219 = arith.constant 219 : index
    %1331 = memref.load %arg1[%c219] : memref<288xf32, #tpu.memory_space<smem>>
    %c220 = arith.constant 220 : index
    %1332 = memref.load %arg1[%c220] : memref<288xf32, #tpu.memory_space<smem>>
    %c221 = arith.constant 221 : index
    %1333 = memref.load %arg1[%c221] : memref<288xf32, #tpu.memory_space<smem>>
    %c222 = arith.constant 222 : index
    %1334 = memref.load %arg1[%c222] : memref<288xf32, #tpu.memory_space<smem>>
    %c223 = arith.constant 223 : index
    %1335 = memref.load %arg1[%c223] : memref<288xf32, #tpu.memory_space<smem>>
    %c224 = arith.constant 224 : index
    %1336 = memref.load %arg1[%c224] : memref<288xf32, #tpu.memory_space<smem>>
    %c225 = arith.constant 225 : index
    %1337 = memref.load %arg1[%c225] : memref<288xf32, #tpu.memory_space<smem>>
    %c226 = arith.constant 226 : index
    %1338 = memref.load %arg1[%c226] : memref<288xf32, #tpu.memory_space<smem>>
    %c227 = arith.constant 227 : index
    %1339 = memref.load %arg1[%c227] : memref<288xf32, #tpu.memory_space<smem>>
    %c228 = arith.constant 228 : index
    %1340 = memref.load %arg1[%c228] : memref<288xf32, #tpu.memory_space<smem>>
    %c229 = arith.constant 229 : index
    %1341 = memref.load %arg1[%c229] : memref<288xf32, #tpu.memory_space<smem>>
    %c230 = arith.constant 230 : index
    %1342 = memref.load %arg1[%c230] : memref<288xf32, #tpu.memory_space<smem>>
    %c231 = arith.constant 231 : index
    %1343 = memref.load %arg1[%c231] : memref<288xf32, #tpu.memory_space<smem>>
    %c232 = arith.constant 232 : index
    %1344 = memref.load %arg1[%c232] : memref<288xf32, #tpu.memory_space<smem>>
    %c233 = arith.constant 233 : index
    %1345 = memref.load %arg1[%c233] : memref<288xf32, #tpu.memory_space<smem>>
    %c234 = arith.constant 234 : index
    %1346 = memref.load %arg1[%c234] : memref<288xf32, #tpu.memory_space<smem>>
    %c235 = arith.constant 235 : index
    %1347 = memref.load %arg1[%c235] : memref<288xf32, #tpu.memory_space<smem>>
    %c236 = arith.constant 236 : index
    %1348 = memref.load %arg1[%c236] : memref<288xf32, #tpu.memory_space<smem>>
    %c237 = arith.constant 237 : index
    %1349 = memref.load %arg1[%c237] : memref<288xf32, #tpu.memory_space<smem>>
    %c238 = arith.constant 238 : index
    %1350 = memref.load %arg1[%c238] : memref<288xf32, #tpu.memory_space<smem>>
    %c239 = arith.constant 239 : index
    %1351 = memref.load %arg1[%c239] : memref<288xf32, #tpu.memory_space<smem>>
    %c240 = arith.constant 240 : index
    %1352 = memref.load %arg1[%c240] : memref<288xf32, #tpu.memory_space<smem>>
    %c241 = arith.constant 241 : index
    %1353 = memref.load %arg1[%c241] : memref<288xf32, #tpu.memory_space<smem>>
    %c242 = arith.constant 242 : index
    %1354 = memref.load %arg1[%c242] : memref<288xf32, #tpu.memory_space<smem>>
    %c243 = arith.constant 243 : index
    %1355 = memref.load %arg1[%c243] : memref<288xf32, #tpu.memory_space<smem>>
    %c244 = arith.constant 244 : index
    %1356 = memref.load %arg1[%c244] : memref<288xf32, #tpu.memory_space<smem>>
    %c245 = arith.constant 245 : index
    %1357 = memref.load %arg1[%c245] : memref<288xf32, #tpu.memory_space<smem>>
    %c246 = arith.constant 246 : index
    %1358 = memref.load %arg1[%c246] : memref<288xf32, #tpu.memory_space<smem>>
    %c247 = arith.constant 247 : index
    %1359 = memref.load %arg1[%c247] : memref<288xf32, #tpu.memory_space<smem>>
    %c248 = arith.constant 248 : index
    %1360 = memref.load %arg1[%c248] : memref<288xf32, #tpu.memory_space<smem>>
    %c249 = arith.constant 249 : index
    %1361 = memref.load %arg1[%c249] : memref<288xf32, #tpu.memory_space<smem>>
    %c250 = arith.constant 250 : index
    %1362 = memref.load %arg1[%c250] : memref<288xf32, #tpu.memory_space<smem>>
    %c251 = arith.constant 251 : index
    %1363 = memref.load %arg1[%c251] : memref<288xf32, #tpu.memory_space<smem>>
    %1364 = vector.broadcast %6 : f32 to vector<16x128xf32>
    %c0_674 = arith.constant 0 : index
    %c0_675 = arith.constant 0 : index
    %c0_676 = arith.constant 0 : index
    %1365 = vector.load %arg3[%c0_674, %c0_675, %c0_676] : memref<4x24x128xf32, #tpu.memory_space<vmem>>, vector<1x16x128xf32>
    %1366 = vector.shape_cast %1365 : vector<1x16x128xf32> to vector<16x128xf32>
    %1367 = vector.broadcast %1328 : f32 to vector<16x128xf32>
    %1368 = arith.mulf %1367, %1366 : vector<16x128xf32>
    %1369 = arith.addf %1364, %1368 : vector<16x128xf32>
    %c0_677 = arith.constant 0 : index
    %c1_678 = arith.constant 1 : index
    %c0_679 = arith.constant 0 : index
    %1370 = vector.load %arg3[%c0_677, %c1_678, %c0_679] : memref<4x24x128xf32, #tpu.memory_space<vmem>>, vector<1x16x128xf32>
    %1371 = vector.shape_cast %1370 : vector<1x16x128xf32> to vector<16x128xf32>
    %1372 = vector.broadcast %1329 : f32 to vector<16x128xf32>
    %1373 = arith.mulf %1372, %1371 : vector<16x128xf32>
    %1374 = arith.addf %1369, %1373 : vector<16x128xf32>
    %c0_680 = arith.constant 0 : index
    %c2_681 = arith.constant 2 : index
    %c0_682 = arith.constant 0 : index
    %1375 = vector.load %arg3[%c0_680, %c2_681, %c0_682] : memref<4x24x128xf32, #tpu.memory_space<vmem>>, vector<1x16x128xf32>
    %1376 = vector.shape_cast %1375 : vector<1x16x128xf32> to vector<16x128xf32>
    %1377 = vector.broadcast %1330 : f32 to vector<16x128xf32>
    %1378 = arith.mulf %1377, %1376 : vector<16x128xf32>
    %1379 = arith.addf %1374, %1378 : vector<16x128xf32>
    %c0_683 = arith.constant 0 : index
    %c3_684 = arith.constant 3 : index
    %c0_685 = arith.constant 0 : index
    %1380 = vector.load %arg3[%c0_683, %c3_684, %c0_685] : memref<4x24x128xf32, #tpu.memory_space<vmem>>, vector<1x16x128xf32>
    %1381 = vector.shape_cast %1380 : vector<1x16x128xf32> to vector<16x128xf32>
    %1382 = vector.broadcast %1331 : f32 to vector<16x128xf32>
    %1383 = arith.mulf %1382, %1381 : vector<16x128xf32>
    %1384 = arith.addf %1379, %1383 : vector<16x128xf32>
    %c0_686 = arith.constant 0 : index
    %c4_687 = arith.constant 4 : index
    %c0_688 = arith.constant 0 : index
    %1385 = vector.load %arg3[%c0_686, %c4_687, %c0_688] : memref<4x24x128xf32, #tpu.memory_space<vmem>>, vector<1x16x128xf32>
    %1386 = vector.shape_cast %1385 : vector<1x16x128xf32> to vector<16x128xf32>
    %1387 = vector.broadcast %1332 : f32 to vector<16x128xf32>
    %1388 = arith.mulf %1387, %1386 : vector<16x128xf32>
    %1389 = arith.addf %1384, %1388 : vector<16x128xf32>
    %c0_689 = arith.constant 0 : index
    %c5_690 = arith.constant 5 : index
    %c0_691 = arith.constant 0 : index
    %1390 = vector.load %arg3[%c0_689, %c5_690, %c0_691] : memref<4x24x128xf32, #tpu.memory_space<vmem>>, vector<1x16x128xf32>
    %1391 = vector.shape_cast %1390 : vector<1x16x128xf32> to vector<16x128xf32>
    %1392 = vector.broadcast %1333 : f32 to vector<16x128xf32>
    %1393 = arith.mulf %1392, %1391 : vector<16x128xf32>
    %1394 = arith.addf %1389, %1393 : vector<16x128xf32>
    %c0_692 = arith.constant 0 : index
    %c6_693 = arith.constant 6 : index
    %c0_694 = arith.constant 0 : index
    %1395 = vector.load %arg3[%c0_692, %c6_693, %c0_694] : memref<4x24x128xf32, #tpu.memory_space<vmem>>, vector<1x16x128xf32>
    %1396 = vector.shape_cast %1395 : vector<1x16x128xf32> to vector<16x128xf32>
    %1397 = vector.broadcast %1334 : f32 to vector<16x128xf32>
    %1398 = arith.mulf %1397, %1396 : vector<16x128xf32>
    %1399 = arith.addf %1394, %1398 : vector<16x128xf32>
    %c0_695 = arith.constant 0 : index
    %c7_696 = arith.constant 7 : index
    %c0_697 = arith.constant 0 : index
    %1400 = vector.load %arg3[%c0_695, %c7_696, %c0_697] : memref<4x24x128xf32, #tpu.memory_space<vmem>>, vector<1x16x128xf32>
    %1401 = vector.shape_cast %1400 : vector<1x16x128xf32> to vector<16x128xf32>
    %1402 = vector.broadcast %1335 : f32 to vector<16x128xf32>
    %1403 = arith.mulf %1402, %1401 : vector<16x128xf32>
    %1404 = arith.addf %1399, %1403 : vector<16x128xf32>
    %c0_698 = arith.constant 0 : index
    %c8_699 = arith.constant 8 : index
    %c0_700 = arith.constant 0 : index
    %1405 = vector.load %arg3[%c0_698, %c8_699, %c0_700] : memref<4x24x128xf32, #tpu.memory_space<vmem>>, vector<1x16x128xf32>
    %1406 = vector.shape_cast %1405 : vector<1x16x128xf32> to vector<16x128xf32>
    %1407 = vector.broadcast %1336 : f32 to vector<16x128xf32>
    %1408 = arith.mulf %1407, %1406 : vector<16x128xf32>
    %1409 = arith.addf %1404, %1408 : vector<16x128xf32>
    %c1_701 = arith.constant 1 : index
    %c0_702 = arith.constant 0 : index
    %c0_703 = arith.constant 0 : index
    %1410 = vector.load %arg3[%c1_701, %c0_702, %c0_703] : memref<4x24x128xf32, #tpu.memory_space<vmem>>, vector<1x16x128xf32>
    %1411 = vector.shape_cast %1410 : vector<1x16x128xf32> to vector<16x128xf32>
    %1412 = vector.broadcast %1337 : f32 to vector<16x128xf32>
    %1413 = arith.mulf %1412, %1411 : vector<16x128xf32>
    %1414 = arith.addf %1409, %1413 : vector<16x128xf32>
    %c1_704 = arith.constant 1 : index
    %c1_705 = arith.constant 1 : index
    %c0_706 = arith.constant 0 : index
    %1415 = vector.load %arg3[%c1_704, %c1_705, %c0_706] : memref<4x24x128xf32, #tpu.memory_space<vmem>>, vector<1x16x128xf32>
    %1416 = vector.shape_cast %1415 : vector<1x16x128xf32> to vector<16x128xf32>
    %1417 = vector.broadcast %1338 : f32 to vector<16x128xf32>
    %1418 = arith.mulf %1417, %1416 : vector<16x128xf32>
    %1419 = arith.addf %1414, %1418 : vector<16x128xf32>
    %c1_707 = arith.constant 1 : index
    %c2_708 = arith.constant 2 : index
    %c0_709 = arith.constant 0 : index
    %1420 = vector.load %arg3[%c1_707, %c2_708, %c0_709] : memref<4x24x128xf32, #tpu.memory_space<vmem>>, vector<1x16x128xf32>
    %1421 = vector.shape_cast %1420 : vector<1x16x128xf32> to vector<16x128xf32>
    %1422 = vector.broadcast %1339 : f32 to vector<16x128xf32>
    %1423 = arith.mulf %1422, %1421 : vector<16x128xf32>
    %1424 = arith.addf %1419, %1423 : vector<16x128xf32>
    %c1_710 = arith.constant 1 : index
    %c3_711 = arith.constant 3 : index
    %c0_712 = arith.constant 0 : index
    %1425 = vector.load %arg3[%c1_710, %c3_711, %c0_712] : memref<4x24x128xf32, #tpu.memory_space<vmem>>, vector<1x16x128xf32>
    %1426 = vector.shape_cast %1425 : vector<1x16x128xf32> to vector<16x128xf32>
    %1427 = vector.broadcast %1340 : f32 to vector<16x128xf32>
    %1428 = arith.mulf %1427, %1426 : vector<16x128xf32>
    %1429 = arith.addf %1424, %1428 : vector<16x128xf32>
    %c1_713 = arith.constant 1 : index
    %c4_714 = arith.constant 4 : index
    %c0_715 = arith.constant 0 : index
    %1430 = vector.load %arg3[%c1_713, %c4_714, %c0_715] : memref<4x24x128xf32, #tpu.memory_space<vmem>>, vector<1x16x128xf32>
    %1431 = vector.shape_cast %1430 : vector<1x16x128xf32> to vector<16x128xf32>
    %1432 = vector.broadcast %1341 : f32 to vector<16x128xf32>
    %1433 = arith.mulf %1432, %1431 : vector<16x128xf32>
    %1434 = arith.addf %1429, %1433 : vector<16x128xf32>
    %c1_716 = arith.constant 1 : index
    %c5_717 = arith.constant 5 : index
    %c0_718 = arith.constant 0 : index
    %1435 = vector.load %arg3[%c1_716, %c5_717, %c0_718] : memref<4x24x128xf32, #tpu.memory_space<vmem>>, vector<1x16x128xf32>
    %1436 = vector.shape_cast %1435 : vector<1x16x128xf32> to vector<16x128xf32>
    %1437 = vector.broadcast %1342 : f32 to vector<16x128xf32>
    %1438 = arith.mulf %1437, %1436 : vector<16x128xf32>
    %1439 = arith.addf %1434, %1438 : vector<16x128xf32>
    %c1_719 = arith.constant 1 : index
    %c6_720 = arith.constant 6 : index
    %c0_721 = arith.constant 0 : index
    %1440 = vector.load %arg3[%c1_719, %c6_720, %c0_721] : memref<4x24x128xf32, #tpu.memory_space<vmem>>, vector<1x16x128xf32>
    %1441 = vector.shape_cast %1440 : vector<1x16x128xf32> to vector<16x128xf32>
    %1442 = vector.broadcast %1343 : f32 to vector<16x128xf32>
    %1443 = arith.mulf %1442, %1441 : vector<16x128xf32>
    %1444 = arith.addf %1439, %1443 : vector<16x128xf32>
    %c1_722 = arith.constant 1 : index
    %c7_723 = arith.constant 7 : index
    %c0_724 = arith.constant 0 : index
    %1445 = vector.load %arg3[%c1_722, %c7_723, %c0_724] : memref<4x24x128xf32, #tpu.memory_space<vmem>>, vector<1x16x128xf32>
    %1446 = vector.shape_cast %1445 : vector<1x16x128xf32> to vector<16x128xf32>
    %1447 = vector.broadcast %1344 : f32 to vector<16x128xf32>
    %1448 = arith.mulf %1447, %1446 : vector<16x128xf32>
    %1449 = arith.addf %1444, %1448 : vector<16x128xf32>
    %c1_725 = arith.constant 1 : index
    %c8_726 = arith.constant 8 : index
    %c0_727 = arith.constant 0 : index
    %1450 = vector.load %arg3[%c1_725, %c8_726, %c0_727] : memref<4x24x128xf32, #tpu.memory_space<vmem>>, vector<1x16x128xf32>
    %1451 = vector.shape_cast %1450 : vector<1x16x128xf32> to vector<16x128xf32>
    %1452 = vector.broadcast %1345 : f32 to vector<16x128xf32>
    %1453 = arith.mulf %1452, %1451 : vector<16x128xf32>
    %1454 = arith.addf %1449, %1453 : vector<16x128xf32>
    %c2_728 = arith.constant 2 : index
    %c0_729 = arith.constant 0 : index
    %c0_730 = arith.constant 0 : index
    %1455 = vector.load %arg3[%c2_728, %c0_729, %c0_730] : memref<4x24x128xf32, #tpu.memory_space<vmem>>, vector<1x16x128xf32>
    %1456 = vector.shape_cast %1455 : vector<1x16x128xf32> to vector<16x128xf32>
    %1457 = vector.broadcast %1346 : f32 to vector<16x128xf32>
    %1458 = arith.mulf %1457, %1456 : vector<16x128xf32>
    %1459 = arith.addf %1454, %1458 : vector<16x128xf32>
    %c2_731 = arith.constant 2 : index
    %c1_732 = arith.constant 1 : index
    %c0_733 = arith.constant 0 : index
    %1460 = vector.load %arg3[%c2_731, %c1_732, %c0_733] : memref<4x24x128xf32, #tpu.memory_space<vmem>>, vector<1x16x128xf32>
    %1461 = vector.shape_cast %1460 : vector<1x16x128xf32> to vector<16x128xf32>
    %1462 = vector.broadcast %1347 : f32 to vector<16x128xf32>
    %1463 = arith.mulf %1462, %1461 : vector<16x128xf32>
    %1464 = arith.addf %1459, %1463 : vector<16x128xf32>
    %c2_734 = arith.constant 2 : index
    %c2_735 = arith.constant 2 : index
    %c0_736 = arith.constant 0 : index
    %1465 = vector.load %arg3[%c2_734, %c2_735, %c0_736] : memref<4x24x128xf32, #tpu.memory_space<vmem>>, vector<1x16x128xf32>
    %1466 = vector.shape_cast %1465 : vector<1x16x128xf32> to vector<16x128xf32>
    %1467 = vector.broadcast %1348 : f32 to vector<16x128xf32>
    %1468 = arith.mulf %1467, %1466 : vector<16x128xf32>
    %1469 = arith.addf %1464, %1468 : vector<16x128xf32>
    %c2_737 = arith.constant 2 : index
    %c3_738 = arith.constant 3 : index
    %c0_739 = arith.constant 0 : index
    %1470 = vector.load %arg3[%c2_737, %c3_738, %c0_739] : memref<4x24x128xf32, #tpu.memory_space<vmem>>, vector<1x16x128xf32>
    %1471 = vector.shape_cast %1470 : vector<1x16x128xf32> to vector<16x128xf32>
    %1472 = vector.broadcast %1349 : f32 to vector<16x128xf32>
    %1473 = arith.mulf %1472, %1471 : vector<16x128xf32>
    %1474 = arith.addf %1469, %1473 : vector<16x128xf32>
    %c2_740 = arith.constant 2 : index
    %c4_741 = arith.constant 4 : index
    %c0_742 = arith.constant 0 : index
    %1475 = vector.load %arg3[%c2_740, %c4_741, %c0_742] : memref<4x24x128xf32, #tpu.memory_space<vmem>>, vector<1x16x128xf32>
    %1476 = vector.shape_cast %1475 : vector<1x16x128xf32> to vector<16x128xf32>
    %1477 = vector.broadcast %1350 : f32 to vector<16x128xf32>
    %1478 = arith.mulf %1477, %1476 : vector<16x128xf32>
    %1479 = arith.addf %1474, %1478 : vector<16x128xf32>
    %c2_743 = arith.constant 2 : index
    %c5_744 = arith.constant 5 : index
    %c0_745 = arith.constant 0 : index
    %1480 = vector.load %arg3[%c2_743, %c5_744, %c0_745] : memref<4x24x128xf32, #tpu.memory_space<vmem>>, vector<1x16x128xf32>
    %1481 = vector.shape_cast %1480 : vector<1x16x128xf32> to vector<16x128xf32>
    %1482 = vector.broadcast %1351 : f32 to vector<16x128xf32>
    %1483 = arith.mulf %1482, %1481 : vector<16x128xf32>
    %1484 = arith.addf %1479, %1483 : vector<16x128xf32>
    %c2_746 = arith.constant 2 : index
    %c6_747 = arith.constant 6 : index
    %c0_748 = arith.constant 0 : index
    %1485 = vector.load %arg3[%c2_746, %c6_747, %c0_748] : memref<4x24x128xf32, #tpu.memory_space<vmem>>, vector<1x16x128xf32>
    %1486 = vector.shape_cast %1485 : vector<1x16x128xf32> to vector<16x128xf32>
    %1487 = vector.broadcast %1352 : f32 to vector<16x128xf32>
    %1488 = arith.mulf %1487, %1486 : vector<16x128xf32>
    %1489 = arith.addf %1484, %1488 : vector<16x128xf32>
    %c2_749 = arith.constant 2 : index
    %c7_750 = arith.constant 7 : index
    %c0_751 = arith.constant 0 : index
    %1490 = vector.load %arg3[%c2_749, %c7_750, %c0_751] : memref<4x24x128xf32, #tpu.memory_space<vmem>>, vector<1x16x128xf32>
    %1491 = vector.shape_cast %1490 : vector<1x16x128xf32> to vector<16x128xf32>
    %1492 = vector.broadcast %1353 : f32 to vector<16x128xf32>
    %1493 = arith.mulf %1492, %1491 : vector<16x128xf32>
    %1494 = arith.addf %1489, %1493 : vector<16x128xf32>
    %c2_752 = arith.constant 2 : index
    %c8_753 = arith.constant 8 : index
    %c0_754 = arith.constant 0 : index
    %1495 = vector.load %arg3[%c2_752, %c8_753, %c0_754] : memref<4x24x128xf32, #tpu.memory_space<vmem>>, vector<1x16x128xf32>
    %1496 = vector.shape_cast %1495 : vector<1x16x128xf32> to vector<16x128xf32>
    %1497 = vector.broadcast %1354 : f32 to vector<16x128xf32>
    %1498 = arith.mulf %1497, %1496 : vector<16x128xf32>
    %1499 = arith.addf %1494, %1498 : vector<16x128xf32>
    %c3_755 = arith.constant 3 : index
    %c0_756 = arith.constant 0 : index
    %c0_757 = arith.constant 0 : index
    %1500 = vector.load %arg3[%c3_755, %c0_756, %c0_757] : memref<4x24x128xf32, #tpu.memory_space<vmem>>, vector<1x16x128xf32>
    %1501 = vector.shape_cast %1500 : vector<1x16x128xf32> to vector<16x128xf32>
    %1502 = vector.broadcast %1355 : f32 to vector<16x128xf32>
    %1503 = arith.mulf %1502, %1501 : vector<16x128xf32>
    %1504 = arith.addf %1499, %1503 : vector<16x128xf32>
    %c3_758 = arith.constant 3 : index
    %c1_759 = arith.constant 1 : index
    %c0_760 = arith.constant 0 : index
    %1505 = vector.load %arg3[%c3_758, %c1_759, %c0_760] : memref<4x24x128xf32, #tpu.memory_space<vmem>>, vector<1x16x128xf32>
    %1506 = vector.shape_cast %1505 : vector<1x16x128xf32> to vector<16x128xf32>
    %1507 = vector.broadcast %1356 : f32 to vector<16x128xf32>
    %1508 = arith.mulf %1507, %1506 : vector<16x128xf32>
    %1509 = arith.addf %1504, %1508 : vector<16x128xf32>
    %c3_761 = arith.constant 3 : index
    %c2_762 = arith.constant 2 : index
    %c0_763 = arith.constant 0 : index
    %1510 = vector.load %arg3[%c3_761, %c2_762, %c0_763] : memref<4x24x128xf32, #tpu.memory_space<vmem>>, vector<1x16x128xf32>
    %1511 = vector.shape_cast %1510 : vector<1x16x128xf32> to vector<16x128xf32>
    %1512 = vector.broadcast %1357 : f32 to vector<16x128xf32>
    %1513 = arith.mulf %1512, %1511 : vector<16x128xf32>
    %1514 = arith.addf %1509, %1513 : vector<16x128xf32>
    %c3_764 = arith.constant 3 : index
    %c3_765 = arith.constant 3 : index
    %c0_766 = arith.constant 0 : index
    %1515 = vector.load %arg3[%c3_764, %c3_765, %c0_766] : memref<4x24x128xf32, #tpu.memory_space<vmem>>, vector<1x16x128xf32>
    %1516 = vector.shape_cast %1515 : vector<1x16x128xf32> to vector<16x128xf32>
    %1517 = vector.broadcast %1358 : f32 to vector<16x128xf32>
    %1518 = arith.mulf %1517, %1516 : vector<16x128xf32>
    %1519 = arith.addf %1514, %1518 : vector<16x128xf32>
    %c3_767 = arith.constant 3 : index
    %c4_768 = arith.constant 4 : index
    %c0_769 = arith.constant 0 : index
    %1520 = vector.load %arg3[%c3_767, %c4_768, %c0_769] : memref<4x24x128xf32, #tpu.memory_space<vmem>>, vector<1x16x128xf32>
    %1521 = vector.shape_cast %1520 : vector<1x16x128xf32> to vector<16x128xf32>
    %1522 = vector.broadcast %1359 : f32 to vector<16x128xf32>
    %1523 = arith.mulf %1522, %1521 : vector<16x128xf32>
    %1524 = arith.addf %1519, %1523 : vector<16x128xf32>
    %c3_770 = arith.constant 3 : index
    %c5_771 = arith.constant 5 : index
    %c0_772 = arith.constant 0 : index
    %1525 = vector.load %arg3[%c3_770, %c5_771, %c0_772] : memref<4x24x128xf32, #tpu.memory_space<vmem>>, vector<1x16x128xf32>
    %1526 = vector.shape_cast %1525 : vector<1x16x128xf32> to vector<16x128xf32>
    %1527 = vector.broadcast %1360 : f32 to vector<16x128xf32>
    %1528 = arith.mulf %1527, %1526 : vector<16x128xf32>
    %1529 = arith.addf %1524, %1528 : vector<16x128xf32>
    %c3_773 = arith.constant 3 : index
    %c6_774 = arith.constant 6 : index
    %c0_775 = arith.constant 0 : index
    %1530 = vector.load %arg3[%c3_773, %c6_774, %c0_775] : memref<4x24x128xf32, #tpu.memory_space<vmem>>, vector<1x16x128xf32>
    %1531 = vector.shape_cast %1530 : vector<1x16x128xf32> to vector<16x128xf32>
    %1532 = vector.broadcast %1361 : f32 to vector<16x128xf32>
    %1533 = arith.mulf %1532, %1531 : vector<16x128xf32>
    %1534 = arith.addf %1529, %1533 : vector<16x128xf32>
    %c3_776 = arith.constant 3 : index
    %c7_777 = arith.constant 7 : index
    %c0_778 = arith.constant 0 : index
    %1535 = vector.load %arg3[%c3_776, %c7_777, %c0_778] : memref<4x24x128xf32, #tpu.memory_space<vmem>>, vector<1x16x128xf32>
    %1536 = vector.shape_cast %1535 : vector<1x16x128xf32> to vector<16x128xf32>
    %1537 = vector.broadcast %1362 : f32 to vector<16x128xf32>
    %1538 = arith.mulf %1537, %1536 : vector<16x128xf32>
    %1539 = arith.addf %1534, %1538 : vector<16x128xf32>
    %c3_779 = arith.constant 3 : index
    %c8_780 = arith.constant 8 : index
    %c0_781 = arith.constant 0 : index
    %1540 = vector.load %arg3[%c3_779, %c8_780, %c0_781] : memref<4x24x128xf32, #tpu.memory_space<vmem>>, vector<1x16x128xf32>
    %1541 = vector.shape_cast %1540 : vector<1x16x128xf32> to vector<16x128xf32>
    %1542 = vector.broadcast %1363 : f32 to vector<16x128xf32>
    %1543 = arith.mulf %1542, %1541 : vector<16x128xf32>
    %1544 = arith.addf %1539, %1543 : vector<16x128xf32>
    %c6_782 = arith.constant 6 : index
    %c0_783 = arith.constant 0 : index
    %c0_784 = arith.constant 0 : index
    %1545 = vector.load %arg4[%c6_782, %c0_783, %c0_784] : memref<8x16x128xf32, #tpu.memory_space<vmem>>, vector<1x16x128xf32>
    %1546 = vector.shape_cast %1545 : vector<1x16x128xf32> to vector<16x128xf32>
    %1547 = vector.shape_cast %1544 : vector<16x128xf32> to vector<1x16x128xf32>
    tpu.vector_store %arg4[%c6_782, %c0_783, %c0_784], %1547 {strides = array<i32>} : memref<8x16x128xf32, #tpu.memory_space<vmem>>, vector<1x16x128xf32>,
    %c252 = arith.constant 252 : index
    %1548 = memref.load %arg1[%c252] : memref<288xf32, #tpu.memory_space<smem>>
    %c253 = arith.constant 253 : index
    %1549 = memref.load %arg1[%c253] : memref<288xf32, #tpu.memory_space<smem>>
    %c254 = arith.constant 254 : index
    %1550 = memref.load %arg1[%c254] : memref<288xf32, #tpu.memory_space<smem>>
    %c255 = arith.constant 255 : index
    %1551 = memref.load %arg1[%c255] : memref<288xf32, #tpu.memory_space<smem>>
    %c256 = arith.constant 256 : index
    %1552 = memref.load %arg1[%c256] : memref<288xf32, #tpu.memory_space<smem>>
    %c257 = arith.constant 257 : index
    %1553 = memref.load %arg1[%c257] : memref<288xf32, #tpu.memory_space<smem>>
    %c258 = arith.constant 258 : index
    %1554 = memref.load %arg1[%c258] : memref<288xf32, #tpu.memory_space<smem>>
    %c259 = arith.constant 259 : index
    %1555 = memref.load %arg1[%c259] : memref<288xf32, #tpu.memory_space<smem>>
    %c260 = arith.constant 260 : index
    %1556 = memref.load %arg1[%c260] : memref<288xf32, #tpu.memory_space<smem>>
    %c261 = arith.constant 261 : index
    %1557 = memref.load %arg1[%c261] : memref<288xf32, #tpu.memory_space<smem>>
    %c262 = arith.constant 262 : index
    %1558 = memref.load %arg1[%c262] : memref<288xf32, #tpu.memory_space<smem>>
    %c263 = arith.constant 263 : index
    %1559 = memref.load %arg1[%c263] : memref<288xf32, #tpu.memory_space<smem>>
    %c264 = arith.constant 264 : index
    %1560 = memref.load %arg1[%c264] : memref<288xf32, #tpu.memory_space<smem>>
    %c265 = arith.constant 265 : index
    %1561 = memref.load %arg1[%c265] : memref<288xf32, #tpu.memory_space<smem>>
    %c266 = arith.constant 266 : index
    %1562 = memref.load %arg1[%c266] : memref<288xf32, #tpu.memory_space<smem>>
    %c267 = arith.constant 267 : index
    %1563 = memref.load %arg1[%c267] : memref<288xf32, #tpu.memory_space<smem>>
    %c268 = arith.constant 268 : index
    %1564 = memref.load %arg1[%c268] : memref<288xf32, #tpu.memory_space<smem>>
    %c269 = arith.constant 269 : index
    %1565 = memref.load %arg1[%c269] : memref<288xf32, #tpu.memory_space<smem>>
    %c270 = arith.constant 270 : index
    %1566 = memref.load %arg1[%c270] : memref<288xf32, #tpu.memory_space<smem>>
    %c271 = arith.constant 271 : index
    %1567 = memref.load %arg1[%c271] : memref<288xf32, #tpu.memory_space<smem>>
    %c272 = arith.constant 272 : index
    %1568 = memref.load %arg1[%c272] : memref<288xf32, #tpu.memory_space<smem>>
    %c273 = arith.constant 273 : index
    %1569 = memref.load %arg1[%c273] : memref<288xf32, #tpu.memory_space<smem>>
    %c274 = arith.constant 274 : index
    %1570 = memref.load %arg1[%c274] : memref<288xf32, #tpu.memory_space<smem>>
    %c275 = arith.constant 275 : index
    %1571 = memref.load %arg1[%c275] : memref<288xf32, #tpu.memory_space<smem>>
    %c276 = arith.constant 276 : index
    %1572 = memref.load %arg1[%c276] : memref<288xf32, #tpu.memory_space<smem>>
    %c277 = arith.constant 277 : index
    %1573 = memref.load %arg1[%c277] : memref<288xf32, #tpu.memory_space<smem>>
    %c278 = arith.constant 278 : index
    %1574 = memref.load %arg1[%c278] : memref<288xf32, #tpu.memory_space<smem>>
    %c279 = arith.constant 279 : index
    %1575 = memref.load %arg1[%c279] : memref<288xf32, #tpu.memory_space<smem>>
    %c280 = arith.constant 280 : index
    %1576 = memref.load %arg1[%c280] : memref<288xf32, #tpu.memory_space<smem>>
    %c281 = arith.constant 281 : index
    %1577 = memref.load %arg1[%c281] : memref<288xf32, #tpu.memory_space<smem>>
    %c282 = arith.constant 282 : index
    %1578 = memref.load %arg1[%c282] : memref<288xf32, #tpu.memory_space<smem>>
    %c283 = arith.constant 283 : index
    %1579 = memref.load %arg1[%c283] : memref<288xf32, #tpu.memory_space<smem>>
    %c284 = arith.constant 284 : index
    %1580 = memref.load %arg1[%c284] : memref<288xf32, #tpu.memory_space<smem>>
    %c285 = arith.constant 285 : index
    %1581 = memref.load %arg1[%c285] : memref<288xf32, #tpu.memory_space<smem>>
    %c286 = arith.constant 286 : index
    %1582 = memref.load %arg1[%c286] : memref<288xf32, #tpu.memory_space<smem>>
    %c287 = arith.constant 287 : index
    %1583 = memref.load %arg1[%c287] : memref<288xf32, #tpu.memory_space<smem>>
    %1584 = vector.broadcast %7 : f32 to vector<16x128xf32>
    %c0_785 = arith.constant 0 : index
    %c0_786 = arith.constant 0 : index
    %c0_787 = arith.constant 0 : index
    %1585 = vector.load %arg3[%c0_785, %c0_786, %c0_787] : memref<4x24x128xf32, #tpu.memory_space<vmem>>, vector<1x16x128xf32>
    %1586 = vector.shape_cast %1585 : vector<1x16x128xf32> to vector<16x128xf32>
    %1587 = vector.broadcast %1548 : f32 to vector<16x128xf32>
    %1588 = arith.mulf %1587, %1586 : vector<16x128xf32>
    %1589 = arith.addf %1584, %1588 : vector<16x128xf32>
    %c0_788 = arith.constant 0 : index
    %c1_789 = arith.constant 1 : index
    %c0_790 = arith.constant 0 : index
    %1590 = vector.load %arg3[%c0_788, %c1_789, %c0_790] : memref<4x24x128xf32, #tpu.memory_space<vmem>>, vector<1x16x128xf32>
    %1591 = vector.shape_cast %1590 : vector<1x16x128xf32> to vector<16x128xf32>
    %1592 = vector.broadcast %1549 : f32 to vector<16x128xf32>
    %1593 = arith.mulf %1592, %1591 : vector<16x128xf32>
    %1594 = arith.addf %1589, %1593 : vector<16x128xf32>
    %c0_791 = arith.constant 0 : index
    %c2_792 = arith.constant 2 : index
    %c0_793 = arith.constant 0 : index
    %1595 = vector.load %arg3[%c0_791, %c2_792, %c0_793] : memref<4x24x128xf32, #tpu.memory_space<vmem>>, vector<1x16x128xf32>
    %1596 = vector.shape_cast %1595 : vector<1x16x128xf32> to vector<16x128xf32>
    %1597 = vector.broadcast %1550 : f32 to vector<16x128xf32>
    %1598 = arith.mulf %1597, %1596 : vector<16x128xf32>
    %1599 = arith.addf %1594, %1598 : vector<16x128xf32>
    %c0_794 = arith.constant 0 : index
    %c3_795 = arith.constant 3 : index
    %c0_796 = arith.constant 0 : index
    %1600 = vector.load %arg3[%c0_794, %c3_795, %c0_796] : memref<4x24x128xf32, #tpu.memory_space<vmem>>, vector<1x16x128xf32>
    %1601 = vector.shape_cast %1600 : vector<1x16x128xf32> to vector<16x128xf32>
    %1602 = vector.broadcast %1551 : f32 to vector<16x128xf32>
    %1603 = arith.mulf %1602, %1601 : vector<16x128xf32>
    %1604 = arith.addf %1599, %1603 : vector<16x128xf32>
    %c0_797 = arith.constant 0 : index
    %c4_798 = arith.constant 4 : index
    %c0_799 = arith.constant 0 : index
    %1605 = vector.load %arg3[%c0_797, %c4_798, %c0_799] : memref<4x24x128xf32, #tpu.memory_space<vmem>>, vector<1x16x128xf32>
    %1606 = vector.shape_cast %1605 : vector<1x16x128xf32> to vector<16x128xf32>
    %1607 = vector.broadcast %1552 : f32 to vector<16x128xf32>
    %1608 = arith.mulf %1607, %1606 : vector<16x128xf32>
    %1609 = arith.addf %1604, %1608 : vector<16x128xf32>
    %c0_800 = arith.constant 0 : index
    %c5_801 = arith.constant 5 : index
    %c0_802 = arith.constant 0 : index
    %1610 = vector.load %arg3[%c0_800, %c5_801, %c0_802] : memref<4x24x128xf32, #tpu.memory_space<vmem>>, vector<1x16x128xf32>
    %1611 = vector.shape_cast %1610 : vector<1x16x128xf32> to vector<16x128xf32>
    %1612 = vector.broadcast %1553 : f32 to vector<16x128xf32>
    %1613 = arith.mulf %1612, %1611 : vector<16x128xf32>
    %1614 = arith.addf %1609, %1613 : vector<16x128xf32>
    %c0_803 = arith.constant 0 : index
    %c6_804 = arith.constant 6 : index
    %c0_805 = arith.constant 0 : index
    %1615 = vector.load %arg3[%c0_803, %c6_804, %c0_805] : memref<4x24x128xf32, #tpu.memory_space<vmem>>, vector<1x16x128xf32>
    %1616 = vector.shape_cast %1615 : vector<1x16x128xf32> to vector<16x128xf32>
    %1617 = vector.broadcast %1554 : f32 to vector<16x128xf32>
    %1618 = arith.mulf %1617, %1616 : vector<16x128xf32>
    %1619 = arith.addf %1614, %1618 : vector<16x128xf32>
    %c0_806 = arith.constant 0 : index
    %c7_807 = arith.constant 7 : index
    %c0_808 = arith.constant 0 : index
    %1620 = vector.load %arg3[%c0_806, %c7_807, %c0_808] : memref<4x24x128xf32, #tpu.memory_space<vmem>>, vector<1x16x128xf32>
    %1621 = vector.shape_cast %1620 : vector<1x16x128xf32> to vector<16x128xf32>
    %1622 = vector.broadcast %1555 : f32 to vector<16x128xf32>
    %1623 = arith.mulf %1622, %1621 : vector<16x128xf32>
    %1624 = arith.addf %1619, %1623 : vector<16x128xf32>
    %c0_809 = arith.constant 0 : index
    %c8_810 = arith.constant 8 : index
    %c0_811 = arith.constant 0 : index
    %1625 = vector.load %arg3[%c0_809, %c8_810, %c0_811] : memref<4x24x128xf32, #tpu.memory_space<vmem>>, vector<1x16x128xf32>
    %1626 = vector.shape_cast %1625 : vector<1x16x128xf32> to vector<16x128xf32>
    %1627 = vector.broadcast %1556 : f32 to vector<16x128xf32>
    %1628 = arith.mulf %1627, %1626 : vector<16x128xf32>
    %1629 = arith.addf %1624, %1628 : vector<16x128xf32>
    %c1_812 = arith.constant 1 : index
    %c0_813 = arith.constant 0 : index
    %c0_814 = arith.constant 0 : index
    %1630 = vector.load %arg3[%c1_812, %c0_813, %c0_814] : memref<4x24x128xf32, #tpu.memory_space<vmem>>, vector<1x16x128xf32>
    %1631 = vector.shape_cast %1630 : vector<1x16x128xf32> to vector<16x128xf32>
    %1632 = vector.broadcast %1557 : f32 to vector<16x128xf32>
    %1633 = arith.mulf %1632, %1631 : vector<16x128xf32>
    %1634 = arith.addf %1629, %1633 : vector<16x128xf32>
    %c1_815 = arith.constant 1 : index
    %c1_816 = arith.constant 1 : index
    %c0_817 = arith.constant 0 : index
    %1635 = vector.load %arg3[%c1_815, %c1_816, %c0_817] : memref<4x24x128xf32, #tpu.memory_space<vmem>>, vector<1x16x128xf32>
    %1636 = vector.shape_cast %1635 : vector<1x16x128xf32> to vector<16x128xf32>
    %1637 = vector.broadcast %1558 : f32 to vector<16x128xf32>
    %1638 = arith.mulf %1637, %1636 : vector<16x128xf32>
    %1639 = arith.addf %1634, %1638 : vector<16x128xf32>
    %c1_818 = arith.constant 1 : index
    %c2_819 = arith.constant 2 : index
    %c0_820 = arith.constant 0 : index
    %1640 = vector.load %arg3[%c1_818, %c2_819, %c0_820] : memref<4x24x128xf32, #tpu.memory_space<vmem>>, vector<1x16x128xf32>
    %1641 = vector.shape_cast %1640 : vector<1x16x128xf32> to vector<16x128xf32>
    %1642 = vector.broadcast %1559 : f32 to vector<16x128xf32>
    %1643 = arith.mulf %1642, %1641 : vector<16x128xf32>
    %1644 = arith.addf %1639, %1643 : vector<16x128xf32>
    %c1_821 = arith.constant 1 : index
    %c3_822 = arith.constant 3 : index
    %c0_823 = arith.constant 0 : index
    %1645 = vector.load %arg3[%c1_821, %c3_822, %c0_823] : memref<4x24x128xf32, #tpu.memory_space<vmem>>, vector<1x16x128xf32>
    %1646 = vector.shape_cast %1645 : vector<1x16x128xf32> to vector<16x128xf32>
    %1647 = vector.broadcast %1560 : f32 to vector<16x128xf32>
    %1648 = arith.mulf %1647, %1646 : vector<16x128xf32>
    %1649 = arith.addf %1644, %1648 : vector<16x128xf32>
    %c1_824 = arith.constant 1 : index
    %c4_825 = arith.constant 4 : index
    %c0_826 = arith.constant 0 : index
    %1650 = vector.load %arg3[%c1_824, %c4_825, %c0_826] : memref<4x24x128xf32, #tpu.memory_space<vmem>>, vector<1x16x128xf32>
    %1651 = vector.shape_cast %1650 : vector<1x16x128xf32> to vector<16x128xf32>
    %1652 = vector.broadcast %1561 : f32 to vector<16x128xf32>
    %1653 = arith.mulf %1652, %1651 : vector<16x128xf32>
    %1654 = arith.addf %1649, %1653 : vector<16x128xf32>
    %c1_827 = arith.constant 1 : index
    %c5_828 = arith.constant 5 : index
    %c0_829 = arith.constant 0 : index
    %1655 = vector.load %arg3[%c1_827, %c5_828, %c0_829] : memref<4x24x128xf32, #tpu.memory_space<vmem>>, vector<1x16x128xf32>
    %1656 = vector.shape_cast %1655 : vector<1x16x128xf32> to vector<16x128xf32>
    %1657 = vector.broadcast %1562 : f32 to vector<16x128xf32>
    %1658 = arith.mulf %1657, %1656 : vector<16x128xf32>
    %1659 = arith.addf %1654, %1658 : vector<16x128xf32>
    %c1_830 = arith.constant 1 : index
    %c6_831 = arith.constant 6 : index
    %c0_832 = arith.constant 0 : index
    %1660 = vector.load %arg3[%c1_830, %c6_831, %c0_832] : memref<4x24x128xf32, #tpu.memory_space<vmem>>, vector<1x16x128xf32>
    %1661 = vector.shape_cast %1660 : vector<1x16x128xf32> to vector<16x128xf32>
    %1662 = vector.broadcast %1563 : f32 to vector<16x128xf32>
    %1663 = arith.mulf %1662, %1661 : vector<16x128xf32>
    %1664 = arith.addf %1659, %1663 : vector<16x128xf32>
    %c1_833 = arith.constant 1 : index
    %c7_834 = arith.constant 7 : index
    %c0_835 = arith.constant 0 : index
    %1665 = vector.load %arg3[%c1_833, %c7_834, %c0_835] : memref<4x24x128xf32, #tpu.memory_space<vmem>>, vector<1x16x128xf32>
    %1666 = vector.shape_cast %1665 : vector<1x16x128xf32> to vector<16x128xf32>
    %1667 = vector.broadcast %1564 : f32 to vector<16x128xf32>
    %1668 = arith.mulf %1667, %1666 : vector<16x128xf32>
    %1669 = arith.addf %1664, %1668 : vector<16x128xf32>
    %c1_836 = arith.constant 1 : index
    %c8_837 = arith.constant 8 : index
    %c0_838 = arith.constant 0 : index
    %1670 = vector.load %arg3[%c1_836, %c8_837, %c0_838] : memref<4x24x128xf32, #tpu.memory_space<vmem>>, vector<1x16x128xf32>
    %1671 = vector.shape_cast %1670 : vector<1x16x128xf32> to vector<16x128xf32>
    %1672 = vector.broadcast %1565 : f32 to vector<16x128xf32>
    %1673 = arith.mulf %1672, %1671 : vector<16x128xf32>
    %1674 = arith.addf %1669, %1673 : vector<16x128xf32>
    %c2_839 = arith.constant 2 : index
    %c0_840 = arith.constant 0 : index
    %c0_841 = arith.constant 0 : index
    %1675 = vector.load %arg3[%c2_839, %c0_840, %c0_841] : memref<4x24x128xf32, #tpu.memory_space<vmem>>, vector<1x16x128xf32>
    %1676 = vector.shape_cast %1675 : vector<1x16x128xf32> to vector<16x128xf32>
    %1677 = vector.broadcast %1566 : f32 to vector<16x128xf32>
    %1678 = arith.mulf %1677, %1676 : vector<16x128xf32>
    %1679 = arith.addf %1674, %1678 : vector<16x128xf32>
    %c2_842 = arith.constant 2 : index
    %c1_843 = arith.constant 1 : index
    %c0_844 = arith.constant 0 : index
    %1680 = vector.load %arg3[%c2_842, %c1_843, %c0_844] : memref<4x24x128xf32, #tpu.memory_space<vmem>>, vector<1x16x128xf32>
    %1681 = vector.shape_cast %1680 : vector<1x16x128xf32> to vector<16x128xf32>
    %1682 = vector.broadcast %1567 : f32 to vector<16x128xf32>
    %1683 = arith.mulf %1682, %1681 : vector<16x128xf32>
    %1684 = arith.addf %1679, %1683 : vector<16x128xf32>
    %c2_845 = arith.constant 2 : index
    %c2_846 = arith.constant 2 : index
    %c0_847 = arith.constant 0 : index
    %1685 = vector.load %arg3[%c2_845, %c2_846, %c0_847] : memref<4x24x128xf32, #tpu.memory_space<vmem>>, vector<1x16x128xf32>
    %1686 = vector.shape_cast %1685 : vector<1x16x128xf32> to vector<16x128xf32>
    %1687 = vector.broadcast %1568 : f32 to vector<16x128xf32>
    %1688 = arith.mulf %1687, %1686 : vector<16x128xf32>
    %1689 = arith.addf %1684, %1688 : vector<16x128xf32>
    %c2_848 = arith.constant 2 : index
    %c3_849 = arith.constant 3 : index
    %c0_850 = arith.constant 0 : index
    %1690 = vector.load %arg3[%c2_848, %c3_849, %c0_850] : memref<4x24x128xf32, #tpu.memory_space<vmem>>, vector<1x16x128xf32>
    %1691 = vector.shape_cast %1690 : vector<1x16x128xf32> to vector<16x128xf32>
    %1692 = vector.broadcast %1569 : f32 to vector<16x128xf32>
    %1693 = arith.mulf %1692, %1691 : vector<16x128xf32>
    %1694 = arith.addf %1689, %1693 : vector<16x128xf32>
    %c2_851 = arith.constant 2 : index
    %c4_852 = arith.constant 4 : index
    %c0_853 = arith.constant 0 : index
    %1695 = vector.load %arg3[%c2_851, %c4_852, %c0_853] : memref<4x24x128xf32, #tpu.memory_space<vmem>>, vector<1x16x128xf32>
    %1696 = vector.shape_cast %1695 : vector<1x16x128xf32> to vector<16x128xf32>
    %1697 = vector.broadcast %1570 : f32 to vector<16x128xf32>
    %1698 = arith.mulf %1697, %1696 : vector<16x128xf32>
    %1699 = arith.addf %1694, %1698 : vector<16x128xf32>
    %c2_854 = arith.constant 2 : index
    %c5_855 = arith.constant 5 : index
    %c0_856 = arith.constant 0 : index
    %1700 = vector.load %arg3[%c2_854, %c5_855, %c0_856] : memref<4x24x128xf32, #tpu.memory_space<vmem>>, vector<1x16x128xf32>
    %1701 = vector.shape_cast %1700 : vector<1x16x128xf32> to vector<16x128xf32>
    %1702 = vector.broadcast %1571 : f32 to vector<16x128xf32>
    %1703 = arith.mulf %1702, %1701 : vector<16x128xf32>
    %1704 = arith.addf %1699, %1703 : vector<16x128xf32>
    %c2_857 = arith.constant 2 : index
    %c6_858 = arith.constant 6 : index
    %c0_859 = arith.constant 0 : index
    %1705 = vector.load %arg3[%c2_857, %c6_858, %c0_859] : memref<4x24x128xf32, #tpu.memory_space<vmem>>, vector<1x16x128xf32>
    %1706 = vector.shape_cast %1705 : vector<1x16x128xf32> to vector<16x128xf32>
    %1707 = vector.broadcast %1572 : f32 to vector<16x128xf32>
    %1708 = arith.mulf %1707, %1706 : vector<16x128xf32>
    %1709 = arith.addf %1704, %1708 : vector<16x128xf32>
    %c2_860 = arith.constant 2 : index
    %c7_861 = arith.constant 7 : index
    %c0_862 = arith.constant 0 : index
    %1710 = vector.load %arg3[%c2_860, %c7_861, %c0_862] : memref<4x24x128xf32, #tpu.memory_space<vmem>>, vector<1x16x128xf32>
    %1711 = vector.shape_cast %1710 : vector<1x16x128xf32> to vector<16x128xf32>
    %1712 = vector.broadcast %1573 : f32 to vector<16x128xf32>
    %1713 = arith.mulf %1712, %1711 : vector<16x128xf32>
    %1714 = arith.addf %1709, %1713 : vector<16x128xf32>
    %c2_863 = arith.constant 2 : index
    %c8_864 = arith.constant 8 : index
    %c0_865 = arith.constant 0 : index
    %1715 = vector.load %arg3[%c2_863, %c8_864, %c0_865] : memref<4x24x128xf32, #tpu.memory_space<vmem>>, vector<1x16x128xf32>
    %1716 = vector.shape_cast %1715 : vector<1x16x128xf32> to vector<16x128xf32>
    %1717 = vector.broadcast %1574 : f32 to vector<16x128xf32>
    %1718 = arith.mulf %1717, %1716 : vector<16x128xf32>
    %1719 = arith.addf %1714, %1718 : vector<16x128xf32>
    %c3_866 = arith.constant 3 : index
    %c0_867 = arith.constant 0 : index
    %c0_868 = arith.constant 0 : index
    %1720 = vector.load %arg3[%c3_866, %c0_867, %c0_868] : memref<4x24x128xf32, #tpu.memory_space<vmem>>, vector<1x16x128xf32>
    %1721 = vector.shape_cast %1720 : vector<1x16x128xf32> to vector<16x128xf32>
    %1722 = vector.broadcast %1575 : f32 to vector<16x128xf32>
    %1723 = arith.mulf %1722, %1721 : vector<16x128xf32>
    %1724 = arith.addf %1719, %1723 : vector<16x128xf32>
    %c3_869 = arith.constant 3 : index
    %c1_870 = arith.constant 1 : index
    %c0_871 = arith.constant 0 : index
    %1725 = vector.load %arg3[%c3_869, %c1_870, %c0_871] : memref<4x24x128xf32, #tpu.memory_space<vmem>>, vector<1x16x128xf32>
    %1726 = vector.shape_cast %1725 : vector<1x16x128xf32> to vector<16x128xf32>
    %1727 = vector.broadcast %1576 : f32 to vector<16x128xf32>
    %1728 = arith.mulf %1727, %1726 : vector<16x128xf32>
    %1729 = arith.addf %1724, %1728 : vector<16x128xf32>
    %c3_872 = arith.constant 3 : index
    %c2_873 = arith.constant 2 : index
    %c0_874 = arith.constant 0 : index
    %1730 = vector.load %arg3[%c3_872, %c2_873, %c0_874] : memref<4x24x128xf32, #tpu.memory_space<vmem>>, vector<1x16x128xf32>
    %1731 = vector.shape_cast %1730 : vector<1x16x128xf32> to vector<16x128xf32>
    %1732 = vector.broadcast %1577 : f32 to vector<16x128xf32>
    %1733 = arith.mulf %1732, %1731 : vector<16x128xf32>
    %1734 = arith.addf %1729, %1733 : vector<16x128xf32>
    %c3_875 = arith.constant 3 : index
    %c3_876 = arith.constant 3 : index
    %c0_877 = arith.constant 0 : index
    %1735 = vector.load %arg3[%c3_875, %c3_876, %c0_877] : memref<4x24x128xf32, #tpu.memory_space<vmem>>, vector<1x16x128xf32>
    %1736 = vector.shape_cast %1735 : vector<1x16x128xf32> to vector<16x128xf32>
    %1737 = vector.broadcast %1578 : f32 to vector<16x128xf32>
    %1738 = arith.mulf %1737, %1736 : vector<16x128xf32>
    %1739 = arith.addf %1734, %1738 : vector<16x128xf32>
    %c3_878 = arith.constant 3 : index
    %c4_879 = arith.constant 4 : index
    %c0_880 = arith.constant 0 : index
    %1740 = vector.load %arg3[%c3_878, %c4_879, %c0_880] : memref<4x24x128xf32, #tpu.memory_space<vmem>>, vector<1x16x128xf32>
    %1741 = vector.shape_cast %1740 : vector<1x16x128xf32> to vector<16x128xf32>
    %1742 = vector.broadcast %1579 : f32 to vector<16x128xf32>
    %1743 = arith.mulf %1742, %1741 : vector<16x128xf32>
    %1744 = arith.addf %1739, %1743 : vector<16x128xf32>
    %c3_881 = arith.constant 3 : index
    %c5_882 = arith.constant 5 : index
    %c0_883 = arith.constant 0 : index
    %1745 = vector.load %arg3[%c3_881, %c5_882, %c0_883] : memref<4x24x128xf32, #tpu.memory_space<vmem>>, vector<1x16x128xf32>
    %1746 = vector.shape_cast %1745 : vector<1x16x128xf32> to vector<16x128xf32>
    %1747 = vector.broadcast %1580 : f32 to vector<16x128xf32>
    %1748 = arith.mulf %1747, %1746 : vector<16x128xf32>
    %1749 = arith.addf %1744, %1748 : vector<16x128xf32>
    %c3_884 = arith.constant 3 : index
    %c6_885 = arith.constant 6 : index
    %c0_886 = arith.constant 0 : index
    %1750 = vector.load %arg3[%c3_884, %c6_885, %c0_886] : memref<4x24x128xf32, #tpu.memory_space<vmem>>, vector<1x16x128xf32>
    %1751 = vector.shape_cast %1750 : vector<1x16x128xf32> to vector<16x128xf32>
    %1752 = vector.broadcast %1581 : f32 to vector<16x128xf32>
    %1753 = arith.mulf %1752, %1751 : vector<16x128xf32>
    %1754 = arith.addf %1749, %1753 : vector<16x128xf32>
    %c3_887 = arith.constant 3 : index
    %c7_888 = arith.constant 7 : index
    %c0_889 = arith.constant 0 : index
    %1755 = vector.load %arg3[%c3_887, %c7_888, %c0_889] : memref<4x24x128xf32, #tpu.memory_space<vmem>>, vector<1x16x128xf32>
    %1756 = vector.shape_cast %1755 : vector<1x16x128xf32> to vector<16x128xf32>
    %1757 = vector.broadcast %1582 : f32 to vector<16x128xf32>
    %1758 = arith.mulf %1757, %1756 : vector<16x128xf32>
    %1759 = arith.addf %1754, %1758 : vector<16x128xf32>
    %c3_890 = arith.constant 3 : index
    %c8_891 = arith.constant 8 : index
    %c0_892 = arith.constant 0 : index
    %1760 = vector.load %arg3[%c3_890, %c8_891, %c0_892] : memref<4x24x128xf32, #tpu.memory_space<vmem>>, vector<1x16x128xf32>
    %1761 = vector.shape_cast %1760 : vector<1x16x128xf32> to vector<16x128xf32>
    %1762 = vector.broadcast %1583 : f32 to vector<16x128xf32>
    %1763 = arith.mulf %1762, %1761 : vector<16x128xf32>
    %1764 = arith.addf %1759, %1763 : vector<16x128xf32>
    %c7_893 = arith.constant 7 : index
    %c0_894 = arith.constant 0 : index
    %c0_895 = arith.constant 0 : index
    %1765 = vector.load %arg4[%c7_893, %c0_894, %c0_895] : memref<8x16x128xf32, #tpu.memory_space<vmem>>, vector<1x16x128xf32>
    %1766 = vector.shape_cast %1765 : vector<1x16x128xf32> to vector<16x128xf32>
    %1767 = vector.shape_cast %1764 : vector<16x128xf32> to vector<1x16x128xf32>
    tpu.vector_store %arg4[%c7_893, %c0_894, %c0_895], %1767 {strides = array<i32>} : memref<8x16x128xf32, #tpu.memory_space<vmem>>, vector<1x16x128xf32>,
    return
  }
  func.func @transform_0(%arg0: i32) -> i32 {
    %c0_i32 = arith.constant 0 : i32
    %c0_i32_0 = arith.constant 0 : i32
    return %c0_i32 : i32
  }
  func.func @transform_1(%arg0: i32) -> i32 {
    %c0_i32 = arith.constant 0 : i32
    %c0_i32_0 = arith.constant 0 : i32
    return %c0_i32 : i32
  }
  func.func @transform_2(%arg0: i32) -> (i32, i32, i32) {
    %c0_i32 = arith.constant 0 : i32
    %c0_i32_0 = arith.constant 0 : i32
    %c0_i32_1 = arith.constant 0 : i32
    return %c0_i32, %c0_i32_0, %arg0 : i32, i32, i32
  }
  func.func @transform_3(%arg0: i32) -> (i32, i32, i32) {
    %c0_i32 = arith.constant 0 : i32
    %c0_i32_0 = arith.constant 0 : i32
    %c0_i32_1 = arith.constant 0 : i32
    return %c0_i32, %c0_i32_0, %arg0 : i32, i32, i32
  }
}

</mosaic_0001>

<bundles_post_ra>
// kernel: tpu_custom_call.1
= control target key start
LH: loop header
LB: loop body
LE: loop exit
PB: predicated region body
PF: predicated region fallthrough
CT: control target
= control target key end

     0   :  { %8 = vsyncpa [#allocation5], 0  ;;  %s5384_s0 = inlined_call_operand.hbm [shape: f32[288], index: 0, kind: input, shape index: {}]   ;;  %s5385_s1 = inlined_call_operand.vmem [shape: f32[8], index: 1, kind: input, shape index: {}]   ;;  %s5386_s2 = inlined_call_operand.hbm [shape: f32[4,24,128], index: 2, kind: input, shape index: {}]   ;;  %s5387_s3 = inlined_call_operand.hbm [shape: f32[8,16,128], index: 3, kind: output, shape index: {}]  }
   0x1   :  { %9 = vsyncpa [#allocation6], 0 }
   0x2   :  { %10 = vsyncpa [#allocation3], 0 }
   0x3   :  { %11 = vsyncpa [#allocation4], 0  ;;  %s26_s14 = sshll.u32 %s5385_s1, 4  ;;  %s2753_s15 = smov [#allocation2]   ;;  %s27_s14 = int_to_ptr.vmem [resolvable:$true] %s26_s14 }
   0x4   :  { %19 = dma.hbm_to_smem %s5384_s0, 48, %s2753_s15, [#allocation5]  }
   0x5   :  { %s2693_s18 = scalar_lea.vmem %s27_s14, 16  ;;  %p2698_p1 = scmp.lt.s32.totalorder %s27_s14, %s27_s14 }
   0x6   :  { %p2694_p0 = scmp.ne.s32.totalorder %s27_s14, %s2693_s18  ;;  %p2699_p2 = scmp.lt.s32.totalorder %s2693_s18, %s2693_s18 }
   0x8   :  { %p2700_p3 = por %p2699_p2, %p2698_p1 }
   0xa   :  { %p2701_p4 = pnand %p2700_p3, %p2694_p0 }
   0xc   :  { %2704 = shalt.err (!%p2701_p4)
}
   0xd   :  { %s2754_s19 = smov [#allocation7]   ;;  %s2755_s20 = smov [#allocation8]  }
   0xe   :  { %29 = dma.vmem_to_smem %s27_s14, 16, %s2754_s19, [#allocation6]  }
   0xf   :  { %s35_s21 = sshll.u32 %s2755_s20, 4  ;;  %s36_s21 = int_to_ptr.vmem [resolvable:$true] %s35_s21 }
  0x10   :  { %s2713_s22 = scalar_lea.vmem %s36_s21, 1536  ;;  %p2718_p6 = scmp.lt.s32.totalorder %s36_s21, %s36_s21 }
  0x11   :  { %p2714_p5 = scmp.ne.s32.totalorder %s36_s21, %s2713_s22  ;;  %p2719_p7 = scmp.lt.s32.totalorder %s2713_s22, %s2713_s22 }
  0x13   :  { %p2720_p8 = por %p2719_p7, %p2718_p6 }
  0x15   :  { %p2721_p9 = pnand %p2720_p8, %p2714_p5 }
  0x17   :  { %2724 = shalt.err (!%p2721_p9)
}
  0x18   :  { %s2756_s0 = smov 128   ;;  %s2757_s1 = smov 8  }
  0x19   :  { %41 = dma.hbm_to_vmem [thread:$0]  %s5386_s2, 1536, %s36_s21, [#allocation3], %s2756_s0, %s2756_s0, %s2757_s1  }
  0x1a   :  { %2745 = dma.done.wait [#allocation5], 48  }
  0x1b   :  { %2746 = vsyncadd [#allocation5], 4294967248 }
  0x1c   :  { %2747 = dma.done.wait [#allocation6], 16  }
  0x1d   :  { %2748 = vsyncadd [#allocation6], 4294967280 }
  0x1e   :  { %2749 = dma.done.wait [#allocation3], 1536  }
  0x1f   :  { %2750 = vsyncadd [#allocation3], 4294965760 }
  0x20   :  { %51 = sfence }
  0x21   :  { %s52_s25 = sld [smem:[#allocation7]]  ;;  %v2799_v0 = vld [vmem:[#allocation8] sm:$0xff]  ;;  %v2801_v1 = vld [vmem:[#allocation8 + $0x8] sm:$0xff]  ;;  %v2870_v45 = vld [vmem:[#allocation8 + $0x10] sm:$0xff] }
  0x22   :  { %s2791_s26 = sld [smem:[#allocation7 + $0x1]]  ;;  %v2805_v2 = vld [vmem:[#allocation8 + $0x1] sm:$0xff]  ;;  %v2807_v3 = vld [vmem:[#allocation8 + $0x9] sm:$0xff]  ;;  %v2877_v49 = vld [vmem:[#allocation8 + $0x18] sm:$0xff] }
  0x23   :  { %s2793_s27 = sld [smem:[#allocation7 + $0x2]]  ;;  %v2811_v6 = vld [vmem:[#allocation8 + $0x2] sm:$0xff]  ;;  %v2813_v7 = vld [vmem:[#allocation8 + $0xa] sm:$0xff]  ;;  %v2886_v56 = vld [vmem:[#allocation8 + $0x19] sm:$0xff] }
  0x24   :  { %s60_s28 = sld [smem:[#allocation2]]  ;;  %v2823_v14 = vld [vmem:[#allocation8 + $0x3] sm:$0xff]  ;;  %v2825_v15 = vld [vmem:[#allocation8 + $0xb] sm:$0xff]  ;;  %5546 = vst [vmem:[#allocation14_spill] sm:$0xff] %v2886_v56  ;;  %v2897_v63 = vld [vmem:[#allocation8 + $0x1a] sm:$0xff] }
  0x25   :  { %s2392_s29 = sld [smem:[#allocation2 + $0x1]]  ;;  %v2831_v20 = vld [vmem:[#allocation8 + $0x4] sm:$0xff]  ;;  %v2836_v22 = vld [vmem:[#allocation8 + $0xc] sm:$0xff]  ;;  %5548 = vst [vmem:[#allocation16_spill] sm:$0xff] %v2897_v63 }
  0x26   :  { %s2393_s30 = sld [smem:[#allocation2 + $0x2]]  ;;  %v2843_v28 = vld [vmem:[#allocation8 + $0x5] sm:$0xff]  ;;  %v2845_v29 = vld [vmem:[#allocation8 + $0xd] sm:$0xff] }
  0x27   :  { %s2795_s4 = sld [smem:[#allocation2 + $0x3]]  ;;  %v96_v4 = vstv %s52_s25  ;;  %v2854_v35 = vld [vmem:[#allocation8 + $0x6] sm:$0xff]  ;;  %v2856_v36 = vld [vmem:[#allocation8 + $0xe] sm:$0xff] }
  0x28   :  { %s2797_s5 = sld [smem:[#allocation2 + $0x4]]  ;;  %v2865_v42 = vld [vmem:[#allocation8 + $0x7] sm:$0xff]  ;;  %v2867_v43 = vld [vmem:[#allocation8 + $0xf] sm:$0xff] }
  0x29   :  { %s2803_s2 = sld [smem:[#allocation2 + $0x5]]  ;;  %v2883_v54 = vld [vmem:[#allocation8 + $0x20] sm:$0xff]  ;;  %v2994_v50 = vld [vmem:[#allocation8 + $0x32] sm:$0xff] }
  0x2a   :  { %s2809_s6 = sld [smem:[#allocation2 + $0x6]]  ;;  %v99_v5 = vstv %s60_s28  ;;  %v2888_v57 = vld [vmem:[#allocation8 + $0x21] sm:$0xff]  ;;  %5565 = vst [vmem:[#allocation33_spill] sm:$0xff] %v2994_v50 }
  0x2b   :  { %s2815_s7 = sld [smem:[#allocation2 + $0x7]]  ;;  %v100_v8 = vmul.f32 %v99_v5, %v2799_v0  ;;  %v101_v9 = vmul.f32 %v99_v5, %v2801_v1  ;;  %v106_v10 = vstv %s2392_s29  ;;  %5547 = vst [vmem:[#allocation15_spill] sm:$0xff] %v2888_v57 }
  0x2c   :  { %s2819_s8 = sld [smem:[#allocation2 + $0x8]]  ;;  %v107_v11 = vmul.f32 %v106_v10, %v2805_v2  ;;  %v108_v12 = vmul.f32 %v106_v10, %v2807_v3  ;;  %v113_v13 = vstv %s2393_s30  ;;  %v2904_v10 = vld [vmem:[#allocation8 + $0x1b] sm:$0xff] }
  0x2d   :  { %s2827_s9 = sld [smem:[#allocation2 + $0x9]]  ;;  %v102_v16 = vadd.f32 %v100_v8, %v96_v4  ;;  %v103_v17 = vadd.f32 %v101_v9, %v96_v4  ;;  %v114_v18 = vmul.f32 %v113_v13, %v2811_v6  ;;  %v115_v19 = vmul.f32 %v113_v13, %v2813_v7  ;;  %v2901_v8 = vld [vmem:[#allocation8 + $0x22] sm:$0xff]  ;;  %5550 = vst [vmem:[#allocation18_spill] sm:$0xff] %v2904_v10 }
  0x2e   :  { %s2833_s10 = sld [smem:[#allocation2 + $0xa]]  ;;  %v120_v21 = vstv %s2795_s4  ;;  %v127_v23 = vstv %s2797_s5  ;;  %5549 = vst [vmem:[#allocation17_spill] sm:$0xff] %v2901_v8 }
  0x2f   :  { %s2839_s11 = sld [smem:[#allocation2 + $0xb]]  ;;  %v109_v24 = vadd.f32 %v107_v11, %v102_v16  ;;  %v110_v25 = vadd.f32 %v108_v12, %v103_v17  ;;  %v121_v26 = vmul.f32 %v120_v21, %v2823_v14  ;;  %v122_v27 = vmul.f32 %v120_v21, %v2825_v15  ;;  %v2906_v11 = vld [vmem:[#allocation8 + $0x23] sm:$0xff] }
  0x30   :  { %s2847_s12 = sld [smem:[#allocation2 + $0xc]]  ;;  %v128_v30 = vmul.f32 %v127_v23, %v2831_v20  ;;  %v134_v31 = vstv %s2803_s2  ;;  %v129_v34 = vmul.f32 %v127_v23, %v2836_v22  ;;  %v141_v37 = vstv %s2809_s6  ;;  %5551 = vst [vmem:[#allocation19_spill] sm:$0xff] %v2906_v11 }
  0x31   :  { %s2851_s13 = sld [smem:[#allocation2 + $0xd]]  ;;  %v116_v32 = vadd.f32 %v114_v18, %v109_v24  ;;  %v117_v33 = vadd.f32 %v115_v19, %v110_v25  ;;  %v135_v38 = vmul.f32 %v134_v31, %v2843_v28  ;;  %v136_v39 = vmul.f32 %v134_v31, %v2845_v29  ;;  %v2915_v19 = vld [vmem:[#allocation8 + $0x1c] sm:$0xff]  ;;  %v2919_v24 = vld [vmem:[#allocation8 + $0x24] sm:$0xff] }
  0x32   :  { %s2859_s14 = sld [smem:[#allocation2 + $0xe]]  ;;  %v148_v44 = vstv %s2815_s7  ;;  %v154_v46 = vstv %s2819_s8  ;;  %v142_v47 = vmul.f32 %v141_v37, %v2854_v35  ;;  %v143_v48 = vmul.f32 %v141_v37, %v2856_v36  ;;  %5552 = vst [vmem:[#allocation20_spill] sm:$0xff] %v2915_v19  ;;  %5553 = vst [vmem:[#allocation21_spill] sm:$0xff] %v2919_v24  ;;  %v2937_v37 = vld [vmem:[#allocation8 + $0x1e] sm:$0xff] }
  0x33   :  { %s2863_s15 = sld [smem:[#allocation2 + $0xf]]  ;;  %v123_v40 = vadd.f32 %v121_v26, %v116_v32  ;;  %v124_v41 = vadd.f32 %v122_v27, %v117_v33  ;;  %v162_v55 = vstv %s2827_s9  ;;  %v149_v59 = vmul.f32 %v148_v44, %v2865_v42  ;;  %v2922_v26 = vld [vmem:[#allocation8 + $0x1d] sm:$0xff]  ;;  %v2924_v27 = vld [vmem:[#allocation8 + $0x25] sm:$0xff]  ;;  %5556 = vst [vmem:[#allocation24_spill] sm:$0xff] %v2937_v37 }
  0x34   :  { %s2873_s16 = sld [smem:[#allocation2 + $0x10]]  ;;  %v169_v58 = vstv %s2833_s10  ;;  %v150_v60 = vmul.f32 %v148_v44, %v2867_v43  ;;  %v155_v61 = vmul.f32 %v154_v46, %v2801_v1  ;;  %v156_v62 = vmul.f32 %v154_v46, %v2870_v45  ;;  %5554 = vst [vmem:[#allocation22_spill] sm:$0xff] %v2922_v26  ;;  %5555 = vst [vmem:[#allocation23_spill] sm:$0xff] %v2924_v27  ;;  %v2944_v44 = vld [vmem:[#allocation8 + $0x1f] sm:$0xff]  ;;  %v2946_v46 = vld [vmem:[#allocation8 + $0x27] sm:$0xff] }
  0x35   :  { %s2881_s17 = sld [smem:[#allocation2 + $0x11]]  ;;  %v130_v52 = vadd.f32 %v128_v30, %v123_v40  ;;  %v131_v53 = vadd.f32 %v129_v34, %v124_v41  ;;  %v176_v9 = vstv %s2839_s11  ;;  %v163_v13 = vmul.f32 %v162_v55, %v2877_v49  ;;  %v2941_v40 = vld [vmem:[#allocation8 + $0x26] sm:$0xff]  ;;  %5558 = vst [vmem:[#allocation26_spill] sm:$0xff] %v2944_v44  ;;  %5559 = vst [vmem:[#allocation27_spill] sm:$0xff] %v2946_v46 }
  0x36   :  { %s2891_s18 = sld [smem:[#allocation2 + $0x12]]  ;;  %v183_v12 = vstv %s2847_s12  ;;  %v164_v16 = vmul.f32 %v162_v55, %v2883_v54  ;;  %v170_v17 = vmul.f32 %v169_v58, %v2886_v56  ;;  %v171_v18 = vmul.f32 %v169_v58, %v2888_v57  ;;  %5557 = vst [vmem:[#allocation25_spill] sm:$0xff] %v2941_v40 }
  0x37   :  { %s2899_s19 = sld [smem:[#allocation2 + $0x13]]  ;;  %v137_v4 = vadd.f32 %v135_v38, %v130_v52  ;;  %v138_v5 = vadd.f32 %v136_v39, %v131_v53  ;;  %v190_v25 = vstv %s2851_s13  ;;  %v177_v31 = vmul.f32 %v176_v9, %v2897_v63  ;;  %v3121_v63 = vld [vmem:[#allocation8 + $0x52] sm:$0xff] }
  0x38   :  { %s2909_s20 = sld [smem:[#allocation2 + $0x14]]  ;;  %v197_v30 = vstv %s2859_s14  ;;  %v178_v32 = vmul.f32 %v176_v9, %v2901_v8  ;;  %v2932_v33 = vmul.f32 %v183_v12, %v2904_v10  ;;  %v2935_v34 = vmul.f32 %v183_v12, %v2906_v11  ;;  %v2970_v9 = vld [vmem:[#allocation8 + $0x38] sm:$0xff]  ;;  %5582 = vst [vmem:[#allocation50_spill] sm:$0xff] %v3121_v63 }
  0x39   :  { %s2917_s21 = sld [smem:[#allocation2 + $0x15]]  ;;  %v144_v21 = vadd.f32 %v142_v47, %v137_v4  ;;  %v145_v23 = vadd.f32 %v143_v48, %v138_v5  ;;  %v204_v41 = vstv %s2863_s15  ;;  %v2952_v48 = vmul.f32 %v190_v25, %v2915_v19  ;;  %v2968_v5 = vld [vmem:[#allocation8 + $0x30] sm:$0xff]  ;;  %5562 = vst [vmem:[#allocation30_spill] sm:$0xff] %v2970_v9  ;;  %v3043_v19 = vld [vmem:[#allocation8 + $0x3d] sm:$0xff] }
  0x3a   :  { %s2927_s22 = sld [smem:[#allocation2 + $0x16]]  ;;  %v211_v47 = vstv %s2873_s16  ;;  %v2955_v52 = vmul.f32 %v190_v25, %v2919_v24  ;;  %v2958_v53 = vmul.f32 %v197_v30, %v2922_v26  ;;  %v2961_v55 = vmul.f32 %v197_v30, %v2924_v27  ;;  %5561 = vst [vmem:[#allocation29_spill] sm:$0xff] %v2968_v5  ;;  %v2987_v25 = vld [vmem:[#allocation8 + $0x31] sm:$0xff]  ;;  %5572 = vst [vmem:[#allocation40_spill] sm:$0xff] %v3043_v19 }
  0x3b   :  { %s2939_s23 = sld [smem:[#allocation2 + $0x17]]  ;;  %v151_v38 = vadd.f32 %v149_v59, %v144_v21  ;;  %v152_v39 = vadd.f32 %v150_v60, %v145_v23  ;;  %v2965_v60 = vld [vmem:[#allocation8 + $0x28] sm:$0xff]  ;;  %v217_v4 = vstv %s2881_s17  ;;  %v2976_v21 = vmul.f32 %v204_v41, %v2937_v37  ;;  %5563 = vst [vmem:[#allocation31_spill] sm:$0xff] %v2987_v25  ;;  %v3017_v37 = vld [vmem:[#allocation8 + $0x3b] sm:$0xff] }
  0x3c   :  { %s2949_s24 = sld [smem:[#allocation2 + $0x18]]  ;;  %5560 = vst [vmem:[#allocation28_spill] sm:$0xff] %v2965_v60  ;;  %v225_v12 = vstv %s2891_s18  ;;  %v2979_v23 = vmul.f32 %v204_v41, %v2941_v40  ;;  %v2996_v41 = vld [vmem:[#allocation8 + $0x3a] sm:$0xff]  ;;  %5568 = vst [vmem:[#allocation36_spill] sm:$0xff] %v3017_v37 }
  0x3d   :  { %s2963_s25 = sld [smem:[#allocation2 + $0x19]]  ;;  %v157_v58 = vadd.f32 %v155_v61, %v151_v38  ;;  %v158_v59 = vadd.f32 %v156_v62, %v152_v39  ;;  %v2982_v61 = vmul.f32 %v211_v47, %v2944_v44  ;;  %v2985_v62 = vmul.f32 %v211_v47, %v2946_v46  ;;  %v2991_v39 = vld [vmem:[#allocation8 + $0x39] sm:$0xff]  ;;  %5566 = vst [vmem:[#allocation34_spill] sm:$0xff] %v2996_v41 }
  0x3e   :  { %s2973_s28 = sld [smem:[#allocation2 + $0x1a]]  ;;  %5564 = vst [vmem:[#allocation32_spill] sm:$0xff] %v2991_v39  ;;  %v232_v51 = vstv %s2899_s19  ;;  %v239_v44 = vstv %s2909_s20  ;;  %v3002_v47 = vmul.f32 %v217_v4, %v2883_v54  ;;  %v3005_v46 = vmul.f32 %v217_v4, %v2965_v60  ;;  %v3020_v26 = vld [vmem:[#allocation8 + $0x34] sm:$0xff]  ;;  %v3022_v4 = vld [vmem:[#allocation8 + $0x3c] sm:$0xff] }
  0x3f   :  { %s2989_s29 = sld [smem:[#allocation2 + $0x1b]]  ;;  %v165_v30 = vadd.f32 %v163_v13, %v157_v58  ;;  %v166_v38 = vadd.f32 %v164_v16, %v158_v59  ;;  %v3008_v13 = vmul.f32 %v225_v12, %v2968_v5  ;;  %v3011_v16 = vmul.f32 %v225_v12, %v2970_v9  ;;  %v3013_v58 = vld [vmem:[#allocation8 + $0x33] sm:$0xff]  ;;  %5569 = vst [vmem:[#allocation37_spill] sm:$0xff] %v3020_v26 }
  0x40   :  { %s2999_s30 = sld [smem:[#allocation2 + $0x1c]]  ;;  %5567 = vst [vmem:[#allocation35_spill] sm:$0xff] %v3013_v58  ;;  %v246_v27 = vstv %s2917_s21  ;;  %5570 = vst [vmem:[#allocation38_spill] sm:$0xff] %v3022_v4  ;;  %v253_v5 = vstv %s2927_s22  ;;  %v3028_v12 = vmul.f32 %v232_v51, %v2987_v25  ;;  %v3031_v60 = vmul.f32 %v232_v51, %v2991_v39  ;;  %v3046_v11 = vld [vmem:[#allocation8 + $0x36] sm:$0xff]  ;;  %v3048_v51 = vld [vmem:[#allocation8 + $0x3e] sm:$0xff] }
  0x41   :  { %s3015_s4 = sld [smem:[#allocation2 + $0x1d]]  ;;  %v172_v59 = vadd.f32 %v170_v17, %v165_v30  ;;  %v173_v40 = vadd.f32 %v171_v18, %v166_v38  ;;  %v3034_v17 = vmul.f32 %v239_v44, %v2994_v50  ;;  %v3037_v18 = vmul.f32 %v239_v44, %v2996_v41  ;;  %v3039_v30 = vld [vmem:[#allocation8 + $0x35] sm:$0xff]  ;;  %5573 = vst [vmem:[#allocation41_spill] sm:$0xff] %v3046_v11 }
  0x42   :  { %s3025_s5 = sld [smem:[#allocation2 + $0x1e]]  ;;  %5571 = vst [vmem:[#allocation39_spill] sm:$0xff] %v3039_v30  ;;  %v260_v25 = vstv %s2939_s23  ;;  %5574 = vst [vmem:[#allocation42_spill] sm:$0xff] %v3048_v51  ;;  %v267_v50 = vstv %s2949_s24  ;;  %v3054_v44 = vmul.f32 %v246_v27, %v3013_v58  ;;  %v3057_v41 = vmul.f32 %v246_v27, %v3017_v37  ;;  %v3069_v39 = vld [vmem:[#allocation8 + $0x37] sm:$0xff]  ;;  %v3071_v58 = vld [vmem:[#allocation8 + $0x3f] sm:$0xff] }
  0x43   :  { %s3041_s2 = sld [smem:[#allocation2 + $0x1f]]  ;;  %v179_v38 = vadd.f32 %v177_v31, %v172_v59  ;;  %v180_v24 = vadd.f32 %v178_v32, %v173_v40  ;;  %v3060_v31 = vmul.f32 %v253_v5, %v3020_v26  ;;  %v3063_v32 = vmul.f32 %v253_v5, %v3022_v4  ;;  %5575 = vst [vmem:[#allocation43_spill] sm:$0xff] %v3069_v39  ;;  %v3074_v37 = vld [vmem:[#allocation8 + $0x40] sm:$0xff]  ;;  %v3093_v4 = vld [vmem:[#allocation8 + $0x48] sm:$0xff] }
  0x44   :  { %s3051_s6 = sld [smem:[#allocation2 + $0x20]]  ;;  %5576 = vst [vmem:[#allocation44_spill] sm:$0xff] %v3071_v58  ;;  %v274_v27 = vstv %s2963_s25  ;;  %5577 = vst [vmem:[#allocation45_spill] sm:$0xff] %v3074_v37  ;;  %v280_v26 = vstv %s2973_s28  ;;  %v3078_v10 = vmul.f32 %v260_v25, %v3039_v30  ;;  %v3081_v5 = vmul.f32 %v260_v25, %v3043_v19  ;;  %v3095_v30 = vld [vmem:[#allocation8 + $0x50] sm:$0xff] }
  0x45   :  { %s3065_s7 = sld [smem:[#allocation2 + $0x21]]  ;;  %v186_v40 = vadd.f32 %v2932_v33, %v179_v38  ;;  %v187_v59 = vadd.f32 %v2935_v34, %v180_v24  ;;  %v3084_v33 = vmul.f32 %v267_v50, %v3046_v11  ;;  %v3087_v24 = vmul.f32 %v267_v50, %v3048_v51  ;;  %5578 = vst [vmem:[#allocation46_spill] sm:$0xff] %v3093_v4  ;;  %v3098_v19 = vld [vmem:[#allocation8 + $0x49] sm:$0xff] }
  0x46   :  { %s3089_s8 = sld [smem:[#allocation2 + $0x22]]  ;;  %v288_v25 = vstv %s2989_s29  ;;  %5579 = vst [vmem:[#allocation47_spill] sm:$0xff] %v3098_v19  ;;  %v295_v11 = vstv %s2999_s30  ;;  %v3102_v8 = vmul.f32 %v274_v27, %v3069_v39  ;;  %v3105_v50 = vmul.f32 %v274_v27, %v3071_v58  ;;  %v3119_v39 = vld [vmem:[#allocation8 + $0x4a] sm:$0xff] }
  0x47   :  { %v193_v34 = vadd.f32 %v2952_v48, %v186_v40  ;;  %v194_v38 = vadd.f32 %v2955_v52, %v187_v59  ;;  %v3108_v48 = vmul.f32 %v280_v26, %v2970_v9  ;;  %v3111_v52 = vmul.f32 %v280_v26, %v3074_v37  ;;  %v3113_v40 = vld [vmem:[#allocation8 + $0x51] sm:$0xff]  ;;  %s3115_s9 = sld [smem:[#allocation2 + $0x24]]  ;;  %5581 = vst [vmem:[#allocation49_spill] sm:$0xff] %v3119_v39 }
  0x48   :  { %5580 = vst [vmem:[#allocation48_spill] sm:$0xff] %v3113_v40  ;;  %v302_v27 = vstv %s3015_s4  ;;  %v3124_v58 = vld [vmem:[#allocation8 + $0x4b] sm:$0xff]  ;;  %v309_v9 = vstv %s3025_s5  ;;  %s3127_s10 = sld [smem:[#allocation2 + $0x25]]  ;;  %v3130_v26 = vmul.f32 %v288_v25, %v3093_v4  ;;  %v3133_v37 = vmul.f32 %v288_v25, %v3095_v30  ;;  %v3150_v25 = vld [vmem:[#allocation8 + $0x54] sm:$0xff] }
  0x49   :  { %v200_v59 = vadd.f32 %v2958_v53, %v193_v34  ;;  %v201_v51 = vadd.f32 %v2961_v55, %v194_v38  ;;  %5583 = vst [vmem:[#allocation51_spill] sm:$0xff] %v3124_v58  ;;  %v3136_v53 = vmul.f32 %v295_v11, %v3098_v19  ;;  %v3138_v55 = vld [vmem:[#allocation8 + $0x53] sm:$0xff]  ;;  %v316_v38 = vstv %s3041_s2  ;;  %s3143_s11 = sld [smem:[#allocation2 + $0x26]]  ;;  %5589 = vst [vmem:[#allocation57_spill] sm:$0xff] %v3150_v25 }
  0x4a   :  { %5584 = vst [vmem:[#allocation52_spill] sm:$0xff] %v3130_v26  ;;  %5585 = vst [vmem:[#allocation53_spill] sm:$0xff] %v3133_v37  ;;  %v3140_v34 = vld [vmem:[#allocation8 + $0x4c] sm:$0xff]  ;;  %v3148_v4 = vmul.f32 %v295_v11, %v3113_v40  ;;  %v3154_v19 = vld [vmem:[#allocation8 + $0x55] sm:$0xff]  ;;  %s3157_s12 = sld [smem:[#allocation2 + $0x27]]  ;;  %v3160_v26 = vmul.f32 %v302_v27, %v3119_v39  ;;  %v3176_v39 = vmul.f32 %v309_v9, %v3138_v55 }
  0x4b   :  { %5586 = vst [vmem:[#allocation54_spill] sm:$0xff] %v3136_v53  ;;  %5587 = vst [vmem:[#allocation55_spill] sm:$0xff] %v3138_v55  ;;  %v207_v57 = vadd.f32 %v2976_v21, %v200_v59  ;;  %v208_v56 = vadd.f32 %v2979_v23, %v201_v51  ;;  %v3152_v37 = vld [vmem:[#allocation8 + $0x4d] sm:$0xff]  ;;  %v323_v53 = vstv %s3051_s6  ;;  %v3163_v21 = vmul.f32 %v302_v27, %v3121_v63  ;;  %s3171_s13 = sld [smem:[#allocation2 + $0x28]] }
  0x4c   :  { %5588 = vst [vmem:[#allocation56_spill] sm:$0xff] %v3140_v34  ;;  %5590 = vst [vmem:[#allocation58_spill] sm:$0xff] %v3152_v37  ;;  %v3166_v23 = vmul.f32 %v309_v9, %v3124_v58  ;;  %v3168_v11 = vld [vmem:[#allocation8 + $0x4e] sm:$0xff]  ;;  %v330_v51 = vstv %s3065_s7  ;;  %v3179_v27 = vmul.f32 %v316_v38, %v3140_v34  ;;  %v3182_v58 = vmul.f32 %v316_v38, %v3150_v25  ;;  %s3190_s14 = sld [smem:[#allocation2 + $0x29]] }
  0x4d   :  { %5591 = vst [vmem:[#allocation59_spill] sm:$0xff] %v3154_v19  ;;  %5593 = vst [vmem:[#allocation61_spill] sm:$0xff] %v3168_v11  ;;  %v214_v59 = vadd.f32 %v2982_v61, %v207_v57  ;;  %v215_v40 = vadd.f32 %v2985_v62, %v208_v56  ;;  %v3185_v63 = vmul.f32 %v323_v53, %v3152_v37  ;;  %v389_v56 = vstv %s3115_s9  ;;  %s3199_s15 = sld [smem:[#allocation2 + $0x2a]] }
  0x4e   :  { %5592 = vst [vmem:[#allocation60_spill] sm:$0xff] %v3166_v23  ;;  %v3188_v23 = vmul.f32 %v323_v53, %v3154_v19  ;;  %v3196_v61 = vmul.f32 %v330_v51, %v3168_v11  ;;  %s3201_s16 = sld [smem:[#allocation2 + $0x23]]  ;;  %v390_v53 = vmul.f32 %v389_v56, %v2799_v0  ;;  %v391_v38 = vmul.f32 %v389_v56, %v2801_v1  ;;  %v3213_v11 = vld [vmem:[#allocation8 + $0x56] sm:$0xff] }
  0x4f   :  { %v220_v57 = vadd.f32 %v3002_v47, %v214_v59  ;;  %v221_v9 = vadd.f32 %v3005_v46, %v215_v40  ;;  %v396_v19 = vstv %s3127_s10  ;;  %v403_v47 = vstv %s3143_s11  ;;  %s3209_s17 = sld [smem:[#allocation2 + $0x2b]] }
  0x50   :  { %v397_v40 = vmul.f32 %v396_v19, %v2805_v2  ;;  %v398_v62 = vmul.f32 %v396_v19, %v2807_v3  ;;  %v5594_v37 = vstv %s2791_s26  ;;  %v404_v34 = vmul.f32 %v403_v47, %v2811_v6  ;;  %s3223_s18 = sld [smem:[#allocation2 + $0x2c]]  ;;  %v3227_v3 = vld [vmem:[#allocation8 + $0x4f] sm:$0xff] }
  0x51   :  { %v228_v59 = vadd.f32 %v3008_v13, %v220_v57  ;;  %v229_v46 = vadd.f32 %v3011_v16, %v221_v9  ;;  %v392_v0 = vadd.f32 %v390_v53, %v5594_v37  ;;  %v5595_v25 = vmov %v5594_v37  ;;  %s3229_s19 = sld [smem:[#allocation2 + $0x2d]] }
  0x52   :  { %v393_v56 = vadd.f32 %v391_v38, %v5595_v25  ;;  %v405_v55 = vmul.f32 %v403_v47, %v2813_v7  ;;  %v410_v2 = vstv %s3157_s12  ;;  %v417_v57 = vstv %s3171_s13  ;;  %s3248_s26 = sld [smem:[#allocation2 + $0x2e]] }
  0x53   :  { %v235_v13 = vadd.f32 %v3028_v12, %v228_v59  ;;  %v236_v16 = vadd.f32 %v3031_v60, %v229_v46  ;;  %v399_v19 = vadd.f32 %v397_v40, %v392_v0  ;;  %v411_v6 = vmul.f32 %v410_v2, %v2823_v14  ;;  %s3251_s20 = sld [smem:[#allocation2 + $0x2f]]  ;;  %v3261_v40 = vld [vmem:[#allocation8 + $0x57] sm:$0xff] }
  0x54   :  { %v400_v37 = vadd.f32 %v398_v62, %v393_v56  ;;  %v412_v7 = vmul.f32 %v410_v2, %v2825_v15  ;;  %v3236_v25 = vmul.f32 %v330_v51, %v3213_v11  ;;  %v418_v9 = vmul.f32 %v417_v57, %v2831_v20  ;;  %s3258_s21 = sld [smem:[#allocation2 + $0x30]] }
  0x55   :  { %v242_v12 = vadd.f32 %v3034_v17, %v235_v13  ;;  %v243_v60 = vadd.f32 %v3037_v18, %v236_v16  ;;  %v406_v53 = vadd.f32 %v404_v34, %v399_v19  ;;  %v419_v47 = vmul.f32 %v417_v57, %v2836_v22  ;;  %s3267_s22 = sld [smem:[#allocation2 + $0x31]] }
  0x56   :  { %v407_v38 = vadd.f32 %v405_v55, %v400_v37  ;;  %v424_v62 = vstv %s3190_s14  ;;  %v5596_v17 = vstv %s3089_s8  ;;  %v431_v18 = vstv %s3199_s15  ;;  %s3283_s23 = sld [smem:[#allocation2 + $0x32]] }
  0x57   :  { %v249_v14 = vadd.f32 %v3054_v44, %v242_v12  ;;  %v250_v15 = vadd.f32 %v3057_v41, %v243_v60  ;;  %v3246_v59 = vmul.f32 %v5596_v17, %v3227_v3  ;;  %v413_v20 = vadd.f32 %v411_v6, %v406_v53  ;;  %s3287_s24 = sld [smem:[#allocation2 + $0x33]] }
  0x58   :  { %v414_v34 = vadd.f32 %v412_v7, %v407_v38  ;;  %v425_v55 = vmul.f32 %v424_v62, %v2843_v28  ;;  %v426_v22 = vmul.f32 %v424_v62, %v2845_v29  ;;  %v343_v51 = vstv %s3201_s16  ;;  %s3293_s25 = sld [smem:[#allocation2 + $0x34]] }
  0x59   :  { %v256_v44 = vadd.f32 %v3060_v31, %v249_v14  ;;  %v257_v41 = vadd.f32 %v3063_v32, %v250_v15  ;;  %v438_v46 = vstv %s3209_s17  ;;  %v420_v0 = vadd.f32 %v418_v9, %v413_v20  ;;  %s3304_s28 = sld [smem:[#allocation2 + $0x35]]  ;;  %v5599_v20 = vld [vmem:[#allocation15_spill] sm:$0xff] }
  0x5a   :  { %v421_v56 = vadd.f32 %v419_v47, %v414_v34  ;;  %v432_v13 = vmul.f32 %v431_v18, %v2854_v35  ;;  %v433_v28 = vmul.f32 %v431_v18, %v2856_v36  ;;  %v439_v32 = vmul.f32 %v438_v46, %v2865_v42  ;;  %v3285_v42 = vld [vmem:[#allocation8 + $0x58] sm:$0xff]  ;;  %s3311_s29 = sld [smem:[#allocation2 + $0x36]] }
  0x5b   :  { %v263_v29 = vadd.f32 %v3078_v10, %v256_v44  ;;  %v264_v31 = vadd.f32 %v3081_v5, %v257_v41  ;;  %v444_v16 = vstv %s3223_s18  ;;  %v427_v2 = vadd.f32 %v425_v55, %v420_v0  ;;  %v5600_v55 = vld [vmem:[#allocation52_spill] sm:$0xff]  ;;  %v5601_v44 = vld [vmem:[#allocation53_spill] sm:$0xff]  ;;  %s3315_s30 = sld [smem:[#allocation2 + $0x37]] }
  0x5c   :  { %v428_v57 = vadd.f32 %v426_v22, %v421_v56  ;;  %v440_v19 = vmul.f32 %v438_v46, %v2867_v43  ;;  %v451_v37 = vstv %s3229_s19  ;;  %v5597_v36 = vmov %v5596_v17  ;;  %v5603_v56 = vld [vmem:[#allocation17_spill] sm:$0xff]  ;;  %s3321_s4 = sld [smem:[#allocation2 + $0x38]] }
  0x5d   :  { %v270_v6 = vadd.f32 %v3084_v33, %v263_v29  ;;  %v271_v35 = vadd.f32 %v3087_v24, %v264_v31  ;;  %v3278_v10 = vmul.f32 %v5597_v36, %v3261_v40  ;;  %v3281_v5 = vmul.f32 %v343_v51, %v3095_v30  ;;  %v5605_v31 = vld [vmem:[#allocation54_spill] sm:$0xff]  ;;  %s3329_s5 = sld [smem:[#allocation2 + $0x39]] }
  0x5e   :  { %v434_v43 = vadd.f32 %v432_v13, %v427_v2  ;;  %v435_v7 = vadd.f32 %v433_v28, %v428_v57  ;;  %v445_v33 = vmul.f32 %v444_v16, %v2801_v1  ;;  %v446_v24 = vmul.f32 %v444_v16, %v2870_v45  ;;  %v5604_v28 = vld [vmem:[#allocation18_spill] sm:$0xff]  ;;  %v5606_v2 = vld [vmem:[#allocation19_spill] sm:$0xff]  ;;  %s3333_s2 = sld [smem:[#allocation2 + $0x3a]] }
  0x5f   :  { %v277_v12 = vadd.f32 %v3102_v8, %v270_v6  ;;  %v278_v60 = vadd.f32 %v3105_v50, %v271_v35  ;;  %v452_v9 = vmul.f32 %v451_v37, %v2877_v49  ;;  %v458_v53 = vstv %s3248_s26  ;;  %v5598_v49 = vld [vmem:[#allocation14_spill] sm:$0xff]  ;;  %v5607_v35 = vld [vmem:[#allocation20_spill] sm:$0xff]  ;;  %s3339_s6 = sld [smem:[#allocation2 + $0x3b]] }
  0x60   :  { %v441_v38 = vadd.f32 %v439_v32, %v434_v43  ;;  %v442_v47 = vadd.f32 %v440_v19, %v435_v7  ;;  %v453_v62 = vmul.f32 %v451_v37, %v2883_v54  ;;  %v465_v14 = vstv %s3251_s20  ;;  %s3343_s7 = sld [smem:[#allocation2 + $0x3c]] }
  0x61   :  { %v283_v15 = vadd.f32 %v3108_v48, %v277_v12  ;;  %v284_v1 = vadd.f32 %v3111_v52, %v278_v60  ;;  %v3302_v45 = vmul.f32 %v343_v51, %v3285_v42  ;;  %v472_v8 = vstv %s3258_s21  ;;  %v5602_v48 = vld [vmem:[#allocation16_spill] sm:$0xff]  ;;  %s3349_s8 = sld [smem:[#allocation2 + $0x3d]] }
  0x62   :  { %v447_v50 = vadd.f32 %v445_v33, %v441_v38  ;;  %v448_v17 = vadd.f32 %v446_v24, %v442_v47  ;;  %v459_v18 = vmul.f32 %v458_v53, %v5598_v49  ;;  %v460_v34 = vmul.f32 %v458_v53, %v5599_v20  ;;  %v5608_v24 = vld [vmem:[#allocation21_spill] sm:$0xff]  ;;  %v5609_v53 = vld [vmem:[#allocation22_spill] sm:$0xff]  ;;  %v5610_v47 = vld [vmem:[#allocation23_spill] sm:$0xff]  ;;  %s3353_s9 = sld [smem:[#allocation2 + $0x3e]] }
  0x63   :  { %v291_v22 = vadd.f32 %v5600_v55, %v283_v15  ;;  %v292_v41 = vadd.f32 %v5601_v44, %v284_v1  ;;  %v466_v52 = vmul.f32 %v465_v14, %v5602_v48  ;;  %v479_v51 = vstv %s3267_s22  ;;  %v5613_v49 = vld [vmem:[#allocation25_spill] sm:$0xff]  ;;  %v5614_v20 = vld [vmem:[#allocation26_spill] sm:$0xff]  ;;  %s3359_s10 = sld [smem:[#allocation2 + $0x3f]] }
  0x64   :  { %v454_v46 = vadd.f32 %v452_v9, %v447_v50  ;;  %v455_v0 = vadd.f32 %v453_v62, %v448_v17  ;;  %v467_v13 = vmul.f32 %v465_v14, %v5603_v56  ;;  %v473_v29 = vmul.f32 %v472_v8, %v5604_v28  ;;  %v5611_v14 = vld [vmem:[#allocation60_spill] sm:$0xff]  ;;  %s3363_s11 = sld [smem:[#allocation2 + $0x40]] }
  0x65   :  { %v298_v32 = vadd.f32 %v5605_v31, %v291_v22  ;;  %v299_v16 = vadd.f32 %v3148_v4, %v292_v41  ;;  %v474_v57 = vmul.f32 %v472_v8, %v5606_v2  ;;  %v486_v19 = vstv %s3283_s23  ;;  %v5617_v31 = vld [vmem:[#allocation29_spill] sm:$0xff]  ;;  %s3369_s12 = sld [smem:[#allocation2 + $0x41]] }
  0x66   :  { %v461_v37 = vadd.f32 %v459_v18, %v454_v46  ;;  %v462_v6 = vadd.f32 %v460_v34, %v455_v0  ;;  %v480_v36 = vmul.f32 %v479_v51, %v5607_v35  ;;  %v493_v43 = vstv %s3287_s24  ;;  %s3373_s13 = sld [smem:[#allocation2 + $0x42]]  ;;  %v5620_v35 = vld [vmem:[#allocation32_spill] sm:$0xff] }
  0x67   :  { %v305_v7 = vadd.f32 %v3160_v26, %v298_v32  ;;  %v306_v33 = vadd.f32 %v3163_v21, %v299_v16  ;;  %v481_v12 = vmul.f32 %v479_v51, %v5608_v24  ;;  %v500_v4 = vstv %s3293_s25  ;;  %v5612_v21 = vld [vmem:[#allocation24_spill] sm:$0xff]  ;;  %v5618_v16 = vld [vmem:[#allocation30_spill] sm:$0xff]  ;;  %s3379_s14 = sld [smem:[#allocation2 + $0x43]] }
  0x68   :  { %v468_v60 = vadd.f32 %v466_v52, %v461_v37  ;;  %v469_v9 = vadd.f32 %v467_v13, %v462_v6  ;;  %v487_v38 = vmul.f32 %v486_v19, %v5609_v53  ;;  %v488_v62 = vmul.f32 %v486_v19, %v5610_v47  ;;  %s3383_s15 = sld [smem:[#allocation2 + $0x44]] }
  0x69   :  { %v312_v15 = vadd.f32 %v5611_v14, %v305_v7  ;;  %v313_v26 = vadd.f32 %v3176_v39, %v306_v33  ;;  %v494_v1 = vmul.f32 %v493_v43, %v5612_v21  ;;  %v506_v8 = vstv %s3304_s28  ;;  %v5615_v39 = vld [vmem:[#allocation27_spill] sm:$0xff]  ;;  %s3391_s16 = sld [smem:[#allocation2 + $0x45]] }
  0x6a   :  { %v475_v50 = vadd.f32 %v473_v29, %v468_v60  ;;  %v476_v17 = vadd.f32 %v474_v57, %v469_v9  ;;  %v495_v18 = vmul.f32 %v493_v43, %v5613_v49  ;;  %v501_v34 = vmul.f32 %v500_v4, %v5614_v20  ;;  %v5621_v43 = vld [vmem:[#allocation33_spill] sm:$0xff]  ;;  %v5623_v9 = vld [vmem:[#allocation35_spill] sm:$0xff]  ;;  %s3395_s17 = sld [smem:[#allocation2 + $0x46]] }
  0x6b   :  { %v319_v55 = vadd.f32 %v3179_v27, %v312_v15  ;;  %v320_v22 = vadd.f32 %v3182_v58, %v313_v26  ;;  %v502_v44 = vmul.f32 %v500_v4, %v5615_v39  ;;  %v513_v41 = vstv %s3311_s29  ;;  %v5616_v58 = vld [vmem:[#allocation28_spill] sm:$0xff]  ;;  %s3405_s18 = sld [smem:[#allocation2 + $0x48]] }
  0x6c   :  { %v482_v48 = vadd.f32 %v480_v36, %v475_v50  ;;  %v483_v52 = vadd.f32 %v481_v12, %v476_v17  ;;  %v507_v51 = vmul.f32 %v506_v8, %v2883_v54  ;;  %v520_v46 = vstv %s3315_s30  ;;  %v5626_v17 = vld [vmem:[#allocation38_spill] sm:$0xff]  ;;  %s3417_s19 = sld [smem:[#allocation2 + $0x49]] }
  0x6d   :  { %v326_v0 = vadd.f32 %v3185_v63, %v319_v55  ;;  %v327_v56 = vadd.f32 %v3188_v23, %v320_v22  ;;  %v508_v27 = vmul.f32 %v506_v8, %v5616_v58  ;;  %v527_v13 = vstv %s3321_s4  ;;  %v5619_v23 = vld [vmem:[#allocation31_spill] sm:$0xff]  ;;  %v5625_v8 = vld [vmem:[#allocation37_spill] sm:$0xff]  ;;  %s3421_s26 = sld [smem:[#allocation2 + $0x4a]] }
  0x6e   :  { %v489_v28 = vadd.f32 %v487_v38, %v482_v48  ;;  %v490_v29 = vadd.f32 %v488_v62, %v483_v52  ;;  %v514_v32 = vmul.f32 %v513_v41, %v5617_v31  ;;  %v515_v54 = vmul.f32 %v513_v41, %v5618_v16  ;;  %v5624_v62 = vld [vmem:[#allocation36_spill] sm:$0xff]  ;;  %v5629_v22 = vld [vmem:[#allocation41_spill] sm:$0xff]  ;;  %v5630_v41 = vld [vmem:[#allocation42_spill] sm:$0xff]  ;;  %s3435_s20 = sld [smem:[#allocation2 + $0x4b]] }
  0x6f   :  { %v333_v2 = vadd.f32 %v3196_v61, %v326_v0  ;;  %v334_v63 = vadd.f32 %v3236_v25, %v327_v56  ;;  %v521_v57 = vmul.f32 %v520_v46, %v5619_v23  ;;  %v534_v19 = vstv %s3329_s5  ;;  %v5622_v25 = vld [vmem:[#allocation34_spill] sm:$0xff]  ;;  %v5631_v52 = vld [vmem:[#allocation43_spill] sm:$0xff]  ;;  %s3449_s21 = sld [smem:[#allocation2 + $0x4c]] }
  0x70   :  { %v496_v37 = vadd.f32 %v494_v1, %v489_v28  ;;  %v497_v6 = vadd.f32 %v495_v18, %v490_v29  ;;  %v522_v36 = vmul.f32 %v520_v46, %v5620_v35  ;;  %v528_v7 = vmul.f32 %v527_v13, %v5621_v43  ;;  %v5628_v18 = vld [vmem:[#allocation40_spill] sm:$0xff]  ;;  %v5633_v29 = vld [vmem:[#allocation45_spill] sm:$0xff]  ;;  %s3471_s22 = sld [smem:[#allocation2 + $0x4d]] }
  0x71   :  { %v340_v33 = vadd.f32 %v3246_v59, %v333_v2  ;;  %v341_v61 = vadd.f32 %v3278_v10, %v334_v63  ;;  %v529_v24 = vmul.f32 %v527_v13, %v5622_v25  ;;  %v541_v12 = vstv %s3333_s2  ;;  %v5632_v46 = vld [vmem:[#allocation44_spill] sm:$0xff]  ;;  %v5637_v43 = vld [vmem:[#allocation49_spill] sm:$0xff]  ;;  %s3476_s23 = sld [smem:[#allocation2 + $0x4e]] }
  0x72   :  { %v503_v4 = vadd.f32 %v501_v34, %v496_v37  ;;  %v504_v60 = vadd.f32 %v502_v44, %v497_v6  ;;  %v535_v53 = vmul.f32 %v534_v19, %v5623_v9  ;;  %v548_v38 = vstv %s3339_s6  ;;  %v5635_v37 = vld [vmem:[#allocation47_spill] sm:$0xff]  ;;  %v5636_v35 = vld [vmem:[#allocation48_spill] sm:$0xff]  ;;  %v3455_v9 = vld [vmem:[#allocation8] sm:$0xff]  ;;  %s3495_s24 = sld [smem:[#allocation2 + $0x4f]] }
  0x73   :  { %v346_v47 = vadd.f32 %v3281_v5, %v340_v33  ;;  %v347_v59 = vadd.f32 %v3302_v45, %v341_v61  ;;  %v536_v10 = vmul.f32 %v534_v19, %v5624_v62  ;;  %v555_v14 = vstv %s3343_s7  ;;  %v5627_v45 = vld [vmem:[#allocation39_spill] sm:$0xff]  ;;  %v5638_v61 = vld [vmem:[#allocation50_spill] sm:$0xff]  ;;  %v5641_v62 = vld [vmem:[#allocation56_spill] sm:$0xff]  ;;  %s3499_s25 = sld [smem:[#allocation2 + $0x50]] }
  0x74   :  { %v509_v15 = vadd.f32 %v507_v51, %v503_v4  ;;  %v510_v26 = vadd.f32 %v508_v27, %v504_v60  ;;  %v562_v21 = vstv %s3349_s8  ;;  %v568_v1 = vstv %s3353_s9  ;;  %s3530_s28 = sld [smem:[#allocation2 + $0x52]] }
  0x75   :  { %348 = vst [vmem:[#allocation9] sm:$0xff] %v346_v47  ;;  %349 = vst [vmem:[#allocation9 + $0x8] sm:$0xff] %v347_v59  ;;  %v542_v50 = vmul.f32 %v541_v12, %v5625_v8  ;;  %v543_v5 = vmul.f32 %v541_v12, %v5626_v17  ;;  %v549_v49 = vmul.f32 %v548_v38, %v5627_v45  ;;  %v575_v44 = vstv %s3359_s10  ;;  %v5639_v12 = vld [vmem:[#allocation51_spill] sm:$0xff]  ;;  %s3538_s29 = sld [smem:[#allocation2 + $0x47]] }
  0x76   :  { %v550_v20 = vmul.f32 %v548_v38, %v5628_v18  ;;  %v516_v34 = vadd.f32 %v514_v32, %v509_v15  ;;  %v517_v55 = vadd.f32 %v515_v54, %v510_v26  ;;  %v3402_v39 = vmul.f32 %v555_v14, %v5629_v22  ;;  %v5634_v32 = vld [vmem:[#allocation46_spill] sm:$0xff]  ;;  %v3457_v38 = vld [vmem:[#allocation8 + $0x8] sm:$0xff]  ;;  %v5642_v15 = vld [vmem:[#allocation57_spill] sm:$0xff]  ;;  %s3544_s30 = sld [smem:[#allocation2 + $0x53]] }
  0x77   :  { %v557_v48 = vmul.f32 %v555_v14, %v5630_v41  ;;  %v3409_v51 = vmul.f32 %v562_v21, %v5631_v52  ;;  %v3412_v0 = vmul.f32 %v562_v21, %v5632_v46  ;;  %v3415_v56 = vmul.f32 %v568_v1, %v5618_v16  ;;  %v5640_v47 = vld [vmem:[#allocation55_spill] sm:$0xff]  ;;  %s3556_s4 = sld [smem:[#allocation2 + $0x54]] }
  0x78   :  { %v523_v58 = vadd.f32 %v521_v57, %v516_v34  ;;  %v524_v27 = vadd.f32 %v522_v36, %v517_v55  ;;  %v582_v13 = vstv %s3363_s11  ;;  %v589_v28 = vstv %s3369_s12  ;;  %v5644_v8 = vld [vmem:[#allocation59_spill] sm:$0xff]  ;;  %v5645_v55 = vld [vmem:[#allocation61_spill] sm:$0xff]  ;;  %s3572_s5 = sld [smem:[#allocation2 + $0x55]] }
  0x79   :  { %v3424_v31 = vmul.f32 %v568_v1, %v5633_v29  ;;  %v3427_v54 = vmul.f32 %v575_v44, %v5634_v32  ;;  %v3430_v2 = vmul.f32 %v575_v44, %v3095_v30  ;;  %v596_v16 = vstv %s3373_s13  ;;  %v3479_v18 = vld [vmem:[#allocation8 + $0x1] sm:$0xff]  ;;  %v3481_v34 = vld [vmem:[#allocation8 + $0x9] sm:$0xff]  ;;  %s3584_s2 = sld [smem:[#allocation2 + $0x56]] }
  0x7a   :  { %v530_v63 = vadd.f32 %v528_v7, %v523_v58  ;;  %v531_v23 = vadd.f32 %v529_v24, %v524_v27  ;;  %v603_v19 = vstv %s3379_s14  ;;  %v610_v57 = vstv %s3383_s15  ;;  %v3491_v41 = vld [vmem:[#allocation8 + $0x2] sm:$0xff]  ;;  %v3493_v52 = vld [vmem:[#allocation8 + $0xa] sm:$0xff]  ;;  %s3590_s6 = sld [smem:[#allocation7 + $0x3]] }
  0x7b   :  { %v3438_v6 = vmul.f32 %v582_v13, %v5635_v37  ;;  %v3441_v36 = vmul.f32 %v582_v13, %v5636_v35  ;;  %v3444_v33 = vmul.f32 %v589_v28, %v5637_v43  ;;  %v3447_v25 = vmul.f32 %v589_v28, %v5638_v61  ;;  %v3514_v43 = vld [vmem:[#allocation8 + $0x4] sm:$0xff]  ;;  %v3516_v61 = vld [vmem:[#allocation8 + $0xc] sm:$0xff]  ;;  %s3598_s7 = sld [smem:[#allocation2 + $0x57]] }
  0x7c   :  { %v537_v7 = vadd.f32 %v535_v53, %v530_v63  ;;  %v538_v24 = vadd.f32 %v536_v10, %v531_v23  ;;  %v3452_v4 = vmul.f32 %v596_v16, %v5639_v12  ;;  %v617_v60 = vstv %s3391_s16  ;;  %v5643_v53 = vld [vmem:[#allocation58_spill] sm:$0xff]  ;;  %s3609_s8 = sld [smem:[#allocation2 + $0x58]] }
  0x7d   :  { %v3460_v59 = vmul.f32 %v596_v16, %v5640_v47  ;;  %v3463_v14 = vmul.f32 %v603_v19, %v5641_v62  ;;  %v3466_v26 = vmul.f32 %v603_v19, %v5642_v15  ;;  %v3469_v10 = vmul.f32 %v610_v57, %v5643_v53  ;;  %v3507_v19 = vld [vmem:[#allocation8 + $0x3] sm:$0xff]  ;;  %s3614_s9 = sld [smem:[#allocation2 + $0x59]] }
  0x7e   :  { %v544_v21 = vadd.f32 %v542_v50, %v537_v7  ;;  %v545_v1 = vadd.f32 %v543_v5, %v538_v24  ;;  %v3474_v17 = vmul.f32 %v610_v57, %v5644_v8  ;;  %v677_v45 = vstv %s3405_s18  ;;  %v3526_v53 = vld [vmem:[#allocation8 + $0x5] sm:$0xff]  ;;  %s3623_s10 = sld [smem:[#allocation2 + $0x5a]] }
  0x7f   :  { %v3486_v22 = vmul.f32 %v617_v60, %v5645_v55  ;;  %v624_v50 = vstv %s3395_s17  ;;  %v678_v5 = vmul.f32 %v677_v45, %v3455_v9  ;;  %v679_v44 = vmul.f32 %v677_v45, %v3457_v38  ;;  %v3534_v45 = vld [vmem:[#allocation8 + $0x6] sm:$0xff]  ;;  %v3536_v55 = vld [vmem:[#allocation8 + $0xe] sm:$0xff]  ;;  %s3628_s11 = sld [smem:[#allocation2 + $0x5b]] }
  0x80   :  { %v551_v46 = vadd.f32 %v549_v49, %v544_v21  ;;  %v552_v58 = vadd.f32 %v550_v20, %v545_v1  ;;  %v684_v27 = vstv %s3417_s19  ;;  %v691_v13 = vstv %s3421_s26  ;;  %v3509_v49 = vld [vmem:[#allocation8 + $0xb] sm:$0xff]  ;;  %s3636_s12 = sld [smem:[#allocation2 + $0x5c]] }
  0x81   :  { %v5646_v28 = vstv %s2793_s27  ;;  %v685_v63 = vmul.f32 %v684_v27, %v3479_v18  ;;  %v686_v23 = vmul.f32 %v684_v27, %v3481_v34  ;;  %v692_v37 = vmul.f32 %v691_v13, %v3491_v41  ;;  %s3522_s27 = sld [smem:[#allocation2 + $0x51]]  ;;  %v3528_v21 = vld [vmem:[#allocation8 + $0xd] sm:$0xff] }
  0x82   :  { %v680_v29 = vadd.f32 %v678_v5, %v5646_v28  ;;  %v5647_v32 = vmov %v5646_v28  ;;  %v558_v20 = vadd.f32 %v3402_v39, %v551_v46  ;;  %v559_v57 = vadd.f32 %v557_v48, %v552_v58  ;;  %s3641_s13 = sld [smem:[#allocation2 + $0x5d]] }
  0x83   :  { %v681_v16 = vadd.f32 %v679_v44, %v5647_v32  ;;  %v693_v35 = vmul.f32 %v691_v13, %v3493_v52  ;;  %v698_v12 = vstv %s3435_s20  ;;  %v705_v47 = vstv %s3449_s21  ;;  %s3650_s14 = sld [smem:[#allocation2 + $0x5e]] }
  0x84   :  { %v687_v7 = vadd.f32 %v685_v63, %v680_v29  ;;  %v565_v62 = vadd.f32 %v3409_v51, %v558_v20  ;;  %v566_v15 = vadd.f32 %v3412_v0, %v559_v57  ;;  %v699_v39 = vmul.f32 %v698_v12, %v3507_v19  ;;  %v3552_v63 = vld [vmem:[#allocation8 + $0x7] sm:$0xff]  ;;  %s3653_s15 = sld [smem:[#allocation2 + $0x5f]] }
  0x85   :  { %v688_v24 = vadd.f32 %v686_v23, %v681_v16  ;;  %v700_v48 = vmul.f32 %v698_v12, %v3509_v49  ;;  %v706_v51 = vmul.f32 %v705_v47, %v3514_v43  ;;  %v707_v0 = vmul.f32 %v705_v47, %v3516_v61  ;;  %v3554_v23 = vld [vmem:[#allocation8 + $0xf] sm:$0xff]  ;;  %s3661_s16 = sld [smem:[#allocation2 + $0x60]] }
  0x86   :  { %v694_v1 = vadd.f32 %v692_v37, %v687_v7  ;;  %v571_v5 = vadd.f32 %v3415_v56, %v565_v62  ;;  %v572_v44 = vadd.f32 %v3424_v31, %v566_v15  ;;  %v712_v46 = vstv %s3471_s22  ;;  %v3570_v12 = vld [vmem:[#allocation8 + $0x10] sm:$0xff]  ;;  %s3665_s17 = sld [smem:[#allocation2 + $0x61]] }
  0x87   :  { %v695_v8 = vadd.f32 %v693_v35, %v688_v24  ;;  %v719_v58 = vstv %s3476_s23  ;;  %v713_v28 = vmul.f32 %v712_v46, %v3526_v53  ;;  %v714_v29 = vmul.f32 %v712_v46, %v3528_v21  ;;  %s3675_s18 = sld [smem:[#allocation2 + $0x62]] }
  0x88   :  { %v701_v27 = vadd.f32 %v699_v39, %v694_v1  ;;  %v578_v32 = vadd.f32 %v3427_v54, %v571_v5  ;;  %v579_v56 = vadd.f32 %v3430_v2, %v572_v44  ;;  %v720_v31 = vmul.f32 %v719_v58, %v3534_v45  ;;  %v3581_v39 = vld [vmem:[#allocation8 + $0x20] sm:$0xff]  ;;  %s3682_s19 = sld [smem:[#allocation2 + $0x63]] }
  0x89   :  { %v702_v13 = vadd.f32 %v700_v48, %v695_v8  ;;  %v721_v16 = vmul.f32 %v719_v58, %v3536_v55  ;;  %v726_v37 = vstv %s3495_s24  ;;  %v732_v35 = vstv %s3499_s25  ;;  %v3596_v58 = vld [vmem:[#allocation8 + $0x21] sm:$0xff]  ;;  %s3692_s26 = sld [smem:[#allocation2 + $0x64]] }
  0x8a   :  { %v708_v20 = vadd.f32 %v706_v51, %v701_v27  ;;  %v585_v7 = vadd.f32 %v3438_v6, %v578_v32  ;;  %v586_v54 = vadd.f32 %v3441_v36, %v579_v56  ;;  %v619_v2 = vmul.f32 %v617_v60, %v3213_v11  ;;  %v3576_v36 = vld [vmem:[#allocation8 + $0x18] sm:$0xff]  ;;  %s3700_s20 = sld [smem:[#allocation2 + $0x65]] }
  0x8b   :  { %v709_v57 = vadd.f32 %v707_v0, %v702_v13  ;;  %v3568_v24 = vmul.f32 %v624_v50, %v3227_v3  ;;  %v727_v15 = vmul.f32 %v726_v37, %v3552_v63  ;;  %v728_v6 = vmul.f32 %v726_v37, %v3554_v23  ;;  %v3587_v0 = vld [vmem:[#allocation8 + $0x19] sm:$0xff]  ;;  %s3710_s21 = sld [smem:[#allocation2 + $0x66]] }
  0x8c   :  { %v715_v47 = vadd.f32 %v713_v28, %v708_v20  ;;  %v592_v11 = vadd.f32 %v3444_v33, %v585_v7  ;;  %v593_v60 = vadd.f32 %v3447_v25, %v586_v54  ;;  %v733_v3 = vmul.f32 %v732_v35, %v3457_v38  ;;  %v3626_v54 = vld [vmem:[#allocation8 + $0x23] sm:$0xff]  ;;  %s3718_s22 = sld [smem:[#allocation2 + $0x67]] }
  0x8d   :  { %v716_v62 = vadd.f32 %v714_v29, %v709_v57  ;;  %v739_v48 = vstv %s3522_s27  ;;  %v734_v51 = vmul.f32 %v732_v35, %v3570_v12  ;;  %v746_v5 = vstv %s3530_s28  ;;  %v3601_v29 = vld [vmem:[#allocation8 + $0x1a] sm:$0xff]  ;;  %5648 = vst [vmem:[#allocation14_spill] sm:$0xff] %v3626_v54  ;;  %s3728_s23 = sld [smem:[#allocation2 + $0x68]] }
  0x8e   :  { %v722_v1 = vadd.f32 %v720_v31, %v715_v47  ;;  %v599_v33 = vadd.f32 %v3452_v4, %v592_v11  ;;  %v600_v25 = vadd.f32 %v3460_v59, %v593_v60  ;;  %v630_v44 = vstv %s3538_s29  ;;  %v3617_v35 = vld [vmem:[#allocation8 + $0x1b] sm:$0xff]  ;;  %s3760_s24 = sld [smem:[#allocation2 + $0x6c]] }
  0x8f   :  { %v723_v8 = vadd.f32 %v721_v16, %v716_v62  ;;  %v740_v46 = vmul.f32 %v739_v48, %v3576_v36  ;;  %v741_v28 = vmul.f32 %v739_v48, %v3581_v39  ;;  %v753_v32 = vstv %s3544_s30  ;;  %v3612_v16 = vld [vmem:[#allocation8 + $0x22] sm:$0xff]  ;;  %s3768_s25 = sld [smem:[#allocation2 + $0x6d]] }
  0x90   :  { %v729_v27 = vadd.f32 %v727_v15, %v722_v1  ;;  %v606_v56 = vadd.f32 %v3463_v14, %v599_v33  ;;  %v607_v4 = vadd.f32 %v3466_v26, %v600_v25  ;;  %v626_v59 = vmul.f32 %v624_v50, %v3261_v40  ;;  %s3784_s27 = sld [smem:[#allocation2 + $0x6e]] }
  0x91   :  { %v730_v13 = vadd.f32 %v728_v6, %v723_v8  ;;  %v747_v31 = vmul.f32 %v746_v5, %v3587_v0  ;;  %v748_v37 = vmul.f32 %v746_v5, %v3596_v58  ;;  %v760_v14 = vstv %s3556_s4  ;;  %v3631_v6 = vld [vmem:[#allocation8 + $0x1c] sm:$0xff]  ;;  %v3646_v5 = vld [vmem:[#allocation8 + $0x25] sm:$0xff]  ;;  %s3808_s28 = sld [smem:[#allocation2 + $0x6f]] }
  0x92   :  { %v735_v20 = vadd.f32 %v733_v3, %v729_v27  ;;  %v613_v26 = vadd.f32 %v3469_v10, %v606_v56  ;;  %v614_v40 = vadd.f32 %v3474_v17, %v607_v4  ;;  %v631_v50 = vmul.f32 %v630_v44, %v3095_v30  ;;  %5649 = vst [vmem:[#allocation15_spill] sm:$0xff] %v3631_v6  ;;  %v3639_v3 = vld [vmem:[#allocation8 + $0x24] sm:$0xff]  ;;  %s3820_s29 = sld [smem:[#allocation2 + $0x70]] }
  0x93   :  { %v736_v57 = vadd.f32 %v734_v51, %v730_v13  ;;  %v754_v7 = vmul.f32 %v753_v32, %v3601_v29  ;;  %v755_v15 = vmul.f32 %v753_v32, %v3612_v16  ;;  %v767_v10 = vstv %s3572_s5  ;;  %5650 = vst [vmem:[#allocation52_spill] sm:$0xff] %v3639_v3  ;;  %v3644_v51 = vld [vmem:[#allocation8 + $0x1d] sm:$0xff]  ;;  %5652 = vst [vmem:[#allocation16_spill] sm:$0xff] %v3646_v5  ;;  %v3658_v13 = vld [vmem:[#allocation8 + $0x26] sm:$0xff]  ;;  %s3822_s30 = sld [smem:[#allocation2 + $0x69]] }
  0x94   :  { %v742_v47 = vadd.f32 %v740_v46, %v735_v20  ;;  %v620_v17 = vadd.f32 %v3486_v22, %v613_v26  ;;  %v621_v11 = vadd.f32 %v619_v2, %v614_v40  ;;  %v632_v30 = vmul.f32 %v630_v44, %v3285_v42  ;;  %5651 = vst [vmem:[#allocation53_spill] sm:$0xff] %v3644_v51  ;;  %v3656_v27 = vld [vmem:[#allocation8 + $0x1e] sm:$0xff]  ;;  %s3844_s4 = sld [smem:[#allocation2 + $0x71]] }
  0x95   :  { %v743_v62 = vadd.f32 %v741_v28, %v736_v57  ;;  %v761_v60 = vmul.f32 %v760_v14, %v3617_v35  ;;  %v762_v8 = vmul.f32 %v760_v14, %v3626_v54  ;;  %v774_v22 = vstv %s3584_s2  ;;  %5653 = vst [vmem:[#allocation17_spill] sm:$0xff] %v3656_v27  ;;  %5654 = vst [vmem:[#allocation18_spill] sm:$0xff] %v3658_v13  ;;  %v3667_v20 = vld [vmem:[#allocation8 + $0x1f] sm:$0xff]  ;;  %v3669_v57 = vld [vmem:[#allocation8 + $0x27] sm:$0xff]  ;;  %s3855_s5 = sld [smem:[#allocation2 + $0x72]] }
  0x96   :  { %v749_v48 = vadd.f32 %v747_v31, %v742_v47  ;;  %v627_v42 = vadd.f32 %v3568_v24, %v620_v17  ;;  %v628_v2 = vadd.f32 %v626_v59, %v621_v11  ;;  %v768_v33 = vmul.f32 %v767_v10, %v3631_v6  ;;  %5655 = vst [vmem:[#allocation54_spill] sm:$0xff] %v3667_v20  ;;  %v3672_v14 = vld [vmem:[#allocation8 + $0x28] sm:$0xff]  ;;  %v3687_v11 = vld [vmem:[#allocation8 + $0x31] sm:$0xff]  ;;  %s3858_s2 = sld [smem:[#allocation2 + $0x6a]] }
  0x97   :  { %v750_v1 = vadd.f32 %v748_v37, %v743_v62  ;;  %v769_v46 = vmul.f32 %v767_v10, %v3639_v3  ;;  %v781_v28 = vstv %s3598_s7  ;;  %v775_v56 = vmul.f32 %v774_v22, %v3644_v51  ;;  %5656 = vst [vmem:[#allocation19_spill] sm:$0xff] %v3669_v57  ;;  %5657 = vst [vmem:[#allocation20_spill] sm:$0xff] %v3672_v14  ;;  %v3684_v10 = vld [vmem:[#allocation8 + $0x38] sm:$0xff]  ;;  %s3874_s7 = sld [smem:[#allocation2 + $0x73]] }
  0x98   :  { %v756_v25 = vadd.f32 %v754_v7, %v749_v48  ;;  %v633_v32 = vadd.f32 %v631_v50, %v627_v42  ;;  %v634_v24 = vadd.f32 %v632_v30, %v628_v2  ;;  %v776_v4 = vmul.f32 %v774_v22, %v3646_v5  ;;  %v3679_v7 = vld [vmem:[#allocation8 + $0x30] sm:$0xff]  ;;  %5659 = vst [vmem:[#allocation22_spill] sm:$0xff] %v3684_v10  ;;  %v3689_v30 = vld [vmem:[#allocation8 + $0x39] sm:$0xff] }
  0x99   :  { %v757_v44 = vadd.f32 %v755_v15, %v750_v1  ;;  %v788_v37 = vstv %s3609_s8  ;;  %v794_v26 = vstv %s3614_s9  ;;  %v782_v40 = vmul.f32 %v781_v28, %v3656_v27  ;;  %5658 = vst [vmem:[#allocation21_spill] sm:$0xff] %v3679_v7  ;;  %5660 = vst [vmem:[#allocation23_spill] sm:$0xff] %v3687_v11  ;;  %v3698_v42 = vld [vmem:[#allocation8 + $0x32] sm:$0xff]  ;;  %s3878_s8 = sld [smem:[#allocation2 + $0x74]] }
  0x9a   :  { %v763_v59 = vadd.f32 %v761_v60, %v756_v25  ;;  %636 = vst [vmem:[#allocation9 + $0x10] sm:$0xff] %v633_v32  ;;  %637 = vst [vmem:[#allocation9 + $0x18] sm:$0xff] %v634_v24  ;;  %v783_v50 = vmul.f32 %v781_v28, %v3658_v13  ;;  %v801_v17 = vstv %s3623_s10  ;;  %v808_v60 = vstv %s3628_s11  ;;  %v3702_v25 = vld [vmem:[#allocation8 + $0x3a] sm:$0xff]  ;;  %s3890_s9 = sld [smem:[#allocation2 + $0x75]] }
  0x9b   :  { %v764_v31 = vadd.f32 %v762_v8, %v757_v44  ;;  %5661 = vst [vmem:[#allocation60_spill] sm:$0xff] %v3689_v30  ;;  %v789_v48 = vmul.f32 %v788_v37, %v3667_v20  ;;  %v790_v1 = vmul.f32 %v788_v37, %v3669_v57  ;;  %v795_v8 = vmul.f32 %v794_v26, %v3581_v39  ;;  %v3707_v28 = vld [vmem:[#allocation8 + $0x3b] sm:$0xff]  ;;  %s3908_s10 = sld [smem:[#allocation2 + $0x77]] }
  0x9c   :  { %v770_v62 = vadd.f32 %v768_v33, %v763_v59  ;;  %v796_v22 = vmul.f32 %v794_v26, %v3672_v14  ;;  %5662 = vst [vmem:[#allocation24_spill] sm:$0xff] %v3698_v42  ;;  %5663 = vst [vmem:[#allocation25_spill] sm:$0xff] %v3702_v25  ;;  %v815_v44 = vstv %s3636_s12  ;;  %v822_v32 = vstv %s3641_s13  ;;  %v3723_v47 = vld [vmem:[#allocation8 + $0x35] sm:$0xff]  ;;  %v3740_v14 = vld [vmem:[#allocation8 + $0x3e] sm:$0xff]  ;;  %s3912_s11 = sld [smem:[#allocation2 + $0x6b]] }
  0x9d   :  { %v771_v15 = vadd.f32 %v769_v46, %v764_v31  ;;  %v3705_v46 = vld [vmem:[#allocation8 + $0x33] sm:$0xff]  ;;  %5665 = vst [vmem:[#allocation27_spill] sm:$0xff] %v3707_v28  ;;  %v802_v24 = vmul.f32 %v801_v17, %v3679_v7  ;;  %v803_v59 = vmul.f32 %v801_v17, %v3684_v10  ;;  %v809_v31 = vmul.f32 %v808_v60, %v3687_v11  ;;  %v3725_v7 = vld [vmem:[#allocation8 + $0x3d] sm:$0xff]  ;;  %s3920_s12 = sld [smem:[#allocation2 + $0x78]] }
  0x9e   :  { %v777_v2 = vadd.f32 %v775_v56, %v770_v62  ;;  %5664 = vst [vmem:[#allocation26_spill] sm:$0xff] %v3705_v46  ;;  %v810_v56 = vmul.f32 %v808_v60, %v3689_v30  ;;  %v3720_v62 = vld [vmem:[#allocation8 + $0x3c] sm:$0xff]  ;;  %5668 = vst [vmem:[#allocation30_spill] sm:$0xff] %v3723_v47  ;;  %v836_v17 = vstv %s3653_s15  ;;  %v816_v60 = vmul.f32 %v815_v44, %v3698_v42  ;;  %s3930_s13 = sld [smem:[#allocation2 + $0x79]] }
  0x9f   :  { %v778_v33 = vadd.f32 %v776_v4, %v771_v15  ;;  %v3716_v4 = vld [vmem:[#allocation8 + $0x34] sm:$0xff]  ;;  %5667 = vst [vmem:[#allocation29_spill] sm:$0xff] %v3720_v62  ;;  %v829_v15 = vstv %s3650_s14  ;;  %5669 = vst [vmem:[#allocation31_spill] sm:$0xff] %v3725_v7  ;;  %v817_v30 = vmul.f32 %v815_v44, %v3702_v25  ;;  %v3733_v11 = vmul.f32 %v822_v32, %v3705_v46  ;;  %v3745_v42 = vld [vmem:[#allocation8 + $0x3f] sm:$0xff]  ;;  %s3938_s14 = sld [smem:[#allocation2 + $0x7a]] }
  0xa0   :  { %5666 = vst [vmem:[#allocation28_spill] sm:$0xff] %v3716_v4  ;;  %v784_v37 = vadd.f32 %v782_v40, %v777_v2  ;;  %v3736_v40 = vmul.f32 %v822_v32, %v3707_v28  ;;  %5671 = vst [vmem:[#allocation33_spill] sm:$0xff] %v3740_v14  ;;  %v843_v57 = vstv %s3661_s16  ;;  %v3743_v20 = vld [vmem:[#allocation8 + $0x37] sm:$0xff]  ;;  %v850_v44 = vstv %s3665_s17  ;;  %s3945_s15 = sld [smem:[#allocation2 + $0x7b]] }
  0xa1   :  { %v785_v26 = vadd.f32 %v783_v50, %v778_v33  ;;  %v3738_v50 = vld [vmem:[#allocation8 + $0x36] sm:$0xff]  ;;  %5672 = vst [vmem:[#allocation34_spill] sm:$0xff] %v3743_v20  ;;  %5673 = vst [vmem:[#allocation35_spill] sm:$0xff] %v3745_v42  ;;  %v3749_v46 = vmul.f32 %v829_v15, %v3716_v4  ;;  %v3752_v32 = vmul.f32 %v829_v15, %v3720_v62  ;;  %v856_v25 = vstv %s3675_s18  ;;  %v3765_v4 = vld [vmem:[#allocation8 + $0x48] sm:$0xff]  ;;  %s3950_s16 = sld [smem:[#allocation2 + $0x7c]] }
  0xa2   :  { %5670 = vst [vmem:[#allocation32_spill] sm:$0xff] %v3738_v50  ;;  %v791_v2 = vadd.f32 %v789_v48, %v784_v37  ;;  %v3755_v28 = vmul.f32 %v836_v17, %v3723_v47  ;;  %v3758_v48 = vmul.f32 %v836_v17, %v3725_v7  ;;  %5675 = vst [vmem:[#allocation37_spill] sm:$0xff] %v3765_v4  ;;  %v863_v13 = vstv %s3682_s19  ;;  %v3786_v47 = vld [vmem:[#allocation8 + $0x49] sm:$0xff]  ;;  %s3957_s17 = sld [smem:[#allocation2 + $0x7d]] }
  0xa3   :  { %v792_v33 = vadd.f32 %v790_v1, %v785_v26  ;;  %v3762_v26 = vld [vmem:[#allocation8 + $0x40] sm:$0xff]  ;;  %v3771_v15 = vmul.f32 %v843_v57, %v3738_v50  ;;  %v3774_v17 = vmul.f32 %v843_v57, %v3740_v14  ;;  %v3777_v7 = vmul.f32 %v850_v44, %v3743_v20  ;;  %5676 = vst [vmem:[#allocation38_spill] sm:$0xff] %v3786_v47  ;;  %v3788_v50 = vld [vmem:[#allocation8 + $0x51] sm:$0xff]  ;;  %s3960_s18 = sld [smem:[#allocation2 + $0x7e]] }
  0xa4   :  { %v797_v1 = vadd.f32 %v795_v8, %v791_v2  ;;  %5674 = vst [vmem:[#allocation36_spill] sm:$0xff] %v3762_v26  ;;  %v3780_v8 = vmul.f32 %v850_v44, %v3745_v42  ;;  %5677 = vst [vmem:[#allocation39_spill] sm:$0xff] %v3788_v50  ;;  %v870_v62 = vstv %s3692_s26  ;;  %v3791_v57 = vld [vmem:[#allocation8 + $0x4a] sm:$0xff]  ;;  %v877_v20 = vstv %s3700_s20  ;;  %s3967_s19 = sld [smem:[#allocation2 + $0x7f]] }
  0xa5   :  { %v798_v37 = vadd.f32 %v796_v22, %v792_v33  ;;  %v3782_v22 = vld [vmem:[#allocation8 + $0x50] sm:$0xff]  ;;  %5678 = vst [vmem:[#allocation40_spill] sm:$0xff] %v3791_v57  ;;  %v3795_v14 = vmul.f32 %v856_v25, %v3684_v10  ;;  %v3798_v44 = vmul.f32 %v856_v25, %v3762_v26  ;;  %v3801_v42 = vmul.f32 %v863_v13, %v3765_v4  ;;  %s3972_s26 = sld [smem:[#allocation2 + $0x80]] }
  0xa6   :  { %v804_v2 = vadd.f32 %v802_v24, %v797_v1  ;;  %v3803_v24 = vld [vmem:[#allocation8 + $0x52] sm:$0xff]  ;;  %v884_v1 = vstv %s3710_s21  ;;  %v3811_v5 = vmul.f32 %v863_v13, %v3782_v22  ;;  %v891_v4 = vstv %s3718_s22  ;;  %s3979_s20 = sld [smem:[#allocation2 + $0x81]] }
  0xa7   :  { %v805_v33 = vadd.f32 %v803_v59, %v798_v37  ;;  %v3805_v59 = vld [vmem:[#allocation8 + $0x4b] sm:$0xff]  ;;  %v3813_v10 = vld [vmem:[#allocation8 + $0x53] sm:$0xff]  ;;  %v3825_v51 = vmul.f32 %v870_v62, %v3786_v47  ;;  %v3831_v13 = vmul.f32 %v877_v20, %v3791_v57  ;;  %v3839_v54 = vmul.f32 %v877_v20, %v3803_v24  ;;  %s3982_s21 = sld [smem:[#allocation2 + $0x82]] }
  0xa8   :  { %v811_v37 = vadd.f32 %v809_v31, %v804_v2  ;;  %5679 = vst [vmem:[#allocation41_spill] sm:$0xff] %v3813_v10  ;;  %v3815_v25 = vld [vmem:[#allocation8 + $0x4c] sm:$0xff]  ;;  %v3817_v26 = vld [vmem:[#allocation8 + $0x54] sm:$0xff]  ;;  %v3828_v31 = vmul.f32 %v870_v62, %v3788_v50  ;;  %v3842_v47 = vmul.f32 %v884_v1, %v3805_v59  ;;  %v3847_v62 = vmul.f32 %v884_v1, %v3813_v10  ;;  %s3987_s22 = sld [smem:[#allocation2 + $0x83]] }
  0xa9   :  { %v812_v27 = vadd.f32 %v810_v56, %v805_v33  ;;  %5680 = vst [vmem:[#allocation42_spill] sm:$0xff] %v3815_v25  ;;  %5681 = vst [vmem:[#allocation43_spill] sm:$0xff] %v3817_v26  ;;  %v3833_v56 = vld [vmem:[#allocation8 + $0x4d] sm:$0xff]  ;;  %v3835_v2 = vld [vmem:[#allocation8 + $0x55] sm:$0xff]  ;;  %v898_v33 = vstv %s3728_s23  ;;  %v3850_v57 = vmul.f32 %v891_v4, %v3815_v25  ;;  %v3853_v50 = vmul.f32 %v891_v4, %v3817_v26  ;;  %s3990_s23 = sld [smem:[#allocation2 + $0x84]] }
  0xaa   :  { %5682 = vst [vmem:[#allocation44_spill] sm:$0xff] %v3833_v56  ;;  %5683 = vst [vmem:[#allocation45_spill] sm:$0xff] %v3835_v2  ;;  %v818_v3 = vadd.f32 %v816_v60, %v811_v37  ;;  %v3863_v60 = vmul.f32 %v898_v33, %v3833_v56  ;;  %v3866_v1 = vmul.f32 %v898_v33, %v3835_v2  ;;  %v972_v26 = vstv %s3768_s25  ;;  %s3998_s25 = sld [smem:[#allocation2 + $0x86]] }
  0xab   :  { %v819_v6 = vadd.f32 %v817_v30, %v812_v27  ;;  %v965_v27 = vstv %s3760_s24  ;;  %v979_v25 = vstv %s3784_s27  ;;  %s3994_s24 = sld [smem:[#allocation2 + $0x85]] }
  0xac   :  { %v825_v20 = vadd.f32 %v3733_v11, %v818_v3  ;;  %v966_v4 = vmul.f32 %v965_v27, %v3455_v9  ;;  %v967_v37 = vmul.f32 %v965_v27, %v3457_v38  ;;  %v974_v11 = vmul.f32 %v972_v26, %v3481_v34  ;;  %s4002_s27 = sld [smem:[#allocation2 + $0x87]] }
  0xad   :  { %v826_v30 = vadd.f32 %v3736_v40, %v819_v6  ;;  %v973_v6 = vmul.f32 %v972_v26, %v3479_v18  ;;  %v5684_v40 = vstv %s3590_s6  ;;  %v980_v27 = vmul.f32 %v979_v25, %v3491_v41  ;;  %s3898_s6 = sld [smem:[#allocation2 + $0x76]] }
  0xae   :  { %v832_v10 = vadd.f32 %v3749_v46, %v825_v20  ;;  %v968_v9 = vadd.f32 %v966_v4, %v5684_v40  ;;  %v5685_v33 = vmov %v5684_v40  ;;  %v981_v56 = vmul.f32 %v979_v25, %v3493_v52 }
  0xaf   :  { %v833_v3 = vadd.f32 %v3752_v32, %v826_v30  ;;  %v969_v2 = vadd.f32 %v967_v37, %v5685_v33  ;;  %v986_v20 = vstv %s3808_s28  ;;  %v993_v18 = vstv %s3820_s29  ;;  %s4006_s28 = sld [smem:[#allocation2 + $0x88]] }
  0xb0   :  { %v839_v46 = vadd.f32 %v3755_v28, %v832_v10  ;;  %v975_v34 = vadd.f32 %v973_v6, %v968_v9  ;;  %v987_v30 = vmul.f32 %v986_v20, %v3507_v19  ;;  %v988_v41 = vmul.f32 %v986_v20, %v3509_v49  ;;  %v3918_v9 = vld [vmem:[#allocation8 + $0x56] sm:$0xff]  ;;  %s4010_s29 = sld [smem:[#allocation2 + $0x89]] }
  0xb1   :  { %v840_v32 = vadd.f32 %v3758_v48, %v833_v3  ;;  %v976_v26 = vadd.f32 %v974_v11, %v969_v2  ;;  %v994_v28 = vmul.f32 %v993_v18, %v3514_v43  ;;  %v995_v48 = vmul.f32 %v993_v18, %v3516_v61 }
  0xb2   :  { %v846_v52 = vadd.f32 %v3771_v15, %v839_v46  ;;  %v982_v25 = vadd.f32 %v980_v27, %v975_v34  ;;  %v1000_v37 = vstv %s3844_s4  ;;  %v1007_v3 = vstv %s3855_s5  ;;  %v3906_v15 = vld [vmem:[#allocation8 + $0x4e] sm:$0xff]  ;;  %s4020_s4 = sld [smem:[#allocation2 + $0x8b]] }
  0xb3   :  { %v847_v10 = vadd.f32 %v3774_v17, %v840_v32  ;;  %v983_v4 = vadd.f32 %v981_v56, %v976_v26  ;;  %v905_v49 = vstv %s3822_s30  ;;  %v912_v6 = vstv %s3858_s2  ;;  %s4016_s30 = sld [smem:[#allocation2 + $0x8a]] }
  0xb4   :  { %v853_v2 = vadd.f32 %v3777_v7, %v846_v52  ;;  %v989_v43 = vadd.f32 %v987_v30, %v982_v25  ;;  %v1001_v17 = vmul.f32 %v1000_v37, %v3526_v53  ;;  %v1002_v56 = vmul.f32 %v1000_v37, %v3528_v21  ;;  %s4026_s5 = sld [smem:[#allocation2 + $0x8c]] }
  0xb5   :  { %v854_v19 = vadd.f32 %v3780_v8, %v847_v10  ;;  %v990_v61 = vadd.f32 %v988_v41, %v983_v4  ;;  %v1008_v8 = vmul.f32 %v1007_v3, %v3534_v45  ;;  %v1014_v40 = vstv %s3874_s7  ;;  %s4030_s2 = sld [smem:[#allocation7 + $0x4]] }
  0xb6   :  { %v859_v11 = vadd.f32 %v3795_v14, %v853_v2  ;;  %v996_v33 = vadd.f32 %v994_v28, %v989_v43  ;;  %v1009_v53 = vmul.f32 %v1007_v3, %v3536_v55  ;;  %v1020_v46 = vstv %s3878_s8  ;;  %s4038_s7 = sld [smem:[#allocation2 + $0x90]] }
  0xb7   :  { %v860_v7 = vadd.f32 %v3798_v44, %v854_v19  ;;  %v997_v27 = vadd.f32 %v995_v48, %v990_v61  ;;  %v906_v14 = vmul.f32 %v905_v49, %v3906_v15  ;;  %v1015_v45 = vmul.f32 %v1014_v40, %v3552_v63  ;;  %v3928_v44 = vld [vmem:[#allocation8 + $0x4f] sm:$0xff]  ;;  %s4048_s8 = sld [smem:[#allocation2 + $0x91]] }
  0xb8   :  { %v866_v21 = vadd.f32 %v3801_v42, %v859_v11  ;;  %v1003_v20 = vadd.f32 %v1001_v17, %v996_v33  ;;  %v1016_v34 = vmul.f32 %v1014_v40, %v3554_v23  ;;  %v1027_v26 = vstv %s3890_s9  ;;  %v5686_v40 = vld [vmem:[#allocation14_spill] sm:$0xff]  ;;  %s4052_s9 = sld [smem:[#allocation2 + $0x92]] }
  0xb9   :  { %v867_v32 = vadd.f32 %v3811_v5, %v860_v7  ;;  %v1004_v18 = vadd.f32 %v1002_v56, %v997_v27  ;;  %v907_v5 = vmul.f32 %v905_v49, %v3918_v9  ;;  %v1021_v30 = vmul.f32 %v1020_v46, %v3457_v38  ;;  %v3948_v38 = vld [vmem:[#allocation8 + $0x57] sm:$0xff] }
  0xba   :  { %v873_v55 = vadd.f32 %v3825_v51, %v866_v21  ;;  %v1010_v63 = vadd.f32 %v1008_v8, %v1003_v20  ;;  %v1022_v52 = vmul.f32 %v1020_v46, %v3570_v12  ;;  %v1034_v10 = vstv %s3898_s6  ;;  %s4066_s6 = sld [smem:[#allocation2 + $0x93]] }
  0xbb   :  { %v874_v42 = vadd.f32 %v3828_v31, %v867_v32  ;;  %v1011_v41 = vadd.f32 %v1009_v53, %v1004_v18  ;;  %v913_v51 = vmul.f32 %v912_v6, %v3928_v44  ;;  %v1028_v31 = vmul.f32 %v1027_v26, %v3576_v36  ;;  %v5688_v32 = vld [vmem:[#allocation52_spill] sm:$0xff] }
  0xbc   :  { %v880_v23 = vadd.f32 %v3831_v13, %v873_v55  ;;  %v1017_v48 = vadd.f32 %v1015_v45, %v1010_v63  ;;  %v1029_v12 = vmul.f32 %v1027_v26, %v3581_v39  ;;  %v1041_v4 = vstv %s3908_s10  ;;  %v5690_v55 = vld [vmem:[#allocation16_spill] sm:$0xff]  ;;  %s4082_s10 = sld [smem:[#allocation2 + $0x94]] }
  0xbd   :  { %v881_v28 = vadd.f32 %v3839_v54, %v874_v42  ;;  %v1018_v25 = vadd.f32 %v1016_v34, %v1011_v41  ;;  %v918_v37 = vstv %s3912_s11  ;;  %v1035_v3 = vmul.f32 %v1034_v10, %v3587_v0  ;;  %v3970_v0 = vld [vmem:[#allocation8 + $0x58] sm:$0xff]  ;;  %s4096_s11 = sld [smem:[#allocation2 + $0x95]] }
  0xbe   :  { %v887_v13 = vadd.f32 %v3842_v47, %v880_v23  ;;  %v1023_v36 = vadd.f32 %v1021_v30, %v1017_v48  ;;  %v1036_v19 = vmul.f32 %v1034_v10, %v3596_v58  ;;  %v1048_v49 = vstv %s3920_s12  ;;  %v5691_v23 = vld [vmem:[#allocation17_spill] sm:$0xff]  ;;  %s4098_s12 = sld [smem:[#allocation2 + $0x8d]] }
  0xbf   :  { %v888_v54 = vadd.f32 %v3847_v62, %v881_v28  ;;  %v1024_v2 = vadd.f32 %v1022_v52, %v1018_v25  ;;  %v914_v47 = vmul.f32 %v912_v6, %v3948_v38  ;;  %v1042_v62 = vmul.f32 %v1041_v4, %v3601_v29 }
  0xc0   :  { %v894_v43 = vadd.f32 %v3850_v57, %v887_v13  ;;  %v1030_v17 = vadd.f32 %v1028_v31, %v1023_v36  ;;  %v1043_v58 = vmul.f32 %v1041_v4, %v3612_v16  ;;  %v1055_v11 = vstv %s3930_s13  ;;  %v5693_v13 = vld [vmem:[#allocation54_spill] sm:$0xff]  ;;  %s4106_s13 = sld [smem:[#allocation2 + $0x8e]] }
  0xc1   :  { %v895_v61 = vadd.f32 %v3853_v50, %v888_v54  ;;  %v1031_v56 = vadd.f32 %v1029_v12, %v1024_v2  ;;  %v919_v6 = vmul.f32 %v918_v37, %v3782_v22  ;;  %v1049_v29 = vmul.f32 %v1048_v49, %v3617_v35  ;;  %v5695_v2 = vld [vmem:[#allocation20_spill] sm:$0xff] }
  0xc2   :  { %v901_v57 = vadd.f32 %v3863_v60, %v894_v43  ;;  %v1037_v7 = vadd.f32 %v1035_v3, %v1030_v17  ;;  %v1050_v33 = vmul.f32 %v1048_v49, %v5686_v40  ;;  %v1062_v27 = vstv %s3938_s14  ;;  %v5700_v40 = vld [vmem:[#allocation24_spill] sm:$0xff]  ;;  %s4129_s14 = sld [smem:[#allocation2 + $0x96]] }
  0xc3   :  { %v902_v50 = vadd.f32 %v3866_v1, %v895_v61  ;;  %v1038_v8 = vadd.f32 %v1036_v19, %v1031_v56  ;;  %v920_v60 = vmul.f32 %v918_v37, %v3970_v0  ;;  %v5687_v1 = vld [vmem:[#allocation15_spill] sm:$0xff]  ;;  %v1057_v45 = vmul.f32 %v1055_v11, %v5688_v32  ;;  %v5697_v56 = vld [vmem:[#allocation22_spill] sm:$0xff] }
  0xc4   :  { %v908_v16 = vadd.f32 %v906_v14, %v901_v57  ;;  %v1056_v46 = vmul.f32 %v1055_v11, %v5687_v1  ;;  %v1044_v35 = vadd.f32 %v1042_v62, %v1037_v7  ;;  %v1069_v20 = vstv %s3945_s15  ;;  %v5689_v14 = vld [vmem:[#allocation53_spill] sm:$0xff]  ;;  %v5694_v37 = vld [vmem:[#allocation19_spill] sm:$0xff]  ;;  %s4138_s15 = sld [smem:[#allocation2 + $0x97]] }
  0xc5   :  { %v909_v53 = vadd.f32 %v907_v5, %v902_v50  ;;  %v1045_v21 = vadd.f32 %v1043_v58, %v1038_v8  ;;  %v1063_v26 = vmul.f32 %v1062_v27, %v5689_v14  ;;  %v1064_v42 = vmul.f32 %v1062_v27, %v5690_v55  ;;  %v5696_v62 = vld [vmem:[#allocation21_spill] sm:$0xff]  ;;  %v5698_v11 = vld [vmem:[#allocation23_spill] sm:$0xff] }
  0xc6   :  { %v915_v18 = vadd.f32 %v913_v51, %v908_v16  ;;  %v1051_v5 = vadd.f32 %v1049_v29, %v1044_v35  ;;  %v1076_v63 = vstv %s3950_s16  ;;  %v1082_v41 = vstv %s3957_s17  ;;  %v5692_v51 = vld [vmem:[#allocation18_spill] sm:$0xff]  ;;  %v5701_v27 = vld [vmem:[#allocation25_spill] sm:$0xff]  ;;  %v5703_v1 = vld [vmem:[#allocation27_spill] sm:$0xff]  ;;  %s4150_s16 = sld [smem:[#allocation2 + $0x98]] }
  0xc7   :  { %v916_v34 = vadd.f32 %v914_v47, %v909_v53  ;;  %v1052_v30 = vadd.f32 %v1050_v33, %v1045_v21  ;;  %v1070_v28 = vmul.f32 %v1069_v20, %v5691_v23  ;;  %v1071_v31 = vmul.f32 %v1069_v20, %v5692_v51  ;;  %v5702_v53 = vld [vmem:[#allocation26_spill] sm:$0xff]  ;;  %v5704_v20 = vld [vmem:[#allocation28_spill] sm:$0xff]  ;;  %s4162_s17 = sld [smem:[#allocation2 + $0x99]] }
  0xc8   :  { %v921_v52 = vadd.f32 %v919_v6, %v915_v18  ;;  %v1058_v48 = vadd.f32 %v1056_v46, %v1051_v5  ;;  %v1089_v12 = vstv %s3960_s18  ;;  %v1096_v4 = vstv %s3967_s19  ;;  %s4176_s18 = sld [smem:[#allocation2 + $0x9a]] }
  0xc9   :  { %v922_v10 = vadd.f32 %v920_v60, %v916_v34  ;;  %v1059_v25 = vadd.f32 %v1057_v45, %v1052_v30  ;;  %v1077_v54 = vmul.f32 %v1076_v63, %v5693_v13  ;;  %v1078_v3 = vmul.f32 %v1076_v63, %v5694_v37  ;;  %v5705_v34 = vld [vmem:[#allocation29_spill] sm:$0xff]  ;;  %s4180_s19 = sld [smem:[#allocation2 + $0x8f]] }
  0xca   :  { %924 = vst [vmem:[#allocation9 + $0x20] sm:$0xff] %v921_v52  ;;  %v1083_v36 = vmul.f32 %v1082_v41, %v3581_v39  ;;  %v1084_v19 = vmul.f32 %v1082_v41, %v5695_v2  ;;  %v1065_v49 = vadd.f32 %v1063_v26, %v1058_v48  ;;  %v1103_v61 = vstv %s3972_s26  ;;  %v5699_v39 = vld [vmem:[#allocation60_spill] sm:$0xff]  ;;  %v5706_v26 = vld [vmem:[#allocation30_spill] sm:$0xff]  ;;  %s4188_s26 = sld [smem:[#allocation2 + $0x9b]] }
  0xcb   :  { %925 = vst [vmem:[#allocation9 + $0x28] sm:$0xff] %v922_v10  ;;  %v1066_v43 = vadd.f32 %v1064_v42, %v1059_v25  ;;  %v1110_v47 = vstv %s3979_s20  ;;  %v1090_v17 = vmul.f32 %v1089_v12, %v5696_v62  ;;  %v1091_v58 = vmul.f32 %v1089_v12, %v5697_v56  ;;  %v5707_v42 = vld [vmem:[#allocation31_spill] sm:$0xff]  ;;  %v5708_v10 = vld [vmem:[#allocation32_spill] sm:$0xff]  ;;  %s4203_s20 = sld [smem:[#allocation2 + $0x9c]] }
  0xcc   :  { %v1097_v57 = vmul.f32 %v1096_v4, %v5698_v11  ;;  %v1098_v50 = vmul.f32 %v1096_v4, %v5699_v39  ;;  %v1072_v6 = vadd.f32 %v1070_v28, %v1065_v49  ;;  %v1117_v7 = vstv %s3982_s21  ;;  %v5709_v28 = vld [vmem:[#allocation33_spill] sm:$0xff]  ;;  %v5711_v25 = vld [vmem:[#allocation35_spill] sm:$0xff]  ;;  %s4215_s21 = sld [smem:[#allocation2 + $0x9d]] }
  0xcd   :  { %v1073_v29 = vadd.f32 %v1071_v31, %v1066_v43  ;;  %v1124_v8 = vstv %s3987_s22  ;;  %v1104_v33 = vmul.f32 %v1103_v61, %v5700_v40  ;;  %v1105_v16 = vmul.f32 %v1103_v61, %v5701_v27  ;;  %v5710_v31 = vld [vmem:[#allocation34_spill] sm:$0xff]  ;;  %v5717_v27 = vld [vmem:[#allocation41_spill] sm:$0xff]  ;;  %s4231_s22 = sld [smem:[#allocation2 + $0x9e]] }
  0xce   :  { %v1111_v60 = vmul.f32 %v1110_v47, %v5702_v53  ;;  %v1112_v46 = vmul.f32 %v1110_v47, %v5703_v1  ;;  %v1079_v35 = vadd.f32 %v1077_v54, %v1072_v6  ;;  %v1131_v32 = vstv %s3990_s23  ;;  %v5718_v1 = vld [vmem:[#allocation42_spill] sm:$0xff]  ;;  %s4238_s23 = sld [smem:[#allocation2 + $0x9f]] }
  0xcf   :  { %v1080_v21 = vadd.f32 %v1078_v3, %v1073_v29  ;;  %v1138_v45 = vstv %s3994_s24  ;;  %v1118_v18 = vmul.f32 %v1117_v7, %v5704_v20  ;;  %v1119_v14 = vmul.f32 %v1117_v7, %v5705_v34  ;;  %v5716_v29 = vld [vmem:[#allocation40_spill] sm:$0xff]  ;;  %s4245_s24 = sld [smem:[#allocation2 + $0xa0]] }
  0xd0   :  { %v4043_v55 = vmul.f32 %v1124_v8, %v5706_v26  ;;  %v4046_v5 = vmul.f32 %v1124_v8, %v5707_v42  ;;  %v1085_v30 = vadd.f32 %v1083_v36, %v1079_v35  ;;  %v1144_v41 = vstv %s3998_s25  ;;  %v5712_v36 = vld [vmem:[#allocation36_spill] sm:$0xff]  ;;  %v5721_v26 = vld [vmem:[#allocation45_spill] sm:$0xff]  ;;  %s4250_s25 = sld [smem:[#allocation7 + $0x5]] }
  0xd1   :  { %v1086_v63 = vadd.f32 %v1084_v19, %v1080_v21  ;;  %v1151_v52 = vstv %s4002_s27  ;;  %v4055_v23 = vmul.f32 %v1131_v32, %v5708_v10  ;;  %v4058_v51 = vmul.f32 %v1131_v32, %v5709_v28  ;;  %v5713_v19 = vld [vmem:[#allocation37_spill] sm:$0xff]  ;;  %v5719_v21 = vld [vmem:[#allocation43_spill] sm:$0xff]  ;;  %s4261_s27 = sld [smem:[#allocation2 + $0xa1]] }
  0xd2   :  { %v4061_v48 = vmul.f32 %v1138_v45, %v5710_v31  ;;  %v4064_v12 = vmul.f32 %v1138_v45, %v5711_v25  ;;  %v1092_v4 = vadd.f32 %v1090_v17, %v1085_v30  ;;  %v1158_v54 = vstv %s4006_s28  ;;  %v4122_v32 = vld [vmem:[#allocation8 + $0x8] sm:$0xff]  ;;  %s4268_s28 = sld [smem:[#allocation2 + $0xa2]] }
  0xd3   :  { %v1093_v13 = vadd.f32 %v1091_v58, %v1086_v63  ;;  %v1165_v37 = vstv %s4010_s29  ;;  %v4071_v3 = vmul.f32 %v1144_v41, %v5697_v56  ;;  %v4074_v2 = vmul.f32 %v1144_v41, %v5712_v36  ;;  %v5714_v58 = vld [vmem:[#allocation38_spill] sm:$0xff]  ;;  %v5715_v56 = vld [vmem:[#allocation39_spill] sm:$0xff]  ;;  %s4275_s29 = sld [smem:[#allocation2 + $0xa3]] }
  0xd4   :  { %v4077_v49 = vmul.f32 %v1151_v52, %v5713_v19  ;;  %v1172_v43 = vstv %s4016_s30  ;;  %v1099_v61 = vadd.f32 %v1097_v57, %v1092_v4  ;;  %v1179_v62 = vstv %s4020_s4  ;;  %v4124_v45 = vld [vmem:[#allocation8 + $0x1] sm:$0xff]  ;;  %v4132_v63 = vld [vmem:[#allocation8 + $0x9] sm:$0xff]  ;;  %s4282_s30 = sld [smem:[#allocation2 + $0xa4]] }
  0xd5   :  { %v1100_v47 = vadd.f32 %v1098_v50, %v1093_v13  ;;  %v1186_v11 = vstv %s4026_s5  ;;  %v4085_v17 = vmul.f32 %v1151_v52, %v3782_v22  ;;  %v4088_v39 = vmul.f32 %v1158_v54, %v5714_v58  ;;  %v4134_v41 = vld [vmem:[#allocation8 + $0x2] sm:$0xff]  ;;  %v4136_v52 = vld [vmem:[#allocation8 + $0xa] sm:$0xff]  ;;  %s4289_s4 = sld [smem:[#allocation2 + $0xa5]] }
  0xd6   :  { %v4091_v6 = vmul.f32 %v1158_v54, %v5715_v56  ;;  %v4094_v7 = vmul.f32 %v1165_v37, %v5716_v29  ;;  %v1106_v57 = vadd.f32 %v1104_v33, %v1099_v61  ;;  %v4101_v8 = vmul.f32 %v1165_v37, %v3803_v24  ;;  %v4146_v54 = vld [vmem:[#allocation8 + $0x3] sm:$0xff]  ;;  %v4148_v37 = vld [vmem:[#allocation8 + $0xb] sm:$0xff]  ;;  %s4296_s5 = sld [smem:[#allocation2 + $0xa6]] }
  0xd7   :  { %v1107_v50 = vadd.f32 %v1105_v16, %v1100_v47  ;;  %v4104_v40 = vmul.f32 %v1172_v43, %v3805_v59  ;;  %v4109_v53 = vmul.f32 %v1172_v43, %v5717_v27  ;;  %v4112_v35 = vmul.f32 %v1179_v62, %v5718_v1  ;;  %v5720_v16 = vld [vmem:[#allocation44_spill] sm:$0xff]  ;;  %v4120_v59 = vld [vmem:[#allocation8] sm:$0xff] }
  0xd8   :  { %v4115_v33 = vmul.f32 %v1179_v62, %v5719_v21  ;;  %v4118_v24 = vmul.f32 %v1186_v11, %v5720_v16  ;;  %v1113_v20 = vadd.f32 %v1111_v60, %v1106_v57  ;;  %v4127_v42 = vmul.f32 %v1186_v11, %v5721_v26  ;;  %v4158_v11 = vld [vmem:[#allocation8 + $0x4] sm:$0xff]  ;;  %v4160_v58 = vld [vmem:[#allocation8 + $0xc] sm:$0xff] }
  0xd9   :  { %v1114_v34 = vadd.f32 %v1112_v46, %v1107_v50  ;;  %v1250_v30 = vstv %s4030_s2  ;;  %v1253_v10 = vstv %s4038_s7  ;;  %v1260_v28 = vstv %s4048_s8  ;;  %v4170_v21 = vld [vmem:[#allocation8 + $0x5] sm:$0xff]  ;;  %v4172_v16 = vld [vmem:[#allocation8 + $0xd] sm:$0xff]  ;;  %s4302_s2 = sld [smem:[#allocation2 + $0xa7]] }
  0xda   :  { %v1267_v31 = vstv %s4052_s9  ;;  %v1274_v25 = vstv %s4066_s6  ;;  %v1120_v60 = vadd.f32 %v1118_v18, %v1113_v20  ;;  %v1254_v4 = vmul.f32 %v1253_v10, %v4120_v59  ;;  %s4309_s7 = sld [smem:[#allocation2 + $0xa8]] }
  0xdb   :  { %v1121_v46 = vadd.f32 %v1119_v14, %v1114_v34  ;;  %v1255_v13 = vmul.f32 %v1253_v10, %v4122_v32  ;;  %v1261_v36 = vmul.f32 %v1260_v28, %v4124_v45  ;;  %v1262_v19 = vmul.f32 %v1260_v28, %v4132_v63  ;;  %s4317_s8 = sld [smem:[#allocation2 + $0xa9]] }
  0xdc   :  { %v1268_v43 = vmul.f32 %v1267_v31, %v4134_v41  ;;  %v1269_v18 = vmul.f32 %v1267_v31, %v4136_v52  ;;  %v1127_v14 = vadd.f32 %v4043_v55, %v1120_v60  ;;  %v1256_v47 = vadd.f32 %v1254_v4, %v1250_v30  ;;  %v4184_v31 = vld [vmem:[#allocation8 + $0x6] sm:$0xff]  ;;  %s4322_s9 = sld [smem:[#allocation2 + $0xaa]] }
  0xdd   :  { %v1128_v61 = vadd.f32 %v4046_v5, %v1121_v46  ;;  %v1257_v62 = vadd.f32 %v1255_v13, %v1250_v30  ;;  %v1275_v56 = vmul.f32 %v1274_v25, %v4146_v54  ;;  %v1276_v29 = vmul.f32 %v1274_v25, %v4148_v37  ;;  %v4186_v25 = vld [vmem:[#allocation8 + $0xe] sm:$0xff]  ;;  %s4328_s6 = sld [smem:[#allocation2 + $0xab]] }
  0xde   :  { %v1281_v57 = vstv %s4082_s10  ;;  %v1288_v50 = vstv %s4096_s11  ;;  %v1134_v55 = vadd.f32 %v4055_v23, %v1127_v14  ;;  %v1263_v27 = vadd.f32 %v1261_v36, %v1256_v47  ;;  %s4338_s10 = sld [smem:[#allocation2 + $0xac]] }
  0xdf   :  { %v1135_v5 = vadd.f32 %v4058_v51, %v1128_v61  ;;  %v1264_v1 = vadd.f32 %v1262_v19, %v1257_v62  ;;  %v1193_v20 = vstv %s4098_s12  ;;  %v1200_v34 = vstv %s4106_s13  ;;  %s4348_s11 = sld [smem:[#allocation2 + $0xad]] }
  0xe0   :  { %v1282_v26 = vmul.f32 %v1281_v57, %v4158_v11  ;;  %v1283_v30 = vmul.f32 %v1281_v57, %v4160_v58  ;;  %v1141_v23 = vadd.f32 %v4061_v48, %v1134_v55  ;;  %v1270_v10 = vadd.f32 %v1268_v43, %v1263_v27  ;;  %v4196_v43 = vld [vmem:[#allocation8 + $0x7] sm:$0xff]  ;;  %v4210_v57 = vld [vmem:[#allocation8 + $0x10] sm:$0xff]  ;;  %s4356_s12 = sld [smem:[#allocation2 + $0xae]] }
  0xe1   :  { %v1142_v51 = vadd.f32 %v4064_v12, %v1135_v5  ;;  %v1271_v28 = vadd.f32 %v1269_v18, %v1264_v1  ;;  %v1289_v60 = vmul.f32 %v1288_v50, %v4170_v21  ;;  %v1290_v46 = vmul.f32 %v1288_v50, %v4172_v16  ;;  %v4198_v18 = vld [vmem:[#allocation8 + $0xf] sm:$0xff]  ;;  %s4366_s13 = sld [smem:[#allocation2 + $0xaf]] }
  0xe2   :  { %v1295_v4 = vstv %s4129_s14  ;;  %v1302_v13 = vstv %s4138_s15  ;;  %v1147_v36 = vadd.f32 %v4071_v3, %v1141_v23  ;;  %v1277_v12 = vadd.f32 %v1275_v56, %v1270_v10  ;;  %s4376_s14 = sld [smem:[#allocation2 + $0xb0]] }
  0xe3   :  { %v1148_v48 = vadd.f32 %v4074_v2, %v1142_v51  ;;  %v1278_v19 = vadd.f32 %v1276_v29, %v1271_v28  ;;  %v4201_v14 = vmul.f32 %v1193_v20, %v3906_v15  ;;  %v1296_v61 = vmul.f32 %v1295_v4, %v4184_v31  ;;  %s4386_s15 = sld [smem:[#allocation2 + $0xb1]] }
  0xe4   :  { %v1297_v47 = vmul.f32 %v1295_v4, %v4186_v25  ;;  %v1308_v62 = vstv %s4150_s16  ;;  %v1154_v3 = vadd.f32 %v4077_v49, %v1147_v36  ;;  %v1284_v56 = vadd.f32 %v1282_v26, %v1277_v12  ;;  %v4222_v26 = vld [vmem:[#allocation8 + $0x18] sm:$0xff]  ;;  %s4406_s16 = sld [smem:[#allocation2 + $0xb4]] }
  0xe5   :  { %v1155_v2 = vadd.f32 %v4085_v17, %v1148_v48  ;;  %v1285_v29 = vadd.f32 %v1283_v30, %v1278_v19  ;;  %v4213_v15 = vmul.f32 %v1193_v20, %v3918_v9  ;;  %v1303_v50 = vmul.f32 %v1302_v13, %v4196_v43  ;;  %v4224_v30 = vld [vmem:[#allocation8 + $0x20] sm:$0xff] }
  0xe6   :  { %v1304_v55 = vmul.f32 %v1302_v13, %v4198_v18  ;;  %v1315_v5 = vstv %s4162_s17  ;;  %v1161_v49 = vadd.f32 %v4088_v39, %v1154_v3  ;;  %v1291_v17 = vadd.f32 %v1289_v60, %v1284_v56  ;;  %v4240_v60 = vld [vmem:[#allocation8 + $0x19] sm:$0xff]  ;;  %s4420_s17 = sld [smem:[#allocation2 + $0xb5]] }
  0xe7   :  { %v1162_v27 = vadd.f32 %v4091_v6, %v1155_v2  ;;  %v1292_v1 = vadd.f32 %v1290_v46, %v1285_v29  ;;  %v4229_v9 = vmul.f32 %v1200_v34, %v3928_v44  ;;  %v1309_v20 = vmul.f32 %v1308_v62, %v4122_v32  ;;  %v4242_v44 = vld [vmem:[#allocation8 + $0x21] sm:$0xff] }
  0xe8   :  { %v1310_v39 = vmul.f32 %v1308_v62, %v4210_v57  ;;  %v1322_v23 = vstv %s4176_s18  ;;  %v1168_v6 = vadd.f32 %v4094_v7, %v1161_v49  ;;  %v1298_v10 = vadd.f32 %v1296_v61, %v1291_v17  ;;  %v4254_v19 = vld [vmem:[#allocation8 + $0x1a] sm:$0xff]  ;;  %v4256_v61 = vld [vmem:[#allocation8 + $0x22] sm:$0xff]  ;;  %s4432_s18 = sld [smem:[#allocation2 + $0xb6]] }
  0xe9   :  { %v1169_v51 = vadd.f32 %v4101_v8, %v1162_v27  ;;  %v1299_v28 = vadd.f32 %v1297_v47, %v1292_v1  ;;  %v1206_v46 = vstv %s4180_s19  ;;  %v1316_v4 = vmul.f32 %v1315_v5, %v4222_v26  ;;  %5722 = vst [vmem:[#allocation46_spill] sm:$0xff] %v4256_v61  ;;  %v4284_v1 = vld [vmem:[#allocation8 + $0x1c] sm:$0xff]  ;;  %s4450_s19 = sld [smem:[#allocation2 + $0xb7]] }
  0xea   :  { %v1317_v13 = vmul.f32 %v1315_v5, %v4224_v30  ;;  %v1329_v7 = vstv %s4188_s26  ;;  %v1175_v8 = vadd.f32 %v4104_v40, %v1168_v6  ;;  %v1305_v48 = vadd.f32 %v1303_v50, %v1298_v10  ;;  %v4270_v50 = vld [vmem:[#allocation8 + $0x1b] sm:$0xff]  ;;  %5725 = vst [vmem:[#allocation49_spill] sm:$0xff] %v4284_v1  ;;  %s4480_s26 = sld [smem:[#allocation2 + $0xb8]] }
  0xeb   :  { %v1176_v36 = vadd.f32 %v4109_v53, %v1169_v51  ;;  %v1306_v12 = vadd.f32 %v1304_v55, %v1299_v28  ;;  %v1202_v47 = vmul.f32 %v1200_v34, %v3948_v38  ;;  %v1323_v62 = vmul.f32 %v1322_v23, %v4240_v60  ;;  %5723 = vst [vmem:[#allocation47_spill] sm:$0xff] %v4270_v50  ;;  %v4272_v55 = vld [vmem:[#allocation8 + $0x23] sm:$0xff] }
  0xec   :  { %v1324_v3 = vmul.f32 %v1322_v23, %v4242_v44  ;;  %v1336_v2 = vstv %s4203_s20  ;;  %v1182_v40 = vadd.f32 %v4112_v35, %v1175_v8  ;;  %v1311_v56 = vadd.f32 %v1309_v20, %v1305_v48  ;;  %5724 = vst [vmem:[#allocation48_spill] sm:$0xff] %v4272_v55  ;;  %v4286_v20 = vld [vmem:[#allocation8 + $0x24] sm:$0xff]  ;;  %s4501_s20 = sld [smem:[#allocation2 + $0xb9]] }
  0xed   :  { %v1183_v53 = vadd.f32 %v4115_v33, %v1176_v36  ;;  %v1312_v29 = vadd.f32 %v1310_v39, %v1306_v12  ;;  %v1207_v38 = vmul.f32 %v1206_v46, %v3782_v22  ;;  %v1330_v34 = vmul.f32 %v1329_v7, %v4254_v19  ;;  %5726 = vst [vmem:[#allocation50_spill] sm:$0xff] %v4286_v20  ;;  %v4298_v28 = vld [vmem:[#allocation8 + $0x1d] sm:$0xff]  ;;  %v4313_v12 = vld [vmem:[#allocation8 + $0x26] sm:$0xff] }
  0xee   :  { %v1331_v5 = vmul.f32 %v1329_v7, %v4256_v61  ;;  %v1343_v35 = vstv %s4215_s21  ;;  %v1189_v33 = vadd.f32 %v4118_v24, %v1182_v40  ;;  %v1318_v27 = vadd.f32 %v1316_v4, %v1311_v56  ;;  %5727 = vst [vmem:[#allocation51_spill] sm:$0xff] %v4298_v28  ;;  %v4300_v4 = vld [vmem:[#allocation8 + $0x25] sm:$0xff]  ;;  %5730 = vst [vmem:[#allocation57_spill] sm:$0xff] %v4313_v12  ;;  %s4511_s21 = sld [smem:[#allocation2 + $0xba]] }
  0xef   :  { %v1190_v49 = vadd.f32 %v4127_v42, %v1183_v53  ;;  %v1319_v17 = vadd.f32 %v1317_v13, %v1312_v29  ;;  %v1208_v22 = vmul.f32 %v1206_v46, %v3970_v0  ;;  %v1337_v39 = vmul.f32 %v1336_v2, %v4270_v50  ;;  %5728 = vst [vmem:[#allocation55_spill] sm:$0xff] %v4300_v4  ;;  %v4311_v48 = vld [vmem:[#allocation8 + $0x1e] sm:$0xff]  ;;  %v4324_v29 = vld [vmem:[#allocation8 + $0x27] sm:$0xff] }
  0xf0   :  { %v1338_v24 = vmul.f32 %v1336_v2, %v4272_v55  ;;  %v1350_v23 = vstv %s4231_s22  ;;  %v1196_v42 = vadd.f32 %v4201_v14, %v1189_v33  ;;  %v1325_v51 = vadd.f32 %v1323_v62, %v1318_v27  ;;  %5729 = vst [vmem:[#allocation56_spill] sm:$0xff] %v4311_v48  ;;  %v4315_v62 = vld [vmem:[#allocation8 + $0x1f] sm:$0xff]  ;;  %5732 = vst [vmem:[#allocation59_spill] sm:$0xff] %v4324_v29  ;;  %s4520_s22 = sld [smem:[#allocation2 + $0xbb]] }
  0xf1   :  { %v1197_v6 = vadd.f32 %v4213_v15, %v1190_v49  ;;  %v1326_v10 = vadd.f32 %v1324_v3, %v1319_v17  ;;  %v1344_v0 = vmul.f32 %v1343_v35, %v4284_v1  ;;  %v1345_v46 = vmul.f32 %v1343_v35, %v4286_v20  ;;  %5731 = vst [vmem:[#allocation58_spill] sm:$0xff] %v4315_v62  ;;  %v4335_v49 = vld [vmem:[#allocation8 + $0x38] sm:$0xff]  ;;  %v4469_v1 = vld [vmem:[#allocation8 + $0x4c] sm:$0xff] }
  0xf2   :  { %v1357_v13 = vstv %s4238_s23  ;;  %v1364_v7 = vstv %s4245_s24  ;;  %v1203_v14 = vadd.f32 %v4229_v9, %v1196_v42  ;;  %v1332_v8 = vadd.f32 %v1330_v34, %v1325_v51  ;;  %v4326_v34 = vld [vmem:[#allocation8 + $0x28] sm:$0xff]  ;;  %5735 = vst [vmem:[#allocation15_spill] sm:$0xff] %v4335_v49  ;;  %v4345_v42 = vld [vmem:[#allocation8 + $0x32] sm:$0xff]  ;;  %5758 = vst [vmem:[#allocation34_spill] sm:$0xff] %v4469_v1  ;;  %s4525_s23 = sld [smem:[#allocation2 + $0xb2]] }
  0xf3   :  { %v1204_v15 = vadd.f32 %v1202_v47, %v1197_v6  ;;  %v1333_v36 = vadd.f32 %v1331_v5, %v1326_v10  ;;  %v1351_v3 = vmul.f32 %v1350_v23, %v4298_v28  ;;  %v1352_v2 = vmul.f32 %v1350_v23, %v4300_v4  ;;  %5733 = vst [vmem:[#allocation61_spill] sm:$0xff] %v4326_v34  ;;  %s4540_s24 = sld [smem:[#allocation2 + $0xbc]] }
  0xf4   :  { %v1370_v40 = vstv %s4261_s27  ;;  %v1209_v9 = vadd.f32 %v1207_v38, %v1203_v14  ;;  %v1339_v53 = vadd.f32 %v1337_v39, %v1332_v8  ;;  %v1358_v5 = vmul.f32 %v1357_v13, %v4311_v48  ;;  %v4333_v38 = vld [vmem:[#allocation8 + $0x30] sm:$0xff]  ;;  %5738 = vst [vmem:[#allocation16_spill] sm:$0xff] %v4345_v42  ;;  %v4353_v14 = vld [vmem:[#allocation8 + $0x3a] sm:$0xff]  ;;  %s4547_s27 = sld [smem:[#allocation2 + $0xb3]] }
  0xf5   :  { %v1210_v47 = vadd.f32 %v1208_v22, %v1204_v15  ;;  %v1340_v56 = vadd.f32 %v1338_v24, %v1333_v36  ;;  %v1359_v35 = vmul.f32 %v1357_v13, %v4313_v12  ;;  %v1365_v33 = vmul.f32 %v1364_v7, %v4315_v62  ;;  %5734 = vst [vmem:[#allocation14_spill] sm:$0xff] %v4333_v38  ;;  %v4340_v39 = vld [vmem:[#allocation8 + $0x31] sm:$0xff]  ;;  %v4342_v24 = vld [vmem:[#allocation8 + $0x39] sm:$0xff] }
  0xf6   :  { %v1377_v27 = vstv %s4268_s28  ;;  %1212 = vst [vmem:[#allocation9 + $0x30] sm:$0xff] %v1209_v9  ;;  %v1346_v17 = vadd.f32 %v1344_v0, %v1339_v53  ;;  %5736 = vst [vmem:[#allocation52_spill] sm:$0xff] %v4340_v39  ;;  %v1384_v23 = vstv %s4275_s29  ;;  %v1391_v6 = vstv %s4282_s30  ;;  %v4359_v36 = vld [vmem:[#allocation8 + $0x33] sm:$0xff]  ;;  %v4361_v9 = vld [vmem:[#allocation8 + $0x3b] sm:$0xff]  ;;  %s4561_s28 = sld [smem:[#allocation2 + $0xbe]] }
  0xf7   :  { %1213 = vst [vmem:[#allocation9 + $0x38] sm:$0xff] %v1210_v47  ;;  %v1347_v22 = vadd.f32 %v1345_v46, %v1340_v56  ;;  %5737 = vst [vmem:[#allocation53_spill] sm:$0xff] %v4342_v24  ;;  %v1366_v51 = vmul.f32 %v1364_v7, %v4324_v29  ;;  %v1371_v10 = vmul.f32 %v1370_v40, %v4224_v30  ;;  %v1398_v0 = vstv %s4289_s4  ;;  %v4363_v7 = vld [vmem:[#allocation8 + $0x34] sm:$0xff]  ;;  %v4374_v56 = vld [vmem:[#allocation8 + $0x3c] sm:$0xff]  ;;  %s4565_s29 = sld [smem:[#allocation2 + $0xbf]] }
  0xf8   :  { %v1372_v13 = vmul.f32 %v1370_v40, %v4326_v34  ;;  %5739 = vst [vmem:[#allocation17_spill] sm:$0xff] %v4353_v14  ;;  %v1353_v46 = vadd.f32 %v1351_v3, %v1346_v17  ;;  %v1378_v8 = vmul.f32 %v1377_v27, %v4333_v38  ;;  %5740 = vst [vmem:[#allocation18_spill] sm:$0xff] %v4359_v36  ;;  %v1405_v47 = vstv %s4296_s5  ;;  %v4378_v38 = vld [vmem:[#allocation8 + $0x35] sm:$0xff]  ;;  %v4380_v34 = vld [vmem:[#allocation8 + $0x3d] sm:$0xff]  ;;  %s4581_s30 = sld [smem:[#allocation2 + $0xc0]] }
  0xf9   :  { %v1354_v15 = vadd.f32 %v1352_v2, %v1347_v22  ;;  %5741 = vst [vmem:[#allocation54_spill] sm:$0xff] %v4361_v9  ;;  %5742 = vst [vmem:[#allocation19_spill] sm:$0xff] %v4363_v7  ;;  %v1379_v40 = vmul.f32 %v1377_v27, %v4335_v49  ;;  %v1385_v53 = vmul.f32 %v1384_v23, %v4340_v39  ;;  %v1412_v27 = vstv %s4302_s2  ;;  %v4383_v29 = vld [vmem:[#allocation8 + $0x36] sm:$0xff]  ;;  %v4402_v12 = vld [vmem:[#allocation8 + $0x3f] sm:$0xff]  ;;  %s4585_s4 = sld [smem:[#allocation2 + $0xc1]] }
  0xfa   :  { %v1386_v3 = vmul.f32 %v1384_v23, %v4342_v24  ;;  %v4372_v2 = vmul.f32 %v1391_v6, %v4345_v42  ;;  %5743 = vst [vmem:[#allocation20_spill] sm:$0xff] %v4374_v56  ;;  %v1360_v17 = vadd.f32 %v1358_v5, %v1353_v46  ;;  %5744 = vst [vmem:[#allocation21_spill] sm:$0xff] %v4378_v38  ;;  %v1419_v39 = vstv %s4309_s7  ;;  %v4398_v46 = vld [vmem:[#allocation8 + $0x3e] sm:$0xff]  ;;  %s4593_s5 = sld [smem:[#allocation2 + $0xc2]] }
  0xfb   :  { %v1361_v22 = vadd.f32 %v1359_v35, %v1354_v15  ;;  %5745 = vst [vmem:[#allocation22_spill] sm:$0xff] %v4380_v34  ;;  %5746 = vst [vmem:[#allocation23_spill] sm:$0xff] %v4383_v29  ;;  %v1393_v23 = vmul.f32 %v1391_v6, %v4353_v14  ;;  %v4390_v42 = vmul.f32 %v1398_v0, %v4359_v36  ;;  %v4400_v62 = vld [vmem:[#allocation8 + $0x37] sm:$0xff]  ;;  %v1426_v48 = vstv %s4317_s8  ;;  %s4601_s2 = sld [smem:[#allocation2 + $0xc3]] }
  0xfc   :  { %v4393_v5 = vmul.f32 %v1398_v0, %v4361_v9  ;;  %v4396_v35 = vmul.f32 %v1405_v47, %v4363_v7  ;;  %5747 = vst [vmem:[#allocation60_spill] sm:$0xff] %v4398_v46  ;;  %v1367_v15 = vadd.f32 %v1365_v33, %v1360_v17  ;;  %5748 = vst [vmem:[#allocation24_spill] sm:$0xff] %v4400_v62  ;;  %v1432_v6 = vstv %s4322_s9  ;;  %v4425_v9 = vld [vmem:[#allocation8 + $0x40] sm:$0xff]  ;;  %s4605_s7 = sld [smem:[#allocation2 + $0xc4]] }
  0xfd   :  { %v1368_v24 = vadd.f32 %v1366_v51, %v1361_v22  ;;  %5749 = vst [vmem:[#allocation25_spill] sm:$0xff] %v4402_v12  ;;  %v4409_v36 = vmul.f32 %v1405_v47, %v4374_v56  ;;  %v4412_v0 = vmul.f32 %v1412_v27, %v4378_v38  ;;  %v4415_v7 = vmul.f32 %v1412_v27, %v4380_v34  ;;  %v4427_v47 = vld [vmem:[#allocation8 + $0x48] sm:$0xff]  ;;  %v4429_v38 = vld [vmem:[#allocation8 + $0x50] sm:$0xff]  ;;  %s4613_s8 = sld [smem:[#allocation2 + $0xc5]] }
  0xfe   :  { %v4418_v33 = vmul.f32 %v1419_v39, %v4383_v29  ;;  %v1373_v51 = vadd.f32 %v1371_v10, %v1367_v15  ;;  %v4423_v22 = vmul.f32 %v1419_v39, %v4398_v46  ;;  %5750 = vst [vmem:[#allocation26_spill] sm:$0xff] %v4425_v9  ;;  %5751 = vst [vmem:[#allocation27_spill] sm:$0xff] %v4427_v47  ;;  %v1439_v27 = vstv %s4328_s6  ;;  %v4448_v46 = vld [vmem:[#allocation8 + $0x4a] sm:$0xff]  ;;  %s4617_s9 = sld [smem:[#allocation2 + $0xc6]] }
  0xff   :  { %v1374_v17 = vadd.f32 %v1372_v13, %v1368_v24  ;;  %v4435_v29 = vmul.f32 %v1426_v48, %v4400_v62  ;;  %v4438_v10 = vmul.f32 %v1426_v48, %v4402_v12  ;;  %v4441_v39 = vmul.f32 %v1432_v6, %v4335_v49  ;;  %v4443_v24 = vld [vmem:[#allocation8 + $0x49] sm:$0xff]  ;;  %v4445_v13 = vld [vmem:[#allocation8 + $0x51] sm:$0xff]  ;;  %5754 = vst [vmem:[#allocation30_spill] sm:$0xff] %v4448_v46  ;;  %s4623_s6 = sld [smem:[#allocation2 + $0xc7]] }
 0x100   :  { %5752 = vst [vmem:[#allocation28_spill] sm:$0xff] %v4443_v24  ;;  %5753 = vst [vmem:[#allocation29_spill] sm:$0xff] %v4445_v13  ;;  %v1446_v15 = vstv %s4338_s10  ;;  %v1380_v34 = vadd.f32 %v1378_v8, %v1373_v51  ;;  %v4452_v62 = vld [vmem:[#allocation8 + $0x52] sm:$0xff]  ;;  %v1453_v14 = vstv %s4348_s11  ;;  %v1460_v49 = vstv %s4356_s12  ;;  %s4627_s10 = sld [smem:[#allocation2 + $0xc8]] }
 0x101   :  { %v1381_v56 = vadd.f32 %v1379_v40, %v1374_v17  ;;  %5755 = vst [vmem:[#allocation31_spill] sm:$0xff] %v4452_v62  ;;  %v4455_v48 = vld [vmem:[#allocation8 + $0x4b] sm:$0xff]  ;;  %v4457_v12 = vld [vmem:[#allocation8 + $0x53] sm:$0xff]  ;;  %v4461_v4 = vmul.f32 %v1432_v6, %v4425_v9  ;;  %v4464_v28 = vmul.f32 %v1439_v27, %v4427_v47  ;;  %v4467_v20 = vmul.f32 %v1439_v27, %v4429_v38  ;;  %s4634_s11 = sld [smem:[#allocation2 + $0xc9]] }
 0x102   :  { %5756 = vst [vmem:[#allocation32_spill] sm:$0xff] %v4455_v48  ;;  %5757 = vst [vmem:[#allocation33_spill] sm:$0xff] %v4457_v12  ;;  %v1467_v8 = vstv %s4366_s13  ;;  %v1387_v40 = vadd.f32 %v1385_v53, %v1380_v34  ;;  %v4473_v17 = vmul.f32 %v1446_v15, %v4443_v24  ;;  %v4476_v6 = vmul.f32 %v1446_v15, %v4445_v13  ;;  %v4478_v47 = vld [vmem:[#allocation8 + $0x54] sm:$0xff]  ;;  %s4637_s12 = sld [smem:[#allocation2 + $0xca]] }
 0x103   :  { %v1388_v51 = vadd.f32 %v1386_v3, %v1381_v56  ;;  %5759 = vst [vmem:[#allocation35_spill] sm:$0xff] %v4478_v47  ;;  %v4483_v27 = vmul.f32 %v1453_v14, %v4448_v46  ;;  %v4486_v9 = vmul.f32 %v1453_v14, %v4452_v62  ;;  %v4489_v34 = vmul.f32 %v1460_v49, %v4455_v48  ;;  %v4498_v13 = vld [vmem:[#allocation8 + $0x4d] sm:$0xff]  ;;  %s4643_s13 = sld [smem:[#allocation2 + $0xcb]] }
 0x104   :  { %v4492_v53 = vmul.f32 %v1460_v49, %v4457_v12  ;;  %v1394_v3 = vadd.f32 %v4372_v2, %v1387_v40  ;;  %v4496_v15 = vmul.f32 %v1467_v8, %v4469_v1  ;;  %5760 = vst [vmem:[#allocation36_spill] sm:$0xff] %v4498_v13  ;;  %v1474_v46 = vstv %s4376_s14  ;;  %v4515_v1 = vld [vmem:[#allocation8 + $0x55] sm:$0xff]  ;;  %s4647_s14 = sld [smem:[#allocation2 + $0xcc]] }
 0x105   :  { %v1395_v56 = vadd.f32 %v1393_v23, %v1388_v51  ;;  %v4504_v14 = vmul.f32 %v1467_v8, %v4478_v47  ;;  %v1481_v48 = vstv %s4386_s15  ;;  %v1538_v49 = vstv %s4250_s25  ;;  %s4543_s25 = sld [smem:[#allocation2 + $0xbd]] }
 0x106   :  { %v1541_v12 = vstv %s4406_s16  ;;  %v1401_v2 = vadd.f32 %v4390_v42, %v1394_v3  ;;  %v4518_v62 = vmul.f32 %v1474_v46, %v4498_v13  ;;  %v1548_v8 = vstv %s4420_s17  ;;  %s4651_s15 = sld [smem:[#allocation2 + $0xcd]] }
 0x107   :  { %v1402_v23 = vadd.f32 %v4393_v5, %v1395_v56  ;;  %v1542_v40 = vmul.f32 %v1541_v12, %v4120_v59  ;;  %v1543_v51 = vmul.f32 %v1541_v12, %v4122_v32  ;;  %v1555_v47 = vstv %s4432_s18  ;;  %v4529_v12 = vld [vmem:[#allocation8 + $0x4e] sm:$0xff]  ;;  %s4655_s16 = sld [smem:[#allocation2 + $0xce]] }
 0x108   :  { %5761 = vst [vmem:[#allocation37_spill] sm:$0xff] %v4518_v62  ;;  %v1562_v24 = vstv %s4450_s19  ;;  %v1408_v42 = vadd.f32 %v4396_v35, %v1401_v2  ;;  %v1549_v56 = vmul.f32 %v1548_v8, %v4124_v45  ;;  %v1550_v13 = vmul.f32 %v1548_v8, %v4132_v63  ;;  %s4659_s17 = sld [smem:[#allocation2 + $0xcf]] }
 0x109   :  { %v1409_v5 = vadd.f32 %v4409_v36, %v1402_v23  ;;  %v1544_v59 = vadd.f32 %v1542_v40, %v1538_v49  ;;  %v1545_v3 = vadd.f32 %v1543_v51, %v1538_v49  ;;  %v1556_v55 = vmul.f32 %v1555_v47, %v4134_v41  ;;  %v4575_v40 = vld [vmem:[#allocation8 + $0x4f] sm:$0xff]  ;;  %s4663_s18 = sld [smem:[#allocation2 + $0xd0]] }
 0x10a   :  { %v1557_v50 = vmul.f32 %v1555_v47, %v4136_v52  ;;  %v1415_v62 = vadd.f32 %v4412_v0, %v1408_v42  ;;  %v4538_v35 = vmul.f32 %v1474_v46, %v4515_v1  ;;  %v1569_v36 = vstv %s4480_s26  ;;  %v4555_v47 = vld [vmem:[#allocation8 + $0x56] sm:$0xff]  ;;  %s4667_s19 = sld [smem:[#allocation2 + $0xd1]] }
 0x10b   :  { %v1416_v61 = vadd.f32 %v4415_v7, %v1409_v5  ;;  %v1551_v45 = vadd.f32 %v1549_v56, %v1544_v59  ;;  %v1552_v49 = vadd.f32 %v1550_v13, %v1545_v3  ;;  %v1563_v63 = vmul.f32 %v1562_v24, %v4146_v54  ;;  %s4673_s26 = sld [smem:[#allocation2 + $0xd2]] }
 0x10c   :  { %v1564_v41 = vmul.f32 %v1562_v24, %v4148_v37  ;;  %v1422_v52 = vadd.f32 %v4418_v33, %v1415_v62  ;;  %v4552_v46 = vmul.f32 %v1481_v48, %v4529_v12  ;;  %v1576_v0 = vstv %s4501_s20  ;;  %s4677_s20 = sld [smem:[#allocation2 + $0xd3]] }
 0x10d   :  { %v1423_v7 = vadd.f32 %v4423_v22, %v1416_v61  ;;  %v1558_v2 = vadd.f32 %v1556_v55, %v1551_v45  ;;  %v1559_v13 = vadd.f32 %v1557_v50, %v1552_v49  ;;  %v1570_v54 = vmul.f32 %v1569_v36, %v4158_v11 }
 0x10e   :  { %v1571_v37 = vmul.f32 %v1569_v36, %v4160_v58  ;;  %v1429_v24 = vadd.f32 %v4435_v29, %v1422_v52  ;;  %v1577_v61 = vmul.f32 %v1576_v0, %v4170_v21  ;;  %v1583_v33 = vstv %s4511_s21  ;;  %s4683_s21 = sld [smem:[#allocation2 + $0xd4]] }
 0x10f   :  { %v1430_v62 = vadd.f32 %v4438_v10, %v1423_v7  ;;  %v1565_v22 = vadd.f32 %v1563_v63, %v1558_v2  ;;  %v1566_v23 = vadd.f32 %v1564_v41, %v1559_v13  ;;  %v1578_v50 = vmul.f32 %v1576_v0, %v4172_v16 }
 0x110   :  { %v1590_v55 = vstv %s4520_s22  ;;  %v1435_v11 = vadd.f32 %v4441_v39, %v1429_v24  ;;  %v4572_v29 = vmul.f32 %v1481_v48, %v4555_v47  ;;  %v1488_v10 = vstv %s4525_s23  ;;  %s4691_s22 = sld [smem:[#allocation7 + $0x6]] }
 0x111   :  { %v1436_v58 = vadd.f32 %v4461_v4, %v1430_v62  ;;  %v1572_v21 = vadd.f32 %v1570_v54, %v1565_v22  ;;  %v1573_v51 = vadd.f32 %v1571_v37, %v1566_v23  ;;  %v1584_v8 = vmul.f32 %v1583_v33, %v4184_v31  ;;  %v5762_v23 = vld [vmem:[#allocation46_spill] sm:$0xff]  ;;  %s4707_s23 = sld [smem:[#allocation2 + $0xd8]] }
 0x112   :  { %v1585_v42 = vmul.f32 %v1583_v33, %v4186_v25  ;;  %v1442_v16 = vadd.f32 %v4464_v28, %v1435_v11  ;;  %v1591_v4 = vmul.f32 %v1590_v55, %v4196_v43  ;;  %v1596_v48 = vstv %s4540_s24  ;;  %v4595_v43 = vld [vmem:[#allocation8 + $0x57] sm:$0xff]  ;;  %s4713_s24 = sld [smem:[#allocation2 + $0xd9]] }
 0x113   :  { %v1443_v39 = vadd.f32 %v4467_v20, %v1436_v58  ;;  %v1579_v5 = vadd.f32 %v1577_v61, %v1572_v21  ;;  %v1580_v59 = vadd.f32 %v1578_v50, %v1573_v51  ;;  %v1592_v3 = vmul.f32 %v1590_v55, %v4198_v18  ;;  %v5763_v55 = vld [vmem:[#allocation37_spill] sm:$0xff]  ;;  %v5765_v51 = vld [vmem:[#allocation48_spill] sm:$0xff] }
 0x114   :  { %v1603_v56 = vstv %s4543_s25  ;;  %v1449_v31 = vadd.f32 %v4473_v17, %v1442_v16  ;;  %v1489_v28 = vmul.f32 %v1488_v10, %v4575_v40  ;;  %v1494_v20 = vstv %s4547_s27  ;;  %s4725_s25 = sld [smem:[#allocation2 + $0xda]] }
 0x115   :  { %v1450_v25 = vadd.f32 %v4476_v6, %v1443_v39  ;;  %v1586_v36 = vadd.f32 %v1584_v8, %v1579_v5  ;;  %v1587_v45 = vadd.f32 %v1585_v42, %v1580_v59  ;;  %v1597_v49 = vmul.f32 %v1596_v48, %v4122_v32  ;;  %v5767_v59 = vld [vmem:[#allocation50_spill] sm:$0xff]  ;;  %s4731_s27 = sld [smem:[#allocation2 + $0xdb]] }
 0x116   :  { %v1598_v18 = vmul.f32 %v1596_v48, %v4210_v57  ;;  %v1456_v63 = vadd.f32 %v4483_v27, %v1449_v31  ;;  %v1604_v6 = vmul.f32 %v1603_v56, %v4222_v26  ;;  %v1610_v41 = vstv %s4561_s28  ;;  %v4615_v26 = vld [vmem:[#allocation8 + $0x58] sm:$0xff]  ;;  %s4745_s28 = sld [smem:[#allocation2 + $0xdc]] }
 0x117   :  { %v1457_v17 = vadd.f32 %v4486_v9, %v1450_v25  ;;  %v1593_v52 = vadd.f32 %v1591_v4, %v1586_v36  ;;  %v1594_v7 = vadd.f32 %v1592_v3, %v1587_v45  ;;  %v1605_v0 = vmul.f32 %v1603_v56, %v4224_v30  ;;  %v5768_v56 = vld [vmem:[#allocation51_spill] sm:$0xff] }
 0x118   :  { %v1617_v2 = vstv %s4565_s29  ;;  %v1463_v32 = vadd.f32 %v4489_v34, %v1456_v63  ;;  %v1490_v27 = vmul.f32 %v1488_v10, %v4595_v43  ;;  %v1495_v9 = vmul.f32 %v1494_v20, %v4429_v38  ;;  %v5764_v10 = vld [vmem:[#allocation47_spill] sm:$0xff]  ;;  %s4759_s29 = sld [smem:[#allocation2 + $0xdd]] }
 0x119   :  { %v1464_v57 = vadd.f32 %v4492_v53, %v1457_v17  ;;  %v1599_v13 = vadd.f32 %v1597_v49, %v1593_v52  ;;  %v1600_v54 = vadd.f32 %v1598_v18, %v1594_v7  ;;  %v1611_v37 = vmul.f32 %v1610_v41, %v4240_v60  ;;  %v5770_v18 = vld [vmem:[#allocation56_spill] sm:$0xff] }
 0x11a   :  { %v1612_v34 = vmul.f32 %v1610_v41, %v4242_v44  ;;  %v1470_v53 = vadd.f32 %v4496_v15, %v1463_v32  ;;  %v1618_v62 = vmul.f32 %v1617_v2, %v4254_v19  ;;  %v1624_v61 = vstv %s4581_s30  ;;  %v5772_v32 = vld [vmem:[#allocation58_spill] sm:$0xff]  ;;  %s4763_s30 = sld [smem:[#allocation2 + $0xd5]] }
 0x11b   :  { %v1471_v24 = vadd.f32 %v4504_v14, %v1464_v57  ;;  %v1606_v33 = vadd.f32 %v1604_v6, %v1599_v13  ;;  %v1607_v22 = vadd.f32 %v1605_v0, %v1600_v54  ;;  %v1619_v50 = vmul.f32 %v1617_v2, %v5762_v23  ;;  %v5776_v23 = vld [vmem:[#allocation15_spill] sm:$0xff] }
 0x11c   :  { %v1631_v60 = vstv %s4585_s4  ;;  %v1477_v11 = vadd.f32 %v5763_v55, %v1470_v53  ;;  %v1496_v15 = vmul.f32 %v1494_v20, %v4615_v26  ;;  %v1638_v14 = vstv %s4593_s5  ;;  %s4787_s4 = sld [smem:[#allocation2 + $0xde]] }
 0x11d   :  { %v1478_v44 = vadd.f32 %v4538_v35, %v1471_v24  ;;  %v1613_v19 = vadd.f32 %v1611_v37, %v1606_v33  ;;  %v1614_v58 = vadd.f32 %v1612_v34, %v1607_v22  ;;  %v1625_v21 = vmul.f32 %v1624_v61, %v5764_v10  ;;  %v5766_v35 = vld [vmem:[#allocation49_spill] sm:$0xff]  ;;  %s4795_s5 = sld [smem:[#allocation2 + $0xdf]] }
 0x11e   :  { %v1626_v8 = vmul.f32 %v1624_v61, %v5765_v51  ;;  %v1484_v42 = vadd.f32 %v4552_v46, %v1477_v11  ;;  %v1632_v39 = vmul.f32 %v1631_v60, %v5766_v35  ;;  %v1645_v4 = vstv %s4601_s2  ;;  %v5769_v46 = vld [vmem:[#allocation55_spill] sm:$0xff]  ;;  %v5774_v37 = vld [vmem:[#allocation61_spill] sm:$0xff]  ;;  %v5775_v61 = vld [vmem:[#allocation14_spill] sm:$0xff]  ;;  %s4805_s2 = sld [smem:[#allocation2 + $0xd6]] }
 0x11f   :  { %v1485_v16 = vadd.f32 %v4572_v29, %v1478_v44  ;;  %v1620_v48 = vadd.f32 %v1618_v62, %v1613_v19  ;;  %v1621_v5 = vadd.f32 %v1619_v50, %v1614_v58  ;;  %v1633_v3 = vmul.f32 %v1631_v60, %v5767_v59  ;;  %v5777_v60 = vld [vmem:[#allocation52_spill] sm:$0xff]  ;;  %v5778_v11 = vld [vmem:[#allocation53_spill] sm:$0xff] }
 0x120   :  { %v1639_v31 = vmul.f32 %v1638_v14, %v5768_v56  ;;  %v1491_v25 = vadd.f32 %v1489_v28, %v1484_v42  ;;  %v1640_v29 = vmul.f32 %v1638_v14, %v5769_v46  ;;  %v1652_v36 = vstv %s4605_s7  ;;  %v5771_v28 = vld [vmem:[#allocation57_spill] sm:$0xff]  ;;  %v5779_v19 = vld [vmem:[#allocation16_spill] sm:$0xff]  ;;  %v5786_v46 = vld [vmem:[#allocation22_spill] sm:$0xff]  ;;  %s4811_s7 = sld [smem:[#allocation2 + $0xe0]] }
 0x121   :  { %v1492_v20 = vadd.f32 %v1490_v27, %v1485_v16  ;;  %v1627_v45 = vadd.f32 %v1625_v21, %v1620_v48  ;;  %v1628_v49 = vadd.f32 %v1626_v8, %v1621_v5  ;;  %v1646_v63 = vmul.f32 %v1645_v4, %v5770_v18  ;;  %v5780_v21 = vld [vmem:[#allocation17_spill] sm:$0xff]  ;;  %v5781_v8 = vld [vmem:[#allocation18_spill] sm:$0xff]  ;;  %v5783_v5 = vld [vmem:[#allocation19_spill] sm:$0xff] }
 0x122   :  { %v1658_v17 = vstv %s4613_s8  ;;  %v1497_v6 = vadd.f32 %v1495_v9, %v1491_v25  ;;  %v1647_v52 = vmul.f32 %v1645_v4, %v5771_v28  ;;  %v1665_v7 = vstv %s4617_s9  ;;  %v5773_v9 = vld [vmem:[#allocation59_spill] sm:$0xff]  ;;  %v5782_v16 = vld [vmem:[#allocation54_spill] sm:$0xff]  ;;  %v5784_v56 = vld [vmem:[#allocation20_spill] sm:$0xff]  ;;  %s4815_s8 = sld [smem:[#allocation2 + $0xd7]] }
 0x123   :  { %v1498_v41 = vadd.f32 %v1496_v15, %v1492_v20  ;;  %v1634_v0 = vadd.f32 %v1632_v39, %v1627_v45  ;;  %v1635_v2 = vadd.f32 %v1633_v3, %v1628_v49  ;;  %v1653_v57 = vmul.f32 %v1652_v36, %v5772_v32  ;;  %v5785_v25 = vld [vmem:[#allocation21_spill] sm:$0xff]  ;;  %v5787_v18 = vld [vmem:[#allocation23_spill] sm:$0xff]  ;;  %v5789_v28 = vld [vmem:[#allocation24_spill] sm:$0xff]  ;;  %s4825_s9 = sld [smem:[#allocation2 + $0xe1]] }
 0x124   :  { %v1672_v27 = vstv %s4623_s6  ;;  %1500 = vst [vmem:[#allocation9 + $0x40] sm:$0xff] %v1497_v6  ;;  %v1654_v13 = vmul.f32 %v1652_v36, %v5773_v9  ;;  %v1659_v54 = vmul.f32 %v1658_v17, %v4224_v30  ;;  %v1660_v34 = vmul.f32 %v1658_v17, %v5774_v37  ;;  %v5788_v6 = vld [vmem:[#allocation60_spill] sm:$0xff]  ;;  %v5792_v37 = vld [vmem:[#allocation27_spill] sm:$0xff]  ;;  %s4839_s6 = sld [smem:[#allocation2 + $0xe2]] }
 0x125   :  { %1501 = vst [vmem:[#allocation9 + $0x48] sm:$0xff] %v1498_v41  ;;  %v1679_v53 = vstv %s4627_s10  ;;  %v1641_v24 = vadd.f32 %v1639_v31, %v1634_v0  ;;  %v1642_v62 = vadd.f32 %v1640_v29, %v1635_v2  ;;  %v1666_v33 = vmul.f32 %v1665_v7, %v5775_v61  ;;  %s4851_s10 = sld [smem:[#allocation2 + $0xe3]] }
 0x126   :  { %v1686_v22 = vstv %s4634_s11  ;;  %v1667_v50 = vmul.f32 %v1665_v7, %v5776_v23  ;;  %v1673_v55 = vmul.f32 %v1672_v27, %v5777_v60  ;;  %v1674_v30 = vmul.f32 %v1672_v27, %v5778_v11  ;;  %v5790_v7 = vld [vmem:[#allocation25_spill] sm:$0xff]  ;;  %s4863_s11 = sld [smem:[#allocation2 + $0xe4]] }
 0x127   :  { %v1693_v44 = vstv %s4637_s12  ;;  %v1648_v15 = vadd.f32 %v1646_v63, %v1641_v24  ;;  %v1649_v14 = vadd.f32 %v1647_v52, %v1642_v62  ;;  %v1680_v58 = vmul.f32 %v1679_v53, %v5779_v19  ;;  %v5794_v60 = vld [vmem:[#allocation29_spill] sm:$0xff]  ;;  %s4873_s12 = sld [smem:[#allocation2 + $0xe5]] }
 0x128   :  { %v1700_v10 = vstv %s4643_s13  ;;  %v1681_v51 = vmul.f32 %v1679_v53, %v5780_v21  ;;  %v1687_v42 = vmul.f32 %v1686_v22, %v5781_v8  ;;  %v1688_v35 = vmul.f32 %v1686_v22, %v5782_v16  ;;  %v5797_v21 = vld [vmem:[#allocation32_spill] sm:$0xff]  ;;  %v5798_v16 = vld [vmem:[#allocation33_spill] sm:$0xff]  ;;  %s4885_s13 = sld [smem:[#allocation2 + $0xe6]] }
 0x129   :  { %v1707_v39 = vstv %s4647_s14  ;;  %v1655_v4 = vadd.f32 %v1653_v57, %v1648_v15  ;;  %v1656_v48 = vadd.f32 %v1654_v13, %v1649_v14  ;;  %v4694_v59 = vmul.f32 %v1693_v44, %v5783_v5  ;;  %v5791_v13 = vld [vmem:[#allocation26_spill] sm:$0xff]  ;;  %v5796_v14 = vld [vmem:[#allocation31_spill] sm:$0xff]  ;;  %s4891_s14 = sld [smem:[#allocation7 + $0x7]] }
 0x12a   :  { %v1714_v3 = vstv %s4651_s15  ;;  %v4698_v31 = vmul.f32 %v1693_v44, %v5784_v56  ;;  %v4701_v20 = vmul.f32 %v1700_v10, %v5785_v25  ;;  %v4704_v29 = vmul.f32 %v1700_v10, %v5786_v46  ;;  %v5795_v44 = vld [vmem:[#allocation30_spill] sm:$0xff]  ;;  %v4775_v5 = vld [vmem:[#allocation8 + $0x9] sm:$0xff]  ;;  %s4899_s15 = sld [smem:[#allocation2 + $0xe7]] }
 0x12b   :  { %v1720_v36 = vstv %s4655_s16  ;;  %v1661_v45 = vadd.f32 %v1659_v54, %v1655_v4  ;;  %v1662_v49 = vadd.f32 %v1660_v34, %v1656_v48  ;;  %v4710_v63 = vmul.f32 %v1707_v39, %v5787_v18  ;;  %v4771_v4 = vld [vmem:[#allocation8 + $0x8] sm:$0xff]  ;;  %s4908_s16 = sld [smem:[#allocation2 + $0xe8]] }
 0x12c   :  { %v1727_v17 = vstv %s4659_s17  ;;  %v4716_v41 = vmul.f32 %v1707_v39, %v5788_v6  ;;  %v4719_v52 = vmul.f32 %v1714_v3, %v5789_v28  ;;  %v4722_v0 = vmul.f32 %v1714_v3, %v5790_v7  ;;  %v4773_v48 = vld [vmem:[#allocation8 + $0x1] sm:$0xff]  ;;  %v4793_v28 = vld [vmem:[#allocation8 + $0xa] sm:$0xff]  ;;  %s4913_s17 = sld [smem:[#allocation2 + $0xe9]] }
 0x12d   :  { %v1734_v2 = vstv %s4663_s18  ;;  %v1668_v32 = vadd.f32 %v1666_v33, %v1661_v45  ;;  %v1669_v57 = vadd.f32 %v1667_v50, %v1662_v49  ;;  %v4728_v27 = vmul.f32 %v1720_v36, %v5776_v23  ;;  %v5793_v23 = vld [vmem:[#allocation28_spill] sm:$0xff]  ;;  %v5799_v3 = vld [vmem:[#allocation34_spill] sm:$0xff]  ;;  %v5800_v25 = vld [vmem:[#allocation35_spill] sm:$0xff]  ;;  %s4922_s18 = sld [smem:[#allocation2 + $0xea]] }
 0x12e   :  { %v1741_v9 = vstv %s4667_s19  ;;  %v4734_v54 = vmul.f32 %v1720_v36, %v5791_v13  ;;  %v4737_v34 = vmul.f32 %v1727_v17, %v5792_v37  ;;  %v4740_v53 = vmul.f32 %v1727_v17, %v4429_v38  ;;  %v4791_v6 = vld [vmem:[#allocation8 + $0x2] sm:$0xff]  ;;  %s4927_s19 = sld [smem:[#allocation2 + $0xeb]] }
 0x12f   :  { %v1748_v24 = vstv %s4673_s26  ;;  %v1675_v62 = vadd.f32 %v1673_v55, %v1668_v32  ;;  %v1676_v61 = vadd.f32 %v1674_v30, %v1669_v57  ;;  %v1755_v33 = vstv %s4677_s20  ;;  %v4761_v55 = vld [vmem:[#allocation8] sm:$0xff]  ;;  %v4803_v57 = vld [vmem:[#allocation8 + $0xb] sm:$0xff]  ;;  %s4938_s26 = sld [smem:[#allocation2 + $0xec]] }
 0x130   :  { %v1762_v22 = vstv %s4683_s21  ;;  %v4748_v50 = vmul.f32 %v1734_v2, %v5793_v23  ;;  %v4751_v11 = vmul.f32 %v1734_v2, %v5794_v60  ;;  %v4754_v15 = vmul.f32 %v1741_v9, %v5795_v44  ;;  %s4943_s20 = sld [smem:[#allocation2 + $0xed]] }
 0x131   :  { %v4757_v19 = vmul.f32 %v1741_v9, %v5796_v14  ;;  %v1682_v30 = vadd.f32 %v1680_v58, %v1675_v62  ;;  %v1683_v10 = vadd.f32 %v1681_v51, %v1676_v61  ;;  %v4766_v8 = vmul.f32 %v1748_v24, %v5797_v21  ;;  %v5801_v58 = vld [vmem:[#allocation36_spill] sm:$0xff]  ;;  %v4821_v14 = vld [vmem:[#allocation8 + $0x4] sm:$0xff]  ;;  %s4954_s21 = sld [smem:[#allocation2 + $0xee]] }
 0x132   :  { %v4769_v39 = vmul.f32 %v1748_v24, %v5798_v16  ;;  %v4778_v56 = vmul.f32 %v1755_v33, %v5799_v3  ;;  %v4781_v46 = vmul.f32 %v1755_v33, %v5800_v25  ;;  %v4784_v51 = vmul.f32 %v1762_v22, %v5801_v58  ;;  %v4828_v3 = vld [vmem:[#allocation8 + $0x5] sm:$0xff] }
 0x133   :  { %v1826_v36 = vstv %s4691_s22  ;;  %v1689_v45 = vadd.f32 %v1687_v42, %v1682_v30  ;;  %v1690_v49 = vadd.f32 %v1688_v35, %v1683_v10  ;;  %v1829_v18 = vstv %s4707_s23  ;;  %v4801_v35 = vld [vmem:[#allocation8 + $0x3] sm:$0xff]  ;;  %v4823_v30 = vld [vmem:[#allocation8 + $0xc] sm:$0xff]  ;;  %s4957_s22 = sld [smem:[#allocation2 + $0xef]] }
 0x134   :  { %v1836_v17 = vstv %s4713_s24  ;;  %v1830_v7 = vmul.f32 %v1829_v18, %v4761_v55  ;;  %v1831_v2 = vmul.f32 %v1829_v18, %v4771_v4  ;;  %v1843_v37 = vstv %s4725_s25  ;;  %s4965_s23 = sld [smem:[#allocation2 + $0xf0]] }
 0x135   :  { %v1837_v32 = vmul.f32 %v1836_v17, %v4773_v48  ;;  %v1838_v42 = vmul.f32 %v1836_v17, %v4775_v5  ;;  %v1696_v9 = vadd.f32 %v4694_v59, %v1689_v45  ;;  %v1697_v13 = vadd.f32 %v4698_v31, %v1690_v49  ;;  %v4837_v45 = vld [vmem:[#allocation8 + $0xd] sm:$0xff]  ;;  %s4969_s24 = sld [smem:[#allocation2 + $0xf1]] }
 0x136   :  { %v1850_v24 = vstv %s4731_s27  ;;  %v1832_v62 = vadd.f32 %v1830_v7, %v1826_v36  ;;  %v1833_v61 = vadd.f32 %v1831_v2, %v1826_v36  ;;  %v1844_v33 = vmul.f32 %v1843_v37, %v4791_v6  ;;  %v4843_v2 = vld [vmem:[#allocation8 + $0x6] sm:$0xff]  ;;  %s4979_s25 = sld [smem:[#allocation2 + $0xf2]] }
 0x137   :  { %v1845_v23 = vmul.f32 %v1843_v37, %v4793_v28  ;;  %v1703_v60 = vadd.f32 %v4701_v20, %v1696_v9  ;;  %v1704_v59 = vadd.f32 %v4704_v29, %v1697_v13  ;;  %v1851_v31 = vmul.f32 %v1850_v24, %v4801_v35  ;;  %v4854_v37 = vld [vmem:[#allocation8 + $0x7] sm:$0xff]  ;;  %s4985_s27 = sld [smem:[#allocation2 + $0xf3]] }
 0x138   :  { %v1852_v44 = vmul.f32 %v1850_v24, %v4803_v57  ;;  %v1839_v10 = vadd.f32 %v1837_v32, %v1832_v62  ;;  %v1840_v21 = vadd.f32 %v1838_v42, %v1833_v61  ;;  %v1857_v16 = vstv %s4745_s28  ;;  %s4995_s28 = sld [smem:[#allocation2 + $0xf4]] }
 0x139   :  { %v1864_v25 = vstv %s4759_s29  ;;  %v1710_v20 = vadd.f32 %v4710_v63, %v1703_v60  ;;  %v1711_v29 = vadd.f32 %v4716_v41, %v1704_v59  ;;  %v4834_v58 = vmul.f32 %v1762_v22, %v4515_v1  ;;  %v4848_v22 = vld [vmem:[#allocation8 + $0xe] sm:$0xff]  ;;  %s5003_s29 = sld [smem:[#allocation2 + $0xf5]] }
 0x13a   :  { %v1769_v36 = vstv %s4763_s30  ;;  %v1846_v49 = vadd.f32 %v1844_v33, %v1839_v10  ;;  %v1847_v18 = vadd.f32 %v1845_v23, %v1840_v21  ;;  %v1858_v17 = vmul.f32 %v1857_v16, %v4821_v14  ;;  %v4861_v33 = vld [vmem:[#allocation8 + $0xf] sm:$0xff]  ;;  %s5013_s30 = sld [smem:[#allocation2 + $0xf6]] }
 0x13b   :  { %v1859_v7 = vmul.f32 %v1857_v16, %v4823_v30  ;;  %v1717_v63 = vadd.f32 %v4719_v52, %v1710_v20  ;;  %v1718_v1 = vadd.f32 %v4722_v0, %v1711_v29  ;;  %v1865_v41 = vmul.f32 %v1864_v25, %v4828_v3  ;;  %v4871_v21 = vld [vmem:[#allocation8 + $0x10] sm:$0xff]  ;;  %v4876_v29 = vld [vmem:[#allocation8 + $0x18] sm:$0xff] }
 0x13c   :  { %v1871_v32 = vstv %s4787_s4  ;;  %v1853_v42 = vadd.f32 %v1851_v31, %v1846_v49  ;;  %v1854_v9 = vadd.f32 %v1852_v44, %v1847_v18  ;;  %v1866_v13 = vmul.f32 %v1864_v25, %v4837_v45  ;;  %s5021_s4 = sld [smem:[#allocation2 + $0xf7]] }
 0x13d   :  { %v1878_v24 = vstv %s4795_s5  ;;  %v1723_v52 = vadd.f32 %v4728_v27, %v1717_v63  ;;  %v1724_v0 = vadd.f32 %v4734_v54, %v1718_v1  ;;  %v1776_v62 = vstv %s4805_s2  ;;  %s5031_s5 = sld [smem:[#allocation2 + $0xf8]] }
 0x13e   :  { %v1872_v61 = vmul.f32 %v1871_v32, %v4843_v2  ;;  %v1860_v23 = vadd.f32 %v1858_v17, %v1853_v42  ;;  %v1861_v60 = vadd.f32 %v1859_v7, %v1854_v9  ;;  %v1873_v59 = vmul.f32 %v1871_v32, %v4848_v22  ;;  %v4883_v7 = vld [vmem:[#allocation8 + $0x20] sm:$0xff]  ;;  %s5043_s2 = sld [smem:[#allocation2 + $0xf9]] }
 0x13f   :  { %v1884_v31 = vstv %s4811_s7  ;;  %v1730_v44 = vadd.f32 %v4737_v34, %v1723_v52  ;;  %v1731_v10 = vadd.f32 %v4740_v53, %v1724_v0  ;;  %v1782_v27 = vstv %s4815_s8  ;;  %v4888_v32 = vld [vmem:[#allocation8 + $0x19] sm:$0xff]  ;;  %s5061_s7 = sld [smem:[#allocation2 + $0xfc]] }
 0x140   :  { %v1879_v54 = vmul.f32 %v1878_v24, %v4854_v37  ;;  %v1867_v16 = vadd.f32 %v1865_v41, %v1860_v23  ;;  %v1868_v25 = vadd.f32 %v1866_v13, %v1861_v60  ;;  %v1880_v20 = vmul.f32 %v1878_v24, %v4861_v33  ;;  %v4897_v13 = vld [vmem:[#allocation8 + $0x21] sm:$0xff]  ;;  %s5069_s8 = sld [smem:[#allocation2 + $0xfd]] }
 0x141   :  { %v1891_v49 = vstv %s4825_s9  ;;  %v1737_v18 = vadd.f32 %v4748_v50, %v1730_v44  ;;  %v1738_v34 = vadd.f32 %v4751_v11, %v1731_v10  ;;  %v1770_v53 = vmul.f32 %v1769_v36, %v4529_v12  ;;  %v4911_v60 = vld [vmem:[#allocation8 + $0x22] sm:$0xff]  ;;  %s5087_s9 = sld [smem:[#allocation2 + $0xfe]] }
 0x142   :  { %v1885_v17 = vmul.f32 %v1884_v31, %v4771_v4  ;;  %v1874_v63 = vadd.f32 %v1872_v61, %v1867_v16  ;;  %v1875_v1 = vadd.f32 %v1873_v59, %v1868_v25  ;;  %v1886_v41 = vmul.f32 %v1884_v31, %v4871_v21  ;;  %v4902_v61 = vld [vmem:[#allocation8 + $0x1a] sm:$0xff]  ;;  %v4925_v25 = vld [vmem:[#allocation8 + $0x23] sm:$0xff] }
 0x143   :  { %v1898_v42 = vstv %s4839_s6  ;;  %v1744_v50 = vadd.f32 %v4754_v15, %v1737_v18  ;;  %v1745_v12 = vadd.f32 %v4757_v19, %v1738_v34  ;;  %v1771_v11 = vmul.f32 %v1769_v36, %v4555_v47  ;;  %v4916_v10 = vld [vmem:[#allocation8 + $0x1b] sm:$0xff]  ;;  %s5111_s6 = sld [smem:[#allocation2 + $0xff]] }
 0x144   :  { %v1892_v9 = vmul.f32 %v1891_v49, %v4876_v29  ;;  %v1881_v24 = vadd.f32 %v1879_v54, %v1874_v63  ;;  %v1882_v52 = vadd.f32 %v1880_v20, %v1875_v1  ;;  %v1893_v0 = vmul.f32 %v1891_v49, %v4883_v7  ;;  %v4930_v34 = vld [vmem:[#allocation8 + $0x1c] sm:$0xff]  ;;  %v4941_v63 = vld [vmem:[#allocation8 + $0x24] sm:$0xff] }
 0x145   :  { %v1905_v23 = vstv %s4851_s10  ;;  %v1751_v15 = vadd.f32 %v4766_v8, %v1744_v50  ;;  %v1752_v19 = vadd.f32 %v4769_v39, %v1745_v12  ;;  %v1777_v47 = vmul.f32 %v1776_v62, %v4575_v40  ;;  %5802 = vst [vmem:[#allocation38_spill] sm:$0xff] %v4930_v34  ;;  %5803 = vst [vmem:[#allocation39_spill] sm:$0xff] %v4941_v63  ;;  %v4946_v50 = vld [vmem:[#allocation8 + $0x1d] sm:$0xff]  ;;  %s5121_s10 = sld [smem:[#allocation2 + $0x100]] }
 0x146   :  { %v1899_v36 = vmul.f32 %v1898_v42, %v4888_v32  ;;  %v1887_v59 = vadd.f32 %v1885_v17, %v1881_v24  ;;  %v1888_v31 = vadd.f32 %v1886_v41, %v1882_v52  ;;  %v1900_v44 = vmul.f32 %v1898_v42, %v4897_v13  ;;  %5804 = vst [vmem:[#allocation40_spill] sm:$0xff] %v4946_v50 }
 0x147   :  { %v1912_v8 = vstv %s4863_s11  ;;  %v1758_v39 = vadd.f32 %v4778_v56, %v1751_v15  ;;  %v1759_v40 = vadd.f32 %v4781_v46, %v1752_v19  ;;  %v1778_v54 = vmul.f32 %v1776_v62, %v4595_v43  ;;  %v4960_v15 = vld [vmem:[#allocation8 + $0x1e] sm:$0xff]  ;;  %v4962_v19 = vld [vmem:[#allocation8 + $0x26] sm:$0xff]  ;;  %s5149_s11 = sld [smem:[#allocation2 + $0x101]] }
 0x148   :  { %v1906_v16 = vmul.f32 %v1905_v23, %v4902_v61  ;;  %v1894_v20 = vadd.f32 %v1892_v9, %v1887_v59  ;;  %v1895_v49 = vadd.f32 %v1893_v0, %v1888_v31  ;;  %v1907_v18 = vmul.f32 %v1905_v23, %v4911_v60  ;;  %5806 = vst [vmem:[#allocation42_spill] sm:$0xff] %v4960_v15 }
 0x149   :  { %v1919_v56 = vstv %s4873_s12  ;;  %v1765_v46 = vadd.f32 %v4784_v51, %v1758_v39  ;;  %v1766_v43 = vadd.f32 %v4834_v58, %v1759_v40  ;;  %v1783_v62 = vmul.f32 %v1782_v27, %v4429_v38  ;;  %v4948_v51 = vld [vmem:[#allocation8 + $0x25] sm:$0xff]  ;;  %5807 = vst [vmem:[#allocation43_spill] sm:$0xff] %v4962_v19  ;;  %s5153_s12 = sld [smem:[#allocation2 + $0x102]] }
 0x14a   :  { %v1913_v17 = vmul.f32 %v1912_v8, %v4916_v10  ;;  %v1901_v1 = vadd.f32 %v1899_v36, %v1894_v20  ;;  %v1902_v41 = vadd.f32 %v1900_v44, %v1895_v49  ;;  %v1914_v42 = vmul.f32 %v1912_v8, %v4925_v25  ;;  %5805 = vst [vmem:[#allocation41_spill] sm:$0xff] %v4948_v51  ;;  %v4971_v44 = vld [vmem:[#allocation8 + $0x1f] sm:$0xff]  ;;  %v4973_v8 = vld [vmem:[#allocation8 + $0x27] sm:$0xff] }
 0x14b   :  { %v1926_v58 = vstv %s4885_s13  ;;  %v1772_v12 = vadd.f32 %v1770_v53, %v1765_v46  ;;  %v1773_v38 = vadd.f32 %v1771_v11, %v1766_v43  ;;  %v1784_v9 = vmul.f32 %v1782_v27, %v4615_v26  ;;  %5808 = vst [vmem:[#allocation44_spill] sm:$0xff] %v4971_v44  ;;  %5809 = vst [vmem:[#allocation45_spill] sm:$0xff] %v4973_v8  ;;  %v4976_v40 = vld [vmem:[#allocation8 + $0x28] sm:$0xff]  ;;  %v4987_v43 = vld [vmem:[#allocation8 + $0x38] sm:$0xff]  ;;  %s5161_s13 = sld [smem:[#allocation2 + $0x103]] }
 0x14c   :  { %v1920_v24 = vmul.f32 %v1919_v56, %v4930_v34  ;;  %v1908_v52 = vadd.f32 %v1906_v16, %v1901_v1  ;;  %v1909_v0 = vadd.f32 %v1907_v18, %v1902_v41  ;;  %v1921_v23 = vmul.f32 %v1919_v56, %v4941_v63  ;;  %5810 = vst [vmem:[#allocation46_spill] sm:$0xff] %v4976_v40  ;;  %v4983_v18 = vld [vmem:[#allocation8 + $0x30] sm:$0xff] }
 0x14d   :  { %v1933_v53 = vstv %s4899_s15  ;;  %v1779_v11 = vadd.f32 %v1777_v47, %v1772_v12  ;;  %v1780_v36 = vadd.f32 %v1778_v54, %v1773_v38  ;;  %v1927_v26 = vmul.f32 %v1926_v58, %v4946_v50  ;;  %5811 = vst [vmem:[#allocation37_spill] sm:$0xff] %v4983_v18  ;;  %5812 = vst [vmem:[#allocation47_spill] sm:$0xff] %v4987_v43  ;;  %v4990_v1 = vld [vmem:[#allocation8 + $0x31] sm:$0xff]  ;;  %s5175_s15 = sld [smem:[#allocation2 + $0xfa]] }
 0x14e   :  { %v1928_v27 = vmul.f32 %v1926_v58, %v4948_v51  ;;  %v1915_v59 = vadd.f32 %v1913_v17, %v1908_v52  ;;  %v1916_v31 = vadd.f32 %v1914_v42, %v1909_v0  ;;  %v1940_v39 = vstv %s4908_s16  ;;  %5813 = vst [vmem:[#allocation48_spill] sm:$0xff] %v4990_v1  ;;  %v5005_v0 = vld [vmem:[#allocation8 + $0x3a] sm:$0xff]  ;;  %s5186_s16 = sld [smem:[#allocation2 + $0x105]] }
 0x14f   :  { %v1946_v47 = vstv %s4913_s17  ;;  %v1785_v54 = vadd.f32 %v1783_v62, %v1779_v11  ;;  %v1786_v16 = vadd.f32 %v1784_v9, %v1780_v36  ;;  %v1934_v20 = vmul.f32 %v1933_v53, %v4960_v15  ;;  %v4992_v62 = vld [vmem:[#allocation8 + $0x39] sm:$0xff]  ;;  %5816 = vst [vmem:[#allocation51_spill] sm:$0xff] %v5005_v0  ;;  %s5189_s17 = sld [smem:[#allocation2 + $0xfb]] }
 0x150   :  { %v1935_v49 = vmul.f32 %v1933_v53, %v4962_v19  ;;  %v1922_v56 = vadd.f32 %v1920_v24, %v1915_v59  ;;  %v1923_v46 = vadd.f32 %v1921_v23, %v1916_v31  ;;  %v1953_v17 = vstv %s4922_s18  ;;  %5814 = vst [vmem:[#allocation49_spill] sm:$0xff] %v4992_v62  ;;  %v5001_v9 = vld [vmem:[#allocation8 + $0x32] sm:$0xff]  ;;  %v5010_v11 = vld [vmem:[#allocation8 + $0x3b] sm:$0xff]  ;;  %v5066_v19 = vld [vmem:[#allocation8 + $0x48] sm:$0xff]  ;;  %s5200_s18 = sld [smem:[#allocation2 + $0x106]] }
 0x151   :  { %v1960_v41 = vstv %s4927_s19  ;;  %1788 = vst [vmem:[#allocation9 + $0x50] sm:$0xff] %v1785_v54  ;;  %1789 = vst [vmem:[#allocation9 + $0x58] sm:$0xff] %v1786_v16  ;;  %v1941_v42 = vmul.f32 %v1940_v39, %v4971_v44  ;;  %v1942_v58 = vmul.f32 %v1940_v39, %v4973_v8  ;;  %v1947_v12 = vmul.f32 %v1946_v47, %v4883_v7  ;;  %v5008_v53 = vld [vmem:[#allocation8 + $0x33] sm:$0xff]  ;;  %v5023_v16 = vld [vmem:[#allocation8 + $0x3c] sm:$0xff]  ;;  %s5214_s19 = sld [smem:[#allocation2 + $0x107]] }
 0x152   :  { %v1948_v38 = vmul.f32 %v1946_v47, %v4976_v40  ;;  %5815 = vst [vmem:[#allocation50_spill] sm:$0xff] %v5001_v9  ;;  %v1929_v24 = vadd.f32 %v1927_v26, %v1922_v56  ;;  %v1930_v52 = vadd.f32 %v1928_v27, %v1923_v46  ;;  %v1967_v23 = vstv %s4938_s26  ;;  %5817 = vst [vmem:[#allocation55_spill] sm:$0xff] %v5008_v53  ;;  %v5019_v27 = vld [vmem:[#allocation8 + $0x34] sm:$0xff]  ;;  %v5045_v40 = vld [vmem:[#allocation8 + $0x3e] sm:$0xff]  ;;  %s5224_s26 = sld [smem:[#allocation2 + $0x108]] }
 0x153   :  { %5818 = vst [vmem:[#allocation56_spill] sm:$0xff] %v5010_v11  ;;  %v1974_v36 = vstv %s4943_s20  ;;  %v1954_v59 = vmul.f32 %v1953_v17, %v4983_v18  ;;  %v1955_v31 = vmul.f32 %v1953_v17, %v4987_v43  ;;  %v1961_v39 = vmul.f32 %v1960_v41, %v4990_v1  ;;  %5819 = vst [vmem:[#allocation57_spill] sm:$0xff] %v5019_v27  ;;  %v5026_v46 = vld [vmem:[#allocation8 + $0x35] sm:$0xff]  ;;  %v5028_v18 = vld [vmem:[#allocation8 + $0x3d] sm:$0xff]  ;;  %s5232_s20 = sld [smem:[#allocation2 + $0x109]] }
 0x154   :  { %v1962_v26 = vmul.f32 %v1960_v41, %v4992_v62  ;;  %v1936_v47 = vadd.f32 %v1934_v20, %v1929_v24  ;;  %v1937_v54 = vadd.f32 %v1935_v49, %v1930_v52  ;;  %5820 = vst [vmem:[#allocation58_spill] sm:$0xff] %v5023_v16  ;;  %v1981_v56 = vstv %s4954_s21  ;;  %5821 = vst [vmem:[#allocation59_spill] sm:$0xff] %v5026_v46  ;;  %v5041_v49 = vld [vmem:[#allocation8 + $0x36] sm:$0xff]  ;;  %s5242_s21 = sld [smem:[#allocation2 + $0x10a]] }
 0x155   :  { %5822 = vst [vmem:[#allocation61_spill] sm:$0xff] %v5028_v18  ;;  %v1988_v17 = vstv %s4957_s22  ;;  %v1968_v41 = vmul.f32 %v1967_v23, %v5001_v9  ;;  %v1969_v62 = vmul.f32 %v1967_v23, %v5005_v0  ;;  %v5036_v1 = vmul.f32 %v1974_v36, %v5008_v53  ;;  %5823 = vst [vmem:[#allocation14_spill] sm:$0xff] %v5041_v49  ;;  %v5048_v9 = vld [vmem:[#allocation8 + $0x37] sm:$0xff]  ;;  %v5050_v23 = vld [vmem:[#allocation8 + $0x3f] sm:$0xff]  ;;  %s5252_s22 = sld [smem:[#allocation2 + $0x10b]] }
 0x156   :  { %v5039_v20 = vmul.f32 %v1974_v36, %v5010_v11  ;;  %v1943_v24 = vadd.f32 %v1941_v42, %v1936_v47  ;;  %v1944_v52 = vadd.f32 %v1942_v58, %v1937_v54  ;;  %5824 = vst [vmem:[#allocation15_spill] sm:$0xff] %v5045_v40  ;;  %v1995_v8 = vstv %s4965_s23  ;;  %5825 = vst [vmem:[#allocation52_spill] sm:$0xff] %v5048_v9  ;;  %v5063_v47 = vld [vmem:[#allocation8 + $0x40] sm:$0xff]  ;;  %s5260_s23 = sld [smem:[#allocation2 + $0x10c]] }
 0x157   :  { %5826 = vst [vmem:[#allocation53_spill] sm:$0xff] %v5050_v23  ;;  %v2002_v53 = vstv %s4969_s24  ;;  %v1982_v0 = vmul.f32 %v1981_v56, %v5019_v27  ;;  %v1983_v36 = vmul.f32 %v1981_v56, %v5023_v16  ;;  %v5056_v11 = vmul.f32 %v1988_v17, %v5026_v46  ;;  %5827 = vst [vmem:[#allocation16_spill] sm:$0xff] %v5063_v47  ;;  %s5270_s24 = sld [smem:[#allocation2 + $0x10d]] }
 0x158   :  { %v5059_v44 = vmul.f32 %v1988_v17, %v5028_v18  ;;  %v1949_v42 = vadd.f32 %v1947_v12, %v1943_v24  ;;  %v1950_v58 = vadd.f32 %v1948_v38, %v1944_v52  ;;  %v2008_v54 = vstv %s4979_s25  ;;  %5828 = vst [vmem:[#allocation17_spill] sm:$0xff] %v5066_v19  ;;  %v5083_v38 = vld [vmem:[#allocation8 + $0x50] sm:$0xff]  ;;  %s5277_s25 = sld [smem:[#allocation2 + $0x10e]] }
 0x159   :  { %v2015_v27 = vstv %s4985_s27  ;;  %v5072_v56 = vmul.f32 %v1995_v8, %v5041_v49  ;;  %v5075_v17 = vmul.f32 %v1995_v8, %v5045_v40  ;;  %v5078_v18 = vmul.f32 %v2002_v53, %v5048_v9  ;;  %v5085_v24 = vld [vmem:[#allocation8 + $0x49] sm:$0xff]  ;;  %v5089_v49 = vld [vmem:[#allocation8 + $0x51] sm:$0xff]  ;;  %s5282_s27 = sld [smem:[#allocation2 + $0x10f]] }
 0x15a   :  { %v5081_v12 = vmul.f32 %v2002_v53, %v5050_v23  ;;  %5829 = vst [vmem:[#allocation18_spill] sm:$0xff] %v5085_v24  ;;  %v1956_v52 = vadd.f32 %v1954_v59, %v1949_v42  ;;  %v1957_v46 = vadd.f32 %v1955_v31, %v1950_v58  ;;  %5830 = vst [vmem:[#allocation54_spill] sm:$0xff] %v5089_v49  ;;  %v2022_v16 = vstv %s4995_s28  ;;  %v5092_v8 = vld [vmem:[#allocation8 + $0x4a] sm:$0xff]  ;;  %v5094_v9 = vld [vmem:[#allocation8 + $0x52] sm:$0xff]  ;;  %s5287_s28 = sld [smem:[#allocation2 + $0x110]] }
 0x15b   :  { %5831 = vst [vmem:[#allocation19_spill] sm:$0xff] %v5092_v8  ;;  %5832 = vst [vmem:[#allocation20_spill] sm:$0xff] %v5094_v9  ;;  %v2029_v40 = vstv %s5003_s29  ;;  %v5098_v53 = vmul.f32 %v2008_v54, %v4987_v43  ;;  %v5101_v23 = vmul.f32 %v2008_v54, %v5063_v47  ;;  %v5104_v15 = vmul.f32 %v2015_v27, %v5066_v19  ;;  %v5106_v59 = vld [vmem:[#allocation8 + $0x4b] sm:$0xff]  ;;  %v5108_v31 = vld [vmem:[#allocation8 + $0x53] sm:$0xff]  ;;  %s5292_s29 = sld [smem:[#allocation2 + $0x111]] }
 0x15c   :  { %5833 = vst [vmem:[#allocation21_spill] sm:$0xff] %v5106_v59  ;;  %5834 = vst [vmem:[#allocation22_spill] sm:$0xff] %v5108_v31  ;;  %v2036_v42 = vstv %s5013_s30  ;;  %v1963_v58 = vadd.f32 %v1961_v39, %v1956_v52  ;;  %v1964_v51 = vadd.f32 %v1962_v26, %v1957_v46  ;;  %v5114_v50 = vmul.f32 %v2015_v27, %v5083_v38  ;;  %v5116_v43 = vld [vmem:[#allocation8 + $0x4c] sm:$0xff]  ;;  %v5118_v54 = vld [vmem:[#allocation8 + $0x54] sm:$0xff]  ;;  %s5297_s30 = sld [smem:[#allocation2 + $0x112]] }
 0x15d   :  { %5835 = vst [vmem:[#allocation23_spill] sm:$0xff] %v5116_v43  ;;  %5836 = vst [vmem:[#allocation60_spill] sm:$0xff] %v5118_v54  ;;  %v2043_v19 = vstv %s5021_s4  ;;  %v5124_v47 = vmul.f32 %v2022_v16, %v5085_v24  ;;  %v5127_v63 = vmul.f32 %v2022_v16, %v5089_v49  ;;  %v5130_v39 = vmul.f32 %v2029_v40, %v5092_v8  ;;  %s5302_s4 = sld [smem:[#allocation2 + $0x113]] }
 0x15e   :  { %v5133_v26 = vmul.f32 %v2029_v40, %v5094_v9  ;;  %v1970_v27 = vadd.f32 %v1968_v41, %v1963_v58  ;;  %v1971_v46 = vadd.f32 %v1969_v62, %v1964_v51  ;;  %v5136_v52 = vmul.f32 %v2036_v42, %v5106_v59 }
 0x15f   :  { %v5139_v24 = vmul.f32 %v2036_v42, %v5108_v31  ;;  %v5142_v16 = vmul.f32 %v2043_v19, %v5116_v43  ;;  %v5145_v49 = vmul.f32 %v2043_v19, %v5118_v54  ;;  %v2050_v8 = vstv %s5031_s5  ;;  %s5307_s5 = sld [smem:[#allocation2 + $0x114]] }
 0x160   :  { %v1977_v40 = vadd.f32 %v5036_v1, %v1970_v27  ;;  %v1978_v51 = vadd.f32 %v5039_v20, %v1971_v46  ;;  %v2114_v62 = vstv %s4891_s14  ;;  %v2117_v41 = vstv %s5061_s7  ;;  %v5165_v27 = vld [vmem:[#allocation8 + $0x4d] sm:$0xff]  ;;  %s5171_s14 = sld [smem:[#allocation2 + $0x104]] }
 0x161   :  { %v2118_v42 = vmul.f32 %v2117_v41, %v4761_v55  ;;  %v2119_v58 = vmul.f32 %v2117_v41, %v4771_v4  ;;  %v2124_v43 = vstv %s5069_s8  ;;  %v2131_v19 = vstv %s5087_s9  ;;  %s5317_s7 = sld [smem:[#allocation2 + $0x116]] }
 0x162   :  { %v1984_v54 = vadd.f32 %v1982_v0, %v1977_v40  ;;  %v1985_v34 = vadd.f32 %v1983_v36, %v1978_v51  ;;  %v2125_v1 = vmul.f32 %v2124_v43, %v4773_v48  ;;  %v2126_v20 = vmul.f32 %v2124_v43, %v4775_v5  ;;  %v5177_v48 = vld [vmem:[#allocation8 + $0x55] sm:$0xff]  ;;  %s5322_s8 = sld [smem:[#allocation2 + $0x117]] }
 0x163   :  { %v2120_v46 = vadd.f32 %v2118_v42, %v2114_v62  ;;  %v2121_v31 = vadd.f32 %v2119_v58, %v2114_v62  ;;  %v2132_v55 = vmul.f32 %v2131_v19, %v4791_v6  ;;  %v2133_v41 = vmul.f32 %v2131_v19, %v4793_v28  ;;  %v5203_v51 = vld [vmem:[#allocation8 + $0x56] sm:$0xff]  ;;  %s5327_s9 = sld [smem:[#allocation2 + $0x118]] }
 0x164   :  { %v1991_v59 = vadd.f32 %v5056_v11, %v1984_v54  ;;  %v1992_v9 = vadd.f32 %v5059_v44, %v1985_v34  ;;  %v2138_v0 = vstv %s5111_s6  ;;  %v2145_v36 = vstv %s5121_s10  ;;  %v5191_v54 = vld [vmem:[#allocation8 + $0x4e] sm:$0xff]  ;;  %s5332_s6 = sld [smem:[#allocation2 + $0x119]] }
 0x165   :  { %v2127_v5 = vadd.f32 %v2125_v1, %v2120_v46  ;;  %v2128_v43 = vadd.f32 %v2126_v20, %v2121_v31  ;;  %v2139_v40 = vmul.f32 %v2138_v0, %v4801_v35  ;;  %v2140_v6 = vmul.f32 %v2138_v0, %v4803_v57  ;;  %s5337_s10 = sld [smem:[#allocation2 + $0x11a]] }
 0x166   :  { %v1998_v28 = vadd.f32 %v5072_v56, %v1991_v59  ;;  %v1999_v34 = vadd.f32 %v5075_v17, %v1992_v9  ;;  %v5184_v44 = vmul.f32 %v2050_v8, %v5165_v27  ;;  %v2146_v11 = vmul.f32 %v2145_v36, %v4821_v14 }
 0x167   :  { %v2134_v31 = vadd.f32 %v2132_v55, %v2127_v5  ;;  %v2135_v35 = vadd.f32 %v2133_v41, %v2128_v43  ;;  %v2147_v57 = vmul.f32 %v2145_v36, %v4823_v30  ;;  %v2152_v56 = vstv %s5149_s11  ;;  %s5342_s11 = sld [smem:[#allocation2 + $0x11b]] }
 0x168   :  { %v2005_v9 = vadd.f32 %v5078_v18, %v1998_v28  ;;  %v2006_v17 = vadd.f32 %v5081_v12, %v1999_v34  ;;  %v5198_v59 = vmul.f32 %v2050_v8, %v5177_v48  ;;  %v2159_v14 = vstv %s5153_s12  ;;  %s5347_s12 = sld [smem:[#allocation2 + $0x11c]] }
 0x169   :  { %v2141_v62 = vadd.f32 %v2139_v40, %v2134_v31  ;;  %v2142_v42 = vadd.f32 %v2140_v6, %v2135_v35  ;;  %v2153_v30 = vmul.f32 %v2152_v56, %v4828_v3  ;;  %v2154_v58 = vmul.f32 %v2152_v56, %v4837_v45  ;;  %v5235_v6 = vld [vmem:[#allocation8 + $0x4f] sm:$0xff]  ;;  %v5245_v35 = vld [vmem:[#allocation8 + $0x57] sm:$0xff] }
 0x16a   :  { %v2011_v18 = vadd.f32 %v5098_v53, %v2005_v9  ;;  %v2012_v12 = vadd.f32 %v5101_v23, %v2006_v17  ;;  %v5837_v8 = vstv %s5043_s2  ;;  %v2166_v1 = vstv %s5161_s13  ;;  %s5312_s2 = sld [smem:[#allocation2 + $0x115]] }
 0x16b   :  { %v5212_v19 = vmul.f32 %v5837_v8, %v5191_v54  ;;  %v2148_v20 = vadd.f32 %v2146_v11, %v2141_v62  ;;  %v2149_v46 = vadd.f32 %v2147_v57, %v2142_v42  ;;  %v2160_v55 = vmul.f32 %v2159_v14, %v4843_v2  ;;  %s5352_s13 = sld [smem:[#allocation2 + $0x11d]] }
 0x16c   :  { %v2161_v3 = vmul.f32 %v2159_v14, %v4848_v22  ;;  %v2018_v45 = vadd.f32 %v5104_v15, %v2011_v18  ;;  %v2019_v53 = vadd.f32 %v5114_v50, %v2012_v12  ;;  %v5838_v23 = vmov %v5837_v8  ;;  %v5263_v18 = vld [vmem:[#allocation8 + $0x58] sm:$0xff] }
 0x16d   :  { %v2059_v41 = vmul.f32 %v5838_v23, %v5203_v51  ;;  %v2172_v0 = vstv %s5171_s14  ;;  %v2155_v36 = vadd.f32 %v2153_v30, %v2148_v20  ;;  %v2156_v5 = vadd.f32 %v2154_v58, %v2149_v46  ;;  %s5357_s14 = sld [smem:[#allocation2 + $0x11e]] }
 0x16e   :  { %v2167_v43 = vmul.f32 %v2166_v1, %v4854_v37  ;;  %v2168_v2 = vmul.f32 %v2166_v1, %v4861_v33  ;;  %v2025_v22 = vadd.f32 %v5124_v47, %v2018_v45  ;;  %v2026_v15 = vadd.f32 %v5127_v63, %v2019_v53 }
 0x16f   :  { %v2064_v40 = vstv %s5175_s15  ;;  %v2179_v50 = vstv %s5186_s16  ;;  %v2162_v28 = vadd.f32 %v2160_v55, %v2155_v36  ;;  %v2163_v34 = vadd.f32 %v2161_v3, %v2156_v5  ;;  %v5840_v5 = vld [vmem:[#allocation39_spill] sm:$0xff]  ;;  %s2678_s15 = sld [smem:[#allocation2 + $0x11f]]  ;;  %s2758_s16 = smov [#allocation9]  }
 0x170   :  { %v2173_v11 = vmul.f32 %v2172_v0, %v4771_v4  ;;  %v2174_v37 = vmul.f32 %v2172_v0, %v4871_v21  ;;  %v2032_v31 = vadd.f32 %v5130_v39, %v2025_v22  ;;  %v2033_v33 = vadd.f32 %v5133_v26, %v2026_v15  ;;  %v5839_v0 = vld [vmem:[#allocation38_spill] sm:$0xff] }
 0x171   :  { %v2070_v47 = vstv %s5189_s17  ;;  %v2186_v63 = vstv %s5200_s18  ;;  %v2169_v57 = vadd.f32 %v2167_v43, %v2162_v28  ;;  %v2170_v56 = vadd.f32 %v2168_v2, %v2163_v34  ;;  %s2371_s17 = sshll.u32 %s2758_s16, 4  ;;  %s2372_s17 = int_to_ptr.vmem [resolvable:$true] %s2371_s17 }
 0x172   :  { %v2180_v9 = vmul.f32 %v2179_v50, %v4876_v29  ;;  %v2181_v4 = vmul.f32 %v2179_v50, %v4883_v7  ;;  %v2039_v17 = vadd.f32 %v5136_v52, %v2032_v31  ;;  %v2040_v21 = vadd.f32 %v5139_v24, %v2033_v33  ;;  %v5843_v33 = vld [vmem:[#allocation42_spill] sm:$0xff]  ;;  %s2725_s18 = scalar_lea.vmem %s2372_s17, 2048  ;;  %p2730_p11 = scmp.lt.s32.totalorder %s2372_s17, %s2372_s17 }
 0x173   :  { %v2065_v39 = vmul.f32 %v2064_v40, %v5235_v6  ;;  %v2193_v26 = vstv %s5214_s19  ;;  %v2175_v14 = vadd.f32 %v2173_v11, %v2169_v57  ;;  %v2176_v62 = vadd.f32 %v2174_v37, %v2170_v56  ;;  %p2726_p10 = scmp.ne.s32.totalorder %s2372_s17, %s2725_s18  ;;  %p2731_p12 = scmp.lt.s32.totalorder %s2725_s18, %s2725_s18 }
 0x174   :  { %v2187_v42 = vmul.f32 %v2186_v63, %v4888_v32  ;;  %v2188_v30 = vmul.f32 %v2186_v63, %v4897_v13  ;;  %v2046_v29 = vadd.f32 %v5142_v16, %v2039_v17  ;;  %v2047_v58 = vadd.f32 %v5145_v49, %v2040_v21  ;;  %v5844_v63 = vld [vmem:[#allocation43_spill] sm:$0xff]  ;;  %v5845_v17 = vld [vmem:[#allocation44_spill] sm:$0xff] }
 0x175   :  { %v2066_v52 = vmul.f32 %v2064_v40, %v5245_v35  ;;  %v2200_v24 = vstv %s5224_s26  ;;  %v2182_v12 = vadd.f32 %v2180_v9, %v2175_v14  ;;  %v2183_v8 = vadd.f32 %v2181_v4, %v2176_v62  ;;  %v5842_v40 = vld [vmem:[#allocation41_spill] sm:$0xff]  ;;  %p2732_p13 = por %p2731_p12, %p2730_p11 }
 0x176   :  { %v2194_v1 = vmul.f32 %v2193_v26, %v4902_v61  ;;  %v2195_v32 = vmul.f32 %v2193_v26, %v4911_v60  ;;  %v2053_v13 = vadd.f32 %v5184_v44, %v2046_v29  ;;  %v2054_v16 = vadd.f32 %v5198_v59, %v2047_v58  ;;  %v5847_v29 = vld [vmem:[#allocation46_spill] sm:$0xff] }
 0x177   :  { %v2071_v49 = vmul.f32 %v2070_v47, %v5083_v38  ;;  %v2207_v20 = vstv %s5232_s20  ;;  %v2189_v46 = vadd.f32 %v2187_v42, %v2182_v12  ;;  %v2190_v55 = vadd.f32 %v2188_v30, %v2183_v8  ;;  %v5848_v8 = vld [vmem:[#allocation37_spill] sm:$0xff]  ;;  %p2733_p0 = pnand %p2732_p13, %p2726_p10 }
 0x178   :  { %v2201_v3 = vmul.f32 %v2200_v24, %v4916_v10  ;;  %v2202_v45 = vmul.f32 %v2200_v24, %v4925_v25  ;;  %v2060_v61 = vadd.f32 %v5212_v19, %v2053_v13  ;;  %v2061_v53 = vadd.f32 %v2059_v41, %v2054_v16  ;;  %v5841_v41 = vld [vmem:[#allocation40_spill] sm:$0xff] }
 0x179   :  { %v2072_v60 = vmul.f32 %v2070_v47, %v5263_v18  ;;  %v2214_v44 = vstv %s5242_s21  ;;  %v2196_v59 = vadd.f32 %v2194_v1, %v2189_v46  ;;  %v2197_v23 = vadd.f32 %v2195_v32, %v2190_v55  ;;  %v5849_v32 = vld [vmem:[#allocation47_spill] sm:$0xff]  ;;  %v5850_v46 = vld [vmem:[#allocation48_spill] sm:$0xff]  ;;  %v5851_v55 = vld [vmem:[#allocation49_spill] sm:$0xff] }
 0x17a   :  { %v2208_v36 = vmul.f32 %v2207_v20, %v5839_v0  ;;  %v2209_v43 = vmul.f32 %v2207_v20, %v5840_v5  ;;  %v2067_v2 = vadd.f32 %v2065_v39, %v2060_v61  ;;  %v2068_v22 = vadd.f32 %v2066_v52, %v2061_v53  ;;  %v5846_v39 = vld [vmem:[#allocation45_spill] sm:$0xff] }
 0x17b   :  { %v2221_v10 = vstv %s5252_s22  ;;  %v2203_v25 = vadd.f32 %v2201_v3, %v2196_v59  ;;  %v2204_v19 = vadd.f32 %v2202_v45, %v2197_v23  ;;  %v2215_v15 = vmul.f32 %v2214_v44, %v5841_v41  ;;  %v5853_v59 = vld [vmem:[#allocation51_spill] sm:$0xff] }
 0x17c   :  { %v2216_v50 = vmul.f32 %v2214_v44, %v5842_v40  ;;  %v2073_v28 = vadd.f32 %v2071_v49, %v2067_v2  ;;  %v2074_v34 = vadd.f32 %v2072_v60, %v2068_v22  ;;  %v2228_v11 = vstv %s5260_s23  ;;  %v5852_v60 = vld [vmem:[#allocation50_spill] sm:$0xff]  ;;  %v5855_v22 = vld [vmem:[#allocation56_spill] sm:$0xff] }
 0x17d   :  { %v2210_v37 = vadd.f32 %v2208_v36, %v2203_v25  ;;  %v2211_v31 = vadd.f32 %v2209_v43, %v2204_v19  ;;  %v2222_v47 = vmul.f32 %v2221_v10, %v5843_v33  ;;  %v2223_v57 = vmul.f32 %v2221_v10, %v5844_v63  ;;  %v5854_v43 = vld [vmem:[#allocation55_spill] sm:$0xff] }
 0x17e   :  { %2076 = vst [vmem:[#allocation9 + $0x60] sm:$0xff] %v2073_v28  ;;  %2077 = vst [vmem:[#allocation9 + $0x68] sm:$0xff] %v2074_v34  ;;  %v2234_v56 = vstv %s5270_s24  ;;  %v2229_v21 = vmul.f32 %v2228_v11, %v5845_v17  ;;  %v2230_v26 = vmul.f32 %v2228_v11, %v5846_v39  ;;  %v2241_v14 = vstv %s5277_s25 }
 0x17f   :  { %v2217_v9 = vadd.f32 %v2215_v15, %v2210_v37  ;;  %v2218_v4 = vadd.f32 %v2216_v50, %v2211_v31  ;;  %v2235_v30 = vmul.f32 %v2234_v56, %v4883_v7  ;;  %v2236_v58 = vmul.f32 %v2234_v56, %v5847_v29  ;;  %v5856_v15 = vld [vmem:[#allocation57_spill] sm:$0xff]  ;;  %v5857_v50 = vld [vmem:[#allocation58_spill] sm:$0xff]  ;;  %v5858_v31 = vld [vmem:[#allocation59_spill] sm:$0xff] }
 0x180   :  { %v2248_v52 = vstv %s5282_s27  ;;  %v2242_v1 = vmul.f32 %v2241_v14, %v5848_v8  ;;  %v2243_v13 = vmul.f32 %v2241_v14, %v5849_v32  ;;  %v2255_v16 = vstv %s5287_s28  ;;  %v5863_v29 = vld [vmem:[#allocation53_spill] sm:$0xff] }
 0x181   :  { %v2224_v62 = vadd.f32 %v2222_v47, %v2217_v9  ;;  %v2225_v42 = vadd.f32 %v2223_v57, %v2218_v4  ;;  %v2249_v7 = vmul.f32 %v2248_v52, %v5850_v46  ;;  %v2250_v3 = vmul.f32 %v2248_v52, %v5851_v55  ;;  %v5859_v47 = vld [vmem:[#allocation61_spill] sm:$0xff]  ;;  %v5860_v4 = vld [vmem:[#allocation14_spill] sm:$0xff] }
 0x182   :  { %v2262_v45 = vstv %s5292_s29  ;;  %v2256_v44 = vmul.f32 %v2255_v16, %v5852_v60  ;;  %v2257_v23 = vmul.f32 %v2255_v16, %v5853_v59  ;;  %v2269_v0 = vstv %s5297_s30  ;;  %v5865_v46 = vld [vmem:[#allocation17_spill] sm:$0xff]  ;;  %v5867_v60 = vld [vmem:[#allocation54_spill] sm:$0xff] }
 0x183   :  { %v2231_v24 = vadd.f32 %v2229_v21, %v2224_v62  ;;  %v2232_v12 = vadd.f32 %v2230_v26, %v2225_v42  ;;  %v2263_v2 = vmul.f32 %v2262_v45, %v5854_v43  ;;  %v2264_v10 = vmul.f32 %v2262_v45, %v5855_v22  ;;  %v5861_v21 = vld [vmem:[#allocation15_spill] sm:$0xff]  ;;  %v5862_v42 = vld [vmem:[#allocation52_spill] sm:$0xff] }
 0x184   :  { %v2276_v25 = vstv %s5302_s4  ;;  %v2270_v40 = vmul.f32 %v2269_v0, %v5856_v15  ;;  %v2271_v28 = vmul.f32 %v2269_v0, %v5857_v50  ;;  %v2283_v34 = vstv %s5307_s5  ;;  %v5869_v43 = vld [vmem:[#allocation20_spill] sm:$0xff]  ;;  %v5871_v15 = vld [vmem:[#allocation22_spill] sm:$0xff] }
 0x185   :  { %v2237_v49 = vadd.f32 %v2235_v30, %v2231_v24  ;;  %v2238_v20 = vadd.f32 %v2236_v58, %v2232_v12  ;;  %v2277_v33 = vmul.f32 %v2276_v25, %v5858_v31  ;;  %v2278_v63 = vmul.f32 %v2276_v25, %v5859_v47  ;;  %v5873_v31 = vld [vmem:[#allocation60_spill] sm:$0xff] }
 0x186   :  { %v2290_v57 = vstv %s5312_s2  ;;  %v2284_v17 = vmul.f32 %v2283_v34, %v5860_v4  ;;  %v2285_v39 = vmul.f32 %v2283_v34, %v5861_v21  ;;  %v2296_v26 = vstv %s5317_s7 }
 0x187   :  { %v2244_v61 = vadd.f32 %v2242_v1, %v2237_v49  ;;  %v2245_v53 = vadd.f32 %v2243_v13, %v2238_v20  ;;  %v2291_v30 = vmul.f32 %v2290_v57, %v5862_v42  ;;  %v2292_v58 = vmul.f32 %v2290_v57, %v5863_v29  ;;  %v5864_v1 = vld [vmem:[#allocation16_spill] sm:$0xff] }
 0x188   :  { %v2303_v52 = vstv %s5322_s8  ;;  %v2297_v8 = vmul.f32 %v2296_v26, %v5849_v32  ;;  %v2298_v13 = vmul.f32 %v2296_v26, %v5864_v1  ;;  %v2310_v16 = vstv %s5327_s9 }
 0x189   :  { %v2251_v36 = vadd.f32 %v2249_v7, %v2244_v61  ;;  %v2252_v5 = vadd.f32 %v2250_v3, %v2245_v53  ;;  %v2304_v7 = vmul.f32 %v2303_v52, %v5865_v46  ;;  %v2305_v55 = vmul.f32 %v2303_v52, %v5083_v38  ;;  %v5866_v53 = vld [vmem:[#allocation18_spill] sm:$0xff] }
 0x18a   :  { %v2317_v3 = vstv %s5332_s6  ;;  %v2311_v32 = vmul.f32 %v2310_v16, %v5866_v53  ;;  %v2324_v59 = vstv %s5337_s10  ;;  %v2331_v22 = vstv %s5342_s11 }
 0x18b   :  { %v2258_v19 = vadd.f32 %v2256_v44, %v2251_v36  ;;  %v2259_v41 = vadd.f32 %v2257_v23, %v2252_v5  ;;  %v2312_v44 = vmul.f32 %v2310_v16, %v5867_v60  ;;  %v5868_v36 = vld [vmem:[#allocation19_spill] sm:$0xff]  ;;  %v2338_v50 = vstv %s5347_s12 }
 0x18c   :  { %v2318_v5 = vmul.f32 %v2317_v3, %v5868_v36  ;;  %v2345_v47 = vstv %s5352_s13  ;;  %v2352_v4 = vstv %s5357_s14 }
 0x18d   :  { %v2265_v11 = vadd.f32 %v2263_v2, %v2258_v19  ;;  %v2266_v37 = vadd.f32 %v2264_v10, %v2259_v41  ;;  %v2319_v2 = vmul.f32 %v2317_v3, %v5869_v43  ;;  %v5870_v19 = vld [vmem:[#allocation21_spill] sm:$0xff]  ;;  %v2347_v26 = vmul.f32 %v2345_v47, %v5203_v51 }
 0x18e   :  { %v2325_v41 = vmul.f32 %v2324_v59, %v5870_v19  ;;  %v2354_v29 = vmul.f32 %v2352_v4, %v5245_v35 }
 0x18f   :  { %v2272_v56 = vadd.f32 %v2270_v40, %v2265_v11  ;;  %v2273_v9 = vadd.f32 %v2271_v28, %v2266_v37  ;;  %v2326_v40 = vmul.f32 %v2324_v59, %v5871_v15  ;;  %v5872_v11 = vld [vmem:[#allocation23_spill] sm:$0xff] }
 0x190   :  { %v2332_v37 = vmul.f32 %v2331_v22, %v5872_v11 }
 0x191   :  { %v2279_v14 = vadd.f32 %v2277_v33, %v2272_v56  ;;  %v2280_v62 = vadd.f32 %v2278_v63, %v2273_v9  ;;  %v2333_v33 = vmul.f32 %v2331_v22, %v5873_v31  ;;  %v2339_v56 = vmul.f32 %v2338_v50, %v5165_v27 }
 0x192   :  { %v2340_v9 = vmul.f32 %v2338_v50, %v5177_v48 }
 0x193   :  { %v2286_v24 = vadd.f32 %v2284_v17, %v2279_v14  ;;  %v2287_v12 = vadd.f32 %v2285_v39, %v2280_v62  ;;  %v2346_v39 = vmul.f32 %v2345_v47, %v5191_v54  ;;  %v2358_v14 = vstv %s2678_s15 }
 0x194   :  { %v2359_v27 = vmul.f32 %v2358_v14, %v5083_v38  ;;  %v2360_v48 = vmul.f32 %v2358_v14, %v5263_v18 }
 0x195   :  { %v2293_v49 = vadd.f32 %v2291_v30, %v2286_v24  ;;  %v2294_v20 = vadd.f32 %v2292_v58, %v2287_v12  ;;  %v2353_v30 = vmul.f32 %v2352_v4, %v5235_v6 }
 0x197   :  { %v2299_v45 = vadd.f32 %v2297_v8, %v2293_v49  ;;  %v2300_v61 = vadd.f32 %v2298_v13, %v2294_v20 }
 0x199   :  { %v2306_v23 = vadd.f32 %v2304_v7, %v2299_v45  ;;  %v2307_v0 = vadd.f32 %v2305_v55, %v2300_v61 }
 0x19b   :  { %v2313_v10 = vadd.f32 %v2311_v32, %v2306_v23  ;;  %v2314_v25 = vadd.f32 %v2312_v44, %v2307_v0 }
 0x19d   :  { %v2320_v28 = vadd.f32 %v2318_v5, %v2313_v10  ;;  %v2321_v34 = vadd.f32 %v2319_v2, %v2314_v25 }
 0x19f   :  { %v2327_v63 = vadd.f32 %v2325_v41, %v2320_v28  ;;  %v2328_v57 = vadd.f32 %v2326_v40, %v2321_v34 }
 0x1a1   :  { %v2334_v17 = vadd.f32 %v2332_v37, %v2327_v63  ;;  %v2335_v21 = vadd.f32 %v2333_v33, %v2328_v57 }
 0x1a3   :  { %v2341_v62 = vadd.f32 %v2339_v56, %v2334_v17  ;;  %v2342_v42 = vadd.f32 %v2340_v9, %v2335_v21 }
 0x1a5   :  { %v2348_v58 = vadd.f32 %v2346_v39, %v2341_v62  ;;  %v2349_v52 = vadd.f32 %v2347_v26, %v2342_v42 }
 0x1a7   :  { %v2355_v24 = vadd.f32 %v2353_v30, %v2348_v58  ;;  %v2356_v12 = vadd.f32 %v2354_v29, %v2349_v52 }
 0x1a9   :  { %v2361_v54 = vadd.f32 %v2359_v27, %v2355_v24  ;;  %v2362_v8 = vadd.f32 %v2360_v48, %v2356_v12 }
 0x1ab   :  { %2364 = vst [vmem:[#allocation9 + $0x70] sm:$0xff] %v2361_v54  ;;  %2365 = vst [vmem:[#allocation9 + $0x78] sm:$0xff] %v2362_v8 }
 0x1ac   :  { %2736 = shalt.err (!%p2733_p0)
}
 0x1ad   :  { %2377 = dma.vmem_to_hbm [thread:$0]  %s2372_s17, 2048, %s5387_s3, [#allocation4], %s2756_s0, %s2756_s0, %s2757_s1  }
 0x1ae   :  { %2751 = dma.done.wait [#allocation4], 2048  }
 0x1af   :  { %2752 = vsyncadd [#allocation4], 4294965248 }
 0x1b0   :  { %2381 = vsyncpa [#allocation3], 1 }
 0x1b1   :  { %2382 = vsyncpa [#allocation4], 1 }
 0x1b2   :  { %2383 = vsyncpa [#allocation5], 1 }
 0x1b3   :  { %2384 = vsyncpa [#allocation6], 1 }

</bundles_post_ra>
